<compile_context>
chip_gen: v5e
topology: v5e:2x2
jax: 0.10.0
libtpu: 0.0.40
codegen_flags: <defaults>
</compile_context>

<pallas_src>
import functools
import math

import jax
import jax.numpy as jnp
from jax.experimental import pallas as pl
from jax.experimental.pallas import tpu as pltpu


# ----------------------------------------------------------------------------
# Fused forward kernel (one grid step == one image)
# ----------------------------------------------------------------------------
def _fused_lenet_kernel(x_ref, w1_ref, b1_ref, w2_ref, b2_ref,
                        s1_ref, s2_ref,
                        fw1_ref, fb1_ref, fw2_ref, fb2_ref,
                        dw_ref, db_ref,
                        o_ref,
                        h1_scr, a2_scr, h2_scr, p2_scr,
                        *, geom, out_act):
    W0, Ho1, P1, Ho2, P2, KS = geom
    L1 = (Ho1 - 1) * W0 + Ho1            # valid span of conv1 output (stride W0)
    T1 = 2 * (P1 - 1) * (W0 + 1) + 1     # span touched by pool1 window corners
    L2 = (Ho2 - 1) * P1 + Ho2            # valid span of conv2 output (stride P1)
    T2 = 2 * (P2 - 1) * (P1 + 1) + 1     # span touched by pool2 window corners
    f32, bf16 = jnp.float32, jnp.bfloat16

    # ---- conv1 + bias + ReLU: 25 shifted-slice taps, fp32 accumulation -------
    acc1 = jnp.zeros((w1_ref.shape[1], L1), f32)
    for kh in range(KS):
        for kw in range(KS):
            d = kh * W0 + kw
            patch = x_ref[0, :, d:d + L1]                       # [C_in, L1] f32
            acc1 = acc1 + jnp.dot(w1_ref[kh * KS + kw],         # [6, C_in] bf16
                                  patch.astype(bf16),
                                  preferred_element_type=f32)
    h1_scr[...] = jnp.maximum(acc1 + b1_ref[...], 0.0)          # [6, L1]

    # ---- maxpool1 (2x2/2): max of 4 shifted windows + selection matmul -------
    t1 = jnp.maximum(
        jnp.maximum(h1_scr[:, 0:T1], h1_scr[:, 1:T1 + 1]),
        jnp.maximum(h1_scr[:, W0:W0 + T1], h1_scr[:, W0 + 1:W0 + 1 + T1]))
    a2_scr[...] = jnp.dot(t1, s1_ref[...],                      # [6, P1*P1]
                          preferred_element_type=f32)

    # ---- conv2 + bias + ReLU --------------------------------------------------
    acc2 = jnp.zeros((w2_ref.shape[1], L2), f32)
    for kh in range(KS):
        for kw in range(KS):
            d = kh * P1 + kw
            patch = a2_scr[:, d:d + L2].astype(bf16)             # [6, L2]
            acc2 = acc2 + jnp.dot(w2_ref[kh * KS + kw],          # [16, 6] bf16
                                  patch, preferred_element_type=f32)
    h2_scr[...] = jnp.maximum(acc2 + b2_ref[...], 0.0)           # [16, L2]

    # ---- maxpool2 (2x2/2) -----------------------------------------------------
    t2 = jnp.maximum(
        jnp.maximum(h2_scr[:, 0:T2], h2_scr[:, 1:T2 + 1]),
        jnp.maximum(h2_scr[:, P1:P1 + T2], h2_scr[:, P1 + 1:P1 + 1 + T2]))
    p2_scr[...] = jnp.dot(t2, s2_ref[...],                       # [16, P2*P2]
                          preferred_element_type=f32)

    # ---- flatten (PyTorch NCHW order) + fc1 + ReLU ----------------------------
    acc3 = jnp.zeros((1, fw1_ref.shape[2]), f32)
    for c in range(fw1_ref.shape[0]):                            # 16 channels
        acc3 = acc3 + jnp.dot(p2_scr[c:c + 1, :].astype(bf16),   # [1, P2*P2]
                              fw1_ref[c],                        # [P2*P2, 120]
                              preferred_element_type=f32)
    h3 = jnp.maximum(acc3 + fb1_ref[...], 0.0)                   # [1, 120]

    # ---- fc2 + ReLU -----------------------------------------------------------
    h4 = jnp.maximum(jnp.dot(h3.astype(bf16), fw2_ref[...],
                             preferred_element_type=f32) + fb2_ref[...], 0.0)

    # ---- dense (BayesLinear, sample=False -> deterministic W_mu) + activation -
    logits = jnp.dot(h4.astype(bf16), dw_ref[...],
                     preferred_element_type=f32) + db_ref[...]
    if out_act == "softmax":
        m = jnp.max(logits, axis=-1, keepdims=True)
        e = jnp.exp(logits - m)
        out = e / jnp.sum(e, axis=-1, keepdims=True)             # exact normalize
    else:  # numerically stable sigmoid (num_class in (None, 2))
        out = 0.5 * (jnp.tanh(0.5 * logits) + 1.0)
    o_ref[0] = out.astype(o_ref.dtype)


def _lenet_pallas_forward(xp, p, *, geom, out_act):
    W0, Ho1, P1, Ho2, P2, _ = geom
    N, C_in, _ = xp.shape
    C1 = p["w1"].shape[1]
    C2 = p["w2"].shape[1]
    n_out = p["db"].shape[1]
    L1 = (Ho1 - 1) * W0 + Ho1
    L2 = (Ho2 - 1) * P1 + Ho2

    kernel = functools.partial(_fused_lenet_kernel, geom=geom, out_act=out_act)
    out = pl.pallas_call(
        kernel,
        out_shape=jax.ShapeDtypeStruct((N, 1, n_out), jnp.float32),
        grid=(N,),
        in_specs=[
            pl.BlockSpec((1, C_in, W0 * W0), lambda n: (n, 0, 0)),   # image
            pl.BlockSpec(p["w1"].shape, lambda n: (0, 0, 0)),
            pl.BlockSpec(p["b1"].shape, lambda n: (0, 0)),
            pl.BlockSpec(p["w2"].shape, lambda n: (0, 0, 0)),
            pl.BlockSpec(p["b2"].shape, lambda n: (0, 0)),
            pl.BlockSpec(p["s1"].shape, lambda n: (0, 0)),
            pl.BlockSpec(p["s2"].shape, lambda n: (0, 0)),
            pl.BlockSpec(p["fw1"].shape, lambda n: (0, 0, 0)),
            pl.BlockSpec(p["fb1"].shape, lambda n: (0, 0)),
            pl.BlockSpec(p["fw2"].shape, lambda n: (0, 0)),
            pl.BlockSpec(p["fb2"].shape, lambda n: (0, 0)),
            pl.BlockSpec(p["dw"].shape, lambda n: (0, 0)),
            pl.BlockSpec(p["db"].shape, lambda n: (0, 0)),
        ],
        out_specs=pl.BlockSpec((1, 1, n_out), lambda n: (n, 0, 0)),
        scratch_shapes=[
            pltpu.VMEM((C1, L1), jnp.float32),        # conv1 output
            pltpu.VMEM((C1, P1 * P1), jnp.float32),   # pool1 output
            pltpu.VMEM((C2, L2), jnp.float32),        # conv2 output
            pltpu.VMEM((C2, P2 * P2), jnp.float32),   # pool2 output
        ],
        compiler_params=pltpu.CompilerParams(
            dimension_semantics=("parallel",),        # batch across TCs on v7x
            vmem_limit_bytes=32 * 1024 * 1024,        # footprint is only a few MB
        ),
    )(xp, p["w1"], p["b1"], p["w2"], p["b2"], p["s1"], p["s2"],
      p["fw1"], p["fb1"], p["fw2"], p["fb2"], p["dw"], p["db"])
    return out.reshape(N, n_out)


# ----------------------------------------------------------------------------
# Parameters: PyTorch-layout init (mirrors _initialize_weights) + one-time pack
# ----------------------------------------------------------------------------
def init_lenet_params(key, in_channel=3, in_size=32, num_class=10):
    ms1 = in_size - 5 + 1
    ms2 = (ms1 // 2 - 5 + 1) // 2
    fc1_in = 16 * ms2 * ms2
    n_dense_out = 1 if num_class in (None, 2) else num_class
    k = jax.random.split(key, 5)
    return {
        # Conv2d: normal(0, sqrt(2 / (kh*kw*out_ch))), bias = 0
        "conv1_w": jax.random.normal(k[0], (6, in_channel, 5, 5), jnp.float32)
        * math.sqrt(2.0 / (5 * 5 * 6)),
        "conv1_b": jnp.zeros((6,), jnp.float32),
        "conv2_w": jax.random.normal(k[1], (16, 6, 5, 5), jnp.float32)
        * math.sqrt(2.0 / (5 * 5 * 16)),
        "conv2_b": jnp.zeros((16,), jnp.float32),
        # Linear: normal(0, 0.01), bias = 0 (PyTorch weight is [out, in])
        "fc1_w": jax.random.normal(k[2], (120, fc1_in), jnp.float32) * 0.01,
        "fc1_b": jnp.zeros((120,), jnp.float32),
        "fc2_w": jax.random.normal(k[3], (84, 120), jnp.float32) * 0.01,
        "fc2_b": jnp.zeros((84,), jnp.float32),
        # BayesLinear (sample=False => deterministic W_mu path): normal(0, 0.01)
        "dense_w": jax.random.normal(k[4], (n_dense_out, 84), jnp.float32) * 0.01,
        "dense_b": jnp.zeros((n_dense_out,), jnp.float32),
    }


def _pool_select_matrix(grid_w, pooled):
    """0/1 matrix selecting the top-left corner of each 2x2 pool window from a
    row-major flattened (stride = grid_w) map; output is flattened with stride
    `pooled`, i.e. already in the layout the next layer expects."""
    t_len = 2 * (pooled - 1) * (grid_w + 1) + 1
    r = jnp.arange(pooled * pooled)
    src = 2 * (r // pooled) * grid_w + 2 * (r % pooled)
    return jax.nn.one_hot(src, t_len, dtype=jnp.float32).T      # [t_len, pooled^2]


def pack_lenet_params(params, in_size=32):
    """One-time re-layout of the PyTorch-style parameters for the fused kernel
    (pre-transposed, pre-reshaped, bf16 for MXU operands, fp32 biases)."""
    W0 = in_size
    Ho1 = W0 - 4
    P1 = Ho1 // 2
    Ho2 = P1 - 4
    P2 = Ho2 // 2
    c2 = params["conv2_w"].shape[0]
    n_hid1 = params["fc1_w"].shape[0]
    packed = {
        # one [out_ch, in_ch] matrix per (kh, kw) tap
        "w1": params["conv1_w"].transpose(2, 3, 0, 1).reshape(25, 6, -1)
              .astype(jnp.bfloat16),
        "b1": params["conv1_b"].reshape(-1, 1).astype(jnp.float32),
        "w2": params["conv2_w"].transpose(2, 3, 0, 1).reshape(25, c2, -1)
              .astype(jnp.bfloat16),
        "b2": params["conv2_b"].reshape(-1, 1).astype(jnp.float32),
        # max-pool stride-2 selection matrices (exact 0/1 constants)
        "s1": _pool_select_matrix(W0, P1),
        "s2": _pool_select_matrix(P1, P2),
        # fc1 weight split per input channel so the kernel consumes the pooled
        # [C2, P2*P2] map in PyTorch NCHW flatten order; others pre-transposed.
        "fw1": params["fc1_w"].T.reshape(c2, P2 * P2, n_hid1).astype(jnp.bfloat16),
        "fb1": params["fc1_b"].reshape(1, -1).astype(jnp.float32),
        "fw2": params["fc2_w"].T.astype(jnp.bfloat16),
        "fb2": params["fc2_b"].reshape(1, -1).astype(jnp.float32),
        "dw": params["dense_w"].T.astype(jnp.bfloat16),
        "db": params["dense_b"].reshape(1, -1).astype(jnp.float32),
    }
    geom = (W0, Ho1, P1, Ho2, P2, 5)
    return packed, geom


def lenet_forward(packed, x, *, geom, num_class=10):
    """Matches LeNet.forward(inputs, hidden=False, sample=False)."""
    N, C_in, H, W = x.shape
    xp = x.reshape(N, C_in, H * W).astype(jnp.float32)           # free XLA reshape
    out_act = "sigmoid" if num_class in (None, 2) else "softmax"
    return _lenet_pallas_forward(xp, packed, geom=geom, out_act=out_act)


# ----------------------------------------------------------------------------
# Pure-JAX reference (used only for a numerical cross-check in __main__)
# ----------------------------------------------------------------------------
def lenet_reference(params, x, num_class=10):
    dn = ("NCHW", "OIHW", "NCHW")
    y = jax.lax.conv_general_dilated(x, params["conv1_w"], (1, 1), "VALID",
                                     dimension_numbers=dn)
    y = jnp.maximum(y + params["conv1_b"].reshape(1, -1, 1, 1), 0.0)
    y = jax.lax.reduce_window(y, -jnp.inf, jax.lax.max,
                              (1, 1, 2, 2), (1, 1, 2, 2), "VALID")
    y = jax.lax.conv_general_dilated(y, params["conv2_w"], (1, 1), "VALID",
                                     dimension_numbers=dn)
    y = jnp.maximum(y + params["conv2_b"].reshape(1, -1, 1, 1), 0.0)
    y = jax.lax.reduce_window(y, -jnp.inf, jax.lax.max,
                              (1, 1, 2, 2), (1, 1, 2, 2), "VALID")
    y = y.reshape(y.shape[0], -1)
    y = jnp.maximum(y @ params["fc1_w"].T + params["fc1_b"], 0.0)
    y = jnp.maximum(y @ params["fc2_w"].T + params["fc2_b"], 0.0)
    logits = y @ params["dense_w"].T + params["dense_b"]
    if num_class in (None, 2):
        return jax.nn.sigmoid(logits)
    return jax.nn.softmax(logits, axis=-1)


if __name__ == "__main__":
    NUM_CLASS = 10
    IN_CHANNEL = 3
    IN_SIZE = 32
    BATCH = 2   # kernel grids over batch, so larger batches scale / split over TCs

    key = jax.random.PRNGKey(0)
    k_param, k_x = jax.random.split(key)
    params = init_lenet_params(k_param, IN_CHANNEL, IN_SIZE, NUM_CLASS)
    packed, geom = pack_lenet_params(params, in_size=IN_SIZE)
    x = jax.random.normal(k_x, (BATCH, IN_CHANNEL, IN_SIZE, IN_SIZE), jnp.float32)

    fwd = jax.jit(functools.partial(lenet_forward, geom=geom, num_class=NUM_CLASS))
    out = jax.block_until_ready(fwd(packed, x))

    assert out.shape == (BATCH, NUM_CLASS)
    assert bool(jnp.all(jnp.isfinite(out)))
    assert bool(jnp.allclose(jnp.sum(out, axis=1), 1.0, atol=1e-5))

    # Cross-check against the pure-JAX reference with parameters scaled so the
    # logits are O(1) (the PyTorch init gives near-uniform softmax, which would
    # make the check vacuous).  Tolerance is wide because conv/fc operands are
    # fed to the MXU in bf16 (fp32 accumulation).
    kb = jax.random.split(jax.random.PRNGKey(1), 5)
    chk = dict(params)
    chk["fc1_w"] = params["fc1_w"] * 5.0
    chk["fc2_w"] = params["fc2_w"] * 9.0
    chk["dense_w"] = params["dense_w"] * 11.0
    chk["conv1_b"] = 0.1 * jax.random.normal(kb[0], params["conv1_b"].shape)
    chk["conv2_b"] = 0.1 * jax.random.normal(kb[1], params["conv2_b"].shape)
    chk["fc1_b"] = 0.1 * jax.random.normal(kb[2], params["fc1_b"].shape)
    chk["fc2_b"] = 0.1 * jax.random.normal(kb[3], params["fc2_b"].shape)
    chk["dense_b"] = 0.1 * jax.random.normal(kb[4], params["dense_b"].shape)
    chk_packed, _ = pack_lenet_params(chk, in_size=IN_SIZE)
    got = jax.block_until_ready(fwd(chk_packed, x))
    ref = lenet_reference(chk, x, num_class=NUM_CLASS)
    assert float(jnp.max(jnp.abs(got - ref))) < 3e-2, "kernel mismatch vs reference"

    print("KERNEL_OK")
</pallas_src>

<mosaic_0001>
module attributes {stable_mosaic.version = 11 : i64} {
  func.func @_fused_lenet_kernel(%arg0: i32, %arg1: memref<1x3x1024xf32, #tpu.memory_space<vmem>>, %arg2: memref<25x6x3xbf16, #tpu.memory_space<vmem>>, %arg3: memref<6x1xf32, #tpu.memory_space<vmem>>, %arg4: memref<25x16x6xbf16, #tpu.memory_space<vmem>>, %arg5: memref<16x1xf32, #tpu.memory_space<vmem>>, %arg6: memref<859x196xf32, #tpu.memory_space<vmem>>, %arg7: memref<121x25xf32, #tpu.memory_space<vmem>>, %arg8: memref<16x25x120xbf16, #tpu.memory_space<vmem>>, %arg9: memref<1x120xf32, #tpu.memory_space<vmem>>, %arg10: memref<120x84xbf16, #tpu.memory_space<vmem>>, %arg11: memref<1x84xf32, #tpu.memory_space<vmem>>, %arg12: memref<84x10xbf16, #tpu.memory_space<vmem>>, %arg13: memref<1x10xf32, #tpu.memory_space<vmem>>, %arg14: memref<1x1x10xf32, #tpu.memory_space<vmem>>, %arg15: memref<6x892xf32, #tpu.memory_space<vmem>>, %arg16: memref<6x196xf32, #tpu.memory_space<vmem>>, %arg17: memref<16x136xf32, #tpu.memory_space<vmem>>, %arg18: memref<16x25xf32, #tpu.memory_space<vmem>>) attributes {dimension_semantics = [#tpu.dimension_semantics<parallel>], iteration_bounds = array<i64: 2>, scalar_prefetch = 0 : i64, scratch_operands = 4 : i64, tpu.core_type = #tpu.core_type<tc>, window_params = [{transform_indices = @transform_0, window_bounds = array<i64: 1, 3, 1024>}, {pipeline_mode = #tpu.pipeline_mode<synchronous>, transform_indices = @transform_1, window_bounds = array<i64: 25, 6, 3>}, {pipeline_mode = #tpu.pipeline_mode<synchronous>, transform_indices = @transform_2, window_bounds = array<i64: 6, 1>}, {pipeline_mode = #tpu.pipeline_mode<synchronous>, transform_indices = @transform_3, window_bounds = array<i64: 25, 16, 6>}, {pipeline_mode = #tpu.pipeline_mode<synchronous>, transform_indices = @transform_4, window_bounds = array<i64: 16, 1>}, {pipeline_mode = #tpu.pipeline_mode<synchronous>, transform_indices = @transform_5, window_bounds = array<i64: 859, 196>}, {pipeline_mode = #tpu.pipeline_mode<synchronous>, transform_indices = @transform_6, window_bounds = array<i64: 121, 25>}, {pipeline_mode = #tpu.pipeline_mode<synchronous>, transform_indices = @transform_7, window_bounds = array<i64: 16, 25, 120>}, {pipeline_mode = #tpu.pipeline_mode<synchronous>, transform_indices = @transform_8, window_bounds = array<i64: 1, 120>}, {pipeline_mode = #tpu.pipeline_mode<synchronous>, transform_indices = @transform_9, window_bounds = array<i64: 120, 84>}, {pipeline_mode = #tpu.pipeline_mode<synchronous>, transform_indices = @transform_10, window_bounds = array<i64: 1, 84>}, {pipeline_mode = #tpu.pipeline_mode<synchronous>, transform_indices = @transform_11, window_bounds = array<i64: 84, 10>}, {pipeline_mode = #tpu.pipeline_mode<synchronous>, transform_indices = @transform_12, window_bounds = array<i64: 1, 10>}, {transform_indices = @transform_13, window_bounds = array<i64: 1, 1, 10>}]} {
    %cst = arith.constant 0.000000e+00 : f32
    %0 = vector.broadcast %cst : f32 to vector<6x892xf32>
    %c0 = arith.constant 0 : index
    %c0_0 = arith.constant 0 : index
    %c0_1 = arith.constant 0 : index
    %1 = vector.load %arg1[%c0, %c0_0, %c0_1] : memref<1x3x1024xf32, #tpu.memory_space<vmem>>, vector<1x3x892xf32>
    %2 = vector.shape_cast %1 : vector<1x3x892xf32> to vector<3x892xf32>
    %c0_2 = arith.constant 0 : index
    %c0_3 = arith.constant 0 : index
    %c0_4 = arith.constant 0 : index
    %3 = vector.load %arg2[%c0_2, %c0_3, %c0_4] : memref<25x6x3xbf16, #tpu.memory_space<vmem>>, vector<1x6x3xbf16>
    %4 = vector.shape_cast %3 : vector<1x6x3xbf16> to vector<6x3xbf16>
    %5 = arith.truncf %2 : vector<3x892xf32> to vector<3x892xbf16>
    %cst_5 = arith.constant dense<0.000000e+00> : vector<6x892xf32>
    %6 = tpu.matmul %4, %5, %cst_5 {dimension_numbers = #tpu.dot_dimension_numbers<[1], [0], [0], [1], [0, 0, 1, 1], [], []>} : vector<6x3xbf16>, vector<3x892xbf16>, vector<6x892xf32> -> vector<6x892xf32>
    %7 = arith.addf %0, %6 : vector<6x892xf32>
    %c0_6 = arith.constant 0 : index
    %c0_7 = arith.constant 0 : index
    %c1 = arith.constant 1 : index
    %8 = vector.load %arg1[%c0_6, %c0_7, %c1] : memref<1x3x1024xf32, #tpu.memory_space<vmem>>, vector<1x3x892xf32>
    %9 = vector.shape_cast %8 : vector<1x3x892xf32> to vector<3x892xf32>
    %c1_8 = arith.constant 1 : index
    %c0_9 = arith.constant 0 : index
    %c0_10 = arith.constant 0 : index
    %10 = vector.load %arg2[%c1_8, %c0_9, %c0_10] : memref<25x6x3xbf16, #tpu.memory_space<vmem>>, vector<1x6x3xbf16>
    %11 = vector.shape_cast %10 : vector<1x6x3xbf16> to vector<6x3xbf16>
    %12 = arith.truncf %9 : vector<3x892xf32> to vector<3x892xbf16>
    %cst_11 = arith.constant dense<0.000000e+00> : vector<6x892xf32>
    %13 = tpu.matmul %11, %12, %cst_11 {dimension_numbers = #tpu.dot_dimension_numbers<[1], [0], [0], [1], [0, 0, 1, 1], [], []>} : vector<6x3xbf16>, vector<3x892xbf16>, vector<6x892xf32> -> vector<6x892xf32>
    %14 = arith.addf %7, %13 : vector<6x892xf32>
    %c0_12 = arith.constant 0 : index
    %c0_13 = arith.constant 0 : index
    %c2 = arith.constant 2 : index
    %15 = vector.load %arg1[%c0_12, %c0_13, %c2] : memref<1x3x1024xf32, #tpu.memory_space<vmem>>, vector<1x3x892xf32>
    %16 = vector.shape_cast %15 : vector<1x3x892xf32> to vector<3x892xf32>
    %c2_14 = arith.constant 2 : index
    %c0_15 = arith.constant 0 : index
    %c0_16 = arith.constant 0 : index
    %17 = vector.load %arg2[%c2_14, %c0_15, %c0_16] : memref<25x6x3xbf16, #tpu.memory_space<vmem>>, vector<1x6x3xbf16>
    %18 = vector.shape_cast %17 : vector<1x6x3xbf16> to vector<6x3xbf16>
    %19 = arith.truncf %16 : vector<3x892xf32> to vector<3x892xbf16>
    %cst_17 = arith.constant dense<0.000000e+00> : vector<6x892xf32>
    %20 = tpu.matmul %18, %19, %cst_17 {dimension_numbers = #tpu.dot_dimension_numbers<[1], [0], [0], [1], [0, 0, 1, 1], [], []>} : vector<6x3xbf16>, vector<3x892xbf16>, vector<6x892xf32> -> vector<6x892xf32>
    %21 = arith.addf %14, %20 : vector<6x892xf32>
    %c0_18 = arith.constant 0 : index
    %c0_19 = arith.constant 0 : index
    %c3 = arith.constant 3 : index
    %22 = vector.load %arg1[%c0_18, %c0_19, %c3] : memref<1x3x1024xf32, #tpu.memory_space<vmem>>, vector<1x3x892xf32>
    %23 = vector.shape_cast %22 : vector<1x3x892xf32> to vector<3x892xf32>
    %c3_20 = arith.constant 3 : index
    %c0_21 = arith.constant 0 : index
    %c0_22 = arith.constant 0 : index
    %24 = vector.load %arg2[%c3_20, %c0_21, %c0_22] : memref<25x6x3xbf16, #tpu.memory_space<vmem>>, vector<1x6x3xbf16>
    %25 = vector.shape_cast %24 : vector<1x6x3xbf16> to vector<6x3xbf16>
    %26 = arith.truncf %23 : vector<3x892xf32> to vector<3x892xbf16>
    %cst_23 = arith.constant dense<0.000000e+00> : vector<6x892xf32>
    %27 = tpu.matmul %25, %26, %cst_23 {dimension_numbers = #tpu.dot_dimension_numbers<[1], [0], [0], [1], [0, 0, 1, 1], [], []>} : vector<6x3xbf16>, vector<3x892xbf16>, vector<6x892xf32> -> vector<6x892xf32>
    %28 = arith.addf %21, %27 : vector<6x892xf32>
    %c0_24 = arith.constant 0 : index
    %c0_25 = arith.constant 0 : index
    %c4 = arith.constant 4 : index
    %29 = vector.load %arg1[%c0_24, %c0_25, %c4] : memref<1x3x1024xf32, #tpu.memory_space<vmem>>, vector<1x3x892xf32>
    %30 = vector.shape_cast %29 : vector<1x3x892xf32> to vector<3x892xf32>
    %c4_26 = arith.constant 4 : index
    %c0_27 = arith.constant 0 : index
    %c0_28 = arith.constant 0 : index
    %31 = vector.load %arg2[%c4_26, %c0_27, %c0_28] : memref<25x6x3xbf16, #tpu.memory_space<vmem>>, vector<1x6x3xbf16>
    %32 = vector.shape_cast %31 : vector<1x6x3xbf16> to vector<6x3xbf16>
    %33 = arith.truncf %30 : vector<3x892xf32> to vector<3x892xbf16>
    %cst_29 = arith.constant dense<0.000000e+00> : vector<6x892xf32>
    %34 = tpu.matmul %32, %33, %cst_29 {dimension_numbers = #tpu.dot_dimension_numbers<[1], [0], [0], [1], [0, 0, 1, 1], [], []>} : vector<6x3xbf16>, vector<3x892xbf16>, vector<6x892xf32> -> vector<6x892xf32>
    %35 = arith.addf %28, %34 : vector<6x892xf32>
    %c0_30 = arith.constant 0 : index
    %c0_31 = arith.constant 0 : index
    %c32 = arith.constant 32 : index
    %36 = vector.load %arg1[%c0_30, %c0_31, %c32] : memref<1x3x1024xf32, #tpu.memory_space<vmem>>, vector<1x3x892xf32>
    %37 = vector.shape_cast %36 : vector<1x3x892xf32> to vector<3x892xf32>
    %c5 = arith.constant 5 : index
    %c0_32 = arith.constant 0 : index
    %c0_33 = arith.constant 0 : index
    %38 = vector.load %arg2[%c5, %c0_32, %c0_33] : memref<25x6x3xbf16, #tpu.memory_space<vmem>>, vector<1x6x3xbf16>
    %39 = vector.shape_cast %38 : vector<1x6x3xbf16> to vector<6x3xbf16>
    %40 = arith.truncf %37 : vector<3x892xf32> to vector<3x892xbf16>
    %cst_34 = arith.constant dense<0.000000e+00> : vector<6x892xf32>
    %41 = tpu.matmul %39, %40, %cst_34 {dimension_numbers = #tpu.dot_dimension_numbers<[1], [0], [0], [1], [0, 0, 1, 1], [], []>} : vector<6x3xbf16>, vector<3x892xbf16>, vector<6x892xf32> -> vector<6x892xf32>
    %42 = arith.addf %35, %41 : vector<6x892xf32>
    %c0_35 = arith.constant 0 : index
    %c0_36 = arith.constant 0 : index
    %c33 = arith.constant 33 : index
    %43 = vector.load %arg1[%c0_35, %c0_36, %c33] : memref<1x3x1024xf32, #tpu.memory_space<vmem>>, vector<1x3x892xf32>
    %44 = vector.shape_cast %43 : vector<1x3x892xf32> to vector<3x892xf32>
    %c6 = arith.constant 6 : index
    %c0_37 = arith.constant 0 : index
    %c0_38 = arith.constant 0 : index
    %45 = vector.load %arg2[%c6, %c0_37, %c0_38] : memref<25x6x3xbf16, #tpu.memory_space<vmem>>, vector<1x6x3xbf16>
    %46 = vector.shape_cast %45 : vector<1x6x3xbf16> to vector<6x3xbf16>
    %47 = arith.truncf %44 : vector<3x892xf32> to vector<3x892xbf16>
    %cst_39 = arith.constant dense<0.000000e+00> : vector<6x892xf32>
    %48 = tpu.matmul %46, %47, %cst_39 {dimension_numbers = #tpu.dot_dimension_numbers<[1], [0], [0], [1], [0, 0, 1, 1], [], []>} : vector<6x3xbf16>, vector<3x892xbf16>, vector<6x892xf32> -> vector<6x892xf32>
    %49 = arith.addf %42, %48 : vector<6x892xf32>
    %c0_40 = arith.constant 0 : index
    %c0_41 = arith.constant 0 : index
    %c34 = arith.constant 34 : index
    %50 = vector.load %arg1[%c0_40, %c0_41, %c34] : memref<1x3x1024xf32, #tpu.memory_space<vmem>>, vector<1x3x892xf32>
    %51 = vector.shape_cast %50 : vector<1x3x892xf32> to vector<3x892xf32>
    %c7 = arith.constant 7 : index
    %c0_42 = arith.constant 0 : index
    %c0_43 = arith.constant 0 : index
    %52 = vector.load %arg2[%c7, %c0_42, %c0_43] : memref<25x6x3xbf16, #tpu.memory_space<vmem>>, vector<1x6x3xbf16>
    %53 = vector.shape_cast %52 : vector<1x6x3xbf16> to vector<6x3xbf16>
    %54 = arith.truncf %51 : vector<3x892xf32> to vector<3x892xbf16>
    %cst_44 = arith.constant dense<0.000000e+00> : vector<6x892xf32>
    %55 = tpu.matmul %53, %54, %cst_44 {dimension_numbers = #tpu.dot_dimension_numbers<[1], [0], [0], [1], [0, 0, 1, 1], [], []>} : vector<6x3xbf16>, vector<3x892xbf16>, vector<6x892xf32> -> vector<6x892xf32>
    %56 = arith.addf %49, %55 : vector<6x892xf32>
    %c0_45 = arith.constant 0 : index
    %c0_46 = arith.constant 0 : index
    %c35 = arith.constant 35 : index
    %57 = vector.load %arg1[%c0_45, %c0_46, %c35] : memref<1x3x1024xf32, #tpu.memory_space<vmem>>, vector<1x3x892xf32>
    %58 = vector.shape_cast %57 : vector<1x3x892xf32> to vector<3x892xf32>
    %c8 = arith.constant 8 : index
    %c0_47 = arith.constant 0 : index
    %c0_48 = arith.constant 0 : index
    %59 = vector.load %arg2[%c8, %c0_47, %c0_48] : memref<25x6x3xbf16, #tpu.memory_space<vmem>>, vector<1x6x3xbf16>
    %60 = vector.shape_cast %59 : vector<1x6x3xbf16> to vector<6x3xbf16>
    %61 = arith.truncf %58 : vector<3x892xf32> to vector<3x892xbf16>
    %cst_49 = arith.constant dense<0.000000e+00> : vector<6x892xf32>
    %62 = tpu.matmul %60, %61, %cst_49 {dimension_numbers = #tpu.dot_dimension_numbers<[1], [0], [0], [1], [0, 0, 1, 1], [], []>} : vector<6x3xbf16>, vector<3x892xbf16>, vector<6x892xf32> -> vector<6x892xf32>
    %63 = arith.addf %56, %62 : vector<6x892xf32>
    %c0_50 = arith.constant 0 : index
    %c0_51 = arith.constant 0 : index
    %c36 = arith.constant 36 : index
    %64 = vector.load %arg1[%c0_50, %c0_51, %c36] : memref<1x3x1024xf32, #tpu.memory_space<vmem>>, vector<1x3x892xf32>
    %65 = vector.shape_cast %64 : vector<1x3x892xf32> to vector<3x892xf32>
    %c9 = arith.constant 9 : index
    %c0_52 = arith.constant 0 : index
    %c0_53 = arith.constant 0 : index
    %66 = vector.load %arg2[%c9, %c0_52, %c0_53] : memref<25x6x3xbf16, #tpu.memory_space<vmem>>, vector<1x6x3xbf16>
    %67 = vector.shape_cast %66 : vector<1x6x3xbf16> to vector<6x3xbf16>
    %68 = arith.truncf %65 : vector<3x892xf32> to vector<3x892xbf16>
    %cst_54 = arith.constant dense<0.000000e+00> : vector<6x892xf32>
    %69 = tpu.matmul %67, %68, %cst_54 {dimension_numbers = #tpu.dot_dimension_numbers<[1], [0], [0], [1], [0, 0, 1, 1], [], []>} : vector<6x3xbf16>, vector<3x892xbf16>, vector<6x892xf32> -> vector<6x892xf32>
    %70 = arith.addf %63, %69 : vector<6x892xf32>
    %c0_55 = arith.constant 0 : index
    %c0_56 = arith.constant 0 : index
    %c64 = arith.constant 64 : index
    %71 = vector.load %arg1[%c0_55, %c0_56, %c64] : memref<1x3x1024xf32, #tpu.memory_space<vmem>>, vector<1x3x892xf32>
    %72 = vector.shape_cast %71 : vector<1x3x892xf32> to vector<3x892xf32>
    %c10 = arith.constant 10 : index
    %c0_57 = arith.constant 0 : index
    %c0_58 = arith.constant 0 : index
    %73 = vector.load %arg2[%c10, %c0_57, %c0_58] : memref<25x6x3xbf16, #tpu.memory_space<vmem>>, vector<1x6x3xbf16>
    %74 = vector.shape_cast %73 : vector<1x6x3xbf16> to vector<6x3xbf16>
    %75 = arith.truncf %72 : vector<3x892xf32> to vector<3x892xbf16>
    %cst_59 = arith.constant dense<0.000000e+00> : vector<6x892xf32>
    %76 = tpu.matmul %74, %75, %cst_59 {dimension_numbers = #tpu.dot_dimension_numbers<[1], [0], [0], [1], [0, 0, 1, 1], [], []>} : vector<6x3xbf16>, vector<3x892xbf16>, vector<6x892xf32> -> vector<6x892xf32>
    %77 = arith.addf %70, %76 : vector<6x892xf32>
    %c0_60 = arith.constant 0 : index
    %c0_61 = arith.constant 0 : index
    %c65 = arith.constant 65 : index
    %78 = vector.load %arg1[%c0_60, %c0_61, %c65] : memref<1x3x1024xf32, #tpu.memory_space<vmem>>, vector<1x3x892xf32>
    %79 = vector.shape_cast %78 : vector<1x3x892xf32> to vector<3x892xf32>
    %c11 = arith.constant 11 : index
    %c0_62 = arith.constant 0 : index
    %c0_63 = arith.constant 0 : index
    %80 = vector.load %arg2[%c11, %c0_62, %c0_63] : memref<25x6x3xbf16, #tpu.memory_space<vmem>>, vector<1x6x3xbf16>
    %81 = vector.shape_cast %80 : vector<1x6x3xbf16> to vector<6x3xbf16>
    %82 = arith.truncf %79 : vector<3x892xf32> to vector<3x892xbf16>
    %cst_64 = arith.constant dense<0.000000e+00> : vector<6x892xf32>
    %83 = tpu.matmul %81, %82, %cst_64 {dimension_numbers = #tpu.dot_dimension_numbers<[1], [0], [0], [1], [0, 0, 1, 1], [], []>} : vector<6x3xbf16>, vector<3x892xbf16>, vector<6x892xf32> -> vector<6x892xf32>
    %84 = arith.addf %77, %83 : vector<6x892xf32>
    %c0_65 = arith.constant 0 : index
    %c0_66 = arith.constant 0 : index
    %c66 = arith.constant 66 : index
    %85 = vector.load %arg1[%c0_65, %c0_66, %c66] : memref<1x3x1024xf32, #tpu.memory_space<vmem>>, vector<1x3x892xf32>
    %86 = vector.shape_cast %85 : vector<1x3x892xf32> to vector<3x892xf32>
    %c12 = arith.constant 12 : index
    %c0_67 = arith.constant 0 : index
    %c0_68 = arith.constant 0 : index
    %87 = vector.load %arg2[%c12, %c0_67, %c0_68] : memref<25x6x3xbf16, #tpu.memory_space<vmem>>, vector<1x6x3xbf16>
    %88 = vector.shape_cast %87 : vector<1x6x3xbf16> to vector<6x3xbf16>
    %89 = arith.truncf %86 : vector<3x892xf32> to vector<3x892xbf16>
    %cst_69 = arith.constant dense<0.000000e+00> : vector<6x892xf32>
    %90 = tpu.matmul %88, %89, %cst_69 {dimension_numbers = #tpu.dot_dimension_numbers<[1], [0], [0], [1], [0, 0, 1, 1], [], []>} : vector<6x3xbf16>, vector<3x892xbf16>, vector<6x892xf32> -> vector<6x892xf32>
    %91 = arith.addf %84, %90 : vector<6x892xf32>
    %c0_70 = arith.constant 0 : index
    %c0_71 = arith.constant 0 : index
    %c67 = arith.constant 67 : index
    %92 = vector.load %arg1[%c0_70, %c0_71, %c67] : memref<1x3x1024xf32, #tpu.memory_space<vmem>>, vector<1x3x892xf32>
    %93 = vector.shape_cast %92 : vector<1x3x892xf32> to vector<3x892xf32>
    %c13 = arith.constant 13 : index
    %c0_72 = arith.constant 0 : index
    %c0_73 = arith.constant 0 : index
    %94 = vector.load %arg2[%c13, %c0_72, %c0_73] : memref<25x6x3xbf16, #tpu.memory_space<vmem>>, vector<1x6x3xbf16>
    %95 = vector.shape_cast %94 : vector<1x6x3xbf16> to vector<6x3xbf16>
    %96 = arith.truncf %93 : vector<3x892xf32> to vector<3x892xbf16>
    %cst_74 = arith.constant dense<0.000000e+00> : vector<6x892xf32>
    %97 = tpu.matmul %95, %96, %cst_74 {dimension_numbers = #tpu.dot_dimension_numbers<[1], [0], [0], [1], [0, 0, 1, 1], [], []>} : vector<6x3xbf16>, vector<3x892xbf16>, vector<6x892xf32> -> vector<6x892xf32>
    %98 = arith.addf %91, %97 : vector<6x892xf32>
    %c0_75 = arith.constant 0 : index
    %c0_76 = arith.constant 0 : index
    %c68 = arith.constant 68 : index
    %99 = vector.load %arg1[%c0_75, %c0_76, %c68] : memref<1x3x1024xf32, #tpu.memory_space<vmem>>, vector<1x3x892xf32>
    %100 = vector.shape_cast %99 : vector<1x3x892xf32> to vector<3x892xf32>
    %c14 = arith.constant 14 : index
    %c0_77 = arith.constant 0 : index
    %c0_78 = arith.constant 0 : index
    %101 = vector.load %arg2[%c14, %c0_77, %c0_78] : memref<25x6x3xbf16, #tpu.memory_space<vmem>>, vector<1x6x3xbf16>
    %102 = vector.shape_cast %101 : vector<1x6x3xbf16> to vector<6x3xbf16>
    %103 = arith.truncf %100 : vector<3x892xf32> to vector<3x892xbf16>
    %cst_79 = arith.constant dense<0.000000e+00> : vector<6x892xf32>
    %104 = tpu.matmul %102, %103, %cst_79 {dimension_numbers = #tpu.dot_dimension_numbers<[1], [0], [0], [1], [0, 0, 1, 1], [], []>} : vector<6x3xbf16>, vector<3x892xbf16>, vector<6x892xf32> -> vector<6x892xf32>
    %105 = arith.addf %98, %104 : vector<6x892xf32>
    %c0_80 = arith.constant 0 : index
    %c0_81 = arith.constant 0 : index
    %c96 = arith.constant 96 : index
    %106 = vector.load %arg1[%c0_80, %c0_81, %c96] : memref<1x3x1024xf32, #tpu.memory_space<vmem>>, vector<1x3x892xf32>
    %107 = vector.shape_cast %106 : vector<1x3x892xf32> to vector<3x892xf32>
    %c15 = arith.constant 15 : index
    %c0_82 = arith.constant 0 : index
    %c0_83 = arith.constant 0 : index
    %108 = vector.load %arg2[%c15, %c0_82, %c0_83] : memref<25x6x3xbf16, #tpu.memory_space<vmem>>, vector<1x6x3xbf16>
    %109 = vector.shape_cast %108 : vector<1x6x3xbf16> to vector<6x3xbf16>
    %110 = arith.truncf %107 : vector<3x892xf32> to vector<3x892xbf16>
    %cst_84 = arith.constant dense<0.000000e+00> : vector<6x892xf32>
    %111 = tpu.matmul %109, %110, %cst_84 {dimension_numbers = #tpu.dot_dimension_numbers<[1], [0], [0], [1], [0, 0, 1, 1], [], []>} : vector<6x3xbf16>, vector<3x892xbf16>, vector<6x892xf32> -> vector<6x892xf32>
    %112 = arith.addf %105, %111 : vector<6x892xf32>
    %c0_85 = arith.constant 0 : index
    %c0_86 = arith.constant 0 : index
    %c97 = arith.constant 97 : index
    %113 = vector.load %arg1[%c0_85, %c0_86, %c97] : memref<1x3x1024xf32, #tpu.memory_space<vmem>>, vector<1x3x892xf32>
    %114 = vector.shape_cast %113 : vector<1x3x892xf32> to vector<3x892xf32>
    %c16 = arith.constant 16 : index
    %c0_87 = arith.constant 0 : index
    %c0_88 = arith.constant 0 : index
    %115 = vector.load %arg2[%c16, %c0_87, %c0_88] : memref<25x6x3xbf16, #tpu.memory_space<vmem>>, vector<1x6x3xbf16>
    %116 = vector.shape_cast %115 : vector<1x6x3xbf16> to vector<6x3xbf16>
    %117 = arith.truncf %114 : vector<3x892xf32> to vector<3x892xbf16>
    %cst_89 = arith.constant dense<0.000000e+00> : vector<6x892xf32>
    %118 = tpu.matmul %116, %117, %cst_89 {dimension_numbers = #tpu.dot_dimension_numbers<[1], [0], [0], [1], [0, 0, 1, 1], [], []>} : vector<6x3xbf16>, vector<3x892xbf16>, vector<6x892xf32> -> vector<6x892xf32>
    %119 = arith.addf %112, %118 : vector<6x892xf32>
    %c0_90 = arith.constant 0 : index
    %c0_91 = arith.constant 0 : index
    %c98 = arith.constant 98 : index
    %120 = vector.load %arg1[%c0_90, %c0_91, %c98] : memref<1x3x1024xf32, #tpu.memory_space<vmem>>, vector<1x3x892xf32>
    %121 = vector.shape_cast %120 : vector<1x3x892xf32> to vector<3x892xf32>
    %c17 = arith.constant 17 : index
    %c0_92 = arith.constant 0 : index
    %c0_93 = arith.constant 0 : index
    %122 = vector.load %arg2[%c17, %c0_92, %c0_93] : memref<25x6x3xbf16, #tpu.memory_space<vmem>>, vector<1x6x3xbf16>
    %123 = vector.shape_cast %122 : vector<1x6x3xbf16> to vector<6x3xbf16>
    %124 = arith.truncf %121 : vector<3x892xf32> to vector<3x892xbf16>
    %cst_94 = arith.constant dense<0.000000e+00> : vector<6x892xf32>
    %125 = tpu.matmul %123, %124, %cst_94 {dimension_numbers = #tpu.dot_dimension_numbers<[1], [0], [0], [1], [0, 0, 1, 1], [], []>} : vector<6x3xbf16>, vector<3x892xbf16>, vector<6x892xf32> -> vector<6x892xf32>
    %126 = arith.addf %119, %125 : vector<6x892xf32>
    %c0_95 = arith.constant 0 : index
    %c0_96 = arith.constant 0 : index
    %c99 = arith.constant 99 : index
    %127 = vector.load %arg1[%c0_95, %c0_96, %c99] : memref<1x3x1024xf32, #tpu.memory_space<vmem>>, vector<1x3x892xf32>
    %128 = vector.shape_cast %127 : vector<1x3x892xf32> to vector<3x892xf32>
    %c18 = arith.constant 18 : index
    %c0_97 = arith.constant 0 : index
    %c0_98 = arith.constant 0 : index
    %129 = vector.load %arg2[%c18, %c0_97, %c0_98] : memref<25x6x3xbf16, #tpu.memory_space<vmem>>, vector<1x6x3xbf16>
    %130 = vector.shape_cast %129 : vector<1x6x3xbf16> to vector<6x3xbf16>
    %131 = arith.truncf %128 : vector<3x892xf32> to vector<3x892xbf16>
    %cst_99 = arith.constant dense<0.000000e+00> : vector<6x892xf32>
    %132 = tpu.matmul %130, %131, %cst_99 {dimension_numbers = #tpu.dot_dimension_numbers<[1], [0], [0], [1], [0, 0, 1, 1], [], []>} : vector<6x3xbf16>, vector<3x892xbf16>, vector<6x892xf32> -> vector<6x892xf32>
    %133 = arith.addf %126, %132 : vector<6x892xf32>
    %c0_100 = arith.constant 0 : index
    %c0_101 = arith.constant 0 : index
    %c100 = arith.constant 100 : index
    %134 = vector.load %arg1[%c0_100, %c0_101, %c100] : memref<1x3x1024xf32, #tpu.memory_space<vmem>>, vector<1x3x892xf32>
    %135 = vector.shape_cast %134 : vector<1x3x892xf32> to vector<3x892xf32>
    %c19 = arith.constant 19 : index
    %c0_102 = arith.constant 0 : index
    %c0_103 = arith.constant 0 : index
    %136 = vector.load %arg2[%c19, %c0_102, %c0_103] : memref<25x6x3xbf16, #tpu.memory_space<vmem>>, vector<1x6x3xbf16>
    %137 = vector.shape_cast %136 : vector<1x6x3xbf16> to vector<6x3xbf16>
    %138 = arith.truncf %135 : vector<3x892xf32> to vector<3x892xbf16>
    %cst_104 = arith.constant dense<0.000000e+00> : vector<6x892xf32>
    %139 = tpu.matmul %137, %138, %cst_104 {dimension_numbers = #tpu.dot_dimension_numbers<[1], [0], [0], [1], [0, 0, 1, 1], [], []>} : vector<6x3xbf16>, vector<3x892xbf16>, vector<6x892xf32> -> vector<6x892xf32>
    %140 = arith.addf %133, %139 : vector<6x892xf32>
    %c0_105 = arith.constant 0 : index
    %c0_106 = arith.constant 0 : index
    %c128 = arith.constant 128 : index
    %141 = vector.load %arg1[%c0_105, %c0_106, %c128] : memref<1x3x1024xf32, #tpu.memory_space<vmem>>, vector<1x3x892xf32>
    %142 = vector.shape_cast %141 : vector<1x3x892xf32> to vector<3x892xf32>
    %c20 = arith.constant 20 : index
    %c0_107 = arith.constant 0 : index
    %c0_108 = arith.constant 0 : index
    %143 = vector.load %arg2[%c20, %c0_107, %c0_108] : memref<25x6x3xbf16, #tpu.memory_space<vmem>>, vector<1x6x3xbf16>
    %144 = vector.shape_cast %143 : vector<1x6x3xbf16> to vector<6x3xbf16>
    %145 = arith.truncf %142 : vector<3x892xf32> to vector<3x892xbf16>
    %cst_109 = arith.constant dense<0.000000e+00> : vector<6x892xf32>
    %146 = tpu.matmul %144, %145, %cst_109 {dimension_numbers = #tpu.dot_dimension_numbers<[1], [0], [0], [1], [0, 0, 1, 1], [], []>} : vector<6x3xbf16>, vector<3x892xbf16>, vector<6x892xf32> -> vector<6x892xf32>
    %147 = arith.addf %140, %146 : vector<6x892xf32>
    %c0_110 = arith.constant 0 : index
    %c0_111 = arith.constant 0 : index
    %c129 = arith.constant 129 : index
    %148 = vector.load %arg1[%c0_110, %c0_111, %c129] : memref<1x3x1024xf32, #tpu.memory_space<vmem>>, vector<1x3x892xf32>
    %149 = vector.shape_cast %148 : vector<1x3x892xf32> to vector<3x892xf32>
    %c21 = arith.constant 21 : index
    %c0_112 = arith.constant 0 : index
    %c0_113 = arith.constant 0 : index
    %150 = vector.load %arg2[%c21, %c0_112, %c0_113] : memref<25x6x3xbf16, #tpu.memory_space<vmem>>, vector<1x6x3xbf16>
    %151 = vector.shape_cast %150 : vector<1x6x3xbf16> to vector<6x3xbf16>
    %152 = arith.truncf %149 : vector<3x892xf32> to vector<3x892xbf16>
    %cst_114 = arith.constant dense<0.000000e+00> : vector<6x892xf32>
    %153 = tpu.matmul %151, %152, %cst_114 {dimension_numbers = #tpu.dot_dimension_numbers<[1], [0], [0], [1], [0, 0, 1, 1], [], []>} : vector<6x3xbf16>, vector<3x892xbf16>, vector<6x892xf32> -> vector<6x892xf32>
    %154 = arith.addf %147, %153 : vector<6x892xf32>
    %c0_115 = arith.constant 0 : index
    %c0_116 = arith.constant 0 : index
    %c130 = arith.constant 130 : index
    %155 = vector.load %arg1[%c0_115, %c0_116, %c130] : memref<1x3x1024xf32, #tpu.memory_space<vmem>>, vector<1x3x892xf32>
    %156 = vector.shape_cast %155 : vector<1x3x892xf32> to vector<3x892xf32>
    %c22 = arith.constant 22 : index
    %c0_117 = arith.constant 0 : index
    %c0_118 = arith.constant 0 : index
    %157 = vector.load %arg2[%c22, %c0_117, %c0_118] : memref<25x6x3xbf16, #tpu.memory_space<vmem>>, vector<1x6x3xbf16>
    %158 = vector.shape_cast %157 : vector<1x6x3xbf16> to vector<6x3xbf16>
    %159 = arith.truncf %156 : vector<3x892xf32> to vector<3x892xbf16>
    %cst_119 = arith.constant dense<0.000000e+00> : vector<6x892xf32>
    %160 = tpu.matmul %158, %159, %cst_119 {dimension_numbers = #tpu.dot_dimension_numbers<[1], [0], [0], [1], [0, 0, 1, 1], [], []>} : vector<6x3xbf16>, vector<3x892xbf16>, vector<6x892xf32> -> vector<6x892xf32>
    %161 = arith.addf %154, %160 : vector<6x892xf32>
    %c0_120 = arith.constant 0 : index
    %c0_121 = arith.constant 0 : index
    %c131 = arith.constant 131 : index
    %162 = vector.load %arg1[%c0_120, %c0_121, %c131] : memref<1x3x1024xf32, #tpu.memory_space<vmem>>, vector<1x3x892xf32>
    %163 = vector.shape_cast %162 : vector<1x3x892xf32> to vector<3x892xf32>
    %c23 = arith.constant 23 : index
    %c0_122 = arith.constant 0 : index
    %c0_123 = arith.constant 0 : index
    %164 = vector.load %arg2[%c23, %c0_122, %c0_123] : memref<25x6x3xbf16, #tpu.memory_space<vmem>>, vector<1x6x3xbf16>
    %165 = vector.shape_cast %164 : vector<1x6x3xbf16> to vector<6x3xbf16>
    %166 = arith.truncf %163 : vector<3x892xf32> to vector<3x892xbf16>
    %cst_124 = arith.constant dense<0.000000e+00> : vector<6x892xf32>
    %167 = tpu.matmul %165, %166, %cst_124 {dimension_numbers = #tpu.dot_dimension_numbers<[1], [0], [0], [1], [0, 0, 1, 1], [], []>} : vector<6x3xbf16>, vector<3x892xbf16>, vector<6x892xf32> -> vector<6x892xf32>
    %168 = arith.addf %161, %167 : vector<6x892xf32>
    %c0_125 = arith.constant 0 : index
    %c0_126 = arith.constant 0 : index
    %c132 = arith.constant 132 : index
    %169 = vector.load %arg1[%c0_125, %c0_126, %c132] : memref<1x3x1024xf32, #tpu.memory_space<vmem>>, vector<1x3x892xf32>
    %170 = vector.shape_cast %169 : vector<1x3x892xf32> to vector<3x892xf32>
    %c24 = arith.constant 24 : index
    %c0_127 = arith.constant 0 : index
    %c0_128 = arith.constant 0 : index
    %171 = vector.load %arg2[%c24, %c0_127, %c0_128] : memref<25x6x3xbf16, #tpu.memory_space<vmem>>, vector<1x6x3xbf16>
    %172 = vector.shape_cast %171 : vector<1x6x3xbf16> to vector<6x3xbf16>
    %173 = arith.truncf %170 : vector<3x892xf32> to vector<3x892xbf16>
    %cst_129 = arith.constant dense<0.000000e+00> : vector<6x892xf32>
    %174 = tpu.matmul %172, %173, %cst_129 {dimension_numbers = #tpu.dot_dimension_numbers<[1], [0], [0], [1], [0, 0, 1, 1], [], []>} : vector<6x3xbf16>, vector<3x892xbf16>, vector<6x892xf32> -> vector<6x892xf32>
    %175 = arith.addf %168, %174 : vector<6x892xf32>
    %c0_130 = arith.constant 0 : index
    %c0_131 = arith.constant 0 : index
    %176 = vector.load %arg3[%c0_130, %c0_131] : memref<6x1xf32, #tpu.memory_space<vmem>>, vector<6x1xf32>
    %177 = vector.broadcast %176 : vector<6x1xf32> to vector<6x892xf32>
    %178 = arith.addf %175, %177 : vector<6x892xf32>
    %cst_132 = arith.constant 0.000000e+00 : f32
    %179 = vector.broadcast %cst_132 : f32 to vector<6x892xf32>
    %180 = arith.maximumf %178, %179 : vector<6x892xf32>
    %c0_133 = arith.constant 0 : index
    %c0_134 = arith.constant 0 : index
    %181 = vector.load %arg15[%c0_133, %c0_134] : memref<6x892xf32, #tpu.memory_space<vmem>>, vector<6x892xf32>
    tpu.vector_store %arg15[%c0_133, %c0_134], %180 {strides = array<i32>} : memref<6x892xf32, #tpu.memory_space<vmem>>, vector<6x892xf32>,
    %c0_135 = arith.constant 0 : index
    %c0_136 = arith.constant 0 : index
    %182 = vector.load %arg15[%c0_135, %c0_136] : memref<6x892xf32, #tpu.memory_space<vmem>>, vector<6x859xf32>
    %c0_137 = arith.constant 0 : index
    %c1_138 = arith.constant 1 : index
    %183 = vector.load %arg15[%c0_137, %c1_138] : memref<6x892xf32, #tpu.memory_space<vmem>>, vector<6x859xf32>
    %184 = arith.maximumf %182, %183 : vector<6x859xf32>
    %c0_139 = arith.constant 0 : index
    %c32_140 = arith.constant 32 : index
    %185 = vector.load %arg15[%c0_139, %c32_140] : memref<6x892xf32, #tpu.memory_space<vmem>>, vector<6x859xf32>
    %c0_141 = arith.constant 0 : index
    %c33_142 = arith.constant 33 : index
    %186 = vector.load %arg15[%c0_141, %c33_142] : memref<6x892xf32, #tpu.memory_space<vmem>>, vector<6x859xf32>
    %187 = arith.maximumf %185, %186 : vector<6x859xf32>
    %188 = arith.maximumf %184, %187 : vector<6x859xf32>
    %c0_143 = arith.constant 0 : index
    %c0_144 = arith.constant 0 : index
    %189 = vector.load %arg6[%c0_143, %c0_144] : memref<859x196xf32, #tpu.memory_space<vmem>>, vector<859x196xf32>
    %cst_145 = arith.constant dense<0.000000e+00> : vector<6x196xf32>
    %190 = tpu.matmul %188, %189, %cst_145 {dimension_numbers = #tpu.dot_dimension_numbers<[1], [0], [0], [1], [0, 0, 1, 1], [], []>} : vector<6x859xf32>, vector<859x196xf32>, vector<6x196xf32> -> vector<6x196xf32>
    %c0_146 = arith.constant 0 : index
    %c0_147 = arith.constant 0 : index
    %191 = vector.load %arg16[%c0_146, %c0_147] : memref<6x196xf32, #tpu.memory_space<vmem>>, vector<6x196xf32>
    tpu.vector_store %arg16[%c0_146, %c0_147], %190 {strides = array<i32>} : memref<6x196xf32, #tpu.memory_space<vmem>>, vector<6x196xf32>,
    %cst_148 = arith.constant 0.000000e+00 : f32
    %192 = vector.broadcast %cst_148 : f32 to vector<16x136xf32>
    %c0_149 = arith.constant 0 : index
    %c0_150 = arith.constant 0 : index
    %193 = vector.load %arg16[%c0_149, %c0_150] : memref<6x196xf32, #tpu.memory_space<vmem>>, vector<6x136xf32>
    %194 = arith.truncf %193 : vector<6x136xf32> to vector<6x136xbf16>
    %c0_151 = arith.constant 0 : index
    %c0_152 = arith.constant 0 : index
    %c0_153 = arith.constant 0 : index
    %195 = vector.load %arg4[%c0_151, %c0_152, %c0_153] : memref<25x16x6xbf16, #tpu.memory_space<vmem>>, vector<1x16x6xbf16>
    %196 = vector.shape_cast %195 : vector<1x16x6xbf16> to vector<16x6xbf16>
    %cst_154 = arith.constant dense<0.000000e+00> : vector<16x136xf32>
    %197 = tpu.matmul %196, %194, %cst_154 {dimension_numbers = #tpu.dot_dimension_numbers<[1], [0], [0], [1], [0, 0, 1, 1], [], []>} : vector<16x6xbf16>, vector<6x136xbf16>, vector<16x136xf32> -> vector<16x136xf32>
    %198 = arith.addf %192, %197 : vector<16x136xf32>
    %c0_155 = arith.constant 0 : index
    %c1_156 = arith.constant 1 : index
    %199 = vector.load %arg16[%c0_155, %c1_156] : memref<6x196xf32, #tpu.memory_space<vmem>>, vector<6x136xf32>
    %200 = arith.truncf %199 : vector<6x136xf32> to vector<6x136xbf16>
    %c1_157 = arith.constant 1 : index
    %c0_158 = arith.constant 0 : index
    %c0_159 = arith.constant 0 : index
    %201 = vector.load %arg4[%c1_157, %c0_158, %c0_159] : memref<25x16x6xbf16, #tpu.memory_space<vmem>>, vector<1x16x6xbf16>
    %202 = vector.shape_cast %201 : vector<1x16x6xbf16> to vector<16x6xbf16>
    %cst_160 = arith.constant dense<0.000000e+00> : vector<16x136xf32>
    %203 = tpu.matmul %202, %200, %cst_160 {dimension_numbers = #tpu.dot_dimension_numbers<[1], [0], [0], [1], [0, 0, 1, 1], [], []>} : vector<16x6xbf16>, vector<6x136xbf16>, vector<16x136xf32> -> vector<16x136xf32>
    %204 = arith.addf %198, %203 : vector<16x136xf32>
    %c0_161 = arith.constant 0 : index
    %c2_162 = arith.constant 2 : index
    %205 = vector.load %arg16[%c0_161, %c2_162] : memref<6x196xf32, #tpu.memory_space<vmem>>, vector<6x136xf32>
    %206 = arith.truncf %205 : vector<6x136xf32> to vector<6x136xbf16>
    %c2_163 = arith.constant 2 : index
    %c0_164 = arith.constant 0 : index
    %c0_165 = arith.constant 0 : index
    %207 = vector.load %arg4[%c2_163, %c0_164, %c0_165] : memref<25x16x6xbf16, #tpu.memory_space<vmem>>, vector<1x16x6xbf16>
    %208 = vector.shape_cast %207 : vector<1x16x6xbf16> to vector<16x6xbf16>
    %cst_166 = arith.constant dense<0.000000e+00> : vector<16x136xf32>
    %209 = tpu.matmul %208, %206, %cst_166 {dimension_numbers = #tpu.dot_dimension_numbers<[1], [0], [0], [1], [0, 0, 1, 1], [], []>} : vector<16x6xbf16>, vector<6x136xbf16>, vector<16x136xf32> -> vector<16x136xf32>
    %210 = arith.addf %204, %209 : vector<16x136xf32>
    %c0_167 = arith.constant 0 : index
    %c3_168 = arith.constant 3 : index
    %211 = vector.load %arg16[%c0_167, %c3_168] : memref<6x196xf32, #tpu.memory_space<vmem>>, vector<6x136xf32>
    %212 = arith.truncf %211 : vector<6x136xf32> to vector<6x136xbf16>
    %c3_169 = arith.constant 3 : index
    %c0_170 = arith.constant 0 : index
    %c0_171 = arith.constant 0 : index
    %213 = vector.load %arg4[%c3_169, %c0_170, %c0_171] : memref<25x16x6xbf16, #tpu.memory_space<vmem>>, vector<1x16x6xbf16>
    %214 = vector.shape_cast %213 : vector<1x16x6xbf16> to vector<16x6xbf16>
    %cst_172 = arith.constant dense<0.000000e+00> : vector<16x136xf32>
    %215 = tpu.matmul %214, %212, %cst_172 {dimension_numbers = #tpu.dot_dimension_numbers<[1], [0], [0], [1], [0, 0, 1, 1], [], []>} : vector<16x6xbf16>, vector<6x136xbf16>, vector<16x136xf32> -> vector<16x136xf32>
    %216 = arith.addf %210, %215 : vector<16x136xf32>
    %c0_173 = arith.constant 0 : index
    %c4_174 = arith.constant 4 : index
    %217 = vector.load %arg16[%c0_173, %c4_174] : memref<6x196xf32, #tpu.memory_space<vmem>>, vector<6x136xf32>
    %218 = arith.truncf %217 : vector<6x136xf32> to vector<6x136xbf16>
    %c4_175 = arith.constant 4 : index
    %c0_176 = arith.constant 0 : index
    %c0_177 = arith.constant 0 : index
    %219 = vector.load %arg4[%c4_175, %c0_176, %c0_177] : memref<25x16x6xbf16, #tpu.memory_space<vmem>>, vector<1x16x6xbf16>
    %220 = vector.shape_cast %219 : vector<1x16x6xbf16> to vector<16x6xbf16>
    %cst_178 = arith.constant dense<0.000000e+00> : vector<16x136xf32>
    %221 = tpu.matmul %220, %218, %cst_178 {dimension_numbers = #tpu.dot_dimension_numbers<[1], [0], [0], [1], [0, 0, 1, 1], [], []>} : vector<16x6xbf16>, vector<6x136xbf16>, vector<16x136xf32> -> vector<16x136xf32>
    %222 = arith.addf %216, %221 : vector<16x136xf32>
    %c0_179 = arith.constant 0 : index
    %c14_180 = arith.constant 14 : index
    %223 = vector.load %arg16[%c0_179, %c14_180] : memref<6x196xf32, #tpu.memory_space<vmem>>, vector<6x136xf32>
    %224 = arith.truncf %223 : vector<6x136xf32> to vector<6x136xbf16>
    %c5_181 = arith.constant 5 : index
    %c0_182 = arith.constant 0 : index
    %c0_183 = arith.constant 0 : index
    %225 = vector.load %arg4[%c5_181, %c0_182, %c0_183] : memref<25x16x6xbf16, #tpu.memory_space<vmem>>, vector<1x16x6xbf16>
    %226 = vector.shape_cast %225 : vector<1x16x6xbf16> to vector<16x6xbf16>
    %cst_184 = arith.constant dense<0.000000e+00> : vector<16x136xf32>
    %227 = tpu.matmul %226, %224, %cst_184 {dimension_numbers = #tpu.dot_dimension_numbers<[1], [0], [0], [1], [0, 0, 1, 1], [], []>} : vector<16x6xbf16>, vector<6x136xbf16>, vector<16x136xf32> -> vector<16x136xf32>
    %228 = arith.addf %222, %227 : vector<16x136xf32>
    %c0_185 = arith.constant 0 : index
    %c15_186 = arith.constant 15 : index
    %229 = vector.load %arg16[%c0_185, %c15_186] : memref<6x196xf32, #tpu.memory_space<vmem>>, vector<6x136xf32>
    %230 = arith.truncf %229 : vector<6x136xf32> to vector<6x136xbf16>
    %c6_187 = arith.constant 6 : index
    %c0_188 = arith.constant 0 : index
    %c0_189 = arith.constant 0 : index
    %231 = vector.load %arg4[%c6_187, %c0_188, %c0_189] : memref<25x16x6xbf16, #tpu.memory_space<vmem>>, vector<1x16x6xbf16>
    %232 = vector.shape_cast %231 : vector<1x16x6xbf16> to vector<16x6xbf16>
    %cst_190 = arith.constant dense<0.000000e+00> : vector<16x136xf32>
    %233 = tpu.matmul %232, %230, %cst_190 {dimension_numbers = #tpu.dot_dimension_numbers<[1], [0], [0], [1], [0, 0, 1, 1], [], []>} : vector<16x6xbf16>, vector<6x136xbf16>, vector<16x136xf32> -> vector<16x136xf32>
    %234 = arith.addf %228, %233 : vector<16x136xf32>
    %c0_191 = arith.constant 0 : index
    %c16_192 = arith.constant 16 : index
    %235 = vector.load %arg16[%c0_191, %c16_192] : memref<6x196xf32, #tpu.memory_space<vmem>>, vector<6x136xf32>
    %236 = arith.truncf %235 : vector<6x136xf32> to vector<6x136xbf16>
    %c7_193 = arith.constant 7 : index
    %c0_194 = arith.constant 0 : index
    %c0_195 = arith.constant 0 : index
    %237 = vector.load %arg4[%c7_193, %c0_194, %c0_195] : memref<25x16x6xbf16, #tpu.memory_space<vmem>>, vector<1x16x6xbf16>
    %238 = vector.shape_cast %237 : vector<1x16x6xbf16> to vector<16x6xbf16>
    %cst_196 = arith.constant dense<0.000000e+00> : vector<16x136xf32>
    %239 = tpu.matmul %238, %236, %cst_196 {dimension_numbers = #tpu.dot_dimension_numbers<[1], [0], [0], [1], [0, 0, 1, 1], [], []>} : vector<16x6xbf16>, vector<6x136xbf16>, vector<16x136xf32> -> vector<16x136xf32>
    %240 = arith.addf %234, %239 : vector<16x136xf32>
    %c0_197 = arith.constant 0 : index
    %c17_198 = arith.constant 17 : index
    %241 = vector.load %arg16[%c0_197, %c17_198] : memref<6x196xf32, #tpu.memory_space<vmem>>, vector<6x136xf32>
    %242 = arith.truncf %241 : vector<6x136xf32> to vector<6x136xbf16>
    %c8_199 = arith.constant 8 : index
    %c0_200 = arith.constant 0 : index
    %c0_201 = arith.constant 0 : index
    %243 = vector.load %arg4[%c8_199, %c0_200, %c0_201] : memref<25x16x6xbf16, #tpu.memory_space<vmem>>, vector<1x16x6xbf16>
    %244 = vector.shape_cast %243 : vector<1x16x6xbf16> to vector<16x6xbf16>
    %cst_202 = arith.constant dense<0.000000e+00> : vector<16x136xf32>
    %245 = tpu.matmul %244, %242, %cst_202 {dimension_numbers = #tpu.dot_dimension_numbers<[1], [0], [0], [1], [0, 0, 1, 1], [], []>} : vector<16x6xbf16>, vector<6x136xbf16>, vector<16x136xf32> -> vector<16x136xf32>
    %246 = arith.addf %240, %245 : vector<16x136xf32>
    %c0_203 = arith.constant 0 : index
    %c18_204 = arith.constant 18 : index
    %247 = vector.load %arg16[%c0_203, %c18_204] : memref<6x196xf32, #tpu.memory_space<vmem>>, vector<6x136xf32>
    %248 = arith.truncf %247 : vector<6x136xf32> to vector<6x136xbf16>
    %c9_205 = arith.constant 9 : index
    %c0_206 = arith.constant 0 : index
    %c0_207 = arith.constant 0 : index
    %249 = vector.load %arg4[%c9_205, %c0_206, %c0_207] : memref<25x16x6xbf16, #tpu.memory_space<vmem>>, vector<1x16x6xbf16>
    %250 = vector.shape_cast %249 : vector<1x16x6xbf16> to vector<16x6xbf16>
    %cst_208 = arith.constant dense<0.000000e+00> : vector<16x136xf32>
    %251 = tpu.matmul %250, %248, %cst_208 {dimension_numbers = #tpu.dot_dimension_numbers<[1], [0], [0], [1], [0, 0, 1, 1], [], []>} : vector<16x6xbf16>, vector<6x136xbf16>, vector<16x136xf32> -> vector<16x136xf32>
    %252 = arith.addf %246, %251 : vector<16x136xf32>
    %c0_209 = arith.constant 0 : index
    %c28 = arith.constant 28 : index
    %253 = vector.load %arg16[%c0_209, %c28] : memref<6x196xf32, #tpu.memory_space<vmem>>, vector<6x136xf32>
    %254 = arith.truncf %253 : vector<6x136xf32> to vector<6x136xbf16>
    %c10_210 = arith.constant 10 : index
    %c0_211 = arith.constant 0 : index
    %c0_212 = arith.constant 0 : index
    %255 = vector.load %arg4[%c10_210, %c0_211, %c0_212] : memref<25x16x6xbf16, #tpu.memory_space<vmem>>, vector<1x16x6xbf16>
    %256 = vector.shape_cast %255 : vector<1x16x6xbf16> to vector<16x6xbf16>
    %cst_213 = arith.constant dense<0.000000e+00> : vector<16x136xf32>
    %257 = tpu.matmul %256, %254, %cst_213 {dimension_numbers = #tpu.dot_dimension_numbers<[1], [0], [0], [1], [0, 0, 1, 1], [], []>} : vector<16x6xbf16>, vector<6x136xbf16>, vector<16x136xf32> -> vector<16x136xf32>
    %258 = arith.addf %252, %257 : vector<16x136xf32>
    %c0_214 = arith.constant 0 : index
    %c29 = arith.constant 29 : index
    %259 = vector.load %arg16[%c0_214, %c29] : memref<6x196xf32, #tpu.memory_space<vmem>>, vector<6x136xf32>
    %260 = arith.truncf %259 : vector<6x136xf32> to vector<6x136xbf16>
    %c11_215 = arith.constant 11 : index
    %c0_216 = arith.constant 0 : index
    %c0_217 = arith.constant 0 : index
    %261 = vector.load %arg4[%c11_215, %c0_216, %c0_217] : memref<25x16x6xbf16, #tpu.memory_space<vmem>>, vector<1x16x6xbf16>
    %262 = vector.shape_cast %261 : vector<1x16x6xbf16> to vector<16x6xbf16>
    %cst_218 = arith.constant dense<0.000000e+00> : vector<16x136xf32>
    %263 = tpu.matmul %262, %260, %cst_218 {dimension_numbers = #tpu.dot_dimension_numbers<[1], [0], [0], [1], [0, 0, 1, 1], [], []>} : vector<16x6xbf16>, vector<6x136xbf16>, vector<16x136xf32> -> vector<16x136xf32>
    %264 = arith.addf %258, %263 : vector<16x136xf32>
    %c0_219 = arith.constant 0 : index
    %c30 = arith.constant 30 : index
    %265 = vector.load %arg16[%c0_219, %c30] : memref<6x196xf32, #tpu.memory_space<vmem>>, vector<6x136xf32>
    %266 = arith.truncf %265 : vector<6x136xf32> to vector<6x136xbf16>
    %c12_220 = arith.constant 12 : index
    %c0_221 = arith.constant 0 : index
    %c0_222 = arith.constant 0 : index
    %267 = vector.load %arg4[%c12_220, %c0_221, %c0_222] : memref<25x16x6xbf16, #tpu.memory_space<vmem>>, vector<1x16x6xbf16>
    %268 = vector.shape_cast %267 : vector<1x16x6xbf16> to vector<16x6xbf16>
    %cst_223 = arith.constant dense<0.000000e+00> : vector<16x136xf32>
    %269 = tpu.matmul %268, %266, %cst_223 {dimension_numbers = #tpu.dot_dimension_numbers<[1], [0], [0], [1], [0, 0, 1, 1], [], []>} : vector<16x6xbf16>, vector<6x136xbf16>, vector<16x136xf32> -> vector<16x136xf32>
    %270 = arith.addf %264, %269 : vector<16x136xf32>
    %c0_224 = arith.constant 0 : index
    %c31 = arith.constant 31 : index
    %271 = vector.load %arg16[%c0_224, %c31] : memref<6x196xf32, #tpu.memory_space<vmem>>, vector<6x136xf32>
    %272 = arith.truncf %271 : vector<6x136xf32> to vector<6x136xbf16>
    %c13_225 = arith.constant 13 : index
    %c0_226 = arith.constant 0 : index
    %c0_227 = arith.constant 0 : index
    %273 = vector.load %arg4[%c13_225, %c0_226, %c0_227] : memref<25x16x6xbf16, #tpu.memory_space<vmem>>, vector<1x16x6xbf16>
    %274 = vector.shape_cast %273 : vector<1x16x6xbf16> to vector<16x6xbf16>
    %cst_228 = arith.constant dense<0.000000e+00> : vector<16x136xf32>
    %275 = tpu.matmul %274, %272, %cst_228 {dimension_numbers = #tpu.dot_dimension_numbers<[1], [0], [0], [1], [0, 0, 1, 1], [], []>} : vector<16x6xbf16>, vector<6x136xbf16>, vector<16x136xf32> -> vector<16x136xf32>
    %276 = arith.addf %270, %275 : vector<16x136xf32>
    %c0_229 = arith.constant 0 : index
    %c32_230 = arith.constant 32 : index
    %277 = vector.load %arg16[%c0_229, %c32_230] : memref<6x196xf32, #tpu.memory_space<vmem>>, vector<6x136xf32>
    %278 = arith.truncf %277 : vector<6x136xf32> to vector<6x136xbf16>
    %c14_231 = arith.constant 14 : index
    %c0_232 = arith.constant 0 : index
    %c0_233 = arith.constant 0 : index
    %279 = vector.load %arg4[%c14_231, %c0_232, %c0_233] : memref<25x16x6xbf16, #tpu.memory_space<vmem>>, vector<1x16x6xbf16>
    %280 = vector.shape_cast %279 : vector<1x16x6xbf16> to vector<16x6xbf16>
    %cst_234 = arith.constant dense<0.000000e+00> : vector<16x136xf32>
    %281 = tpu.matmul %280, %278, %cst_234 {dimension_numbers = #tpu.dot_dimension_numbers<[1], [0], [0], [1], [0, 0, 1, 1], [], []>} : vector<16x6xbf16>, vector<6x136xbf16>, vector<16x136xf32> -> vector<16x136xf32>
    %282 = arith.addf %276, %281 : vector<16x136xf32>
    %c0_235 = arith.constant 0 : index
    %c42 = arith.constant 42 : index
    %283 = vector.load %arg16[%c0_235, %c42] : memref<6x196xf32, #tpu.memory_space<vmem>>, vector<6x136xf32>
    %284 = arith.truncf %283 : vector<6x136xf32> to vector<6x136xbf16>
    %c15_236 = arith.constant 15 : index
    %c0_237 = arith.constant 0 : index
    %c0_238 = arith.constant 0 : index
    %285 = vector.load %arg4[%c15_236, %c0_237, %c0_238] : memref<25x16x6xbf16, #tpu.memory_space<vmem>>, vector<1x16x6xbf16>
    %286 = vector.shape_cast %285 : vector<1x16x6xbf16> to vector<16x6xbf16>
    %cst_239 = arith.constant dense<0.000000e+00> : vector<16x136xf32>
    %287 = tpu.matmul %286, %284, %cst_239 {dimension_numbers = #tpu.dot_dimension_numbers<[1], [0], [0], [1], [0, 0, 1, 1], [], []>} : vector<16x6xbf16>, vector<6x136xbf16>, vector<16x136xf32> -> vector<16x136xf32>
    %288 = arith.addf %282, %287 : vector<16x136xf32>
    %c0_240 = arith.constant 0 : index
    %c43 = arith.constant 43 : index
    %289 = vector.load %arg16[%c0_240, %c43] : memref<6x196xf32, #tpu.memory_space<vmem>>, vector<6x136xf32>
    %290 = arith.truncf %289 : vector<6x136xf32> to vector<6x136xbf16>
    %c16_241 = arith.constant 16 : index
    %c0_242 = arith.constant 0 : index
    %c0_243 = arith.constant 0 : index
    %291 = vector.load %arg4[%c16_241, %c0_242, %c0_243] : memref<25x16x6xbf16, #tpu.memory_space<vmem>>, vector<1x16x6xbf16>
    %292 = vector.shape_cast %291 : vector<1x16x6xbf16> to vector<16x6xbf16>
    %cst_244 = arith.constant dense<0.000000e+00> : vector<16x136xf32>
    %293 = tpu.matmul %292, %290, %cst_244 {dimension_numbers = #tpu.dot_dimension_numbers<[1], [0], [0], [1], [0, 0, 1, 1], [], []>} : vector<16x6xbf16>, vector<6x136xbf16>, vector<16x136xf32> -> vector<16x136xf32>
    %294 = arith.addf %288, %293 : vector<16x136xf32>
    %c0_245 = arith.constant 0 : index
    %c44 = arith.constant 44 : index
    %295 = vector.load %arg16[%c0_245, %c44] : memref<6x196xf32, #tpu.memory_space<vmem>>, vector<6x136xf32>
    %296 = arith.truncf %295 : vector<6x136xf32> to vector<6x136xbf16>
    %c17_246 = arith.constant 17 : index
    %c0_247 = arith.constant 0 : index
    %c0_248 = arith.constant 0 : index
    %297 = vector.load %arg4[%c17_246, %c0_247, %c0_248] : memref<25x16x6xbf16, #tpu.memory_space<vmem>>, vector<1x16x6xbf16>
    %298 = vector.shape_cast %297 : vector<1x16x6xbf16> to vector<16x6xbf16>
    %cst_249 = arith.constant dense<0.000000e+00> : vector<16x136xf32>
    %299 = tpu.matmul %298, %296, %cst_249 {dimension_numbers = #tpu.dot_dimension_numbers<[1], [0], [0], [1], [0, 0, 1, 1], [], []>} : vector<16x6xbf16>, vector<6x136xbf16>, vector<16x136xf32> -> vector<16x136xf32>
    %300 = arith.addf %294, %299 : vector<16x136xf32>
    %c0_250 = arith.constant 0 : index
    %c45 = arith.constant 45 : index
    %301 = vector.load %arg16[%c0_250, %c45] : memref<6x196xf32, #tpu.memory_space<vmem>>, vector<6x136xf32>
    %302 = arith.truncf %301 : vector<6x136xf32> to vector<6x136xbf16>
    %c18_251 = arith.constant 18 : index
    %c0_252 = arith.constant 0 : index
    %c0_253 = arith.constant 0 : index
    %303 = vector.load %arg4[%c18_251, %c0_252, %c0_253] : memref<25x16x6xbf16, #tpu.memory_space<vmem>>, vector<1x16x6xbf16>
    %304 = vector.shape_cast %303 : vector<1x16x6xbf16> to vector<16x6xbf16>
    %cst_254 = arith.constant dense<0.000000e+00> : vector<16x136xf32>
    %305 = tpu.matmul %304, %302, %cst_254 {dimension_numbers = #tpu.dot_dimension_numbers<[1], [0], [0], [1], [0, 0, 1, 1], [], []>} : vector<16x6xbf16>, vector<6x136xbf16>, vector<16x136xf32> -> vector<16x136xf32>
    %306 = arith.addf %300, %305 : vector<16x136xf32>
    %c0_255 = arith.constant 0 : index
    %c46 = arith.constant 46 : index
    %307 = vector.load %arg16[%c0_255, %c46] : memref<6x196xf32, #tpu.memory_space<vmem>>, vector<6x136xf32>
    %308 = arith.truncf %307 : vector<6x136xf32> to vector<6x136xbf16>
    %c19_256 = arith.constant 19 : index
    %c0_257 = arith.constant 0 : index
    %c0_258 = arith.constant 0 : index
    %309 = vector.load %arg4[%c19_256, %c0_257, %c0_258] : memref<25x16x6xbf16, #tpu.memory_space<vmem>>, vector<1x16x6xbf16>
    %310 = vector.shape_cast %309 : vector<1x16x6xbf16> to vector<16x6xbf16>
    %cst_259 = arith.constant dense<0.000000e+00> : vector<16x136xf32>
    %311 = tpu.matmul %310, %308, %cst_259 {dimension_numbers = #tpu.dot_dimension_numbers<[1], [0], [0], [1], [0, 0, 1, 1], [], []>} : vector<16x6xbf16>, vector<6x136xbf16>, vector<16x136xf32> -> vector<16x136xf32>
    %312 = arith.addf %306, %311 : vector<16x136xf32>
    %c0_260 = arith.constant 0 : index
    %c56 = arith.constant 56 : index
    %313 = vector.load %arg16[%c0_260, %c56] : memref<6x196xf32, #tpu.memory_space<vmem>>, vector<6x136xf32>
    %314 = arith.truncf %313 : vector<6x136xf32> to vector<6x136xbf16>
    %c20_261 = arith.constant 20 : index
    %c0_262 = arith.constant 0 : index
    %c0_263 = arith.constant 0 : index
    %315 = vector.load %arg4[%c20_261, %c0_262, %c0_263] : memref<25x16x6xbf16, #tpu.memory_space<vmem>>, vector<1x16x6xbf16>
    %316 = vector.shape_cast %315 : vector<1x16x6xbf16> to vector<16x6xbf16>
    %cst_264 = arith.constant dense<0.000000e+00> : vector<16x136xf32>
    %317 = tpu.matmul %316, %314, %cst_264 {dimension_numbers = #tpu.dot_dimension_numbers<[1], [0], [0], [1], [0, 0, 1, 1], [], []>} : vector<16x6xbf16>, vector<6x136xbf16>, vector<16x136xf32> -> vector<16x136xf32>
    %318 = arith.addf %312, %317 : vector<16x136xf32>
    %c0_265 = arith.constant 0 : index
    %c57 = arith.constant 57 : index
    %319 = vector.load %arg16[%c0_265, %c57] : memref<6x196xf32, #tpu.memory_space<vmem>>, vector<6x136xf32>
    %320 = arith.truncf %319 : vector<6x136xf32> to vector<6x136xbf16>
    %c21_266 = arith.constant 21 : index
    %c0_267 = arith.constant 0 : index
    %c0_268 = arith.constant 0 : index
    %321 = vector.load %arg4[%c21_266, %c0_267, %c0_268] : memref<25x16x6xbf16, #tpu.memory_space<vmem>>, vector<1x16x6xbf16>
    %322 = vector.shape_cast %321 : vector<1x16x6xbf16> to vector<16x6xbf16>
    %cst_269 = arith.constant dense<0.000000e+00> : vector<16x136xf32>
    %323 = tpu.matmul %322, %320, %cst_269 {dimension_numbers = #tpu.dot_dimension_numbers<[1], [0], [0], [1], [0, 0, 1, 1], [], []>} : vector<16x6xbf16>, vector<6x136xbf16>, vector<16x136xf32> -> vector<16x136xf32>
    %324 = arith.addf %318, %323 : vector<16x136xf32>
    %c0_270 = arith.constant 0 : index
    %c58 = arith.constant 58 : index
    %325 = vector.load %arg16[%c0_270, %c58] : memref<6x196xf32, #tpu.memory_space<vmem>>, vector<6x136xf32>
    %326 = arith.truncf %325 : vector<6x136xf32> to vector<6x136xbf16>
    %c22_271 = arith.constant 22 : index
    %c0_272 = arith.constant 0 : index
    %c0_273 = arith.constant 0 : index
    %327 = vector.load %arg4[%c22_271, %c0_272, %c0_273] : memref<25x16x6xbf16, #tpu.memory_space<vmem>>, vector<1x16x6xbf16>
    %328 = vector.shape_cast %327 : vector<1x16x6xbf16> to vector<16x6xbf16>
    %cst_274 = arith.constant dense<0.000000e+00> : vector<16x136xf32>
    %329 = tpu.matmul %328, %326, %cst_274 {dimension_numbers = #tpu.dot_dimension_numbers<[1], [0], [0], [1], [0, 0, 1, 1], [], []>} : vector<16x6xbf16>, vector<6x136xbf16>, vector<16x136xf32> -> vector<16x136xf32>
    %330 = arith.addf %324, %329 : vector<16x136xf32>
    %c0_275 = arith.constant 0 : index
    %c59 = arith.constant 59 : index
    %331 = vector.load %arg16[%c0_275, %c59] : memref<6x196xf32, #tpu.memory_space<vmem>>, vector<6x136xf32>
    %332 = arith.truncf %331 : vector<6x136xf32> to vector<6x136xbf16>
    %c23_276 = arith.constant 23 : index
    %c0_277 = arith.constant 0 : index
    %c0_278 = arith.constant 0 : index
    %333 = vector.load %arg4[%c23_276, %c0_277, %c0_278] : memref<25x16x6xbf16, #tpu.memory_space<vmem>>, vector<1x16x6xbf16>
    %334 = vector.shape_cast %333 : vector<1x16x6xbf16> to vector<16x6xbf16>
    %cst_279 = arith.constant dense<0.000000e+00> : vector<16x136xf32>
    %335 = tpu.matmul %334, %332, %cst_279 {dimension_numbers = #tpu.dot_dimension_numbers<[1], [0], [0], [1], [0, 0, 1, 1], [], []>} : vector<16x6xbf16>, vector<6x136xbf16>, vector<16x136xf32> -> vector<16x136xf32>
    %336 = arith.addf %330, %335 : vector<16x136xf32>
    %c0_280 = arith.constant 0 : index
    %c60 = arith.constant 60 : index
    %337 = vector.load %arg16[%c0_280, %c60] : memref<6x196xf32, #tpu.memory_space<vmem>>, vector<6x136xf32>
    %338 = arith.truncf %337 : vector<6x136xf32> to vector<6x136xbf16>
    %c24_281 = arith.constant 24 : index
    %c0_282 = arith.constant 0 : index
    %c0_283 = arith.constant 0 : index
    %339 = vector.load %arg4[%c24_281, %c0_282, %c0_283] : memref<25x16x6xbf16, #tpu.memory_space<vmem>>, vector<1x16x6xbf16>
    %340 = vector.shape_cast %339 : vector<1x16x6xbf16> to vector<16x6xbf16>
    %cst_284 = arith.constant dense<0.000000e+00> : vector<16x136xf32>
    %341 = tpu.matmul %340, %338, %cst_284 {dimension_numbers = #tpu.dot_dimension_numbers<[1], [0], [0], [1], [0, 0, 1, 1], [], []>} : vector<16x6xbf16>, vector<6x136xbf16>, vector<16x136xf32> -> vector<16x136xf32>
    %342 = arith.addf %336, %341 : vector<16x136xf32>
    %c0_285 = arith.constant 0 : index
    %c0_286 = arith.constant 0 : index
    %343 = vector.load %arg5[%c0_285, %c0_286] : memref<16x1xf32, #tpu.memory_space<vmem>>, vector<16x1xf32>
    %344 = vector.broadcast %343 : vector<16x1xf32> to vector<16x136xf32>
    %345 = arith.addf %342, %344 : vector<16x136xf32>
    %cst_287 = arith.constant 0.000000e+00 : f32
    %346 = vector.broadcast %cst_287 : f32 to vector<16x136xf32>
    %347 = arith.maximumf %345, %346 : vector<16x136xf32>
    %c0_288 = arith.constant 0 : index
    %c0_289 = arith.constant 0 : index
    %348 = vector.load %arg17[%c0_288, %c0_289] : memref<16x136xf32, #tpu.memory_space<vmem>>, vector<16x136xf32>
    tpu.vector_store %arg17[%c0_288, %c0_289], %347 {strides = array<i32>} : memref<16x136xf32, #tpu.memory_space<vmem>>, vector<16x136xf32>,
    %c0_290 = arith.constant 0 : index
    %c0_291 = arith.constant 0 : index
    %349 = vector.load %arg17[%c0_290, %c0_291] : memref<16x136xf32, #tpu.memory_space<vmem>>, vector<16x121xf32>
    %c0_292 = arith.constant 0 : index
    %c1_293 = arith.constant 1 : index
    %350 = vector.load %arg17[%c0_292, %c1_293] : memref<16x136xf32, #tpu.memory_space<vmem>>, vector<16x121xf32>
    %351 = arith.maximumf %349, %350 : vector<16x121xf32>
    %c0_294 = arith.constant 0 : index
    %c14_295 = arith.constant 14 : index
    %352 = vector.load %arg17[%c0_294, %c14_295] : memref<16x136xf32, #tpu.memory_space<vmem>>, vector<16x121xf32>
    %c0_296 = arith.constant 0 : index
    %c15_297 = arith.constant 15 : index
    %353 = vector.load %arg17[%c0_296, %c15_297] : memref<16x136xf32, #tpu.memory_space<vmem>>, vector<16x121xf32>
    %354 = arith.maximumf %352, %353 : vector<16x121xf32>
    %355 = arith.maximumf %351, %354 : vector<16x121xf32>
    %c0_298 = arith.constant 0 : index
    %c0_299 = arith.constant 0 : index
    %356 = vector.load %arg7[%c0_298, %c0_299] : memref<121x25xf32, #tpu.memory_space<vmem>>, vector<121x25xf32>
    %cst_300 = arith.constant dense<0.000000e+00> : vector<16x25xf32>
    %357 = tpu.matmul %355, %356, %cst_300 {dimension_numbers = #tpu.dot_dimension_numbers<[1], [0], [0], [1], [0, 0, 1, 1], [], []>} : vector<16x121xf32>, vector<121x25xf32>, vector<16x25xf32> -> vector<16x25xf32>
    %c0_301 = arith.constant 0 : index
    %c0_302 = arith.constant 0 : index
    %358 = vector.load %arg18[%c0_301, %c0_302] : memref<16x25xf32, #tpu.memory_space<vmem>>, vector<16x25xf32>
    tpu.vector_store %arg18[%c0_301, %c0_302], %357 {strides = array<i32>} : memref<16x25xf32, #tpu.memory_space<vmem>>, vector<16x25xf32>,
    %cst_303 = arith.constant 0.000000e+00 : f32
    %359 = vector.broadcast %cst_303 : f32 to vector<1x120xf32>
    %c0_304 = arith.constant 0 : index
    %c0_305 = arith.constant 0 : index
    %360 = vector.load %arg18[%c0_304, %c0_305] : memref<16x25xf32, #tpu.memory_space<vmem>>, vector<1x25xf32>
    %361 = arith.truncf %360 : vector<1x25xf32> to vector<1x25xbf16>
    %c0_306 = arith.constant 0 : index
    %c0_307 = arith.constant 0 : index
    %c0_308 = arith.constant 0 : index
    %362 = vector.load %arg8[%c0_306, %c0_307, %c0_308] : memref<16x25x120xbf16, #tpu.memory_space<vmem>>, vector<1x25x120xbf16>
    %363 = vector.shape_cast %362 : vector<1x25x120xbf16> to vector<25x120xbf16>
    %cst_309 = arith.constant dense<0.000000e+00> : vector<1x120xf32>
    %364 = tpu.matmul %361, %363, %cst_309 {dimension_numbers = #tpu.dot_dimension_numbers<[1], [0], [0], [1], [0, 0, 1, 1], [], []>} : vector<1x25xbf16>, vector<25x120xbf16>, vector<1x120xf32> -> vector<1x120xf32>
    %365 = arith.addf %359, %364 : vector<1x120xf32>
    %c1_310 = arith.constant 1 : index
    %c0_311 = arith.constant 0 : index
    %366 = vector.load %arg18[%c1_310, %c0_311] : memref<16x25xf32, #tpu.memory_space<vmem>>, vector<1x25xf32>
    %367 = arith.truncf %366 : vector<1x25xf32> to vector<1x25xbf16>
    %c1_312 = arith.constant 1 : index
    %c0_313 = arith.constant 0 : index
    %c0_314 = arith.constant 0 : index
    %368 = vector.load %arg8[%c1_312, %c0_313, %c0_314] : memref<16x25x120xbf16, #tpu.memory_space<vmem>>, vector<1x25x120xbf16>
    %369 = vector.shape_cast %368 : vector<1x25x120xbf16> to vector<25x120xbf16>
    %cst_315 = arith.constant dense<0.000000e+00> : vector<1x120xf32>
    %370 = tpu.matmul %367, %369, %cst_315 {dimension_numbers = #tpu.dot_dimension_numbers<[1], [0], [0], [1], [0, 0, 1, 1], [], []>} : vector<1x25xbf16>, vector<25x120xbf16>, vector<1x120xf32> -> vector<1x120xf32>
    %371 = arith.addf %365, %370 : vector<1x120xf32>
    %c2_316 = arith.constant 2 : index
    %c0_317 = arith.constant 0 : index
    %372 = vector.load %arg18[%c2_316, %c0_317] : memref<16x25xf32, #tpu.memory_space<vmem>>, vector<1x25xf32>
    %373 = arith.truncf %372 : vector<1x25xf32> to vector<1x25xbf16>
    %c2_318 = arith.constant 2 : index
    %c0_319 = arith.constant 0 : index
    %c0_320 = arith.constant 0 : index
    %374 = vector.load %arg8[%c2_318, %c0_319, %c0_320] : memref<16x25x120xbf16, #tpu.memory_space<vmem>>, vector<1x25x120xbf16>
    %375 = vector.shape_cast %374 : vector<1x25x120xbf16> to vector<25x120xbf16>
    %cst_321 = arith.constant dense<0.000000e+00> : vector<1x120xf32>
    %376 = tpu.matmul %373, %375, %cst_321 {dimension_numbers = #tpu.dot_dimension_numbers<[1], [0], [0], [1], [0, 0, 1, 1], [], []>} : vector<1x25xbf16>, vector<25x120xbf16>, vector<1x120xf32> -> vector<1x120xf32>
    %377 = arith.addf %371, %376 : vector<1x120xf32>
    %c3_322 = arith.constant 3 : index
    %c0_323 = arith.constant 0 : index
    %378 = vector.load %arg18[%c3_322, %c0_323] : memref<16x25xf32, #tpu.memory_space<vmem>>, vector<1x25xf32>
    %379 = arith.truncf %378 : vector<1x25xf32> to vector<1x25xbf16>
    %c3_324 = arith.constant 3 : index
    %c0_325 = arith.constant 0 : index
    %c0_326 = arith.constant 0 : index
    %380 = vector.load %arg8[%c3_324, %c0_325, %c0_326] : memref<16x25x120xbf16, #tpu.memory_space<vmem>>, vector<1x25x120xbf16>
    %381 = vector.shape_cast %380 : vector<1x25x120xbf16> to vector<25x120xbf16>
    %cst_327 = arith.constant dense<0.000000e+00> : vector<1x120xf32>
    %382 = tpu.matmul %379, %381, %cst_327 {dimension_numbers = #tpu.dot_dimension_numbers<[1], [0], [0], [1], [0, 0, 1, 1], [], []>} : vector<1x25xbf16>, vector<25x120xbf16>, vector<1x120xf32> -> vector<1x120xf32>
    %383 = arith.addf %377, %382 : vector<1x120xf32>
    %c4_328 = arith.constant 4 : index
    %c0_329 = arith.constant 0 : index
    %384 = vector.load %arg18[%c4_328, %c0_329] : memref<16x25xf32, #tpu.memory_space<vmem>>, vector<1x25xf32>
    %385 = arith.truncf %384 : vector<1x25xf32> to vector<1x25xbf16>
    %c4_330 = arith.constant 4 : index
    %c0_331 = arith.constant 0 : index
    %c0_332 = arith.constant 0 : index
    %386 = vector.load %arg8[%c4_330, %c0_331, %c0_332] : memref<16x25x120xbf16, #tpu.memory_space<vmem>>, vector<1x25x120xbf16>
    %387 = vector.shape_cast %386 : vector<1x25x120xbf16> to vector<25x120xbf16>
    %cst_333 = arith.constant dense<0.000000e+00> : vector<1x120xf32>
    %388 = tpu.matmul %385, %387, %cst_333 {dimension_numbers = #tpu.dot_dimension_numbers<[1], [0], [0], [1], [0, 0, 1, 1], [], []>} : vector<1x25xbf16>, vector<25x120xbf16>, vector<1x120xf32> -> vector<1x120xf32>
    %389 = arith.addf %383, %388 : vector<1x120xf32>
    %c5_334 = arith.constant 5 : index
    %c0_335 = arith.constant 0 : index
    %390 = vector.load %arg18[%c5_334, %c0_335] : memref<16x25xf32, #tpu.memory_space<vmem>>, vector<1x25xf32>
    %391 = arith.truncf %390 : vector<1x25xf32> to vector<1x25xbf16>
    %c5_336 = arith.constant 5 : index
    %c0_337 = arith.constant 0 : index
    %c0_338 = arith.constant 0 : index
    %392 = vector.load %arg8[%c5_336, %c0_337, %c0_338] : memref<16x25x120xbf16, #tpu.memory_space<vmem>>, vector<1x25x120xbf16>
    %393 = vector.shape_cast %392 : vector<1x25x120xbf16> to vector<25x120xbf16>
    %cst_339 = arith.constant dense<0.000000e+00> : vector<1x120xf32>
    %394 = tpu.matmul %391, %393, %cst_339 {dimension_numbers = #tpu.dot_dimension_numbers<[1], [0], [0], [1], [0, 0, 1, 1], [], []>} : vector<1x25xbf16>, vector<25x120xbf16>, vector<1x120xf32> -> vector<1x120xf32>
    %395 = arith.addf %389, %394 : vector<1x120xf32>
    %c6_340 = arith.constant 6 : index
    %c0_341 = arith.constant 0 : index
    %396 = vector.load %arg18[%c6_340, %c0_341] : memref<16x25xf32, #tpu.memory_space<vmem>>, vector<1x25xf32>
    %397 = arith.truncf %396 : vector<1x25xf32> to vector<1x25xbf16>
    %c6_342 = arith.constant 6 : index
    %c0_343 = arith.constant 0 : index
    %c0_344 = arith.constant 0 : index
    %398 = vector.load %arg8[%c6_342, %c0_343, %c0_344] : memref<16x25x120xbf16, #tpu.memory_space<vmem>>, vector<1x25x120xbf16>
    %399 = vector.shape_cast %398 : vector<1x25x120xbf16> to vector<25x120xbf16>
    %cst_345 = arith.constant dense<0.000000e+00> : vector<1x120xf32>
    %400 = tpu.matmul %397, %399, %cst_345 {dimension_numbers = #tpu.dot_dimension_numbers<[1], [0], [0], [1], [0, 0, 1, 1], [], []>} : vector<1x25xbf16>, vector<25x120xbf16>, vector<1x120xf32> -> vector<1x120xf32>
    %401 = arith.addf %395, %400 : vector<1x120xf32>
    %c7_346 = arith.constant 7 : index
    %c0_347 = arith.constant 0 : index
    %402 = vector.load %arg18[%c7_346, %c0_347] : memref<16x25xf32, #tpu.memory_space<vmem>>, vector<1x25xf32>
    %403 = arith.truncf %402 : vector<1x25xf32> to vector<1x25xbf16>
    %c7_348 = arith.constant 7 : index
    %c0_349 = arith.constant 0 : index
    %c0_350 = arith.constant 0 : index
    %404 = vector.load %arg8[%c7_348, %c0_349, %c0_350] : memref<16x25x120xbf16, #tpu.memory_space<vmem>>, vector<1x25x120xbf16>
    %405 = vector.shape_cast %404 : vector<1x25x120xbf16> to vector<25x120xbf16>
    %cst_351 = arith.constant dense<0.000000e+00> : vector<1x120xf32>
    %406 = tpu.matmul %403, %405, %cst_351 {dimension_numbers = #tpu.dot_dimension_numbers<[1], [0], [0], [1], [0, 0, 1, 1], [], []>} : vector<1x25xbf16>, vector<25x120xbf16>, vector<1x120xf32> -> vector<1x120xf32>
    %407 = arith.addf %401, %406 : vector<1x120xf32>
    %c8_352 = arith.constant 8 : index
    %c0_353 = arith.constant 0 : index
    %408 = vector.load %arg18[%c8_352, %c0_353] : memref<16x25xf32, #tpu.memory_space<vmem>>, vector<1x25xf32>
    %409 = arith.truncf %408 : vector<1x25xf32> to vector<1x25xbf16>
    %c8_354 = arith.constant 8 : index
    %c0_355 = arith.constant 0 : index
    %c0_356 = arith.constant 0 : index
    %410 = vector.load %arg8[%c8_354, %c0_355, %c0_356] : memref<16x25x120xbf16, #tpu.memory_space<vmem>>, vector<1x25x120xbf16>
    %411 = vector.shape_cast %410 : vector<1x25x120xbf16> to vector<25x120xbf16>
    %cst_357 = arith.constant dense<0.000000e+00> : vector<1x120xf32>
    %412 = tpu.matmul %409, %411, %cst_357 {dimension_numbers = #tpu.dot_dimension_numbers<[1], [0], [0], [1], [0, 0, 1, 1], [], []>} : vector<1x25xbf16>, vector<25x120xbf16>, vector<1x120xf32> -> vector<1x120xf32>
    %413 = arith.addf %407, %412 : vector<1x120xf32>
    %c9_358 = arith.constant 9 : index
    %c0_359 = arith.constant 0 : index
    %414 = vector.load %arg18[%c9_358, %c0_359] : memref<16x25xf32, #tpu.memory_space<vmem>>, vector<1x25xf32>
    %415 = arith.truncf %414 : vector<1x25xf32> to vector<1x25xbf16>
    %c9_360 = arith.constant 9 : index
    %c0_361 = arith.constant 0 : index
    %c0_362 = arith.constant 0 : index
    %416 = vector.load %arg8[%c9_360, %c0_361, %c0_362] : memref<16x25x120xbf16, #tpu.memory_space<vmem>>, vector<1x25x120xbf16>
    %417 = vector.shape_cast %416 : vector<1x25x120xbf16> to vector<25x120xbf16>
    %cst_363 = arith.constant dense<0.000000e+00> : vector<1x120xf32>
    %418 = tpu.matmul %415, %417, %cst_363 {dimension_numbers = #tpu.dot_dimension_numbers<[1], [0], [0], [1], [0, 0, 1, 1], [], []>} : vector<1x25xbf16>, vector<25x120xbf16>, vector<1x120xf32> -> vector<1x120xf32>
    %419 = arith.addf %413, %418 : vector<1x120xf32>
    %c10_364 = arith.constant 10 : index
    %c0_365 = arith.constant 0 : index
    %420 = vector.load %arg18[%c10_364, %c0_365] : memref<16x25xf32, #tpu.memory_space<vmem>>, vector<1x25xf32>
    %421 = arith.truncf %420 : vector<1x25xf32> to vector<1x25xbf16>
    %c10_366 = arith.constant 10 : index
    %c0_367 = arith.constant 0 : index
    %c0_368 = arith.constant 0 : index
    %422 = vector.load %arg8[%c10_366, %c0_367, %c0_368] : memref<16x25x120xbf16, #tpu.memory_space<vmem>>, vector<1x25x120xbf16>
    %423 = vector.shape_cast %422 : vector<1x25x120xbf16> to vector<25x120xbf16>
    %cst_369 = arith.constant dense<0.000000e+00> : vector<1x120xf32>
    %424 = tpu.matmul %421, %423, %cst_369 {dimension_numbers = #tpu.dot_dimension_numbers<[1], [0], [0], [1], [0, 0, 1, 1], [], []>} : vector<1x25xbf16>, vector<25x120xbf16>, vector<1x120xf32> -> vector<1x120xf32>
    %425 = arith.addf %419, %424 : vector<1x120xf32>
    %c11_370 = arith.constant 11 : index
    %c0_371 = arith.constant 0 : index
    %426 = vector.load %arg18[%c11_370, %c0_371] : memref<16x25xf32, #tpu.memory_space<vmem>>, vector<1x25xf32>
    %427 = arith.truncf %426 : vector<1x25xf32> to vector<1x25xbf16>
    %c11_372 = arith.constant 11 : index
    %c0_373 = arith.constant 0 : index
    %c0_374 = arith.constant 0 : index
    %428 = vector.load %arg8[%c11_372, %c0_373, %c0_374] : memref<16x25x120xbf16, #tpu.memory_space<vmem>>, vector<1x25x120xbf16>
    %429 = vector.shape_cast %428 : vector<1x25x120xbf16> to vector<25x120xbf16>
    %cst_375 = arith.constant dense<0.000000e+00> : vector<1x120xf32>
    %430 = tpu.matmul %427, %429, %cst_375 {dimension_numbers = #tpu.dot_dimension_numbers<[1], [0], [0], [1], [0, 0, 1, 1], [], []>} : vector<1x25xbf16>, vector<25x120xbf16>, vector<1x120xf32> -> vector<1x120xf32>
    %431 = arith.addf %425, %430 : vector<1x120xf32>
    %c12_376 = arith.constant 12 : index
    %c0_377 = arith.constant 0 : index
    %432 = vector.load %arg18[%c12_376, %c0_377] : memref<16x25xf32, #tpu.memory_space<vmem>>, vector<1x25xf32>
    %433 = arith.truncf %432 : vector<1x25xf32> to vector<1x25xbf16>
    %c12_378 = arith.constant 12 : index
    %c0_379 = arith.constant 0 : index
    %c0_380 = arith.constant 0 : index
    %434 = vector.load %arg8[%c12_378, %c0_379, %c0_380] : memref<16x25x120xbf16, #tpu.memory_space<vmem>>, vector<1x25x120xbf16>
    %435 = vector.shape_cast %434 : vector<1x25x120xbf16> to vector<25x120xbf16>
    %cst_381 = arith.constant dense<0.000000e+00> : vector<1x120xf32>
    %436 = tpu.matmul %433, %435, %cst_381 {dimension_numbers = #tpu.dot_dimension_numbers<[1], [0], [0], [1], [0, 0, 1, 1], [], []>} : vector<1x25xbf16>, vector<25x120xbf16>, vector<1x120xf32> -> vector<1x120xf32>
    %437 = arith.addf %431, %436 : vector<1x120xf32>
    %c13_382 = arith.constant 13 : index
    %c0_383 = arith.constant 0 : index
    %438 = vector.load %arg18[%c13_382, %c0_383] : memref<16x25xf32, #tpu.memory_space<vmem>>, vector<1x25xf32>
    %439 = arith.truncf %438 : vector<1x25xf32> to vector<1x25xbf16>
    %c13_384 = arith.constant 13 : index
    %c0_385 = arith.constant 0 : index
    %c0_386 = arith.constant 0 : index
    %440 = vector.load %arg8[%c13_384, %c0_385, %c0_386] : memref<16x25x120xbf16, #tpu.memory_space<vmem>>, vector<1x25x120xbf16>
    %441 = vector.shape_cast %440 : vector<1x25x120xbf16> to vector<25x120xbf16>
    %cst_387 = arith.constant dense<0.000000e+00> : vector<1x120xf32>
    %442 = tpu.matmul %439, %441, %cst_387 {dimension_numbers = #tpu.dot_dimension_numbers<[1], [0], [0], [1], [0, 0, 1, 1], [], []>} : vector<1x25xbf16>, vector<25x120xbf16>, vector<1x120xf32> -> vector<1x120xf32>
    %443 = arith.addf %437, %442 : vector<1x120xf32>
    %c14_388 = arith.constant 14 : index
    %c0_389 = arith.constant 0 : index
    %444 = vector.load %arg18[%c14_388, %c0_389] : memref<16x25xf32, #tpu.memory_space<vmem>>, vector<1x25xf32>
    %445 = arith.truncf %444 : vector<1x25xf32> to vector<1x25xbf16>
    %c14_390 = arith.constant 14 : index
    %c0_391 = arith.constant 0 : index
    %c0_392 = arith.constant 0 : index
    %446 = vector.load %arg8[%c14_390, %c0_391, %c0_392] : memref<16x25x120xbf16, #tpu.memory_space<vmem>>, vector<1x25x120xbf16>
    %447 = vector.shape_cast %446 : vector<1x25x120xbf16> to vector<25x120xbf16>
    %cst_393 = arith.constant dense<0.000000e+00> : vector<1x120xf32>
    %448 = tpu.matmul %445, %447, %cst_393 {dimension_numbers = #tpu.dot_dimension_numbers<[1], [0], [0], [1], [0, 0, 1, 1], [], []>} : vector<1x25xbf16>, vector<25x120xbf16>, vector<1x120xf32> -> vector<1x120xf32>
    %449 = arith.addf %443, %448 : vector<1x120xf32>
    %c15_394 = arith.constant 15 : index
    %c0_395 = arith.constant 0 : index
    %450 = vector.load %arg18[%c15_394, %c0_395] : memref<16x25xf32, #tpu.memory_space<vmem>>, vector<1x25xf32>
    %451 = arith.truncf %450 : vector<1x25xf32> to vector<1x25xbf16>
    %c15_396 = arith.constant 15 : index
    %c0_397 = arith.constant 0 : index
    %c0_398 = arith.constant 0 : index
    %452 = vector.load %arg8[%c15_396, %c0_397, %c0_398] : memref<16x25x120xbf16, #tpu.memory_space<vmem>>, vector<1x25x120xbf16>
    %453 = vector.shape_cast %452 : vector<1x25x120xbf16> to vector<25x120xbf16>
    %cst_399 = arith.constant dense<0.000000e+00> : vector<1x120xf32>
    %454 = tpu.matmul %451, %453, %cst_399 {dimension_numbers = #tpu.dot_dimension_numbers<[1], [0], [0], [1], [0, 0, 1, 1], [], []>} : vector<1x25xbf16>, vector<25x120xbf16>, vector<1x120xf32> -> vector<1x120xf32>
    %455 = arith.addf %449, %454 : vector<1x120xf32>
    %c0_400 = arith.constant 0 : index
    %c0_401 = arith.constant 0 : index
    %456 = vector.load %arg9[%c0_400, %c0_401] : memref<1x120xf32, #tpu.memory_space<vmem>>, vector<1x120xf32>
    %457 = arith.addf %455, %456 : vector<1x120xf32>
    %cst_402 = arith.constant 0.000000e+00 : f32
    %458 = vector.broadcast %cst_402 : f32 to vector<1x120xf32>
    %459 = arith.maximumf %457, %458 : vector<1x120xf32>
    %460 = arith.truncf %459 : vector<1x120xf32> to vector<1x120xbf16>
    %c0_403 = arith.constant 0 : index
    %c0_404 = arith.constant 0 : index
    %461 = vector.load %arg10[%c0_403, %c0_404] : memref<120x84xbf16, #tpu.memory_space<vmem>>, vector<120x84xbf16>
    %cst_405 = arith.constant dense<0.000000e+00> : vector<1x84xf32>
    %462 = tpu.matmul %460, %461, %cst_405 {dimension_numbers = #tpu.dot_dimension_numbers<[1], [0], [0], [1], [0, 0, 1, 1], [], []>} : vector<1x120xbf16>, vector<120x84xbf16>, vector<1x84xf32> -> vector<1x84xf32>
    %c0_406 = arith.constant 0 : index
    %c0_407 = arith.constant 0 : index
    %463 = vector.load %arg11[%c0_406, %c0_407] : memref<1x84xf32, #tpu.memory_space<vmem>>, vector<1x84xf32>
    %464 = arith.addf %462, %463 : vector<1x84xf32>
    %cst_408 = arith.constant 0.000000e+00 : f32
    %465 = vector.broadcast %cst_408 : f32 to vector<1x84xf32>
    %466 = arith.maximumf %464, %465 : vector<1x84xf32>
    %467 = arith.truncf %466 : vector<1x84xf32> to vector<1x84xbf16>
    %c0_409 = arith.constant 0 : index
    %c0_410 = arith.constant 0 : index
    %468 = vector.load %arg12[%c0_409, %c0_410] : memref<84x10xbf16, #tpu.memory_space<vmem>>, vector<84x10xbf16>
    %cst_411 = arith.constant dense<0.000000e+00> : vector<1x10xf32>
    %469 = tpu.matmul %467, %468, %cst_411 {dimension_numbers = #tpu.dot_dimension_numbers<[1], [0], [0], [1], [0, 0, 1, 1], [], []>} : vector<1x84xbf16>, vector<84x10xbf16>, vector<1x10xf32> -> vector<1x10xf32>
    %c0_412 = arith.constant 0 : index
    %c0_413 = arith.constant 0 : index
    %470 = vector.load %arg13[%c0_412, %c0_413] : memref<1x10xf32, #tpu.memory_space<vmem>>, vector<1x10xf32>
    %471 = arith.addf %469, %470 : vector<1x10xf32>
    %cst_414 = arith.constant dense<0xFF800000> : vector<1xf32>
    %472 = vector.multi_reduction <maximumf>, %471, %cst_414 [1] : vector<1x10xf32> to vector<1xf32>
    %473 = vector.shape_cast %472 : vector<1xf32> to vector<1x1xf32>
    %474 = vector.broadcast %473 : vector<1x1xf32> to vector<1x10xf32>
    %475 = arith.subf %471, %474 : vector<1x10xf32>
    %476 = math.exp %475 : vector<1x10xf32>
    %cst_415 = arith.constant dense<0.000000e+00> : vector<1xf32>
    %477 = vector.multi_reduction <add>, %476, %cst_415 [1] : vector<1x10xf32> to vector<1xf32>
    %478 = vector.shape_cast %477 : vector<1xf32> to vector<1x1xf32>
    %479 = vector.broadcast %478 : vector<1x1xf32> to vector<1x10xf32>
    %480 = arith.divf %476, %479 : vector<1x10xf32>
    %c0_416 = arith.constant 0 : index
    %c0_417 = arith.constant 0 : index
    %c0_418 = arith.constant 0 : index
    %481 = vector.load %arg14[%c0_416, %c0_417, %c0_418] : memref<1x1x10xf32, #tpu.memory_space<vmem>>, vector<1x1x10xf32>
    %482 = vector.shape_cast %481 : vector<1x1x10xf32> to vector<1x10xf32>
    %483 = vector.shape_cast %480 : vector<1x10xf32> to vector<1x1x10xf32>
    tpu.vector_store %arg14[%c0_416, %c0_417, %c0_418], %483 {strides = array<i32>} : memref<1x1x10xf32, #tpu.memory_space<vmem>>, vector<1x1x10xf32>,
    return
  }
  func.func @transform_0(%arg0: i32) -> (i32, i32, i32) {
    %c0_i32 = arith.constant 0 : i32
    %c0_i32_0 = arith.constant 0 : i32
    %c0_i32_1 = arith.constant 0 : i32
    return %arg0, %c0_i32, %c0_i32_0 : i32, i32, i32
  }
  func.func @transform_1(%arg0: i32) -> (i32, i32, i32) {
    %c0_i32 = arith.constant 0 : i32
    %c0_i32_0 = arith.constant 0 : i32
    %c0_i32_1 = arith.constant 0 : i32
    %c0_i32_2 = arith.constant 0 : i32
    return %c0_i32, %c0_i32_0, %c0_i32_1 : i32, i32, i32
  }
  func.func @transform_2(%arg0: i32) -> (i32, i32) {
    %c0_i32 = arith.constant 0 : i32
    %c0_i32_0 = arith.constant 0 : i32
    %c0_i32_1 = arith.constant 0 : i32
    return %c0_i32, %c0_i32_0 : i32, i32
  }
  func.func @transform_3(%arg0: i32) -> (i32, i32, i32) {
    %c0_i32 = arith.constant 0 : i32
    %c0_i32_0 = arith.constant 0 : i32
    %c0_i32_1 = arith.constant 0 : i32
    %c0_i32_2 = arith.constant 0 : i32
    return %c0_i32, %c0_i32_0, %c0_i32_1 : i32, i32, i32
  }
  func.func @transform_4(%arg0: i32) -> (i32, i32) {
    %c0_i32 = arith.constant 0 : i32
    %c0_i32_0 = arith.constant 0 : i32
    %c0_i32_1 = arith.constant 0 : i32
    return %c0_i32, %c0_i32_0 : i32, i32
  }
  func.func @transform_5(%arg0: i32) -> (i32, i32) {
    %c0_i32 = arith.constant 0 : i32
    %c0_i32_0 = arith.constant 0 : i32
    %c0_i32_1 = arith.constant 0 : i32
    return %c0_i32, %c0_i32_0 : i32, i32
  }
  func.func @transform_6(%arg0: i32) -> (i32, i32) {
    %c0_i32 = arith.constant 0 : i32
    %c0_i32_0 = arith.constant 0 : i32
    %c0_i32_1 = arith.constant 0 : i32
    return %c0_i32, %c0_i32_0 : i32, i32
  }
  func.func @transform_7(%arg0: i32) -> (i32, i32, i32) {
    %c0_i32 = arith.constant 0 : i32
    %c0_i32_0 = arith.constant 0 : i32
    %c0_i32_1 = arith.constant 0 : i32
    %c0_i32_2 = arith.constant 0 : i32
    return %c0_i32, %c0_i32_0, %c0_i32_1 : i32, i32, i32
  }
  func.func @transform_8(%arg0: i32) -> (i32, i32) {
    %c0_i32 = arith.constant 0 : i32
    %c0_i32_0 = arith.constant 0 : i32
    %c0_i32_1 = arith.constant 0 : i32
    return %c0_i32, %c0_i32_0 : i32, i32
  }
  func.func @transform_9(%arg0: i32) -> (i32, i32) {
    %c0_i32 = arith.constant 0 : i32
    %c0_i32_0 = arith.constant 0 : i32
    %c0_i32_1 = arith.constant 0 : i32
    return %c0_i32, %c0_i32_0 : i32, i32
  }
  func.func @transform_10(%arg0: i32) -> (i32, i32) {
    %c0_i32 = arith.constant 0 : i32
    %c0_i32_0 = arith.constant 0 : i32
    %c0_i32_1 = arith.constant 0 : i32
    return %c0_i32, %c0_i32_0 : i32, i32
  }
  func.func @transform_11(%arg0: i32) -> (i32, i32) {
    %c0_i32 = arith.constant 0 : i32
    %c0_i32_0 = arith.constant 0 : i32
    %c0_i32_1 = arith.constant 0 : i32
    return %c0_i32, %c0_i32_0 : i32, i32
  }
  func.func @transform_12(%arg0: i32) -> (i32, i32) {
    %c0_i32 = arith.constant 0 : i32
    %c0_i32_0 = arith.constant 0 : i32
    %c0_i32_1 = arith.constant 0 : i32
    return %c0_i32, %c0_i32_0 : i32, i32
  }
  func.func @transform_13(%arg0: i32) -> (i32, i32, i32) {
    %c0_i32 = arith.constant 0 : i32
    %c0_i32_0 = arith.constant 0 : i32
    %c0_i32_1 = arith.constant 0 : i32
    return %arg0, %c0_i32, %c0_i32_0 : i32, i32, i32
  }
}

</mosaic_0001>

<bundles_post_ra>
// kernel: lenet_forward.1
= control target key start
LH: loop header
LB: loop body
LE: loop exit
PB: predicated region body
PF: predicated region fallthrough
CT: control target
= control target key end

     0   :  { %s12119_s0 = inlined_call_operand.vmem [shape: f32[2,3,1024], index: 0, kind: input, shape index: {}]   ;;  %s12120_s1 = inlined_call_operand.vmem [shape: bf16[25,6,3], index: 1, kind: input, shape index: {}]   ;;  %s12121_s2 = inlined_call_operand.vmem [shape: f32[6,1], index: 2, kind: input, shape index: {}]   ;;  %s12122_s3 = inlined_call_operand.vmem [shape: bf16[25,16,6], index: 3, kind: input, shape index: {}]   ;;  %s12123_s4 = inlined_call_operand.vmem [shape: f32[16,1], index: 4, kind: input, shape index: {}]   ;;  %s12124_s5 = inlined_call_operand.vmem [shape: f32[859,196], index: 5, kind: input, shape index: {}]   ;;  %s12125_s6 = inlined_call_operand.vmem [shape: f32[121,25], index: 6, kind: input, shape index: {}]   ;;  %s12126_s7 = inlined_call_operand.vmem [shape: bf16[16,25,120], index: 7, kind: input, shape index: {}]   ;;  %s12127_s8 = inlined_call_operand.vmem [shape: f32[1,120], index: 8, kind: input, shape index: {}]   ;;  %s12128_s9 = inlined_call_operand.vmem [shape: bf16[120,84], index: 9, kind: input, shape index: {}]   ;;  %s12129_s10 = inlined_call_operand.vmem [shape: f32[1,84], index: 10, kind: input, shape index: {}]   ;;  %s12130_s11 = inlined_call_operand.vmem [shape: bf16[84,10], index: 11, kind: input, shape index: {}]   ;;  %s12131_s12 = inlined_call_operand.vmem [shape: f32[1,10], index: 12, kind: input, shape index: {}]   ;;  %s12132_s13 = inlined_call_operand.hbm [shape: f32[2,1,10], index: 13, kind: output, shape index: {}]  }
   0x1   :  { %12144 = sst [smem:[#allocation11_spill]] %s12119_s0 }
   0x2   :  { %12145 = sst [smem:[#allocation12_spill]] %s12120_s1 }
   0x3   :  { %12146 = sst [smem:[#allocation13_spill]] %s12121_s2 }
   0x4   :  { %18 = vsyncpa [#allocation7], 0 }
   0x5   :  { %20 = vsyncpa [#allocation7 + $0x1], 0  ;;  %s9171_s25 = smov 0   ;;  %s9173_s26 = smov 0  }
   0x6   :  { %s9175_s27 = smov 0   ;;  %s9177_s28 = smov 0  }
   0x7 LB: > { %12147 = sst [smem:[#allocation9_spill]] %s9055_s27  ;;  %s9192_s29 = sadd.s32 4294967295, %s9059_s28   ;;  %s9059_s28 = sphi %s9177_s28, %s12163_s28   ;;  %s9055_s27 = sphi %s9175_s27, %s12160_s27   ;;  %s9051_s26 = sphi %s9173_s26, %s12162_s26   ;;  %s9047_s25 = sphi %s9171_s25, %s12161_s25  }
   0x8   : > { %s8146_s30 = sadd.s32 4294967294, %s9059_s28   ;;  %s9196_s14 = sadd.s32 1, %s9059_s28  }
   0x9   : > { %s311_s15 = sadd.s32 1, %s9055_s27  ;;  %s308_s16 = ssub.s32 %s9059_s28, %s9196_s14 }
   0xa   : > { %p321_p0 = scmp.ne.s32.totalorder %s9055_s27, %s9051_s26  ;;  %p309_p1 = scmp.eq.s32.totalorder %s308_s16, 0 }
   0xb   : > { %p322_p2 = scmp.eq.s32.totalorder %s9192_s29, 1  ;;  %p327_p3 = scmp.ne.s32.totalorder %s9051_s26, %s9047_s25 }
   0xc   : > { %p328_p4 = scmp.eq.s32.totalorder %s8146_s30, 1  ;;  %p8149_p7 = scmp.ge.s32.totalorder %s9059_s28, 1 }
   0xd   : > { %s9207_s17 = scalar_select %p309_p1, %s9055_s27, %s311_s15  }
   0xe   : > { %p9209_p5 = por %p322_p2, %p321_p0  ;;  %p9213_p6 = por %p328_p4, %p327_p3 }
   0xf   : > { %12148 = sst [smem:[#allocation10_spill]] %s9207_s17  ;;  %p390_p8 = scmp.lt.s32.totalorder %s9059_s28, 3 }
  0x11   : > { %p391_p9 = pnand %p8149_p7, %p390_p8 }
  0x12   : > { %p433_p10 = scmp.lt.s32.totalorder (!%p391_p9), %s9192_s29, 1  ;;  %s12151_s0 = sld [smem:[#allocation11_spill]] (!%p391_p9) }
  0x13   : > { %394 = sbr.rel (%p391_p9) target bundleno = 2984 (0xba8), region = 72  ;;  %s12141_s30 = smov (!%p391_p9), 127  }
  0x14   : > { %s12139_s15 = smov (!%p391_p9), 126   ;;  %s12137_s16 = smov (!%p391_p9), 125  }
  0x15   : > { %s12152_s1 = sld [smem:[#allocation12_spill]] (!%p391_p9)  ;;  %s9067_s22 = smov (!%p391_p9), 95  }
  0x16   : > { %s9071_s23 = smov (!%p391_p9), 64   ;;  %s12155_s2 = sld [smem:[#allocation13_spill]] (!%p391_p9) }
  0x17   : > { %s12156_s17 = smov (!%p391_p9), 96   ;;  %s9082_s27 = smov (!%p391_p9), 113  }
  0x18   : > { %s434_s20 = scalar_select %p433_p10, %s9192_s29, 1  ;;  %vm546_vm0 = vcmask 1040384   ;;  %vm547_vm1 = vcmask 1041408   ;;  %vm535_vm2 = vcmask 1039360   ;;  %vm542_vm3 = vcmask 23552  }
  0x19   : > { %vm836_vm4 = vcmask 1031168   ;;  %vm1024_vm5 = vcmask 1022976   ;;  %vm1212_vm6 = vcmask 1014784   ;;  %vm1406_vm7 = vcmask 785408  }
  0x1a   : > { %s8812_s21 = sshll.u32 %s434_s20, 5  ;;  %s12133_s20 = smov 124   ;;  %vm1601_vm8 = vcmask 777216   ;;  %vm1796_vm9 = vcmask 769024   ;;  %vm1991_vm10 = vcmask 760832   ;;  %vm2186_vm11 = vcmask 752640  }
  0x1b   : > { %s9224_s24 = scalar_lea.vmem %s12151_s0, %s8812_s21  ;;  %s12135_s21 = smov 96   ;;  %vm2381_vm12 = vcmask 523264   ;;  %vm2576_vm13 = vcmask 515072   ;;  %vm2771_vm14 = vcmask 506880   ;;  %vm2966_vm15 = vcmask 498688  }
  0x1c   : > { %v440_v0 = vld [vmem:[%s9224_s24 + $0x8] sm:$0x77]  ;;  %v439_v1 = vld [vmem:[%s9224_s24] sm:$0x77]  ;;  %v441_v2 = vld [vmem:[%s9224_s24 + $0x10] sm:$0x77] }
  0x1d   : > { %450 = vst [vmem:[#allocation1 + $0x10] ss:$2 sm:$0xff] %v440_v0  ;;  %v442_v3 = vld [vmem:[%s9224_s24 + $0x18] sm:$0x7]  ;;  %v477_v4 = vld [vmem:[%s9224_s24 + $0x8] sm:$0x77] }
  0x1e   : > { %448 = vst [vmem:[#allocation1] ss:$2 sm:$0xff] %v439_v1  ;;  %v476_v5 = vld [vmem:[%s9224_s24] sm:$0x77]  ;;  %v478_v6 = vld [vmem:[%s9224_s24 + $0x10] sm:$0x77] }
  0x1f   : > { %452 = vst [vmem:[#allocation1 + $0x20] ss:$2 sm:$0xff] %v441_v2  ;;  %v479_v9 = vld [vmem:[%s9224_s24 + $0x18] sm:$0x7]  ;;  %v778_v15 = vld [vmem:[%s9224_s24 + $0x8] sm:$0x77] }
  0x20   : > { %454 = vst [vmem:[#allocation1 + $0x30] ss:$2 sm:$0xff] %v442_v3  ;;  %v777_v26 = vld [vmem:[%s9224_s24] sm:$0x77]  ;;  %v779_v27 = vld [vmem:[%s9224_s24 + $0x10] sm:$0x77] }
  0x21   : > { %v780_v28 = vld [vmem:[%s9224_s24 + $0x18] sm:$0x7]  ;;  %v966_v29 = vld [vmem:[%s9224_s24 + $0x8] sm:$0x77]  ;;  %v965_v35 = vld [vmem:[%s9224_s24] sm:$0x77] }
  0x22   : > { %v967_v40 = vld [vmem:[%s9224_s24 + $0x10] sm:$0x77]  ;;  %v968_v45 = vld [vmem:[%s9224_s24 + $0x18] sm:$0x7]  ;;  %v1154_v48 = vld [vmem:[%s9224_s24 + $0x8] sm:$0x77] }
  0x23   : > { %v1153_v54 = vld [vmem:[%s9224_s24] sm:$0x77]  ;;  %v1155_v60 = vld [vmem:[%s9224_s24 + $0x10] sm:$0x77]  ;;  %s12158_s0 = smov 127  }
  0x24   : > { %v9233_v7 = vld.sshfl [vmem:[#allocation1 + $0x10] sm:$0xff pattern:$0x75316420]  ;;  %v9235_v8 = vld.sshfl [vmem:[#allocation1 + $0x18] sm:$0xff pattern:$0x75316420] }
  0x25   : > { %488 = vst [vmem:[#allocation1 + $0x10] ss:$2 sm:$0xff] %v477_v4  ;;  %v9238_v10 = vld.sshfl [vmem:[#allocation1] sm:$0xff pattern:$0x75316420] }
  0x26   : > { %v9240_v11 = vld.sshfl [vmem:[#allocation1 + $0x8] sm:$0xff pattern:$0x75316420]  ;;  %v9242_v12 = vld.sshfl [vmem:[#allocation1 + $0x20] sm:$0xff pattern:$0x75316420] }
  0x27   : > { %486 = vst [vmem:[#allocation1] ss:$2 sm:$0xff] %v476_v5  ;;  %v9244_v13 = vld.sshfl [vmem:[#allocation1 + $0x28] sm:$0xff pattern:$0x75316420] }
  0x28   : > { %490 = vst [vmem:[#allocation1 + $0x20] ss:$2 sm:$0xff] %v478_v6  ;;  %v9246_v14 = vld.sshfl [vmem:[#allocation1 + $0x30] sm:$0xff pattern:$0x75316420] }
  0x29   : > { %492 = vst [vmem:[#allocation1 + $0x30] ss:$2 sm:$0xff] %v479_v9 }
  0x2c   : > { %v495_v16 = vld.sshfl [vmem:[#allocation1 + $0x10] sm:$0xff pattern:$0x75316420]  ;;  %v496_v17 = vld.sshfl [vmem:[#allocation1 + $0x18] sm:$0xff pattern:$0x75316420] }
  0x2d   : > { %v509_v18 = vpack.c.bf16 %v495_v16, %v495_v16  ;;  %789 = vst [vmem:[#allocation1 + $0x10] ss:$2 sm:$0xff] %v778_v15  ;;  %v510_v30 = vpack.c.bf16 %v496_v17, %v496_v17 }
  0x2e   : > { %v493_v19 = vld.sshfl [vmem:[#allocation1] sm:$0xff pattern:$0x75316420]  ;;  %v494_v20 = vld.sshfl [vmem:[#allocation1 + $0x8] sm:$0xff pattern:$0x75316420] }
  0x2f   : > { %525 = vrot.lane.b32.xlu0 %v509_v18, %s12141_s30  ;;  %v507_v21 = vpack.c.bf16 %v493_v19, %v493_v19  ;;  %v498_v22 = vld.sshfl [vmem:[#allocation1 + $0x28] sm:$0xff pattern:$0x75316420]  ;;  %v497_v23 = vld.sshfl [vmem:[#allocation1 + $0x20] sm:$0xff pattern:$0x75316420]  ;;  %v508_v33 = vpack.c.bf16 %v494_v20, %v494_v20 }
  0x30   : > { %v511_v24 = vpack.c.bf16 %v497_v23, %v497_v23  ;;  %v499_v25 = vld.sshfl [vmem:[#allocation1 + $0x30] sm:$0xff pattern:$0x75316420]  ;;  %787 = vst [vmem:[#allocation1] ss:$2 sm:$0xff] %v777_v26  ;;  %v512_v39 = vpack.c.bf16 %v498_v22, %v498_v22 }
  0x31   : > { %521 = vrot.lane.b32.xlu1 %v507_v21, %s12141_s30  ;;  %791 = vst [vmem:[#allocation1 + $0x20] ss:$2 sm:$0xff] %v779_v27  ;;  %v513_v34 = vpack.c.bf16 %v499_v25, %v499_v25  ;;  %v1342_v21 = vld [vmem:[%s9224_s24 + $0x8] sm:$0x77]  ;;  %v1341_v23 = vld [vmem:[%s9224_s24] sm:$0x77] }
  0x32   : > { %529 = vrot.lane.b32.xlu2 %v511_v24, %s12141_s30  ;;  %793 = vst [vmem:[#allocation1 + $0x30] ss:$2 sm:$0xff] %v780_v28  ;;  %v1343_v25 = vld [vmem:[%s9224_s24 + $0x10] sm:$0x77]  ;;  %v1156_v26 = vld [vmem:[%s9224_s24 + $0x18] sm:$0x7] }
  0x34   : > { %v796_v31 = vld.sshfl [vmem:[#allocation1 + $0x10] sm:$0xff pattern:$0x75316420]  ;;  %v797_v32 = vld.sshfl [vmem:[#allocation1 + $0x18] sm:$0xff pattern:$0x75316420] }
  0x35   : > { %977 = vst [vmem:[#allocation1 + $0x10] ss:$2 sm:$0xff] %v966_v29  ;;  %v810_v49 = vpack.c.bf16 %v796_v31, %v796_v31  ;;  %v811_v55 = vpack.c.bf16 %v797_v32, %v797_v32 }
  0x37   : > { %527 = vrot.lane.b32.xlu0 %v510_v30, %s12141_s30  ;;  %v794_v36 = vld.sshfl [vmem:[#allocation1] sm:$0xff pattern:$0x75316420]  ;;  %v795_v37 = vld.sshfl [vmem:[#allocation1 + $0x8] sm:$0xff pattern:$0x75316420] }
  0x38   : > { %975 = vst [vmem:[#allocation1] ss:$2 sm:$0xff] %v965_v35  ;;  %v799_v38 = vld.sshfl [vmem:[#allocation1 + $0x28] sm:$0xff pattern:$0x75316420]  ;;  %v808_v42 = vpack.c.bf16 %v794_v36, %v794_v36  ;;  %v809_v43 = vpack.c.bf16 %v795_v37, %v795_v37 }
  0x39   : > { %523 = vrot.lane.b32.xlu1 %v508_v33, %s12141_s30  ;;  %v798_v41 = vld.sshfl [vmem:[#allocation1 + $0x20] sm:$0xff pattern:$0x75316420]  ;;  %v800_v46 = vld.sshfl [vmem:[#allocation1 + $0x30] sm:$0xff pattern:$0x75316420]  ;;  %v813_v51 = vpack.c.bf16 %v799_v38, %v799_v38 }
  0x3a   : > { %533 = vrot.lane.b32.xlu2 %v513_v34, %s12141_s30  ;;  %979 = vst [vmem:[#allocation1 + $0x20] ss:$2 sm:$0xff] %v967_v40  ;;  %v812_v50 = vpack.c.bf16 %v798_v41, %v798_v41  ;;  %v814_v56 = vpack.c.bf16 %v800_v46, %v800_v46  ;;  %v1344_v35 = vld [vmem:[%s9224_s24 + $0x18] sm:$0x77]  ;;  %v469_v46 = vpack.c.bf16 %v9238_v10, %v9238_v10 }
  0x3b   : > { %981 = vst [vmem:[#allocation1 + $0x30] ss:$2 sm:$0xff] %v968_v45 }
  0x3c   : > { %v985_v44 = vld.sshfl [vmem:[#allocation1 + $0x18] sm:$0xff pattern:$0x75316420]  ;;  %v984_v47 = vld.sshfl [vmem:[#allocation1 + $0x10] sm:$0xff pattern:$0x75316420] }
  0x3d   : > { %1165 = vst [vmem:[#allocation1 + $0x10] ss:$2 sm:$0xff] %v1154_v48  ;;  %v998_v61 = vpack.c.bf16 %v984_v47, %v984_v47  ;;  %v999_v63 = vpack.c.bf16 %v985_v44, %v985_v44 }
  0x3f   : > { %531 = vrot.lane.b32.xlu0 %v512_v39, %s12141_s30  ;;  %v982_v52 = vld.sshfl [vmem:[#allocation1] sm:$0xff pattern:$0x75316420]  ;;  %v983_v53 = vld.sshfl [vmem:[#allocation1 + $0x8] sm:$0xff pattern:$0x75316420] }
  0x40   : > { %1163 = vst [vmem:[#allocation1] ss:$2 sm:$0xff] %v1153_v54  ;;  %v997_v58 = vpack.c.bf16 %v983_v53, %v983_v53  ;;  %v996_v62 = vpack.c.bf16 %v982_v52, %v982_v52  ;;  %v473_v53 = vpack.c.bf16 %v9242_v12, %v9242_v12  ;;  %v470_v12 = vpack.c.bf16 %v9240_v11, %v9240_v11 }
  0x41   : > { %822 = vrot.lane.b32.xlu1 %v808_v42, %s12139_s15  ;;  %v986_v57 = vld.sshfl [vmem:[#allocation1 + $0x20] sm:$0xff pattern:$0x75316420]  ;;  %v987_v59 = vld.sshfl [vmem:[#allocation1 + $0x28] sm:$0xff pattern:$0x75316420]  ;;  %v471_v11 = vpack.c.bf16 %v9233_v7, %v9233_v7 }
  0x42   : > { %824 = vrot.lane.b32.xlu2 %v809_v43, %s12139_s15  ;;  %1167 = vst [vmem:[#allocation1 + $0x20] ss:$2 sm:$0xff] %v1155_v60  ;;  %v988_v0 = vld.sshfl [vmem:[#allocation1 + $0x30] sm:$0xff pattern:$0x75316420]  ;;  %v1001_v1 = vpack.c.bf16 %v987_v59, %v987_v59  ;;  %v1000_v3 = vpack.c.bf16 %v986_v57, %v986_v57  ;;  %v9066_v43 = vmov 65535  }
  0x43   : > { %v1002_v2 = vpack.c.bf16 %v988_v0, %v988_v0  ;;  %1169 = vst [vmem:[#allocation1 + $0x30] ss:$2 sm:$0xff] %v1156_v26  ;;  %v1536_v42 = vld [vmem:[%s9224_s24] sm:$0x77]  ;;  %v548_v44 = vsel %vm546_vm0, 4294967295, %v9066_v43 }
  0x44   : > { %v1172_v4 = vld.sshfl [vmem:[#allocation1 + $0x10] sm:$0xff pattern:$0x75316420]  ;;  %v1173_v5 = vld.sshfl [vmem:[#allocation1 + $0x18] sm:$0xff pattern:$0x75316420] }
  0x45   : > { %v1186_v6 = vpack.c.bf16 %v1172_v4, %v1172_v4  ;;  %v1187_v9 = vpack.c.bf16 %v1173_v5, %v1173_v5  ;;  %1353 = vst [vmem:[#allocation1 + $0x10] ss:$2 sm:$0xff] %v1342_v21  ;;  %v1538_v4 = vld [vmem:[%s9224_s24 + $0x10] sm:$0x77]  ;;  %v1539_v21 = vld [vmem:[%s9224_s24 + $0x18] sm:$0x77] }
  0x47   : > { %826 = vrot.lane.b32.xlu0 %v810_v49, %s12139_s15  ;;  %v1171_v15 = vld.sshfl [vmem:[#allocation1 + $0x8] sm:$0xff pattern:$0x75316420]  ;;  %v1170_v22 = vld.sshfl [vmem:[#allocation1] sm:$0xff pattern:$0x75316420] }
  0x48   : > { %v1185_v17 = vpack.c.bf16 %v1171_v15, %v1171_v15  ;;  %1351 = vst [vmem:[#allocation1] ss:$2 sm:$0xff] %v1341_v23  ;;  %v1184_v24 = vpack.c.bf16 %v1170_v22, %v1170_v22 }
  0x49   : > { %830 = vrot.lane.b32.xlu1 %v812_v50, %s12139_s15  ;;  %v1174_v16 = vld.sshfl [vmem:[#allocation1 + $0x20] sm:$0xff pattern:$0x75316420]  ;;  %v1175_v19 = vld.sshfl [vmem:[#allocation1 + $0x28] sm:$0xff pattern:$0x75316420] }
  0x4a   : > { %832 = vrot.lane.b32.xlu2 %v813_v51, %s12139_s15  ;;  %v1188_v18 = vpack.c.bf16 %v1174_v16, %v1174_v16  ;;  %v1189_v20 = vpack.c.bf16 %v1175_v19, %v1175_v19  ;;  %1355 = vst [vmem:[#allocation1 + $0x20] ss:$2 sm:$0xff] %v1343_v25  ;;  %v1176_v34 = vld.sshfl [vmem:[#allocation1 + $0x30] sm:$0xff pattern:$0x75316420]  ;;  %v9304_v50 = vsel %vm547_vm1, %v548_v44, 0  ;;  %v472_v51 = vpack.c.bf16 %v9235_v8, %v9235_v8 }
  0x4b   : > { %v1190_v37 = vpack.c.bf16 %v1176_v34, %v1176_v34  ;;  %1357 = vst [vmem:[#allocation1 + $0x30] ss:$2 sm:$0xff] %v1344_v35  ;;  %v669_v15 = vand.u32 %v9304_v50, %v470_v12  ;;  %v9365_v34 = vld [vmem:[%s12152_s1] sm:$0x7] }
  0x4c   : > { %v1361_v27 = vld.sshfl [vmem:[#allocation1 + $0x18] sm:$0xff pattern:$0x75316420] }
  0x4d   : > { %v1377_v28 = vpack.c.bf16 %v1361_v27, %v1361_v27  ;;  %v1731_v44 = vld [vmem:[%s9224_s24] sm:$0x77] }
  0x4f   : > { %828 = vrot.lane.b32.xlu0 %v811_v55, %s12139_s15  ;;  %v1358_v29 = vld.sshfl [vmem:[#allocation1] sm:$0xff pattern:$0x75316420]  ;;  %v1359_v40 = vld.sshfl [vmem:[#allocation1 + $0x8] sm:$0xff pattern:$0x75316420] }
  0x50   : > { %v1374_v30 = vpack.c.bf16 %v1358_v29, %v1358_v29  ;;  %1546 = vst [vmem:[#allocation1] ss:$2 sm:$0xff] %v1536_v42  ;;  %v1375_v45 = vpack.c.bf16 %v1359_v40, %v1359_v40 }
  0x51   : > { %834 = vrot.lane.b32.xlu1 %v814_v56, %s12139_s15  ;;  %v1363_v31 = vld.sshfl [vmem:[#allocation1 + $0x28] sm:$0xff pattern:$0x75316420]  ;;  %v1362_v32 = vld.sshfl [vmem:[#allocation1 + $0x20] sm:$0xff pattern:$0x75316420]  ;;  %v666_v56 = vand.u32 %v9304_v50, %v469_v46 }
  0x52   : > { %1012 = vrot.lane.b32.xlu2 %v997_v58, %s12137_s16  ;;  %v1379_v33 = vpack.c.bf16 %v1363_v31, %v1363_v31  ;;  %v1378_v38 = vpack.c.bf16 %v1362_v32, %v1362_v32  ;;  %v1364_v47 = vld.sshfl [vmem:[#allocation1 + $0x30] sm:$0xff pattern:$0x75316420]  ;;  %1550 = vst [vmem:[#allocation1 + $0x20] ss:$2 sm:$0xff] %v1538_v4  ;;  %v474_v32 = vpack.c.bf16 %v9244_v13, %v9244_v13 }
  0x53   : > { %v1380_v49 = vpack.c.bf16 %v1364_v47, %v1364_v47 }
  0x54   : > { %v681_v13 = vand.u32 %v9304_v50, %v474_v32 }
  0x57   : > { %1014 = vrot.lane.b32.xlu0 %v998_v61, %s12137_s16  ;;  %v675_v61 = vand.u32 %v9304_v50, %v472_v51  ;;  %v1554_v22 = vld.sshfl [vmem:[#allocation1 + $0x8] sm:$0xff pattern:$0x75316420] }
  0x59   : > { %1010 = vrot.lane.b32.xlu1 %v996_v62, %s12137_s16  ;;  %v1360_v62 = vld.sshfl [vmem:[#allocation1 + $0x10] sm:$0xff pattern:$0x75316420]  ;;  %v1557_v23 = vld.sshfl [vmem:[#allocation1 + $0x20] sm:$0xff pattern:$0x75316420] }
  0x5a   : > { %1016 = vrot.lane.b32.xlu2 %v999_v63, %s12137_s16  ;;  %v1553_v63 = vld.sshfl [vmem:[#allocation1] sm:$0xff pattern:$0x75316420]  ;;  %v1376_v5 = vpack.c.bf16 %v1360_v62, %v1360_v62 }
  0x5b   : > { %1741 = vst [vmem:[#allocation1] ss:$2 sm:$0xff] %v1731_v44 }
  0x5f   : > { %1020 = vrot.lane.b32.xlu0 %v1001_v1, %s12137_s16 }
  0x61   : > { %1022 = vrot.lane.b32.xlu1 %v1002_v2, %s12137_s16  ;;  %v9329_v2 = vld [vmem:[%s12152_s1 + $0x4] sm:$0x7] }
  0x62   : > { %1018 = vrot.lane.b32.xlu2 %v1000_v3, %s12137_s16  ;;  %v678_v3 = vand.u32 %v9304_v50, %v473_v53  ;;  %s12153_s16 = smov 125  }
  0x67   : > { %1202 = vrot.lane.b32.xlu0 %v1186_v6, %s12133_s20  ;;  %v1569_v6 = vpack.c.bf16 %v1553_v63, %v1553_v63  ;;  %v1748_v63 = vld.sshfl [vmem:[#allocation1] sm:$0xff pattern:$0x75316420] }
  0x69   : > { %1204 = vrot.lane.b32.xlu1 %v1187_v9, %s12133_s20 }
  0x6a   : > { %1198 = vrot.lane.b32.xlu2 %v1184_v24, %s12133_s20  ;;  %v1573_v24 = vpack.c.bf16 %v1557_v23, %v1557_v23 }
  0x6f   : > { %1200 = vrot.lane.b32.xlu0 %v1185_v17, %s12133_s20  ;;  %v672_v17 = vand.u32 %v9304_v50, %v471_v11 }
  0x71   : > { %1206 = vrot.lane.b32.xlu1 %v1188_v18, %s12133_s20  ;;  %v1365_v18 = vld.sshfl [vmem:[#allocation1 + $0x38] sm:$0xff pattern:$0x75316420] }
  0x72   : > { %1210 = vrot.lane.b32.xlu2 %v1190_v37, %s12133_s20  ;;  %1552 = vst [vmem:[#allocation1 + $0x30] ss:$2 sm:$0xff] %v1539_v21  ;;  %v1381_v25 = vpack.c.bf16 %v1365_v18, %v1365_v18  ;;  %v9416_v18 = vld [vmem:[%s12152_s1 + $0x8] sm:$0x7] }
  0x77   : > { %1208 = vrot.lane.b32.xlu0 %v1189_v20, %s12133_s20  ;;  %s9068_s20 = smov 94  }
  0x79   : > { %1390 = vrot.lane.b32.xlu1 %v1374_v30, %s12135_s21  ;;  %v1559_v37 = vld.sshfl [vmem:[#allocation1 + $0x30] sm:$0xff pattern:$0x75316420]  ;;  %v1560_v46 = vld.sshfl [vmem:[#allocation1 + $0x38] sm:$0xff pattern:$0x75316420] }
  0x7a   : > { %1392 = vrot.lane.b32.xlu2 %v1375_v45, %s12135_s21 }
  0x7f   : > { %1396 = vrot.lane.b32.xlu0 %v1377_v28, %s12135_s21  ;;  %v1570_v28 = vpack.c.bf16 %v1554_v22, %v1554_v22 }
  0x81   : > { %1398 = vrot.lane.b32.xlu1 %v1378_v38, %s12135_s21  ;;  %v1558_v38 = vld.sshfl [vmem:[#allocation1 + $0x28] sm:$0xff pattern:$0x75316420] }
  0x82   : > { %1394 = vrot.lane.b32.xlu2 %v1376_v5, %s12135_s21 }
  0x87   : > { %1400 = vrot.lane.b32.xlu0 %v1379_v33, %s12135_s21  ;;  %v475_v33 = vpack.c.bf16 %v9246_v14, %v9246_v14  ;;  %v1575_v14 = vpack.c.bf16 %v1559_v37, %v1559_v37 }
  0x89   : > { %1585 = vrot.lane.b32.xlu1 %v1569_v6, %s9067_s22  ;;  %v684_v40 = vand.u32 %v9304_v50, %v475_v33 }
  0x8a   : > { %1587 = vrot.lane.b32.xlu2 %v1570_v28, %s9067_s22 }
  0x8c   : > { %v9293_v36 = vpop.permute.xlu2 %529 }
  0x8f   : > { %1402 = vrot.lane.b32.xlu0 %v1380_v49, %s12135_s21  ;;  %v1576_v49 = vpack.c.bf16 %v1560_v46, %v1560_v46 }
  0x91   : > { %1404 = vrot.lane.b32.xlu1 %v1381_v25, %s12135_s21  ;;  %s9072_s21 = smov 63  }
  0x94   : > { %v534_v48 = vpop.permute.xlu2 %533 }
  0x95   : > { %v569_v55 = vand.u32 %v9304_v50, %v534_v48 }
  0x97   : > { %1593 = vrot.lane.b32.xlu0 %v1573_v24, %s9067_s22  ;;  %v1927_v24 = vld [vmem:[%s9224_s24 + $0x8] sm:$0x77] }
  0x9c   : > { %v825_v26 = vpop.permute.xlu2 %824 }
  0x9f   : > { %1597 = vrot.lane.b32.xlu0 %v1575_v14, %s9067_s22 }
  0xa1   : > { %v526_v39 = vpop.permute.xlu0 %525 }
  0xa3   : > { %v522_v41 = vpop.permute.xlu1 %521 }
  0xa4   : > { %v833_v45 = vpop.permute.xlu2 %832 }
  0xa7   : > { %1599 = vrot.lane.b32.xlu0 %v1576_v49, %s9067_s22 }
  0xa9   : > { %v528_v52 = vpop.permute.xlu0 %527 }
  0xaa   : > { %v538_v10 = vsel %vm535_vm2, %v526_v39, %v528_v52  ;;  %v539_v54 = vsel %vm535_vm2, %v528_v52, %v9293_v36 }
  0xab   : > { %v524_v57 = vpop.permute.xlu1 %523  ;;  %v557_v8 = vand.u32 %v9304_v50, %v538_v10  ;;  %v560_v58 = vand.u32 %v9304_v50, %v539_v54  ;;  %v1749_v54 = vld.sshfl [vmem:[#allocation1 + $0x8] sm:$0xff pattern:$0x75316420] }
  0xac   : > { %v536_v59 = vsel %vm535_vm2, %v522_v41, %v524_v57  ;;  %v537_v60 = vsel %vm535_vm2, %v524_v57, %v526_v39  ;;  %v1537_v39 = vld [vmem:[%s9224_s24 + $0x8] sm:$0x77]  ;;  %v1574_v41 = vpack.c.bf16 %v1558_v38, %v1558_v38  ;;  %v1765_v57 = vpack.c.bf16 %v1749_v54, %v1749_v54 }
  0xad   : > { %v551_v0 = vand.u32 %v9304_v50, %v536_v59  ;;  %v554_v1 = vand.u32 %v9304_v50, %v537_v60  ;;  %604 = vmatpush.bf16.msra.mxu2 %v557_v8  ;;  %617 = vmatpush.bf16.msra.mxu3 %v560_v58  ;;  %1548 = vst [vmem:[#allocation1 + $0x10] ss:$2 sm:$0xff] %v1537_v39 }
  0xae   : > { %1595 = vrot.lane.b32.xlu1 %v1574_v41, %s9067_s22 }
  0xaf   : > { %578 = vmatpush.bf16.msra.mxu0 %v551_v0  ;;  %591 = vmatpush.bf16.msra.mxu1 %v554_v1  ;;  %v1764_v0 = vpack.c.bf16 %v1748_v63, %v1748_v63  ;;  %v1733_v1 = vld [vmem:[%s9224_s24 + $0x10] sm:$0x77] }
  0xb0   : > { %8155 = vmatmul.msk.bf16.vlgmr.msra.gmra.mxu2 %vm542_vm3, %v9329_v2  ;;  %8156 = vmatmul.msk.bf16.vlgmr.msra.gmra.mxu3 %vm542_vm3, %v9329_v2  ;;  %1745 = vst [vmem:[#allocation1 + $0x20] ss:$2 sm:$0xff] %v1733_v1 }
  0xb1   : > { %656 = vmatpush.bf16.msrb.mxu2 %v569_v55  ;;  %693 = vmatpush.bf16.msrb.mxu3 %v666_v56  ;;  %v532_v9 = vpop.permute.xlu0 %531 }
  0xb2   : > { %8153 = vmatmul.msk.bf16.vlgmr.msra.gmra.mxu0 %vm542_vm3, %v9329_v2  ;;  %8154 = vmatmul.msk.bf16.vlgmr.msra.gmra.mxu1 %vm542_vm3, %v9329_v2  ;;  %v540_v7 = vsel %vm535_vm2, %v9293_v36, %v532_v9  ;;  %v541_v16 = vsel %vm535_vm2, %v532_v9, %v534_v48 }
  0xb3   : > { %v563_v19 = vand.u32 %v9304_v50, %v540_v7  ;;  %v566_v20 = vand.u32 %v9304_v50, %v541_v16  ;;  %v823_v27 = vpop.permute.xlu1 %822 }
  0xb4   : > { %v837_v31 = vsel %vm836_vm4, %v823_v27, %v825_v26  ;;  %v1555_v47 = vld.sshfl [vmem:[#allocation1 + $0x10] sm:$0xff pattern:$0x75316420]  ;;  %v1556_v59 = vld.sshfl [vmem:[#allocation1 + $0x18] sm:$0xff pattern:$0x75316420] }
  0xb5   : > { %732 = vmatpush.bf16.msra.mxu2 %v675_v61  ;;  %745 = vmatpush.bf16.msra.mxu3 %v678_v3  ;;  %v847_v36 = vand.u32 %v837_v31, %v9304_v50  ;;  %v1571_v48 = vpack.c.bf16 %v1555_v47, %v1555_v47  ;;  %v1013_v61 = vpop.permute.xlu2 %1012  ;;  %v1572_v62 = vpack.c.bf16 %v1556_v59, %v1556_v59  ;;  %v1734_v3 = vld [vmem:[%s9224_s24 + $0x18] sm:$0x77] }
  0xb6   : > { %630 = vmatpush.bf16.msrb.mxu0 %v563_v19  ;;  %643 = vmatpush.bf16.msrb.mxu1 %v566_v20  ;;  %1747 = vst [vmem:[#allocation1 + $0x30] ss:$2 sm:$0xff] %v1734_v3 }
  0xb7   : > { %1589 = vrot.lane.b32.xlu2 %v1571_v48, %s9067_s22  ;;  %1782 = vrot.lane.b32.xlu1 %v1765_v57, %s9068_s20  ;;  %v1752_v37 = vld.sshfl [vmem:[#allocation1 + $0x20] sm:$0xff pattern:$0x75316420] }
  0xb8   : > { %v1768_v39 = vpack.c.bf16 %v1752_v37, %v1752_v37 }
  0xb9   : > { %v827_v29 = vpop.permute.xlu0 %826 }
  0xba   : > { %706 = vmatpush.bf16.msra.mxu0 %v669_v15  ;;  %719 = vmatpush.bf16.msra.mxu1 %v672_v17  ;;  %v838_v30 = vsel %vm836_vm4, %v825_v26, %v827_v29  ;;  %v1753_v15 = vld.sshfl [vmem:[#allocation1 + $0x28] sm:$0xff pattern:$0x75316420] }
  0xbb   : > { %v850_v35 = vand.u32 %v838_v30, %v9304_v50  ;;  %v831_v42 = vpop.permute.xlu1 %830  ;;  %v1769_v16 = vpack.c.bf16 %v1753_v15, %v1753_v15 }
  0xbc   : > { %v841_v52 = vsel %vm836_vm4, %v831_v42, %v833_v45 }
  0xbd   : > { %v859_v8 = vand.u32 %v841_v52, %v9304_v50  ;;  %v1017_v4 = vpop.permute.xlu2 %1016  ;;  %v1754_v22 = vld.sshfl [vmem:[#allocation1 + $0x30] sm:$0xff pattern:$0x75316420]  ;;  %1790 = vrot.lane.b32.xlu0 %v1769_v16, %s9068_s20  ;;  %v1755_v28 = vld.sshfl [vmem:[#allocation1 + $0x38] sm:$0xff pattern:$0x75316420] }
  0xbe   : > { %v1770_v27 = vpack.c.bf16 %v1754_v22, %v1754_v22  ;;  %v1771_v32 = vpack.c.bf16 %v1755_v28, %v1755_v28 }
  0xbf   : > { %1591 = vrot.lane.b32.xlu2 %v1572_v62, %s9067_s22  ;;  %1780 = vrot.lane.b32.xlu1 %v1764_v0, %s9068_s20  ;;  %s9069_s22 = smov 93   ;;  %v8175_v0 = vld [vmem:[%s12152_s1 + $0xc] sm:$0x7] }
  0xc0   : > { %8159 = vmatmul.msk.bf16.vlgmr.msrb.gmra.mxu2 %vm542_vm3, %v9329_v2  ;;  %8160 = vmatmul.msk.bf16.vlgmr.msrb.gmra.mxu3 %vm542_vm3, %v9365_v34 }
  0xc1   : > { %874 = vmatpush.bf16.msrb.mxu2 %v847_v36  ;;  %887 = vmatpush.bf16.msrb.mxu3 %v850_v35  ;;  %v829_v51 = vpop.permute.xlu0 %828 }
  0xc2   : > { %8157 = vmatmul.msk.bf16.vlgmr.msrb.gmra.mxu0 %vm542_vm3, %v9329_v2  ;;  %8158 = vmatmul.msk.bf16.vlgmr.msrb.gmra.mxu1 %vm542_vm3, %v9329_v2  ;;  %v839_v55 = vsel %vm836_vm4, %v827_v29, %v829_v51  ;;  %v840_v56 = vsel %vm836_vm4, %v829_v51, %v831_v42  ;;  %v1732_v2 = vld [vmem:[%s9224_s24 + $0x8] sm:$0x77]  ;;  %v1926_v29 = vld [vmem:[%s9224_s24] sm:$0x77] }
  0xc3   : > { %758 = vmatpush.bf16.msrb.mxu0 %v681_v13  ;;  %771 = vmatpush.bf16.msrb.mxu1 %v684_v40  ;;  %v9385_v53 = vpop.permute.xlu1 %834  ;;  %v853_v60 = vand.u32 %v839_v55, %v9304_v50  ;;  %v856_v12 = vand.u32 %v840_v56, %v9304_v50  ;;  %1743 = vst [vmem:[#allocation1 + $0x10] ss:$2 sm:$0xff] %v1732_v2 }
  0xc4   : > { %v842_v10 = vsel %vm836_vm4, %v833_v45, %v9385_v53  ;;  %v865_v25 = vand.u32 %v9385_v53, %v9304_v50  ;;  %1936 = vst [vmem:[#allocation1] ss:$2 sm:$0xff] %v1926_v29  ;;  %v1929_v45 = vld [vmem:[%s9224_s24 + $0x18] sm:$0x77] }
  0xc5   : > { %v862_v58 = vand.u32 %v842_v10, %v9304_v50  ;;  %1794 = vrot.lane.b32.xlu0 %v1771_v32, %s9068_s20  ;;  %1942 = vst [vmem:[#allocation1 + $0x30] ss:$2 sm:$0xff] %v1929_v45  ;;  %v2121_v10 = vld [vmem:[%s9224_s24] sm:$0x77] }
  0xc7   : > { %1792 = vrot.lane.b32.xlu1 %v1770_v27, %s9068_s20 }
  0xc9   : > { %v1015_v11 = vpop.permute.xlu0 %1014 }
  0xca   : > { %v1026_v6 = vsel %vm1024_vm5, %v1013_v61, %v1015_v11  ;;  %v1027_v9 = vsel %vm1024_vm5, %v1015_v11, %v1017_v4  ;;  %v1750_v17 = vld.sshfl [vmem:[#allocation1 + $0x10] sm:$0xff pattern:$0x75316420]  ;;  %v1751_v23 = vld.sshfl [vmem:[#allocation1 + $0x18] sm:$0xff pattern:$0x75316420] }
  0xcb   : > { %v1011_v5 = vpop.permute.xlu1 %1010  ;;  %v1038_v19 = vand.u32 %v1026_v6, %v9304_v50  ;;  %v1041_v20 = vand.u32 %v1027_v9, %v9304_v50  ;;  %v1766_v21 = vpack.c.bf16 %v1750_v17, %v1750_v17  ;;  %1938 = vst [vmem:[#allocation1 + $0x10] ss:$2 sm:$0xff] %v1927_v24  ;;  %v1767_v31 = vpack.c.bf16 %v1751_v23, %v1751_v23  ;;  %v1944_v44 = vld.sshfl [vmem:[#allocation1 + $0x8] sm:$0xff pattern:$0x75316420] }
  0xcc   : > { %v1025_v7 = vsel %vm1024_vm5, %v1011_v5, %v1013_v61  ;;  %v1960_v48 = vpack.c.bf16 %v1944_v44, %v1944_v44  ;;  %v1943_v51 = vld.sshfl [vmem:[#allocation1] sm:$0xff pattern:$0x75316420]  ;;  %v1950_v55 = vld.sshfl [vmem:[#allocation1 + $0x38] sm:$0xff pattern:$0x75316420] }
  0xcd   : > { %v1035_v26 = vand.u32 %v1025_v7, %v9304_v50  ;;  %1784 = vrot.lane.b32.xlu2 %v1766_v21, %s9068_s20  ;;  %v1959_v52 = vpack.c.bf16 %v1943_v51, %v1943_v51  ;;  %2131 = vst [vmem:[#allocation1] ss:$2 sm:$0xff] %v2121_v10  ;;  %v1949_v56 = vld.sshfl [vmem:[#allocation1 + $0x30] sm:$0xff pattern:$0x75316420] }
  0xce   : > { %v1965_v59 = vpack.c.bf16 %v1949_v56, %v1949_v56  ;;  %v1928_v11 = vld [vmem:[%s9224_s24 + $0x10] sm:$0x77]  ;;  %v2124_v10 = vld [vmem:[%s9224_s24 + $0x18] sm:$0x77] }
  0xcf   : > { %1975 = vrot.lane.b32.xlu0 %v1959_v52, %s9069_s22  ;;  %1940 = vst [vmem:[#allocation1 + $0x20] ss:$2 sm:$0xff] %v1928_v11  ;;  %v2123_v23 = vld [vmem:[%s9224_s24 + $0x10] sm:$0x77] }
  0xd0   : > { %8163 = vmatmul.msk.bf16.vlgmr.msra.gmra.mxu2 %vm542_vm3, %v9365_v34  ;;  %8164 = vmatmul.msk.bf16.vlgmr.msra.gmra.mxu3 %vm542_vm3, %v9365_v34  ;;  %2137 = vst [vmem:[#allocation1 + $0x30] ss:$2 sm:$0xff] %v2124_v10  ;;  %v2319_v10 = vld [vmem:[%s9224_s24 + $0x18] sm:$0x77] }
  0xd1   : > { %926 = vmatpush.bf16.msra.mxu2 %v859_v8  ;;  %939 = vmatpush.bf16.msra.mxu3 %v862_v58  ;;  %v1021_v35 = vpop.permute.xlu0 %1020  ;;  %v1966_v58 = vpack.c.bf16 %v1950_v55, %v1950_v55 }
  0xd2   : > { %8161 = vmatmul.msk.bf16.vlgmr.msra.gmra.mxu0 %vm542_vm3, %v9365_v34  ;;  %8162 = vmatmul.msk.bf16.vlgmr.msra.gmra.mxu1 %vm542_vm3, %v9365_v34  ;;  %v1945_v33 = vld.sshfl [vmem:[#allocation1 + $0x10] sm:$0xff pattern:$0x75316420]  ;;  %v1946_v53 = vld.sshfl [vmem:[#allocation1 + $0x18] sm:$0xff pattern:$0x75316420] }
  0xd3   : > { %900 = vmatpush.bf16.msra.mxu0 %v853_v60  ;;  %913 = vmatpush.bf16.msra.mxu1 %v856_v12  ;;  %v1023_v30 = vpop.permute.xlu1 %1022  ;;  %v1961_v36 = vpack.c.bf16 %v1945_v33, %v1945_v33  ;;  %v1962_v54 = vpack.c.bf16 %v1946_v53, %v1946_v53 }
  0xd4   : > { %v1030_v38 = vsel %vm1024_vm5, %v1021_v35, %v1023_v30  ;;  %v1053_v41 = vand.u32 %v1023_v30, %v9304_v50  ;;  %v2139_v3 = vld.sshfl [vmem:[#allocation1 + $0x8] sm:$0xff pattern:$0x75316420]  ;;  %v2138_v7 = vld.sshfl [vmem:[#allocation1] sm:$0xff pattern:$0x75316420] }
  0xd5   : > { %1786 = vrot.lane.b32.xlu2 %v1767_v31, %s9068_s20  ;;  %1979 = vrot.lane.b32.xlu1 %v1961_v36, %s9069_s22  ;;  %v1050_v14 = vand.u32 %v1030_v38, %v9304_v50  ;;  %v2155_v9 = vpack.c.bf16 %v2139_v3, %v2139_v3  ;;  %v2154_v16 = vpack.c.bf16 %v2138_v7, %v2138_v7  ;;  %v2316_v30 = vld [vmem:[%s9224_s24] sm:$0x77] }
  0xd6   : > { %v1947_v17 = vld.sshfl [vmem:[#allocation1 + $0x20] sm:$0xff pattern:$0x75316420]  ;;  %2326 = vst [vmem:[#allocation1] ss:$2 sm:$0xff] %v2316_v30 }
  0xd7   : > { %1987 = vrot.lane.b32.xlu0 %v1965_v59, %s9069_s22  ;;  %v1963_v21 = vpack.c.bf16 %v1947_v17, %v1947_v17  ;;  %v2511_v30 = vld [vmem:[%s9224_s24] sm:$0x77] }
  0xd9   : > { %v1203_v49 = vpop.permute.xlu0 %1202 }
  0xdb   : > { %v1205_v42 = vpop.permute.xlu1 %1204 }
  0xdc   : > { %v1215_v60 = vsel %vm1212_vm6, %v1203_v49, %v1205_v42 }
  0xdd   : > { %1788 = vrot.lane.b32.xlu2 %v1768_v39, %s9068_s20  ;;  %1977 = vrot.lane.b32.xlu1 %v1960_v48, %s9069_s22  ;;  %v1229_v1 = vand.u32 %v1215_v60, %v9304_v50  ;;  %s9070_s20 = smov 92   ;;  %v2334_v39 = vld.sshfl [vmem:[#allocation1 + $0x8] sm:$0xff pattern:$0x75316420] }
  0xde   : > { %v9508_v48 = vld [vmem:[%s12152_s1 + $0x10] sm:$0x7]  ;;  %v2333_v53 = vld.sshfl [vmem:[#allocation1] sm:$0xff pattern:$0x75316420] }
  0xdf   : > { %2170 = vrot.lane.b32.xlu0 %v2154_v16, %s9070_s20  ;;  %2521 = vst [vmem:[#allocation1] ss:$2 sm:$0xff] %v2511_v30 }
  0xe0   : > { %8168 = vmatmul.msk.bf16.vlgmr.msrb.gmra.mxu2 %vm542_vm3, %v9416_v18  ;;  %8169 = vmatmul.msk.bf16.vlgmr.msrb.gmra.mxu3 %vm542_vm3, %v9416_v18 }
  0xe1   : > { %1075 = vmatpush.bf16.msrb.mxu2 %v1038_v19  ;;  %1088 = vmatpush.bf16.msrb.mxu3 %v1041_v20  ;;  %v1201_v61 = vpop.permute.xlu0 %1200  ;;  %v1948_v19 = vld.sshfl [vmem:[#allocation1 + $0x28] sm:$0xff pattern:$0x75316420] }
  0xe2   : > { %8165 = vmatmul.msk.bf16.vlgmr.msrb.gmra.mxu0 %vm542_vm3, %v9365_v34  ;;  %8166 = vmatmul.msk.bf16.vlgmr.msrb.gmra.mxu1 %vm542_vm3, %v9365_v34  ;;  %v1019_v34 = vpop.permute.xlu2 %1018  ;;  %v1214_v62 = vsel %vm1212_vm6, %v1201_v61, %v1203_v49  ;;  %2135 = vst [vmem:[#allocation1 + $0x20] ss:$2 sm:$0xff] %v2123_v23 }
  0xe3   : > { %952 = vmatpush.bf16.msrb.mxu0 %v865_v25  ;;  %1062 = vmatpush.bf16.msrb.mxu1 %v1035_v26  ;;  %v1028_v13 = vsel %vm1024_vm5, %v1017_v4, %v1019_v34  ;;  %v1029_v40 = vsel %vm1024_vm5, %v1019_v34, %v1021_v35  ;;  %v1207_v8 = vpop.permute.xlu1 %1206  ;;  %v2122_v4 = vld [vmem:[%s9224_s24 + $0x8] sm:$0x77]  ;;  %v1226_v5 = vand.u32 %v1214_v62, %v9304_v50 }
  0xe4   : > { %v1044_v46 = vand.u32 %v1028_v13, %v9304_v50  ;;  %v1047_v47 = vand.u32 %v1029_v40, %v9304_v50  ;;  %v1216_v12 = vsel %vm1212_vm6, %v1205_v42, %v1207_v8  ;;  %2133 = vst [vmem:[#allocation1 + $0x10] ss:$2 sm:$0xff] %v2122_v4  ;;  %v1964_v34 = vpack.c.bf16 %v1948_v19, %v1948_v19  ;;  %v2144_v19 = vld.sshfl [vmem:[#allocation1 + $0x30] sm:$0xff pattern:$0x75316420] }
  0xe5   : > { %1981 = vrot.lane.b32.xlu2 %v1962_v54, %s9069_s22  ;;  %1989 = vrot.lane.b32.xlu1 %v1966_v58, %s9069_s22  ;;  %v1232_v2 = vand.u32 %v1216_v12, %v9304_v50  ;;  %v2145_v12 = vld.sshfl [vmem:[#allocation1 + $0x38] sm:$0xff pattern:$0x75316420] }
  0xe6   : > { %2332 = vst [vmem:[#allocation1 + $0x30] ss:$2 sm:$0xff] %v2319_v10 }
  0xe9   : > { %v1209_v20 = vpop.permute.xlu0 %1208  ;;  %v2142_v36 = vld.sshfl [vmem:[#allocation1 + $0x20] sm:$0xff pattern:$0x75316420] }
  0xea   : > { %v1199_v57 = vpop.permute.xlu2 %1198  ;;  %v1217_v25 = vsel %vm1212_vm6, %v1207_v8, %v1209_v20  ;;  %v2158_v37 = vpack.c.bf16 %v2142_v36, %v2142_v36 }
  0xeb   : > { %v1213_v63 = vsel %vm1212_vm6, %v1199_v57, %v1201_v61  ;;  %v2140_v22 = vld.sshfl [vmem:[#allocation1 + $0x10] sm:$0xff pattern:$0x75316420]  ;;  %v1391_v28 = vpop.permute.xlu1 %1390  ;;  %v1235_v31 = vand.u32 %v1217_v25, %v9304_v50  ;;  %v2141_v13 = vld.sshfl [vmem:[#allocation1 + $0x18] sm:$0xff pattern:$0x75316420]  ;;  %v2349_v57 = vpack.c.bf16 %v2333_v53, %v2333_v53 }
  0xec   : > { %v1223_v6 = vand.u32 %v1213_v63, %v9304_v50  ;;  %v2156_v24 = vpack.c.bf16 %v2140_v22, %v2140_v22  ;;  %2178 = vrot.lane.b32.xlu0 %v2158_v37, %s9070_s20  ;;  %v2157_v8 = vpack.c.bf16 %v2141_v13, %v2141_v13  ;;  %v2143_v61 = vld.sshfl [vmem:[#allocation1 + $0x28] sm:$0xff pattern:$0x75316420] }
  0xed   : > { %2172 = vrot.lane.b32.xlu1 %v2155_v9, %s9070_s20  ;;  %1983 = vrot.lane.b32.xlu2 %v1963_v21, %s9069_s22 }
  0xf0   : > { %8172 = vmatmul.msk.bf16.vlgmr.msra.gmra.mxu2 %vm542_vm3, %v9416_v18  ;;  %8173 = vmatmul.msk.bf16.vlgmr.msra.gmra.mxu3 %vm542_vm3, %v9416_v18 }
  0xf1   : > { %1140 = vmatpush.bf16.msra.mxu3 %v1053_v41  ;;  %1127 = vmatpush.bf16.msra.mxu2 %v1050_v14  ;;  %v1397_v33 = vpop.permute.xlu0 %1396  ;;  %v2350_v14 = vpack.c.bf16 %v2334_v39, %v2334_v39  ;;  %v2317_v41 = vld [vmem:[%s9224_s24 + $0x8] sm:$0x77] }
  0xf2   : > { %8170 = vmatmul.msk.bf16.vlgmr.msra.gmra.mxu0 %vm542_vm3, %v9416_v18  ;;  %8171 = vmatmul.msk.bf16.vlgmr.msra.gmra.mxu1 %vm542_vm3, %v9416_v18  ;;  %v1211_v15 = vpop.permute.xlu2 %1210  ;;  %2328 = vst [vmem:[#allocation1 + $0x10] ss:$2 sm:$0xff] %v2317_v41 }
  0xf3   : > { %1101 = vmatpush.bf16.msra.mxu0 %v1044_v46  ;;  %1114 = vmatpush.bf16.msra.mxu1 %v1047_v47  ;;  %v1218_v26 = vsel %vm1212_vm6, %v1209_v20, %v1211_v15  ;;  %v1241_v27 = vand.u32 %v1211_v15, %v9304_v50  ;;  %v1399_v40 = vpop.permute.xlu1 %1398  ;;  %v2512_v20 = vld [vmem:[%s9224_s24 + $0x8] sm:$0x77] }
  0xf4   : > { %v1238_v32 = vand.u32 %v1218_v26, %v9304_v50  ;;  %v1410_v44 = vsel %vm1406_vm7, %v1397_v33, %v1399_v40  ;;  %2365 = vrot.lane.b32.xlu0 %v2349_v57, %s9071_s23  ;;  %v2160_v26 = vpack.c.bf16 %v2144_v19, %v2144_v19 }
  0xf5   : > { %2174 = vrot.lane.b32.xlu1 %v2156_v24, %s9070_s20  ;;  %1985 = vrot.lane.b32.xlu2 %v1964_v34, %s9069_s22  ;;  %v1427_v49 = vand.u32 %v1410_v44, %v9304_v50  ;;  %s9076_s22 = smov 32  }
  0xf9   : > { %v1401_v42 = vpop.permute.xlu0 %1400  ;;  %v2335_v56 = vld.sshfl [vmem:[#allocation1 + $0x10] sm:$0xff pattern:$0x75316420]  ;;  %v2336_v63 = vld.sshfl [vmem:[#allocation1 + $0x18] sm:$0xff pattern:$0x75316420] }
  0xfa   : > { %v1411_v45 = vsel %vm1406_vm7, %v1399_v40, %v1401_v42  ;;  %v2351_v58 = vpack.c.bf16 %v2335_v56, %v2335_v56  ;;  %v2352_v3 = vpack.c.bf16 %v2336_v63, %v2336_v63  ;;  %2523 = vst [vmem:[#allocation1 + $0x10] ss:$2 sm:$0xff] %v2512_v20 }
  0xfb   : > { %v1430_v51 = vand.u32 %v1411_v45, %v9304_v50  ;;  %v1586_v59 = vpop.permute.xlu1 %1585 }
  0xfd   : > { %2367 = vrot.lane.b32.xlu1 %v2350_v14, %s9071_s23  ;;  %2176 = vrot.lane.b32.xlu2 %v2157_v8, %s9070_s20 }
 0x100   : > { %8177 = vmatmul.msk.bf16.vlgmr.msrb.gmra.mxu2 %vm542_vm3, %v8175_v0  ;;  %8178 = vmatmul.msk.bf16.vlgmr.msrb.gmra.mxu3 %vm542_vm3, %v8175_v0 }
 0x101   : > { %1276 = vmatpush.bf16.msrb.mxu2 %v1229_v1  ;;  %1289 = vmatpush.bf16.msrb.mxu3 %v1232_v2  ;;  %v1403_v60 = vpop.permute.xlu0 %1402  ;;  %v2161_v1 = vpack.c.bf16 %v2145_v12, %v2145_v12  ;;  %v2159_v2 = vpack.c.bf16 %v2143_v61, %v2143_v61 }
 0x102   : > { %8174 = vmatmul.msk.bf16.vlgmr.msrb.gmra.mxu0 %vm542_vm3, %v9416_v18  ;;  %8176 = vmatmul.msk.bf16.vlgmr.msrb.gmra.mxu1 %vm542_vm3, %v8175_v0  ;;  %v1393_v18 = vpop.permute.xlu2 %1392 }
 0x103   : > { %1263 = vmatpush.bf16.msrb.mxu1 %v1226_v5  ;;  %1250 = vmatpush.bf16.msrb.mxu0 %v1223_v6  ;;  %v1407_v29 = vsel %vm1406_vm7, %v1391_v28, %v1393_v18  ;;  %v1412_v5 = vsel %vm1406_vm7, %v1401_v42, %v1403_v60  ;;  %v9535_v6 = vld [vmem:[%s12152_s1 + $0x14] sm:$0x7]  ;;  %v1405_v7 = vpop.permute.xlu1 %1404 }
 0x104   : > { %v1418_v35 = vand.u32 %v1407_v29, %v9304_v50  ;;  %2184 = vrot.lane.b32.xlu0 %v2161_v1, %s9070_s20  ;;  %v1413_v17 = vsel %vm1406_vm7, %v1403_v60, %v1405_v7  ;;  %v1433_v23 = vand.u32 %v1412_v5, %v9304_v50  ;;  %v2529_v42 = vld.sshfl [vmem:[#allocation1 + $0x8] sm:$0xff pattern:$0x75316420]  ;;  %v2528_v60 = vld.sshfl [vmem:[#allocation1] sm:$0xff pattern:$0x75316420] }
 0x105   : > { %2369 = vrot.lane.b32.xlu1 %v2351_v58, %s9071_s23  ;;  %2180 = vrot.lane.b32.xlu2 %v2159_v2, %s9070_s20  ;;  %v1436_v24 = vand.u32 %v1413_v17, %v9304_v50  ;;  %v2544_v12 = vpack.c.bf16 %v2528_v60, %v2528_v60  ;;  %v2339_v1 = vld.sshfl [vmem:[#allocation1 + $0x30] sm:$0xff pattern:$0x75316420]  ;;  %v2340_v2 = vld.sshfl [vmem:[#allocation1 + $0x38] sm:$0xff pattern:$0x75316420] }
 0x109   : > { %v1594_v16 = vpop.permute.xlu0 %1593 }
 0x10a   : > { %v1395_v38 = vpop.permute.xlu2 %1394 }
 0x10b   : > { %v1408_v46 = vsel %vm1406_vm7, %v1393_v18, %v1395_v38  ;;  %v1409_v47 = vsel %vm1406_vm7, %v1395_v38, %v1397_v33 }
 0x10c   : > { %v1421_v54 = vand.u32 %v1408_v46, %v9304_v50  ;;  %v1424_v55 = vand.u32 %v1409_v47, %v9304_v50  ;;  %v2545_v46 = vpack.c.bf16 %v2529_v42, %v2529_v42 }
 0x10d   : > { %2371 = vrot.lane.b32.xlu1 %v2352_v3, %s9071_s23  ;;  %2182 = vrot.lane.b32.xlu2 %v2160_v26, %s9070_s20  ;;  %v2355_v3 = vpack.c.bf16 %v2339_v1, %v2339_v1  ;;  %s9073_s20 = smov 62  }
 0x110   : > { %8181 = vmatmul.msk.bf16.vlgmr.msra.gmra.mxu2 %vm542_vm3, %v8175_v0  ;;  %8182 = vmatmul.msk.bf16.vlgmr.msra.gmra.mxu3 %vm542_vm3, %v8175_v0 }
 0x111   : > { %1328 = vmatpush.bf16.msra.mxu2 %v1241_v27  ;;  %1445 = vmatpush.bf16.msra.mxu3 %v1418_v35  ;;  %v1598_v37 = vpop.permute.xlu0 %1597 }
 0x112   : > { %8179 = vmatmul.msk.bf16.vlgmr.msra.gmra.mxu0 %vm542_vm3, %v8175_v0  ;;  %8180 = vmatmul.msk.bf16.vlgmr.msra.gmra.mxu1 %vm542_vm3, %v8175_v0  ;;  %v1588_v52 = vpop.permute.xlu2 %1587  ;;  %v2318_v0 = vld [vmem:[%s9224_s24 + $0x10] sm:$0x77] }
 0x113   : > { %1302 = vmatpush.bf16.msra.mxu0 %v1235_v31  ;;  %1315 = vmatpush.bf16.msra.mxu1 %v1238_v32  ;;  %2330 = vst [vmem:[#allocation1 + $0x20] ss:$2 sm:$0xff] %v2318_v0  ;;  %v1602_v4 = vsel %vm1601_vm8, %v1586_v59, %v1588_v52  ;;  %v2530_v32 = vld.sshfl [vmem:[#allocation1 + $0x10] sm:$0xff pattern:$0x75316420] }
 0x114   : > { %v1613_v15 = vand.u32 %v1602_v4, %v9304_v50  ;;  %v2546_v36 = vpack.c.bf16 %v2530_v32, %v2530_v32 }
 0x116   : > { %2564 = vrot.lane.b32.xlu1 %v2546_v36, %s9072_s21 }
 0x119   : > { %v1600_v4 = vpop.permute.xlu0 %1599 }
 0x11a   : > { %v1590_v62 = vpop.permute.xlu2 %1589  ;;  %v2338_v18 = vld.sshfl [vmem:[#allocation1 + $0x28] sm:$0xff pattern:$0x75316420]  ;;  %v2337_v47 = vld.sshfl [vmem:[#allocation1 + $0x20] sm:$0xff pattern:$0x75316420]  ;;  %v1608_v19 = vsel %vm1601_vm8, %v1598_v37, %v1600_v4 }
 0x11b   : > { %v1603_v11 = vsel %vm1601_vm8, %v1588_v52, %v1590_v62  ;;  %v2354_v25 = vpack.c.bf16 %v2338_v18, %v2338_v18  ;;  %v2707_v18 = vld [vmem:[%s9224_s24 + $0x8] sm:$0x77] }
 0x11c   : > { %v1616_v9 = vand.u32 %v1603_v11, %v9304_v50 }
 0x11d   : > { %2375 = vrot.lane.b32.xlu0 %v2354_v25, %s9071_s23 }
 0x120   : > { %8186 = vmatmul.msk.bf16.vlgmr.msrb.gmra.mxu2 %vm542_vm3, %v9508_v48  ;;  %8187 = vmatmul.msk.bf16.vlgmr.msrb.gmra.mxu3 %vm542_vm3, %v9508_v48  ;;  %v1596_v31 = vpop.permute.xlu1 %1595 }
 0x121   : > { %1484 = vmatpush.bf16.msrb.mxu2 %v1427_v49  ;;  %1497 = vmatpush.bf16.msrb.mxu3 %v1430_v51  ;;  %v1606_v34 = vsel %vm1601_vm8, %v1594_v16, %v1596_v31  ;;  %v1607_v38 = vsel %vm1601_vm8, %v1596_v31, %v1598_v37 }
 0x122   : > { %8184 = vmatmul.msk.bf16.vlgmr.msrb.gmra.mxu0 %vm542_vm3, %v9508_v48  ;;  %8185 = vmatmul.msk.bf16.vlgmr.msrb.gmra.mxu1 %vm542_vm3, %v9508_v48  ;;  %v1592_v29 = vpop.permute.xlu2 %1591  ;;  %v1625_v44 = vand.u32 %v1606_v34, %v9304_v50  ;;  %v1628_v45 = vand.u32 %v1607_v38, %v9304_v50 }
 0x123   : > { %1458 = vmatpush.bf16.msrb.mxu0 %v1421_v54  ;;  %1471 = vmatpush.bf16.msrb.mxu1 %v1424_v55  ;;  %v1604_v40 = vsel %vm1601_vm8, %v1590_v62, %v1592_v29  ;;  %v1605_v14 = vsel %vm1601_vm8, %v1592_v29, %v1594_v16  ;;  %v2513_v54 = vld [vmem:[%s9224_s24 + $0x10] sm:$0x77]  ;;  %v2353_v55 = vpack.c.bf16 %v2337_v47, %v2337_v47  ;;  %v2514_v62 = vld [vmem:[%s9224_s24 + $0x18] sm:$0x77]  ;;  %vm3161_vm8 = vcmask 490496  }
 0x124   : > { %v1619_v52 = vand.u32 %v1604_v40, %v9304_v50  ;;  %v1622_v53 = vand.u32 %v1605_v14, %v9304_v50  ;;  %2525 = vst [vmem:[#allocation1 + $0x20] ss:$2 sm:$0xff] %v2513_v54  ;;  %v1631_v29 = vand.u32 %v1608_v19, %v9304_v50 }
 0x125   : > { %2562 = vrot.lane.b32.xlu0 %v2545_v46, %s9072_s21  ;;  %2373 = vrot.lane.b32.xlu2 %v2353_v55, %s9071_s23  ;;  %2527 = vst [vmem:[#allocation1 + $0x30] ss:$2 sm:$0xff] %v2514_v62  ;;  %v2708_v46 = vld [vmem:[%s9224_s24 + $0x10] sm:$0x77] }
 0x129   : > { %v1783_v57 = vpop.permute.xlu1 %1782 }
 0x12a   : > { %v1785_v41 = vpop.permute.xlu2 %1784 }
 0x12b   : > { %v2532_v11 = vld.sshfl [vmem:[#allocation1 + $0x20] sm:$0xff pattern:$0x75316420] }
 0x12c   : > { %v2548_v5 = vpack.c.bf16 %v2532_v11, %v2532_v11  ;;  %v9646_v54 = vld.sshfl [vmem:[#allocation1 + $0x38] sm:$0xff pattern:$0x75316420] }
 0x12d   : > { %2560 = vrot.lane.b32.xlu0 %v2544_v12, %s9072_s21  ;;  %2377 = vrot.lane.b32.xlu2 %v2355_v3, %s9071_s23  ;;  %v2709_v12 = vld [vmem:[%s9224_s24 + $0x18] sm:$0x77] }
 0x12f   : > { %v9542_v21 = vpop.f32.mrf.mxu0  ;;  %v9544_v22 = vpop.f32.mrf.mxu1 }
 0x130   : > { %8190 = vmatmul.msk.bf16.vlgmr.msra.gmra.mxu2 %vm542_vm3, %v9508_v48  ;;  %8192 = vmatmul.msk.bf16.vlgmr.msra.gmra.mxu3 %vm542_vm3, %v9535_v6 }
 0x131   : > { %1640 = vmatpush.bf16.msra.mxu2 %v1613_v15  ;;  %1653 = vmatpush.bf16.msra.mxu3 %v1616_v9  ;;  %v1781_v9 = vpop.permute.xlu1 %1780  ;;  %v1798_v15 = vsel %vm1796_vm9, %v1783_v57, %v1785_v41 }
 0x132   : > { %8188 = vmatmul.msk.bf16.vlgmr.msra.gmra.mxu0 %vm542_vm3, %v9508_v48  ;;  %8189 = vmatmul.msk.bf16.vlgmr.msra.gmra.mxu1 %vm542_vm3, %v9508_v48  ;;  %v2531_v48 = vld.sshfl [vmem:[#allocation1 + $0x18] sm:$0xff pattern:$0x75316420]  ;;  %v9594_v61 = vpop.permute.xlu2 %1786  ;;  %v1797_v20 = vsel %vm1796_vm9, %v1781_v9, %v1783_v57 }
 0x133   : > { %v9556_v27 = vpop.f32.mrf.mxu2  ;;  %v9558_v28 = vpop.f32.mrf.mxu3  ;;  %1510 = vmatpush.bf16.msra.mxu0 %v1433_v23  ;;  %1523 = vmatpush.bf16.msra.mxu1 %v1436_v24  ;;  %v2547_v56 = vpack.c.bf16 %v2531_v48, %v2531_v48  ;;  %v1799_v7 = vsel %vm1796_vm9, %v1785_v41, %v9594_v61  ;;  %v1811_v23 = vand.u32 %v1798_v15, %v9304_v50 }
 0x134   : > { %v1814_v24 = vand.u32 %v1799_v7, %v9304_v50  ;;  %v1808_v30 = vand.u32 %v1797_v20, %v9304_v50  ;;  %2718 = vst [vmem:[#allocation1 + $0x10] ss:$2 sm:$0xff] %v2707_v18  ;;  %v2901_v18 = vld [vmem:[%s9224_s24] sm:$0x77] }
 0x135   : > { %2566 = vrot.lane.b32.xlu1 %v2547_v56, %s9072_s21 }
 0x137   : > { %v582_v33 = vpop.f32.mrf.mxu0  ;;  %v595_v35 = vpop.f32.mrf.mxu1 }
 0x138   : > { %v2534_v33 = vld.sshfl [vmem:[#allocation1 + $0x30] sm:$0xff pattern:$0x75316420]  ;;  %v2356_v35 = vpack.c.bf16 %v2340_v2, %v2340_v2 }
 0x139   : > { %v2550_v36 = vpack.c.bf16 %v2534_v33, %v2534_v33  ;;  %2722 = vst [vmem:[#allocation1 + $0x30] ss:$2 sm:$0xff] %v2709_v12 }
 0x13a   : > { %2379 = vrot.lane.b32.xlu2 %v2356_v35, %s9071_s23  ;;  %s9074_s23 = smov 61  }
 0x13b   : > { %v608_v39 = vpop.f32.mrf.mxu2  ;;  %v621_v13 = vpop.f32.mrf.mxu3  ;;  %2572 = vrot.lane.b32.xlu0 %v2550_v36, %s9072_s21  ;;  %v2725_v40 = vld.sshfl [vmem:[#allocation1 + $0x10] sm:$0xff pattern:$0x75316420]  ;;  %v2726_v14 = vld.sshfl [vmem:[#allocation1 + $0x18] sm:$0xff pattern:$0x75316420] }
 0x13c   : > { %v1789_v39 = vpop.permute.xlu2 %1788  ;;  %v9637_v13 = vld.sshfl [vmem:[#allocation1 + $0x28] sm:$0xff pattern:$0x75316420] }
 0x13d   : > { %2568 = vrot.lane.b32.xlu1 %v2548_v5, %s9072_s21  ;;  %2720 = vst [vmem:[#allocation1 + $0x20] ss:$2 sm:$0xff] %v2708_v46  ;;  %v1800_v10 = vsel %vm1796_vm9, %v9594_v61, %v1789_v39 }
 0x13f   : > { %v9570_v49 = vpop.f32.mrf.mxu0  ;;  %v9572_v51 = vpop.f32.mrf.mxu1 }
 0x140   : > { %8195 = vmatmul.msk.bf16.vlgmr.msrb.gmra.mxu2 %vm542_vm3, %v9535_v6  ;;  %8196 = vmatmul.msk.bf16.vlgmr.msrb.gmra.mxu3 %vm542_vm3, %v9535_v6  ;;  %v2730_v19 = vld.sshfl [vmem:[#allocation1 + $0x38] sm:$0xff pattern:$0x75316420] }
 0x141   : > { %1692 = vmatpush.bf16.msrb.mxu2 %v1625_v44  ;;  %1705 = vmatpush.bf16.msrb.mxu3 %v1628_v45  ;;  %v2742_v44 = vpack.c.bf16 %v2726_v14, %v2726_v14  ;;  %v2706_v45 = vld [vmem:[%s9224_s24] sm:$0x77] }
 0x142   : > { %8193 = vmatmul.msk.bf16.vlgmr.msrb.gmra.mxu0 %vm542_vm3, %v9535_v6  ;;  %8194 = vmatmul.msk.bf16.vlgmr.msrb.gmra.mxu1 %vm542_vm3, %v9535_v6  ;;  %2716 = vst [vmem:[#allocation1] ss:$2 sm:$0xff] %v2706_v45 }
 0x143   : > { %v9587_v8 = vpop.f32.mrf.mxu2  ;;  %v695_v58 = vpop.f32.mrf.mxu3  ;;  %1666 = vmatpush.bf16.msrb.mxu0 %v1619_v52  ;;  %1679 = vmatpush.bf16.msrb.mxu1 %v1622_v53 }
 0x144   : > { %v9590_v59 = vadd.f32 %v695_v58, %v9542_v21  ;;  %v9608_v21 = vld [vmem:[%s12152_s1 + $0x18] sm:$0x7]  ;;  %v1982_v56 = vpop.permute.xlu2 %1981  ;;  %v2727_v11 = vld.sshfl [vmem:[#allocation1 + $0x20] sm:$0xff pattern:$0x75316420] }
 0x145   : > { %2761 = vrot.lane.b32.xlu1 %v2742_v44, %s9073_s20  ;;  %v2743_v5 = vpack.c.bf16 %v2727_v11, %v2727_v11  ;;  %v2728_v20 = vld.sshfl [vmem:[#allocation1 + $0x28] sm:$0xff pattern:$0x75316420] }
 0x147   : > { %v634_v63 = vpop.f32.mrf.mxu0  ;;  %v647_v0 = vpop.f32.mrf.mxu1 }
 0x148   : > { %v1817_v0 = vand.u32 %v1800_v10, %v9304_v50 }
 0x149   : > { %v2724_v61 = vld.sshfl [vmem:[#allocation1 + $0x8] sm:$0xff pattern:$0x75316420]  ;;  %v9677_v7 = vld.sshfl [vmem:[#allocation1] sm:$0xff pattern:$0x75316420] }
 0x14a   : > { %v2740_v4 = vpack.c.bf16 %v2724_v61, %v2724_v61  ;;  %2911 = vst [vmem:[#allocation1] ss:$2 sm:$0xff] %v2901_v18  ;;  %v2739_v18 = vpack.c.bf16 %v9677_v7, %v9677_v7 }
 0x14b   : > { %v660_v16 = vpop.f32.mrf.mxu2  ;;  %v697_v17 = vpop.f32.mrf.mxu3 }
 0x14c   : > { %v9679_v16 = vpop.permute.xlu2 %1983 }
 0x14d   : > { %2763 = vrot.lane.b32.xlu1 %v2743_v5, %s9073_s20 }
 0x14f   : > { %v708_v25 = vpop.f32.mrf.mxu0  ;;  %v721_v26 = vpop.f32.mrf.mxu1 }
 0x150   : > { %v9616_v31 = vadd.f32 %v708_v25, %v9544_v22  ;;  %v9619_v32 = vadd.f32 %v721_v26, %v9556_v27  ;;  %8200 = vmatmul.msk.bf16.vlgmr.msra.gmra.mxu2 %vm542_vm3, %v9608_v21  ;;  %8201 = vmatmul.msk.bf16.vlgmr.msra.gmra.mxu3 %vm542_vm3, %v9608_v21  ;;  %v1791_v22 = vpop.permute.xlu0 %1790  ;;  %v2746_v25 = vpack.c.bf16 %v2730_v19, %v2730_v19 }
 0x151   : > { %1848 = vmatpush.bf16.msra.mxu2 %v1811_v23  ;;  %1861 = vmatpush.bf16.msra.mxu3 %v1814_v24  ;;  %v1801_v55 = vsel %vm1796_vm9, %v1789_v39, %v1791_v22  ;;  %v2744_v26 = vpack.c.bf16 %v2728_v20, %v2728_v20  ;;  %v9732_v61 = vld.sshfl [vmem:[#allocation1] sm:$0xff pattern:$0x75316420] }
 0x152   : > { %8197 = vmatmul.msk.bf16.vlgmr.msra.gmra.mxu0 %vm542_vm3, %v9535_v6  ;;  %8198 = vmatmul.msk.bf16.vlgmr.msra.gmra.mxu1 %vm542_vm3, %v9535_v6  ;;  %v1793_v6 = vpop.permute.xlu1 %1792  ;;  %v1820_v1 = vand.u32 %v1801_v55, %v9304_v50 }
 0x153   : > { %v734_v27 = vpop.f32.mrf.mxu2  ;;  %v747_v37 = vpop.f32.mrf.mxu3  ;;  %1718 = vmatpush.bf16.msra.mxu0 %v1631_v29  ;;  %1835 = vmatpush.bf16.msra.mxu1 %v1808_v30  ;;  %v1802_v47 = vsel %vm1796_vm9, %v1791_v22, %v1793_v6 }
 0x154   : > { %v9630_v34 = vadd.f32 %v734_v27, %v9558_v28  ;;  %v9633_v38 = vadd.f32 %v747_v37, %v9570_v49  ;;  %v2741_v28 = vpack.c.bf16 %v2725_v40, %v2725_v40  ;;  %v1823_v57 = vand.u32 %v1802_v47, %v9304_v50  ;;  %v9695_v27 = vld [vmem:[%s12152_s1 + $0x1c] sm:$0x7] }
 0x155   : > { %2765 = vrot.lane.b32.xlu1 %v2744_v26, %s9073_s20 }
 0x156   : > { %2759 = vrot.lane.b32.xlu0 %v2741_v28, %s9073_s20  ;;  %v2551_v28 = vpack.c.bf16 %v9646_v54, %v9646_v54 }
 0x157   : > { %v710_v41 = vpop.f32.mrf.mxu0  ;;  %v723_v42 = vpop.f32.mrf.mxu1 }
 0x158   : > { %v1795_v48 = vpop.permute.xlu0 %1794  ;;  %v2919_v42 = vld.sshfl [vmem:[#allocation1 + $0x8] sm:$0xff pattern:$0x75316420] }
 0x159   : > { %v1803_v53 = vsel %vm1796_vm9, %v1793_v6, %v1795_v48  ;;  %v2935_v47 = vpack.c.bf16 %v2919_v42, %v2919_v42  ;;  %vm3356_vm9 = vcmask 261120  }
 0x15a   : > { %v1826_v58 = vand.u32 %v1803_v53, %v9304_v50  ;;  %v1980_v60 = vpop.permute.xlu1 %1979 }
 0x15b   : > { %v736_v49 = vpop.f32.mrf.mxu2  ;;  %v749_v52 = vpop.f32.mrf.mxu3  ;;  %v1994_v30 = vsel %vm1991_vm10, %v1980_v60, %v1982_v56 }
 0x15c   : > { %v2009_v37 = vand.u32 %v1994_v30, %v9304_v50 }
 0x15e   : > { %2757 = vrot.lane.b32.xlu0 %v2740_v4, %s9073_s20 }
 0x15f   : > { %v760_v62 = vpop.f32.mrf.mxu0  ;;  %v773_v63 = vpop.f32.mrf.mxu1 }
 0x160   : > { %v9656_v2 = vadd.f32 %v760_v62, %v9572_v51  ;;  %v9659_v3 = vadd.f32 %v773_v63, %v9587_v8  ;;  %8204 = vmatmul.msk.bf16.vlgmr.msrb.gmra.mxu2 %vm542_vm3, %v9608_v21  ;;  %8205 = vmatmul.msk.bf16.vlgmr.msrb.gmra.mxu3 %vm542_vm3, %v9608_v21  ;;  %v1976_v29 = vpop.permute.xlu0 %1975 }
 0x161   : > { %1900 = vmatpush.bf16.msrb.mxu2 %v1823_v57  ;;  %1913 = vmatpush.bf16.msrb.mxu3 %v1826_v58  ;;  %v2903_v57 = vld [vmem:[%s9224_s24 + $0x10] sm:$0x77] }
 0x162   : > { %8202 = vmatmul.msk.bf16.vlgmr.msrb.gmra.mxu0 %vm542_vm3, %v9608_v21  ;;  %8203 = vmatmul.msk.bf16.vlgmr.msrb.gmra.mxu1 %vm542_vm3, %v9608_v21  ;;  %v1978_v17 = vpop.permute.xlu1 %1977  ;;  %2915 = vst [vmem:[#allocation1 + $0x20] ss:$2 sm:$0xff] %v2903_v57 }
 0x163   : > { %v876_v51 = vpop.f32.mrf.mxu2  ;;  %v889_v8 = vpop.f32.mrf.mxu3  ;;  %1874 = vmatpush.bf16.msrb.mxu0 %v1817_v0  ;;  %1887 = vmatpush.bf16.msrb.mxu1 %v1820_v1  ;;  %v1993_v36 = vsel %vm1991_vm10, %v1978_v17, %v1980_v60  ;;  %v1992_v22 = vsel %vm1991_vm10, %v1976_v29, %v1978_v17 }
 0x164   : > { %v9670_v9 = vadd.f32 %v876_v51, %v9590_v59  ;;  %v9673_v15 = vadd.f32 %v889_v8, %v9616_v31  ;;  %v2549_v59 = vpack.c.bf16 %v9637_v13, %v9637_v13  ;;  %v1995_v31 = vsel %vm1991_vm10, %v1982_v56, %v9679_v16  ;;  %v2902_v13 = vld [vmem:[%s9224_s24 + $0x8] sm:$0x77]  ;;  %v3096_v51 = vld [vmem:[%s9224_s24] sm:$0x77] }
 0x165   : > { %v2012_v39 = vand.u32 %v1995_v31, %v9304_v50  ;;  %v2006_v14 = vand.u32 %v1993_v36, %v9304_v50  ;;  %v2003_v41 = vand.u32 %v1992_v22, %v9304_v50  ;;  %2913 = vst [vmem:[#allocation1 + $0x10] ss:$2 sm:$0xff] %v2902_v13  ;;  %v2729_v8 = vld.sshfl [vmem:[#allocation1 + $0x30] sm:$0xff pattern:$0x75316420] }
 0x166   : > { %2570 = vrot.lane.b32.xlu2 %v2549_v59, %s9072_s21  ;;  %2769 = vrot.lane.b32.xlu0 %v2746_v25, %s9073_s20  ;;  %3106 = vst [vmem:[#allocation1] ss:$2 sm:$0xff] %v3096_v51  ;;  %v2904_v25 = vld [vmem:[%s9224_s24 + $0x18] sm:$0x77] }
 0x167   : > { %v762_v23 = vpop.f32.mrf.mxu0  ;;  %v775_v24 = vpop.f32.mrf.mxu1  ;;  %2917 = vst [vmem:[#allocation1 + $0x30] ss:$2 sm:$0xff] %v2904_v25 }
 0x169   : > { %v2923_v23 = vld.sshfl [vmem:[#allocation1 + $0x28] sm:$0xff pattern:$0x75316420] }
 0x16a   : > { %v1990_v46 = vpop.permute.xlu1 %1989  ;;  %v2939_v26 = vpack.c.bf16 %v2923_v23, %v2923_v23 }
 0x16b   : > { %v878_v33 = vpop.f32.mrf.mxu2  ;;  %v891_v35 = vpop.f32.mrf.mxu3 }
 0x16c   : > { %v2920_v53 = vld.sshfl [vmem:[#allocation1 + $0x10] sm:$0xff pattern:$0x75316420]  ;;  %v2921_v10 = vld.sshfl [vmem:[#allocation1 + $0x18] sm:$0xff pattern:$0x75316420] }
 0x16d   : > { %v2937_v56 = vpack.c.bf16 %v2921_v10, %v2921_v10  ;;  %v2936_v58 = vpack.c.bf16 %v2920_v53, %v2920_v53  ;;  %v3114_v33 = vld.sshfl [vmem:[#allocation1 + $0x8] sm:$0xff pattern:$0x75316420]  ;;  %v3097_v35 = vld [vmem:[%s9224_s24 + $0x8] sm:$0x77] }
 0x16e   : > { %2952 = vrot.lane.b32.xlu0 %v2935_v47, %s9074_s23  ;;  %2574 = vrot.lane.b32.xlu2 %v2551_v28, %s9072_s21  ;;  %3108 = vst [vmem:[#allocation1 + $0x10] ss:$2 sm:$0xff] %v3097_v35  ;;  %s9075_s21 = smov 60  }
 0x16f   : > { %v902_v6 = vpop.f32.mrf.mxu0  ;;  %v915_v40 = vpop.f32.mrf.mxu1  ;;  %2956 = vrot.lane.b32.xlu1 %v2937_v56, %s9074_s23  ;;  %v3098_v56 = vld [vmem:[%s9224_s24 + $0x10] sm:$0x77] }
 0x170   : > { %v9703_v44 = vadd.f32 %v902_v6, %v9619_v32  ;;  %v9706_v45 = vadd.f32 %v915_v40, %v9630_v34  ;;  %8209 = vmatmul.msk.bf16.vlgmr.msra.gmra.mxu2 %vm542_vm3, %v9695_v27  ;;  %8210 = vmatmul.msk.bf16.vlgmr.msra.gmra.mxu3 %vm542_vm3, %v9695_v27  ;;  %v1988_v32 = vpop.permute.xlu0 %1987 }
 0x171   : > { %2056 = vmatpush.bf16.msra.mxu2 %v2009_v37  ;;  %2069 = vmatpush.bf16.msra.mxu3 %v2012_v39  ;;  %v2745_v37 = vpack.c.bf16 %v2729_v8, %v2729_v8  ;;  %v2924_v39 = vld.sshfl [vmem:[#allocation1 + $0x30] sm:$0xff pattern:$0x75316420] }
 0x172   : > { %8206 = vmatmul.msk.bf16.vlgmr.msra.gmra.mxu0 %vm542_vm3, %v9608_v21  ;;  %8208 = vmatmul.msk.bf16.vlgmr.msra.gmra.mxu1 %vm542_vm3, %v9695_v27  ;;  %v1986_v21 = vpop.permute.xlu2 %1985  ;;  %v2173_v60 = vpop.permute.xlu1 %2172 }
 0x173   : > { %v928_v34 = vpop.f32.mrf.mxu2  ;;  %v941_v48 = vpop.f32.mrf.mxu3  ;;  %2043 = vmatpush.bf16.msra.mxu1 %v2006_v14  ;;  %2030 = vmatpush.bf16.msra.mxu0 %v2003_v41  ;;  %v1996_v1 = vsel %vm1991_vm10, %v9679_v16, %v1986_v21 }
 0x174   : > { %v9719_v49 = vadd.f32 %v928_v34, %v9633_v38  ;;  %v9722_v52 = vadd.f32 %v941_v48, %v9656_v2  ;;  %v1998_v38 = vsel %vm1991_vm10, %v1988_v32, %v1990_v46  ;;  %v1997_v2 = vsel %vm1991_vm10, %v1986_v21, %v1988_v32  ;;  %v9777_v46 = vld [vmem:[%s12152_s1 + $0x20] sm:$0x7]  ;;  %v2922_v48 = vld.sshfl [vmem:[#allocation1 + $0x20] sm:$0xff pattern:$0x75316420] }
 0x175   : > { %v2021_v11 = vand.u32 %v1998_v38, %v9304_v50  ;;  %v2015_v20 = vand.u32 %v1996_v1, %v9304_v50  ;;  %v2018_v16 = vand.u32 %v1997_v2, %v9304_v50  ;;  %v3115_v34 = vld.sshfl [vmem:[#allocation1 + $0x10] sm:$0xff pattern:$0x75316420]  ;;  %v2934_v38 = vpack.c.bf16 %v9732_v61, %v9732_v61  ;;  %3110 = vst [vmem:[#allocation1 + $0x20] ss:$2 sm:$0xff] %v3098_v56 }
 0x176   : > { %2954 = vrot.lane.b32.xlu0 %v2936_v58, %s9074_s23  ;;  %2755 = vrot.lane.b32.xlu2 %v2739_v18, %s9073_s20  ;;  %v3116_v1 = vld.sshfl [vmem:[#allocation1 + $0x18] sm:$0xff pattern:$0x75316420]  ;;  %v3099_v61 = vld [vmem:[%s9224_s24 + $0x18] sm:$0x77]  ;;  %v2938_v51 = vpack.c.bf16 %v2922_v48, %v2922_v48  ;;  %vm3551_vm10 = vcmask 252928  }
 0x177   : > { %v904_v54 = vpop.f32.mrf.mxu0  ;;  %v917_v55 = vpop.f32.mrf.mxu1  ;;  %2960 = vrot.lane.b32.xlu1 %v2939_v26, %s9074_s23 }
 0x178   : > { %v2171_v12 = vpop.permute.xlu0 %2170  ;;  %v3131_v55 = vpack.c.bf16 %v3115_v34, %v3115_v34 }
 0x179   : > { %v2187_v0 = vsel %vm2186_vm11, %v2171_v12, %v2173_v60 }
 0x17a   : > { %v2198_v4 = vand.u32 %v2187_v0, %v9304_v50  ;;  %v2177_v5 = vpop.permute.xlu2 %2176  ;;  %v2175_v30 = vpop.permute.xlu1 %2174 }
 0x17b   : > { %v930_v62 = vpop.f32.mrf.mxu2  ;;  %v943_v63 = vpop.f32.mrf.mxu3  ;;  %v2188_v42 = vsel %vm2186_vm11, %v2173_v60, %v2175_v30 }
 0x17c   : > { %v2201_v10 = vand.u32 %v2188_v42, %v9304_v50  ;;  %v9808_v62 = vld.sshfl [vmem:[#allocation1 + $0x38] sm:$0xff pattern:$0x75316420] }
 0x17d   : > { %3112 = vst [vmem:[#allocation1 + $0x30] ss:$2 sm:$0xff] %v3099_v61 }
 0x17e   : > { %2767 = vrot.lane.b32.xlu2 %v2745_v37, %s9073_s20  ;;  %s9079_s20 = smov 29  }
 0x17f   : > { %v954_v17 = vpop.f32.mrf.mxu0  ;;  %v1064_v19 = vpop.f32.mrf.mxu1 }
 0x180   : > { %v9742_v24 = vadd.f32 %v954_v17, %v9659_v3  ;;  %v9745_v59 = vadd.f32 %v1064_v19, %v9670_v9  ;;  %8213 = vmatmul.msk.bf16.vlgmr.msrb.gmra.mxu2 %vm542_vm3, %v9695_v27  ;;  %8214 = vmatmul.msk.bf16.vlgmr.msrb.gmra.mxu3 %vm542_vm3, %v9695_v27  ;;  %v2179_v31 = vpop.permute.xlu0 %2178 }
 0x181   : > { %2108 = vmatpush.bf16.msrb.mxu2 %v2021_v11  ;;  %2225 = vmatpush.bf16.msrb.mxu3 %v2198_v4  ;;  %v2190_v6 = vsel %vm2186_vm11, %v2177_v5, %v2179_v31  ;;  %v3117_v4 = vld.sshfl [vmem:[#allocation1 + $0x20] sm:$0xff pattern:$0x75316420] }
 0x182   : > { %8211 = vmatmul.msk.bf16.vlgmr.msrb.gmra.mxu0 %vm542_vm3, %v9695_v27  ;;  %8212 = vmatmul.msk.bf16.vlgmr.msrb.gmra.mxu1 %vm542_vm3, %v9695_v27  ;;  %v3130_v27 = vpack.c.bf16 %v3114_v33, %v3114_v33  ;;  %v2181_v13 = vpop.permute.xlu2 %2180  ;;  %v2207_v28 = vand.u32 %v2190_v6, %v9304_v50  ;;  %v2368_v32 = vpop.permute.xlu1 %2367  ;;  %v3133_v8 = vpack.c.bf16 %v3117_v4, %v3117_v4 }
 0x183   : > { %v1077_v3 = vpop.f32.mrf.mxu2  ;;  %v1090_v9 = vpop.f32.mrf.mxu3  ;;  %2082 = vmatpush.bf16.msrb.mxu0 %v2015_v20  ;;  %2095 = vmatpush.bf16.msrb.mxu1 %v2018_v16  ;;  %v2191_v40 = vsel %vm2186_vm11, %v2179_v31, %v2181_v13 }
 0x184   : > { %v9759_v29 = vadd.f32 %v1077_v3, %v9673_v15  ;;  %v9762_v7 = vadd.f32 %v1090_v9, %v9703_v44  ;;  %3147 = vrot.lane.b32.xlu0 %v3130_v27, %s9075_s21  ;;  %v2940_v15 = vpack.c.bf16 %v2924_v39, %v2924_v39  ;;  %v2189_v44 = vsel %vm2186_vm11, %v2175_v30, %v2177_v5  ;;  %v3292_v9 = vld [vmem:[%s9224_s24 + $0x8] sm:$0x77] }
 0x185   : > { %v2210_v47 = vand.u32 %v2191_v40, %v9304_v50  ;;  %v2204_v54 = vand.u32 %v2189_v44, %v9304_v50  ;;  %3303 = vst [vmem:[#allocation1 + $0x10] ss:$2 sm:$0xff] %v3292_v9 }
 0x186   : > { %2962 = vrot.lane.b32.xlu1 %v2940_v15, %s9074_s23  ;;  %2950 = vrot.lane.b32.xlu2 %v2934_v38, %s9074_s23 }
 0x187   : > { %v956_v36 = vpop.f32.mrf.mxu0  ;;  %v1066_v22 = vpop.f32.mrf.mxu1 }
 0x188   : > { %v2366_v0 = vpop.permute.xlu0 %2365  ;;  %v3119_v36 = vld.sshfl [vmem:[#allocation1 + $0x30] sm:$0xff pattern:$0x75316420] }
 0x189   : > { %v2382_v17 = vsel %vm2381_vm12, %v2366_v0, %v2368_v32  ;;  %v3135_v39 = vpack.c.bf16 %v3119_v36, %v3119_v36 }
 0x18a   : > { %v2183_v63 = vpop.permute.xlu2 %2182  ;;  %v2370_v5 = vpop.permute.xlu1 %2369  ;;  %v2393_v18 = vand.u32 %v2382_v17, %v9304_v50 }
 0x18b   : > { %v1079_v14 = vpop.f32.mrf.mxu2  ;;  %v1092_v41 = vpop.f32.mrf.mxu3  ;;  %v2383_v19 = vsel %vm2381_vm12, %v2368_v32, %v2370_v5  ;;  %v2192_v23 = vsel %vm2186_vm11, %v2181_v13, %v2183_v63 }
 0x18c   : > { %3149 = vrot.lane.b32.xlu0 %v3131_v55, %s9075_s21  ;;  %v2396_v25 = vand.u32 %v2383_v19, %v9304_v50  ;;  %v2213_v33 = vand.u32 %v2192_v23, %v9304_v50  ;;  %v3310_v14 = vld.sshfl [vmem:[#allocation1 + $0x10] sm:$0xff pattern:$0x75316420]  ;;  %v3113_v41 = vld.sshfl [vmem:[#allocation1] sm:$0xff pattern:$0x75316420] }
 0x18e   : > { %3153 = vrot.lane.b32.xlu1 %v3133_v8, %s9075_s21  ;;  %2958 = vrot.lane.b32.xlu2 %v2938_v51, %s9074_s23 }
 0x18f   : > { %v1103_v21 = vpop.f32.mrf.mxu0  ;;  %v1116_v53 = vpop.f32.mrf.mxu1 }
 0x190   : > { %v9785_v57 = vadd.f32 %v1103_v21, %v9706_v45  ;;  %v9788_v58 = vadd.f32 %v1116_v53, %v9719_v49  ;;  %8218 = vmatmul.msk.bf16.vlgmr.msra.gmra.mxu2 %vm542_vm3, %v9777_v46  ;;  %8219 = vmatmul.msk.bf16.vlgmr.msra.gmra.mxu3 %vm542_vm3, %v9777_v46  ;;  %v2185_v26 = vpop.permute.xlu0 %2184 }
 0x191   : > { %2264 = vmatpush.bf16.msra.mxu2 %v2207_v28  ;;  %2277 = vmatpush.bf16.msra.mxu3 %v2210_v47  ;;  %v2193_v35 = vsel %vm2186_vm11, %v2183_v63, %v2185_v26  ;;  %v3326_v28 = vpack.c.bf16 %v3310_v14, %v3310_v14  ;;  %v3120_v47 = vld.sshfl [vmem:[#allocation1 + $0x38] sm:$0xff pattern:$0x75316420]  ;;  %v3294_v14 = vld [vmem:[%s9224_s24 + $0x18] sm:$0x77]  ;;  %vm3746_vm11 = vcmask 244736  }
 0x192   : > { %8216 = vmatmul.msk.bf16.vlgmr.msra.gmra.mxu0 %vm542_vm3, %v9777_v46  ;;  %8217 = vmatmul.msk.bf16.vlgmr.msra.gmra.mxu1 %vm542_vm3, %v9777_v46  ;;  %v2374_v3 = vpop.permute.xlu2 %2373  ;;  %v2216_v37 = vand.u32 %v2193_v35, %v9304_v50  ;;  %v2372_v6 = vpop.permute.xlu1 %2371  ;;  %v3136_v32 = vpack.c.bf16 %v3120_v47, %v3120_v47  ;;  %v9898_v35 = vld [vmem:[%s12152_s1 + $0x28] sm:$0x7]  ;;  %3307 = vst [vmem:[#allocation1 + $0x30] ss:$2 sm:$0xff] %v3294_v14 }
 0x193   : > { %v1129_v45 = vpop.f32.mrf.mxu2  ;;  %v1142_v49 = vpop.f32.mrf.mxu3  ;;  %2238 = vmatpush.bf16.msra.mxu0 %v2201_v10  ;;  %2251 = vmatpush.bf16.msra.mxu1 %v2204_v54  ;;  %v3118_v10 = vld.sshfl [vmem:[#allocation1 + $0x28] sm:$0xff pattern:$0x75316420]  ;;  %v2384_v54 = vsel %vm2381_vm12, %v2370_v5, %v2372_v6  ;;  %v2385_v55 = vsel %vm2381_vm12, %v2372_v6, %v2374_v3  ;;  %v2941_v5 = vpack.c.bf16 %v9808_v62, %v9808_v62 }
 0x194   : > { %v9801_v60 = vadd.f32 %v1129_v45, %v9722_v52  ;;  %v9804_v12 = vadd.f32 %v1142_v49, %v9742_v24  ;;  %v3132_v52 = vpack.c.bf16 %v3116_v1, %v3116_v1  ;;  %v9820_v24 = vld [vmem:[%s12152_s1 + $0x24] sm:$0x7]  ;;  %v3293_v49 = vld [vmem:[%s9224_s24 + $0x10] sm:$0x77]  ;;  %v2399_v1 = vand.u32 %v2384_v54, %v9304_v50 }
 0x195   : > { %v3311_v45 = vld.sshfl [vmem:[#allocation1 + $0x18] sm:$0xff pattern:$0x75316420]  ;;  %v2402_v61 = vand.u32 %v2385_v55, %v9304_v50  ;;  %3305 = vst [vmem:[#allocation1 + $0x20] ss:$2 sm:$0xff] %v3293_v49  ;;  %v3134_v23 = vpack.c.bf16 %v3118_v10, %v3118_v10 }
 0x196   : > { %3151 = vrot.lane.b32.xlu0 %v3132_v52, %s9075_s21  ;;  %3157 = vrot.lane.b32.xlu1 %v3135_v39, %s9075_s21  ;;  %v3487_v39 = vld [vmem:[%s9224_s24 + $0x8] sm:$0x77] }
 0x197   : > { %v1105_v2 = vpop.f32.mrf.mxu0  ;;  %v1118_v11 = vpop.f32.mrf.mxu1  ;;  %3498 = vst [vmem:[#allocation1 + $0x10] ss:$2 sm:$0xff] %v3487_v39 }
 0x198   : > { %v2376_v40 = vpop.permute.xlu0 %2375  ;;  %v3327_v2 = vpack.c.bf16 %v3311_v45, %v3311_v45 }
 0x19a   : > { %v2378_v34 = vpop.permute.xlu2 %2377  ;;  %v2565_v56 = vpop.permute.xlu1 %2564 }
 0x19b   : > { %v1131_v20 = vpop.f32.mrf.mxu2  ;;  %v1144_v16 = vpop.f32.mrf.mxu3  ;;  %v2387_v48 = vsel %vm2381_vm12, %v2376_v40, %v2378_v34 }
 0x19c   : > { %v2408_v38 = vand.u32 %v2387_v48, %v9304_v50  ;;  %v3312_v17 = vld.sshfl [vmem:[#allocation1 + $0x20] sm:$0xff pattern:$0x75316420] }
 0x19d   : > { %v3328_v16 = vpack.c.bf16 %v3312_v17, %v3312_v17 }
 0x19e   : > { %3344 = vrot.lane.b32.xlu0 %v3326_v28, %s9076_s22  ;;  %3159 = vrot.lane.b32.xlu1 %v3136_v32, %s9075_s21 }
 0x19f   : > { %v1252_v30 = vpop.f32.mrf.mxu0  ;;  %v1265_v31 = vpop.f32.mrf.mxu1 }
 0x1a0   : > { %v9828_v22 = vadd.f32 %v1252_v30, %v9745_v59  ;;  %v9831_v27 = vadd.f32 %v1265_v31, %v9759_v29  ;;  %8222 = vmatmul.msk.bf16.vlgmr.msrb.gmra.mxu2 %vm542_vm3, %v9777_v46  ;;  %8224 = vmatmul.msk.bf16.vlgmr.msrb.gmra.mxu3 %vm542_vm3, %v9820_v24  ;;  %v2563_v52 = vpop.permute.xlu0 %2562 }
 0x1a1   : > { %2420 = vmatpush.bf16.msrb.mxu2 %v2393_v18  ;;  %2433 = vmatpush.bf16.msrb.mxu3 %v2396_v25  ;;  %v2578_v25 = vsel %vm2576_vm13, %v2563_v52, %v2565_v56 }
 0x1a2   : > { %8220 = vmatmul.msk.bf16.vlgmr.msrb.gmra.mxu0 %vm542_vm3, %v9777_v46  ;;  %8221 = vmatmul.msk.bf16.vlgmr.msrb.gmra.mxu1 %vm542_vm3, %v9777_v46  ;;  %v3129_v46 = vpack.c.bf16 %v3113_v41, %v3113_v41  ;;  %v2380_v18 = vpop.permute.xlu2 %2379  ;;  %v2591_v36 = vand.u32 %v2578_v25, %v9304_v50 }
 0x1a3   : > { %v1278_v59 = vpop.f32.mrf.mxu2  ;;  %v1291_v29 = vpop.f32.mrf.mxu3  ;;  %2290 = vmatpush.bf16.msrb.mxu0 %v2213_v33  ;;  %2303 = vmatpush.bf16.msrb.mxu1 %v2216_v37  ;;  %v2388_v30 = vsel %vm2381_vm12, %v2378_v34, %v2380_v18  ;;  %v3291_v33 = vld [vmem:[%s9224_s24] sm:$0x77]  ;;  %v3313_v37 = vld.sshfl [vmem:[#allocation1 + $0x28] sm:$0xff pattern:$0x75316420] }
 0x1a4   : > { %v9843_v13 = vadd.f32 %v1278_v59, %v9762_v7  ;;  %v9846_v15 = vadd.f32 %v1291_v29, %v9785_v57  ;;  %3145 = vrot.lane.b32.xlu2 %v3129_v46, %s9075_s21  ;;  %v2386_v7 = vsel %vm2381_vm12, %v2374_v3, %v2376_v40  ;;  %3301 = vst [vmem:[#allocation1] ss:$2 sm:$0xff] %v3291_v33  ;;  %v3314_v33 = vld.sshfl [vmem:[#allocation1 + $0x30] sm:$0xff pattern:$0x75316420]  ;;  %vm3941_vm12 = vcmask 236544  }
 0x1a5   : > { %v2405_v57 = vand.u32 %v2386_v7, %v9304_v50  ;;  %v2411_v6 = vand.u32 %v2388_v30, %v9304_v50  ;;  %v3330_v39 = vpack.c.bf16 %v3314_v33, %v3314_v33 }
 0x1a6   : > { %3346 = vrot.lane.b32.xlu0 %v3327_v2, %s9076_s22  ;;  %v3486_v2 = vld [vmem:[%s9224_s24] sm:$0x77] }
 0x1a7   : > { %v1254_v42 = vpop.f32.mrf.mxu0  ;;  %v1267_v44 = vpop.f32.mrf.mxu1 }
 0x1a8   : > { %v9885_v62 = vpop.permute.xlu1 %2566  ;;  %v3329_v44 = vpack.c.bf16 %v3313_v37, %v3313_v37 }
 0x1a9   : > { %v2579_v26 = vsel %vm2576_vm13, %v2565_v56, %v9885_v62 }
 0x1aa   : > { %3350 = vrot.lane.b32.xlu1 %v3329_v44, %s9076_s22 }
 0x1ab   : > { %v1280_v21 = vpop.f32.mrf.mxu2  ;;  %v1293_v53 = vpop.f32.mrf.mxu3  ;;  %v3309_v34 = vld.sshfl [vmem:[#allocation1 + $0x8] sm:$0xff pattern:$0x75316420]  ;;  %v3308_v45 = vld.sshfl [vmem:[#allocation1] sm:$0xff pattern:$0x75316420] }
 0x1ac   : > { %2964 = vrot.lane.b32.xlu2 %v2941_v5, %s9074_s23  ;;  %v3325_v7 = vpack.c.bf16 %v3309_v34, %v3309_v34  ;;  %v3506_v21 = vld.sshfl [vmem:[#allocation1 + $0x18] sm:$0xff pattern:$0x75316420]  ;;  %v3488_v53 = vld [vmem:[%s9224_s24 + $0x10] sm:$0x77]  ;;  %s9091_s23 = smov 85  }
 0x1ad   : > { %v3522_v54 = vpack.c.bf16 %v3506_v21, %v3506_v21  ;;  %3500 = vst [vmem:[#allocation1 + $0x20] ss:$2 sm:$0xff] %v3488_v53 }
 0x1ae   : > { %3348 = vrot.lane.b32.xlu0 %v3328_v16, %s9076_s22  ;;  %3496 = vst [vmem:[#allocation1] ss:$2 sm:$0xff] %v3486_v2 }
 0x1af   : > { %v1304_v63 = vpop.f32.mrf.mxu0  ;;  %v1317_v0 = vpop.f32.mrf.mxu1 }
 0x1b0   : > { %v9862_v11 = vadd.f32 %v1304_v63, %v9788_v58  ;;  %v9865_v4 = vadd.f32 %v1317_v0, %v9801_v60  ;;  %8227 = vmatmul.msk.bf16.vlgmr.msra.gmra.mxu2 %vm542_vm3, %v9820_v24  ;;  %8228 = vmatmul.msk.bf16.vlgmr.msra.gmra.mxu3 %vm542_vm3, %v9820_v24  ;;  %v2569_v47 = vpop.permute.xlu1 %2568 }
 0x1b1   : > { %2472 = vmatpush.bf16.msra.mxu2 %v2405_v57  ;;  %2485 = vmatpush.bf16.msra.mxu3 %v2408_v38  ;;  %v2580_v49 = vsel %vm2576_vm13, %v9885_v62, %v2569_v47 }
 0x1b2   : > { %8225 = vmatmul.msk.bf16.vlgmr.msra.gmra.mxu0 %vm542_vm3, %v9820_v24  ;;  %8226 = vmatmul.msk.bf16.vlgmr.msra.gmra.mxu1 %vm542_vm3, %v9820_v24  ;;  %v2597_v17 = vand.u32 %v2580_v49, %v9304_v50 }
 0x1b3   : > { %v1330_v58 = vpop.f32.mrf.mxu2  ;;  %v1447_v60 = vpop.f32.mrf.mxu3  ;;  %2446 = vmatpush.bf16.msra.mxu0 %v2399_v1  ;;  %2459 = vmatpush.bf16.msra.mxu1 %v2402_v61  ;;  %v3324_v1 = vpack.c.bf16 %v3308_v45, %v3308_v45 }
 0x1b4   : > { %v9878_v51 = vadd.f32 %v1330_v58, %v9804_v12  ;;  %v9881_v8 = vadd.f32 %v1447_v60, %v9828_v22  ;;  %v2561_v12 = vpop.permute.xlu0 %2560  ;;  %3155 = vrot.lane.b32.xlu2 %v3134_v23, %s9075_s21  ;;  %v2594_v22 = vand.u32 %v2579_v26, %v9304_v50  ;;  %s9077_s21 = smov 31  }
 0x1b5   : > { %v2577_v31 = vsel %vm2576_vm13, %v2561_v12, %v2563_v52  ;;  %v3507_v52 = vld.sshfl [vmem:[#allocation1 + $0x20] sm:$0xff pattern:$0x75316420] }
 0x1b6   : > { %v2588_v40 = vand.u32 %v2577_v31, %v9304_v50  ;;  %3541 = vrot.lane.b32.xlu0 %v3522_v54, %s9077_s21  ;;  %v3503_v26 = vld.sshfl [vmem:[#allocation1] sm:$0xff pattern:$0x75316420]  ;;  %v3508_v31 = vld.sshfl [vmem:[#allocation1 + $0x28] sm:$0xff pattern:$0x75316420] }
 0x1b7   : > { %v1306_v19 = vpop.f32.mrf.mxu0  ;;  %v1319_v20 = vpop.f32.mrf.mxu1  ;;  %v3519_v30 = vpack.c.bf16 %v3503_v26, %v3503_v26  ;;  %v3524_v37 = vpack.c.bf16 %v3508_v31, %v3508_v31 }
 0x1b8   : > { %v2762_v0 = vpop.permute.xlu1 %2761  ;;  %v3523_v20 = vpack.c.bf16 %v3507_v52, %v3507_v52 }
 0x1bb   : > { %v1332_v3 = vpop.f32.mrf.mxu2  ;;  %v1449_v9 = vpop.f32.mrf.mxu3 }
 0x1bc   : > { %v2573_v48 = vpop.permute.xlu0 %2572  ;;  %3342 = vrot.lane.b32.xlu2 %v3325_v7, %s9076_s22 }
 0x1be   : > { %3543 = vrot.lane.b32.xlu0 %v3523_v20, %s9077_s21 }
 0x1bf   : > { %v1460_v59 = vpop.f32.mrf.mxu0  ;;  %v1473_v29 = vpop.f32.mrf.mxu1 }
 0x1c0   : > { %v9907_v41 = vadd.f32 %v1460_v59, %v9831_v27  ;;  %v9910_v42 = vadd.f32 %v1473_v29, %v9843_v13  ;;  %8232 = vmatmul.msk.bf16.vlgmr.msrb.gmra.mxu2 %vm542_vm3, %v9898_v35  ;;  %8233 = vmatmul.msk.bf16.vlgmr.msrb.gmra.mxu3 %vm542_vm3, %v9898_v35  ;;  %v2571_v32 = vpop.permute.xlu2 %2570  ;;  %v9963_v9 = vpop.permute.xlu1 %2763  ;;  %v3489_v59 = vld [vmem:[%s9224_s24 + $0x18] sm:$0x77] }
 0x1c1   : > { %2628 = vmatpush.bf16.msrb.mxu2 %v2591_v36  ;;  %2641 = vmatpush.bf16.msrb.mxu3 %v2594_v22  ;;  %v2582_v56 = vsel %vm2576_vm13, %v2571_v32, %v2573_v48  ;;  %v2581_v63 = vsel %vm2576_vm13, %v2569_v47, %v2571_v32  ;;  %v2775_v29 = vsel %vm2771_vm14, %v2762_v0, %v9963_v9  ;;  %v3505_v47 = vld.sshfl [vmem:[#allocation1 + $0x10] sm:$0xff pattern:$0x75316420]  ;;  %v3682_v32 = vld [vmem:[%s9224_s24 + $0x8] sm:$0x77] }
 0x1c2   : > { %8229 = vmatmul.msk.bf16.vlgmr.msrb.gmra.mxu0 %vm542_vm3, %v9820_v24  ;;  %8230 = vmatmul.msk.bf16.vlgmr.msrb.gmra.mxu1 %vm542_vm3, %v9820_v24  ;;  %v2603_v61 = vand.u32 %v2582_v56, %v9304_v50  ;;  %v2600_v19 = vand.u32 %v2581_v63, %v9304_v50  ;;  %v3521_v53 = vpack.c.bf16 %v3505_v47, %v3505_v47  ;;  %v3504_v56 = vld.sshfl [vmem:[#allocation1 + $0x8] sm:$0xff pattern:$0x75316420] }
 0x1c3   : > { %v1486_v27 = vpop.f32.mrf.mxu2  ;;  %v1499_v13 = vpop.f32.mrf.mxu3  ;;  %2498 = vmatpush.bf16.msrb.mxu0 %v2411_v6  ;;  %2615 = vmatpush.bf16.msrb.mxu1 %v2588_v40  ;;  %3693 = vst [vmem:[#allocation1 + $0x10] ss:$2 sm:$0xff] %v3682_v32 }
 0x1c4   : > { %v9921_v28 = vadd.f32 %v1486_v27, %v9846_v15  ;;  %v9924_v46 = vadd.f32 %v1499_v13, %v9862_v11  ;;  %v3315_v15 = vld.sshfl [vmem:[#allocation1 + $0x38] sm:$0xff pattern:$0x75316420]  ;;  %3340 = vrot.lane.b32.xlu2 %v3324_v1, %s9076_s22  ;;  %v2792_v27 = vand.u32 %v2775_v29, %v9304_v50  ;;  %v3683_v1 = vld [vmem:[%s9224_s24 + $0x10] sm:$0x77] }
 0x1c5   : > { %v3331_v55 = vpack.c.bf16 %v3315_v15, %v3315_v15  ;;  %3502 = vst [vmem:[#allocation1 + $0x30] ss:$2 sm:$0xff] %v3489_v59 }
 0x1c6   : > { %3545 = vrot.lane.b32.xlu0 %v3524_v37, %s9077_s21  ;;  %3695 = vst [vmem:[#allocation1 + $0x20] ss:$2 sm:$0xff] %v3683_v1  ;;  %v3684_v37 = vld [vmem:[%s9224_s24 + $0x18] sm:$0x77] }
 0x1c7   : > { %v1462_v24 = vpop.f32.mrf.mxu0  ;;  %v1475_v10 = vpop.f32.mrf.mxu1  ;;  %3354 = vrot.lane.b32.xlu1 %v3331_v55, %s9076_s22 }
 0x1c8   : > { %v2760_v11 = vpop.permute.xlu0 %2759  ;;  %v2575_v5 = vpop.permute.xlu2 %2574 }
 0x1c9   : > { %v2583_v62 = vsel %vm2576_vm13, %v2573_v48, %v2575_v5  ;;  %v2766_v63 = vpop.permute.xlu1 %2765  ;;  %v3520_v5 = vpack.c.bf16 %v3504_v56, %v3504_v56  ;;  %vm4136_vm13 = vcmask 228352  }
 0x1ca   : > { %v2606_v18 = vand.u32 %v2583_v62, %v9304_v50  ;;  %v2776_v62 = vsel %vm2771_vm14, %v9963_v9, %v2766_v63 }
 0x1cb   : > { %v1488_v57 = vpop.f32.mrf.mxu2  ;;  %v1501_v38 = vpop.f32.mrf.mxu3  ;;  %v2795_v31 = vand.u32 %v2776_v62, %v9304_v50 }
 0x1cc   : > { %3352 = vrot.lane.b32.xlu2 %v3330_v39, %s9076_s22  ;;  %v3509_v24 = vld.sshfl [vmem:[#allocation1 + $0x30] sm:$0xff pattern:$0x75316420]  ;;  %v3681_v38 = vld [vmem:[%s9224_s24] sm:$0x77]  ;;  %s9078_s22 = smov 30  }
 0x1cd   : > { %v3525_v57 = vpack.c.bf16 %v3509_v24, %v3509_v24  ;;  %3691 = vst [vmem:[#allocation1] ss:$2 sm:$0xff] %v3681_v38  ;;  %v3510_v26 = vld.sshfl [vmem:[#allocation1 + $0x38] sm:$0xff pattern:$0x75316420] }
 0x1ce   : > { %3697 = vst [vmem:[#allocation1 + $0x30] ss:$2 sm:$0xff] %v3684_v37  ;;  %v3526_v29 = vpack.c.bf16 %v3510_v26, %v3510_v26 }
 0x1cf   : > { %v1512_v58 = vpop.f32.mrf.mxu0  ;;  %v1525_v60 = vpop.f32.mrf.mxu1  ;;  %3535 = vrot.lane.b32.xlu1 %v3519_v30, %s9077_s21 }
 0x1d0   : > { %v9942_v16 = vadd.f32 %v1512_v58, %v9865_v4  ;;  %v9945_v23 = vadd.f32 %v1525_v60, %v9878_v51  ;;  %8236 = vmatmul.msk.bf16.vlgmr.msra.gmra.mxu2 %vm542_vm3, %v9898_v35  ;;  %8237 = vmatmul.msk.bf16.vlgmr.msra.gmra.mxu3 %vm542_vm3, %v9898_v35  ;;  %v2758_v3 = vpop.permute.xlu0 %2757  ;;  %v2756_v13 = vpop.permute.xlu2 %2755 }
 0x1d1   : > { %2680 = vmatpush.bf16.msra.mxu2 %v2603_v61  ;;  %2693 = vmatpush.bf16.msra.mxu3 %v2606_v18  ;;  %v2773_v14 = vsel %vm2771_vm14, %v2758_v3, %v2760_v11  ;;  %v2772_v21 = vsel %vm2771_vm14, %v2756_v13, %v2758_v3 }
 0x1d2   : > { %8234 = vmatmul.msk.bf16.vlgmr.msra.gmra.mxu0 %vm542_vm3, %v9898_v35  ;;  %8235 = vmatmul.msk.bf16.vlgmr.msra.gmra.mxu1 %vm542_vm3, %v9898_v35  ;;  %v2786_v48 = vand.u32 %v2773_v14, %v9304_v50  ;;  %v2783_v15 = vand.u32 %v2772_v21, %v9304_v50 }
 0x1d3   : > { %v1642_v4 = vpop.f32.mrf.mxu2  ;;  %v1655_v51 = vpop.f32.mrf.mxu3  ;;  %2654 = vmatpush.bf16.msra.mxu0 %v2597_v17  ;;  %2667 = vmatpush.bf16.msra.mxu1 %v2600_v19 }
 0x1d4   : > { %v9958_v12 = vadd.f32 %v1642_v4, %v9881_v8  ;;  %v9961_v25 = vadd.f32 %v1655_v51, %v9907_v41  ;;  %v2774_v8 = vsel %vm2771_vm14, %v2760_v11, %v2762_v0  ;;  %v9976_v41 = vld [vmem:[%s12152_s1 + $0x2c] sm:$0x7]  ;;  %3539 = vrot.lane.b32.xlu2 %v3521_v53, %s9077_s21  ;;  %v3701_v0 = vld.sshfl [vmem:[#allocation1 + $0x18] sm:$0xff pattern:$0x75316420] }
 0x1d5   : > { %v2789_v44 = vand.u32 %v2774_v8, %v9304_v50  ;;  %v3717_v11 = vpack.c.bf16 %v3701_v0, %v3701_v0  ;;  %v3703_v51 = vld.sshfl [vmem:[#allocation1 + $0x28] sm:$0xff pattern:$0x75316420] }
 0x1d6   : > { %v3699_v13 = vld.sshfl [vmem:[#allocation1 + $0x8] sm:$0xff pattern:$0x75316420] }
 0x1d7   : > { %v1514_v36 = vpop.f32.mrf.mxu0  ;;  %v1527_v22 = vpop.f32.mrf.mxu1  ;;  %3547 = vrot.lane.b32.xlu1 %v3525_v57, %s9077_s21  ;;  %3736 = vrot.lane.b32.xlu0 %v3717_v11, %s9078_s22  ;;  %v10054_v57 = vld [vmem:[%s12152_s1 + $0x30] sm:$0x7] }
 0x1d8   : > { %v2770_v55 = vpop.permute.xlu0 %2769  ;;  %v3719_v36 = vpack.c.bf16 %v3703_v51, %v3703_v51  ;;  %v3702_v22 = vld.sshfl [vmem:[#allocation1 + $0x20] sm:$0xff pattern:$0x75316420]  ;;  %v3878_v11 = vld [vmem:[%s9224_s24 + $0x10] sm:$0x77] }
 0x1d9   : > { %3890 = vst [vmem:[#allocation1 + $0x20] ss:$2 sm:$0xff] %v3878_v11 }
 0x1db   : > { %v1644_v6 = vpop.f32.mrf.mxu2  ;;  %v1657_v40 = vpop.f32.mrf.mxu3 }
 0x1dc   : > { %3537 = vrot.lane.b32.xlu2 %v3520_v5, %s9077_s21 }
 0x1df   : > { %v1668_v34 = vpop.f32.mrf.mxu0  ;;  %v1681_v7 = vpop.f32.mrf.mxu1  ;;  %3740 = vrot.lane.b32.xlu0 %v3719_v36, %s9078_s22  ;;  %v10095_v36 = vld [vmem:[%s12152_s1 + $0x34] sm:$0x7] }
 0x1e0   : > { %v9984_v10 = vadd.f32 %v1668_v34, %v9910_v42  ;;  %v9987_v54 = vadd.f32 %v1681_v7, %v9921_v28  ;;  %8241 = vmatmul.msk.bf16.vlgmr.msrb.gmra.mxu2 %vm542_vm3, %v9976_v41  ;;  %8242 = vmatmul.msk.bf16.vlgmr.msrb.gmra.mxu3 %vm542_vm3, %v9976_v41  ;;  %v2953_v52 = vpop.permute.xlu0 %2952  ;;  %v3704_v34 = vld.sshfl [vmem:[#allocation1 + $0x30] sm:$0xff pattern:$0x75316420]  ;;  %v3897_v51 = vld.sshfl [vmem:[#allocation1 + $0x20] sm:$0xff pattern:$0x75316420] }
 0x1e1   : > { %2836 = vmatpush.bf16.msrb.mxu2 %v2789_v44  ;;  %2849 = vmatpush.bf16.msrb.mxu3 %v2792_v27  ;;  %v2957_v4 = vpop.permute.xlu1 %2956  ;;  %v3720_v7 = vpack.c.bf16 %v3704_v34, %v3704_v34 }
 0x1e2   : > { %8238 = vmatmul.msk.bf16.vlgmr.msrb.gmra.mxu0 %vm542_vm3, %v9898_v35  ;;  %8240 = vmatmul.msk.bf16.vlgmr.msrb.gmra.mxu1 %vm542_vm3, %v9976_v41  ;;  %v2768_v35 = vpop.permute.xlu2 %2767 }
 0x1e3   : > { %v1694_v42 = vpop.f32.mrf.mxu2  ;;  %v1707_v28 = vpop.f32.mrf.mxu3  ;;  %2823 = vmatpush.bf16.msrb.mxu1 %v2786_v48  ;;  %2810 = vmatpush.bf16.msrb.mxu0 %v2783_v15  ;;  %v2778_v58 = vsel %vm2771_vm14, %v2768_v35, %v2770_v55  ;;  %v2777_v20 = vsel %vm2771_vm14, %v2766_v63, %v2768_v35  ;;  %v3715_v48 = vpack.c.bf16 %v3699_v13, %v3699_v13  ;;  %v3898_v13 = vld.sshfl [vmem:[#allocation1 + $0x28] sm:$0xff pattern:$0x75316420]  ;;  %vm5513_vm14 = vcmask 1042432  }
 0x1e4   : > { %v10000_v45 = vadd.f32 %v1694_v42, %v9924_v46  ;;  %v10003_v49 = vadd.f32 %v1707_v28, %v9942_v16  ;;  %v3698_v46 = vld.sshfl [vmem:[#allocation1] sm:$0xff pattern:$0x75316420]  ;;  %v2801_v16 = vand.u32 %v2778_v58, %v9304_v50  ;;  %v2798_v9 = vand.u32 %v2777_v20, %v9304_v50  ;;  %3549 = vrot.lane.b32.xlu2 %v3526_v29, %s9077_s21  ;;  %v3700_v28 = vld.sshfl [vmem:[#allocation1 + $0x10] sm:$0xff pattern:$0x75316420] }
 0x1e5   : > { %v3714_v60 = vpack.c.bf16 %v3698_v46, %v3698_v46  ;;  %v3705_v20 = vld.sshfl [vmem:[#allocation1 + $0x38] sm:$0xff pattern:$0x75316420]  ;;  %s9090_s21 = smov 97  }
 0x1e6   : > { %v3721_v26 = vpack.c.bf16 %v3705_v20, %v3705_v20 }
 0x1e7   : > { %v1670_v61 = vpop.f32.mrf.mxu0  ;;  %v1683_v2 = vpop.f32.mrf.mxu1  ;;  %3730 = vrot.lane.b32.xlu1 %v3714_v60, %s9078_s22  ;;  %3742 = vrot.lane.b32.xlu0 %v3720_v7, %s9078_s22 }
 0x1e8   : > { %v2955_v44 = vpop.permute.xlu0 %2954  ;;  %v3716_v2 = vpack.c.bf16 %v3700_v28, %v3700_v28 }
 0x1e9   : > { %v2968_v15 = vsel %vm2966_vm15, %v2953_v52, %v2955_v44  ;;  %v2969_v55 = vsel %vm2966_vm15, %v2955_v44, %v2957_v4 }
 0x1ea   : > { %v2951_v18 = vpop.permute.xlu2 %2950  ;;  %v2981_v1 = vand.u32 %v2968_v15, %v9304_v50  ;;  %v2984_v61 = vand.u32 %v2969_v55, %v9304_v50 }
 0x1eb   : > { %v1696_v17 = vpop.f32.mrf.mxu2  ;;  %v1709_v19 = vpop.f32.mrf.mxu3  ;;  %v2967_v33 = vsel %vm2966_vm15, %v2951_v18, %v2953_v52 }
 0x1ec   : > { %v2978_v8 = vand.u32 %v2967_v33, %v9304_v50  ;;  %3732 = vrot.lane.b32.xlu2 %v3715_v48, %s9078_s22 }
 0x1ef   : > { %v1720_v3 = vpop.f32.mrf.mxu0  ;;  %v1837_v30 = vpop.f32.mrf.mxu1 }
 0x1f0   : > { %v10021_v39 = vadd.f32 %v1720_v3, %v9945_v23  ;;  %v10024_v59 = vadd.f32 %v1837_v30, %v9958_v12  ;;  %8245 = vmatmul.msk.bf16.vlgmr.msra.gmra.mxu2 %vm542_vm3, %v9976_v41  ;;  %8246 = vmatmul.msk.bf16.vlgmr.msra.gmra.mxu3 %vm542_vm3, %v9976_v41  ;;  %v3718_v23 = vpack.c.bf16 %v3702_v22, %v3702_v22 }
 0x1f1   : > { %2888 = vmatpush.bf16.msra.mxu2 %v2801_v16  ;;  %3005 = vmatpush.bf16.msra.mxu3 %v2978_v8  ;;  %v3879_v16 = vld [vmem:[%s9224_s24 + $0x18] sm:$0x77] }
 0x1f2   : > { %8243 = vmatmul.msk.bf16.vlgmr.msra.gmra.mxu0 %vm542_vm3, %v9976_v41  ;;  %8244 = vmatmul.msk.bf16.vlgmr.msra.gmra.mxu1 %vm542_vm3, %v9976_v41  ;;  %v2959_v27 = vpop.permute.xlu2 %2958  ;;  %v3876_v41 = vld [vmem:[%s9224_s24] sm:$0x77]  ;;  %3892 = vst [vmem:[#allocation1 + $0x30] ss:$2 sm:$0xff] %v3879_v16 }
 0x1f3   : > { %v1850_v12 = vpop.f32.mrf.mxu2  ;;  %v1863_v6 = vpop.f32.mrf.mxu3  ;;  %2862 = vmatpush.bf16.msra.mxu0 %v2795_v31  ;;  %2875 = vmatpush.bf16.msra.mxu1 %v2798_v9  ;;  %3886 = vst [vmem:[#allocation1] ss:$2 sm:$0xff] %v3876_v41  ;;  %v2970_v21 = vsel %vm2966_vm15, %v2957_v4, %v2959_v27  ;;  %v3877_v41 = vld [vmem:[%s9224_s24 + $0x8] sm:$0x77] }
 0x1f4   : > { %v10037_v40 = vadd.f32 %v1850_v12, %v9961_v25  ;;  %v10040_v14 = vadd.f32 %v1863_v6, %v9984_v10  ;;  %3738 = vrot.lane.b32.xlu1 %v3718_v23, %s9078_s22  ;;  %v2961_v25 = vpop.permute.xlu1 %2960  ;;  %v2987_v38 = vand.u32 %v2970_v21, %v9304_v50  ;;  %3734 = vrot.lane.b32.xlu2 %v3716_v2, %s9078_s22 }
 0x1f5   : > { %v2971_v53 = vsel %vm2966_vm15, %v2959_v27, %v2961_v25  ;;  %3888 = vst [vmem:[#allocation1 + $0x10] ss:$2 sm:$0xff] %v3877_v41 }
 0x1f6   : > { %v3148_v56 = vpop.permute.xlu0 %3147  ;;  %v2990_v42 = vand.u32 %v2971_v53, %v9304_v50 }
 0x1f7   : > { %v1722_v47 = vpop.f32.mrf.mxu0  ;;  %v1839_v32 = vpop.f32.mrf.mxu1 }
 0x1f9   : > { %v3899_v29 = vld.sshfl [vmem:[#allocation1 + $0x30] sm:$0xff pattern:$0x75316420]  ;;  %v3900_v55 = vld.sshfl [vmem:[#allocation1 + $0x38] sm:$0xff pattern:$0x75316420] }
 0x1fa   : > { %v3893_v63 = vld.sshfl [vmem:[#allocation1] sm:$0xff pattern:$0x75316420]  ;;  %v3894_v23 = vld.sshfl [vmem:[#allocation1 + $0x8] sm:$0xff pattern:$0x75316420]  ;;  %v3915_v34 = vpack.c.bf16 %v3899_v29, %v3899_v29 }
 0x1fb   : > { %v1852_v24 = vpop.f32.mrf.mxu2  ;;  %v1865_v10 = vpop.f32.mrf.mxu3  ;;  %v3909_v52 = vpack.c.bf16 %v3893_v63, %v3893_v63  ;;  %v3910_v48 = vpack.c.bf16 %v3894_v23, %v3894_v23 }
 0x1fc   : > { %v2963_v19 = vpop.permute.xlu1 %2962  ;;  %v4071_v10 = vld [vmem:[%s9224_s24] sm:$0x77] }
 0x1fd   : > { %3925 = vrot.lane.b32.xlu1 %v3909_v52, %s9079_s20  ;;  %v2972_v33 = vsel %vm2966_vm15, %v2961_v25, %v2963_v19  ;;  %3927 = vrot.lane.b32.xlu2 %v3910_v48, %s9079_s20  ;;  %4081 = vst [vmem:[#allocation1] ss:$2 sm:$0xff] %v4071_v10 }
 0x1fe   : > { %v3146_v17 = vpop.permute.xlu2 %3145  ;;  %v10083_v62 = vpop.permute.xlu0 %3149  ;;  %v2993_v44 = vand.u32 %v2972_v33, %v9304_v50 }
 0x1ff   : > { %v1876_v35 = vpop.f32.mrf.mxu0  ;;  %v1889_v0 = vpop.f32.mrf.mxu1  ;;  %v3163_v3 = vsel %vm3161_vm8, %v3148_v56, %v10083_v62  ;;  %v3162_v30 = vsel %vm3161_vm8, %v3146_v17, %v3148_v56  ;;  %v3896_v17 = vld.sshfl [vmem:[#allocation1 + $0x18] sm:$0xff pattern:$0x75316420] }
 0x200   : > { %v10062_v5 = vadd.f32 %v1876_v35, %v9987_v54  ;;  %v10065_v46 = vadd.f32 %v1889_v0, %v10000_v45  ;;  %8250 = vmatmul.msk.bf16.vlgmr.msrb.gmra.mxu2 %vm542_vm3, %v10054_v57  ;;  %8251 = vmatmul.msk.bf16.vlgmr.msrb.gmra.mxu3 %vm542_vm3, %v10054_v57  ;;  %v3176_v22 = vand.u32 %v3163_v3, %v9304_v50 }
 0x201   : > { %3044 = vmatpush.bf16.msrb.mxu2 %v2987_v38  ;;  %3057 = vmatpush.bf16.msrb.mxu3 %v2990_v42  ;;  %v3173_v37 = vand.u32 %v3162_v30, %v9304_v50  ;;  %v3895_v38 = vld.sshfl [vmem:[#allocation1 + $0x10] sm:$0xff pattern:$0x75316420]  ;;  %v3916_v42 = vpack.c.bf16 %v3900_v55, %v3900_v55 }
 0x202   : > { %8248 = vmatmul.msk.bf16.vlgmr.msrb.gmra.mxu0 %vm542_vm3, %v10054_v57  ;;  %8249 = vmatmul.msk.bf16.vlgmr.msrb.gmra.mxu1 %vm542_vm3, %v10054_v57 }
 0x203   : > { %v1902_v54 = vpop.f32.mrf.mxu2  ;;  %v1915_v45 = vpop.f32.mrf.mxu3  ;;  %3018 = vmatpush.bf16.msrb.mxu0 %v2981_v1  ;;  %3031 = vmatpush.bf16.msrb.mxu1 %v2984_v61 }
 0x204   : > { %v10076_v58 = vadd.f32 %v1902_v54, %v10003_v49  ;;  %v10079_v60 = vadd.f32 %v1915_v45, %v10021_v39  ;;  %v3913_v49 = vpack.c.bf16 %v3897_v51, %v3897_v51  ;;  %v3154_v8 = vpop.permute.xlu1 %3153  ;;  %v3912_v51 = vpack.c.bf16 %v3896_v17, %v3896_v17  ;;  %v4088_v30 = vld.sshfl [vmem:[#allocation1] sm:$0xff pattern:$0x75316420] }
 0x205   : > { %3744 = vrot.lane.b32.xlu1 %v3721_v26, %s9078_s22  ;;  %s9080_s22 = smov 28  }
 0x206   : > { %3933 = vrot.lane.b32.xlu0 %v3913_v49, %s9079_s20  ;;  %v2965_v39 = vpop.permute.xlu2 %2964 }
 0x207   : > { %v1878_v18 = vpop.f32.mrf.mxu0  ;;  %v1891_v4 = vpop.f32.mrf.mxu1  ;;  %v2973_v27 = vsel %vm2966_vm15, %v2963_v19, %v2965_v39  ;;  %v4074_v39 = vld [vmem:[%s9224_s24 + $0x18] sm:$0x77]  ;;  %vm5509_vm15 = vcmask 744448  }
 0x208   : > { %v2996_v7 = vand.u32 %v2973_v27, %v9304_v50  ;;  %v3152_v24 = vpop.permute.xlu0 %3151  ;;  %4087 = vst [vmem:[#allocation1 + $0x30] ss:$2 sm:$0xff] %v4074_v39 }
 0x209   : > { %v3164_v61 = vsel %vm3161_vm8, %v10083_v62, %v3152_v24  ;;  %v3165_v2 = vsel %vm3161_vm8, %v3152_v24, %v3154_v8 }
 0x20a   : > { %v3179_v16 = vand.u32 %v3164_v61, %v9304_v50  ;;  %v3182_v62 = vand.u32 %v3165_v2, %v9304_v50 }
 0x20b   : > { %v1904_v31 = vpop.f32.mrf.mxu2  ;;  %v1917_v9 = vpop.f32.mrf.mxu3 }
 0x20c   : > { %v3158_v28 = vpop.permute.xlu1 %3157  ;;  %v4266_v31 = vld [vmem:[%s9224_s24 + $0x4] sm:$0x77]  ;;  %v4104_v9 = vpack.c.bf16 %v4088_v30, %v4088_v30 }
 0x20e   : > { %3937 = vrot.lane.b32.xlu0 %v3915_v34, %s9079_s20  ;;  %v3156_v15 = vpop.permute.xlu2 %3155 }
 0x20f   : > { %v2032_v12 = vpop.f32.mrf.mxu0  ;;  %v2045_v6 = vpop.f32.mrf.mxu1  ;;  %v3166_v63 = vsel %vm3161_vm8, %v3154_v8, %v3156_v15  ;;  %v3167_v35 = vsel %vm3161_vm8, %v3156_v15, %v3158_v28 }
 0x210   : > { %v10103_v47 = vadd.f32 %v2032_v12, %v10024_v59  ;;  %v10106_v32 = vadd.f32 %v2045_v6, %v10037_v40  ;;  %8254 = vmatmul.msk.bf16.vlgmr.msra.gmra.mxu2 %vm542_vm3, %v10054_v57  ;;  %8256 = vmatmul.msk.bf16.vlgmr.msra.gmra.mxu3 %vm542_vm3, %v10095_v36  ;;  %v3914_v59 = vpack.c.bf16 %v3898_v13, %v3898_v13  ;;  %v3345_v11 = vpop.permute.xlu0 %3344 }
 0x211   : > { %3200 = vmatpush.bf16.msra.mxu2 %v3173_v37  ;;  %3213 = vmatpush.bf16.msra.mxu3 %v3176_v22  ;;  %v3185_v52 = vand.u32 %v3166_v63, %v9304_v50  ;;  %v3188_v54 = vand.u32 %v3167_v35, %v9304_v50  ;;  %v4073_v22 = vld [vmem:[%s9224_s24 + $0x10] sm:$0x77]  ;;  %v4072_v37 = vld [vmem:[%s9224_s24 + $0x8] sm:$0x77] }
 0x212   : > { %8252 = vmatmul.msk.bf16.vlgmr.msra.gmra.mxu0 %vm542_vm3, %v10054_v57  ;;  %8253 = vmatmul.msk.bf16.vlgmr.msra.gmra.mxu1 %vm542_vm3, %v10054_v57  ;;  %4085 = vst [vmem:[#allocation1 + $0x20] ss:$2 sm:$0xff] %v4073_v22 }
 0x213   : > { %v2058_v40 = vpop.f32.mrf.mxu2  ;;  %v2071_v25 = vpop.f32.mrf.mxu3  ;;  %3070 = vmatpush.bf16.msra.mxu0 %v2993_v44  ;;  %3083 = vmatpush.bf16.msra.mxu1 %v2996_v7  ;;  %4083 = vst [vmem:[#allocation1 + $0x10] ss:$2 sm:$0xff] %v4072_v37 }
 0x214   : > { %v10118_v21 = vadd.f32 %v2058_v40, %v10040_v14  ;;  %v10121_v53 = vadd.f32 %v2071_v25, %v10062_v5  ;;  %3935 = vrot.lane.b32.xlu1 %v3914_v59, %s9079_s20  ;;  %v3911_v14 = vpack.c.bf16 %v3895_v38, %v3895_v38  ;;  %v4089_v5 = vld.sshfl [vmem:[#allocation1 + $0x8] sm:$0xff pattern:$0x75316420] }
 0x215   : > { %v4105_v45 = vpack.c.bf16 %v4089_v5, %v4089_v5  ;;  %4276 = vst [vmem:[#allocation1] ss:$2 sm:$0xff] %v4266_v31  ;;  %v4267_v5 = vld [vmem:[%s9224_s24 + $0xc] sm:$0x77] }
 0x216   : > { %3939 = vrot.lane.b32.xlu0 %v3916_v42, %s9079_s20  ;;  %3929 = vrot.lane.b32.xlu2 %v3911_v14, %s9079_s20  ;;  %v3343_v49 = vpop.permute.xlu2 %3342 }
 0x217   : > { %v2034_v56 = vpop.f32.mrf.mxu0  ;;  %v2047_v57 = vpop.f32.mrf.mxu1  ;;  %v3358_v12 = vsel %vm3356_vm9, %v3343_v49, %v3345_v11 }
 0x218   : > { %v10161_v33 = vpop.permute.xlu0 %3346  ;;  %v3371_v34 = vand.u32 %v3358_v12, %v9304_v50  ;;  %v4094_v57 = vld.sshfl [vmem:[#allocation1 + $0x30] sm:$0xff pattern:$0x75316420] }
 0x219   : > { %v3359_v6 = vsel %vm3356_vm9, %v3345_v11, %v10161_v33  ;;  %v4093_v48 = vld.sshfl [vmem:[#allocation1 + $0x28] sm:$0xff pattern:$0x75316420]  ;;  %v4110_v42 = vpack.c.bf16 %v4094_v57, %v4094_v57  ;;  %v4269_v11 = vld [vmem:[%s9224_s24 + $0x1c] sm:$0x7] }
 0x21a   : > { %v3374_v7 = vand.u32 %v3359_v6, %v9304_v50  ;;  %v4090_v10 = vld.sshfl [vmem:[#allocation1 + $0x10] sm:$0xff pattern:$0x75316420]  ;;  %v4109_v56 = vpack.c.bf16 %v4093_v48, %v4093_v48  ;;  %v4427_v57 = vld [vmem:[%s9224_s24 + $0xc] sm:$0x77] }
 0x21b   : > { %v2060_v0 = vpop.f32.mrf.mxu2  ;;  %v2073_v1 = vpop.f32.mrf.mxu3  ;;  %v4106_v38 = vpack.c.bf16 %v4090_v10, %v4090_v10  ;;  %v10252_v10 = vld [vmem:[%s12152_s1 + $0x3c] sm:$0x7] }
 0x21c   : > { %4122 = vrot.lane.b32.xlu1 %v4105_v45, %s9080_s22  ;;  %v4095_v0 = vld.sshfl [vmem:[#allocation1 + $0x38] sm:$0xff pattern:$0x75316420] }
 0x21d   : > { %v4091_v1 = vld.sshfl [vmem:[#allocation1 + $0x18] sm:$0xff pattern:$0x75316420]  ;;  %4282 = vst [vmem:[#allocation1 + $0x30] ss:$2 sm:$0xff] %v4269_v11 }
 0x21e   : > { %3931 = vrot.lane.b32.xlu2 %v3912_v51, %s9079_s20  ;;  %v3341_v23 = vpop.permute.xlu2 %3340  ;;  %4130 = vrot.lane.b32.xlu0 %v4109_v56, %s9080_s22  ;;  %4278 = vst [vmem:[#allocation1 + $0x10] ss:$2 sm:$0xff] %v4267_v5  ;;  %s12154_s20 = smov 124  }
 0x21f   : > { %v2084_v19 = vpop.f32.mrf.mxu0  ;;  %v2097_v20 = vpop.f32.mrf.mxu1  ;;  %v3357_v41 = vsel %vm3356_vm9, %v3341_v23, %v3343_v49  ;;  %v4092_v49 = vld.sshfl [vmem:[#allocation1 + $0x20] sm:$0xff pattern:$0x75316420] }
 0x220   : > { %v10140_v18 = vadd.f32 %v2084_v19, %v10065_v46  ;;  %v10143_v4 = vadd.f32 %v2097_v20, %v10076_v58  ;;  %8259 = vmatmul.msk.bf16.vlgmr.msrb.gmra.mxu2 %vm542_vm3, %v10095_v36  ;;  %8260 = vmatmul.msk.bf16.vlgmr.msrb.gmra.mxu3 %vm542_vm3, %v10095_v36  ;;  %v3368_v24 = vand.u32 %v3357_v41, %v9304_v50  ;;  %v3349_v63 = vpop.permute.xlu0 %3348 }
 0x221   : > { %3252 = vmatpush.bf16.msrb.mxu2 %v3185_v52  ;;  %3265 = vmatpush.bf16.msrb.mxu3 %v3188_v54  ;;  %v4107_v52 = vpack.c.bf16 %v4091_v1, %v4091_v1  ;;  %v3360_v19 = vsel %vm3356_vm9, %v10161_v33, %v3349_v63  ;;  %v4108_v37 = vpack.c.bf16 %v4092_v49, %v4092_v49 }
 0x222   : > { %8257 = vmatmul.msk.bf16.vlgmr.msrb.gmra.mxu0 %vm542_vm3, %v10095_v36  ;;  %8258 = vmatmul.msk.bf16.vlgmr.msrb.gmra.mxu1 %vm542_vm3, %v10095_v36  ;;  %v3377_v30 = vand.u32 %v3360_v19, %v9304_v50 }
 0x223   : > { %v2110_v46 = vpop.f32.mrf.mxu2  ;;  %v2227_v58 = vpop.f32.mrf.mxu3  ;;  %3226 = vmatpush.bf16.msrb.mxu0 %v3179_v16  ;;  %3239 = vmatpush.bf16.msrb.mxu1 %v3182_v62 }
 0x224   : > { %v10154_v26 = vadd.f32 %v2110_v46, %v10079_v60  ;;  %v10157_v3 = vadd.f32 %v2227_v58, %v10103_v47  ;;  %4120 = vrot.lane.b32.xlu1 %v4104_v9, %s9080_s22  ;;  %v3160_v60 = vpop.permute.xlu1 %3159  ;;  %v10175_v47 = vld [vmem:[%s12152_s1 + $0x38] sm:$0x7] }
 0x225   : > { %v3168_v13 = vsel %vm3161_vm8, %v3158_v28, %v3160_v60  ;;  %v10241_v48 = vld.sshfl [vmem:[#allocation1 + $0x10] sm:$0xff pattern:$0x75316420]  ;;  %vm5801_vm8 = vcmask 553984  }
 0x226   : > { %v3191_v25 = vand.u32 %v3168_v13, %v9304_v50  ;;  %4124 = vrot.lane.b32.xlu2 %v4106_v38, %s9080_s22  ;;  %v3353_v35 = vpop.permute.xlu2 %3352  ;;  %v4426_v38 = vld [vmem:[%s9224_s24 + $0x4] sm:$0x77] }
 0x227   : > { %v2086_v8 = vpop.f32.mrf.mxu0  ;;  %v2099_v29 = vpop.f32.mrf.mxu1 }
 0x228   : > { %v3542_v16 = vpop.permute.xlu0 %3541  ;;  %v4268_v8 = vld [vmem:[%s9224_s24 + $0x14] sm:$0x77] }
 0x229   : > { %4280 = vst [vmem:[#allocation1 + $0x20] ss:$2 sm:$0xff] %v4268_v8 }
 0x22b   : > { %v2112_v44 = vpop.f32.mrf.mxu2  ;;  %v2229_v27 = vpop.f32.mrf.mxu3 }
 0x22c   : > { %4132 = vrot.lane.b32.xlu1 %v4110_v42, %s9080_s22 }
 0x22e   : > { %4126 = vrot.lane.b32.xlu2 %v4107_v52, %s9080_s22  ;;  %v4428_v52 = vld [vmem:[%s9224_s24 + $0x14] sm:$0x77] }
 0x22f   : > { %v2240_v59 = vpop.f32.mrf.mxu0  ;;  %v2253_v40 = vpop.f32.mrf.mxu1 }
 0x230   : > { %v10182_v15 = vadd.f32 %v2240_v59, %v10106_v32  ;;  %v10185_v55 = vadd.f32 %v2253_v40, %v10118_v21  ;;  %8264 = vmatmul.msk.bf16.vlgmr.msra.gmra.mxu2 %vm542_vm3, %v10175_v47  ;;  %8265 = vmatmul.msk.bf16.vlgmr.msra.gmra.mxu3 %vm542_vm3, %v10175_v47  ;;  %v3544_v23 = vpop.permute.xlu0 %3543  ;;  %v10243_v59 = vld.sshfl [vmem:[#allocation1 + $0x18] sm:$0xff pattern:$0x75316420]  ;;  %v10281_v11 = vld.sshfl [vmem:[#allocation1 + $0x28] sm:$0xff pattern:$0x75316420] }
 0x231   : > { %3408 = vmatpush.bf16.msra.mxu2 %v3371_v34  ;;  %3421 = vmatpush.bf16.msra.mxu3 %v3374_v7  ;;  %v3555_v13 = vsel %vm3551_vm10, %v3542_v16, %v3544_v23  ;;  %4438 = vst [vmem:[#allocation1 + $0x10] ss:$2 sm:$0xff] %v4427_v57 }
 0x232   : > { %8261 = vmatmul.msk.bf16.vlgmr.msra.gmra.mxu0 %vm542_vm3, %v10095_v36  ;;  %8262 = vmatmul.msk.bf16.vlgmr.msra.gmra.mxu1 %vm542_vm3, %v10095_v36  ;;  %v3351_v36 = vpop.permute.xlu1 %3350  ;;  %v3572_v56 = vand.u32 %v3555_v13, %v9304_v50  ;;  %v4613_v13 = vld [vmem:[%s9224_s24 + $0x4] sm:$0x77] }
 0x233   : > { %v2266_v32 = vpop.f32.mrf.mxu2  ;;  %v2279_v21 = vpop.f32.mrf.mxu3  ;;  %3278 = vmatpush.bf16.msra.mxu0 %v3191_v25  ;;  %3395 = vmatpush.bf16.msra.mxu1 %v3368_v24  ;;  %v3362_v54 = vsel %vm3356_vm9, %v3351_v36, %v3353_v35  ;;  %v3361_v20 = vsel %vm3356_vm9, %v3349_v63, %v3351_v36  ;;  %v10247_v24 = vld.sshfl [vmem:[#allocation1 + $0x8] sm:$0xff pattern:$0x75316420] }
 0x234   : > { %v10196_v14 = vadd.f32 %v2266_v32, %v10121_v53  ;;  %v10199_v28 = vadd.f32 %v2279_v21, %v10140_v18  ;;  %v4111_v53 = vpack.c.bf16 %v4095_v0, %v4095_v0  ;;  %v3383_v62 = vand.u32 %v3362_v54, %v9304_v50  ;;  %v3540_v18 = vpop.permute.xlu2 %3539 }
 0x235   : > { %v3380_v31 = vand.u32 %v3361_v20, %v9304_v50  ;;  %v3554_v27 = vsel %vm3551_vm10, %v3540_v18, %v3542_v16 }
 0x236   : > { %4134 = vrot.lane.b32.xlu0 %v4111_v53, %s9080_s22  ;;  %4128 = vrot.lane.b32.xlu2 %v4108_v37, %s9080_s22  ;;  %s12157_s22 = smov 126  }
 0x237   : > { %v2242_v61 = vpop.f32.mrf.mxu0  ;;  %v2255_v2 = vpop.f32.mrf.mxu1 }
 0x238   : > { %v10279_v2 = vld.sshfl [vmem:[#allocation1 + $0x20] sm:$0xff pattern:$0x75316420]  ;;  %v3546_v5 = vpop.permute.xlu0 %3545 }
 0x239   : > { %4440 = vst [vmem:[#allocation1 + $0x20] ss:$2 sm:$0xff] %v4428_v52  ;;  %v10331_v52 = vld [vmem:[%s12152_s1 + $0x40] sm:$0x7] }
 0x23a   : > { %v3355_v51 = vpop.permute.xlu1 %3354 }
 0x23b   : > { %v2268_v45 = vpop.f32.mrf.mxu2  ;;  %v2281_v17 = vpop.f32.mrf.mxu3  ;;  %v3363_v9 = vsel %vm3356_vm9, %v3353_v35, %v3355_v51  ;;  %vm5824_vm9 = vcmask 48128  }
 0x23c   : > { %v3386_v39 = vand.u32 %v3363_v9, %v9304_v50  ;;  %v3538_v44 = vpop.permute.xlu2 %3537 }
 0x23d   : > { %v3553_v40 = vsel %vm3551_vm10, %v3538_v44, %v3540_v18  ;;  %v3556_v18 = vsel %vm3551_vm10, %v3544_v23, %v3546_v5 }
 0x23e   : > { %v3566_v21 = vand.u32 %v3553_v40, %v9304_v50  ;;  %v3575_v8 = vand.u32 %v3556_v18, %v9304_v50 }
 0x23f   : > { %v2292_v46 = vpop.f32.mrf.mxu0  ;;  %v2305_v58 = vpop.f32.mrf.mxu1 }
 0x240   : > { %v2314_v33 = vadd.f32 %v2292_v46, %v10143_v4  ;;  %v10218_v22 = vadd.f32 %v2305_v58, %v10154_v26  ;;  %8268 = vmatmul.msk.bf16.vlgmr.msrb.gmra.mxu2 %vm542_vm3, %v10175_v47  ;;  %8269 = vmatmul.msk.bf16.vlgmr.msrb.gmra.mxu3 %vm542_vm3, %v10175_v47  ;;  %v10289_v46 = vld.sshfl [vmem:[#allocation1 + $0x30] sm:$0xff pattern:$0x75316420]  ;;  %v4448_v9 = vld.sshfl [vmem:[#allocation1 + $0x28] sm:$0xff pattern:$0x75316420] }
 0x241   : > { %3460 = vmatpush.bf16.msrb.mxu2 %v3383_v62  ;;  %3473 = vmatpush.bf16.msrb.mxu3 %v3386_v39  ;;  %v4462_v23 = vpack.c.bf16 %v4448_v9, %v4448_v9 }
 0x242   : > { %8266 = vmatmul.msk.bf16.vlgmr.msrb.gmra.mxu0 %vm542_vm3, %v10175_v47  ;;  %8267 = vmatmul.msk.bf16.vlgmr.msrb.gmra.mxu1 %vm542_vm3, %v10175_v47  ;;  %v3536_v41 = vpop.permute.xlu1 %3535 }
 0x243   : > { %v2422_v4 = vpop.f32.mrf.mxu2  ;;  %v2435_v26 = vpop.f32.mrf.mxu3  ;;  %3434 = vmatpush.bf16.msrb.mxu0 %v3377_v30  ;;  %3447 = vmatpush.bf16.msrb.mxu1 %v3380_v31  ;;  %v3552_v25 = vsel %vm3551_vm10, %v3536_v41, %v3538_v44 }
 0x244   : > { %v10231_v29 = vadd.f32 %v2422_v4, %v10157_v3  ;;  %v10234_v60 = vadd.f32 %v2435_v26, %v10182_v15  ;;  %v10239_v3 = vld.sshfl [vmem:[#allocation1] sm:$0xff pattern:$0x75316420]  ;;  %v3569_v15 = vand.u32 %v3554_v27, %v9304_v50  ;;  %v3563_v63 = vand.u32 %v3552_v25, %v9304_v50 }
 0x245   : > { %4436 = vst [vmem:[#allocation1] ss:$2 sm:$0xff] %v4426_v38 }
 0x247   : > { %v2294_v12 = vpop.f32.mrf.mxu0  ;;  %v2307_v6 = vpop.f32.mrf.mxu1 }
 0x248   : > { %v4429_v12 = vld [vmem:[%s9224_s24 + $0x1c] sm:$0x7] }
 0x249   : > { %v3737_v30 = vpop.permute.xlu0 %3736  ;;  %4442 = vst [vmem:[#allocation1 + $0x30] ss:$2 sm:$0xff] %v4429_v12 }
 0x24a   : > { %v3548_v53 = vpop.permute.xlu1 %3547 }
 0x24b   : > { %v2424_v34 = vpop.f32.mrf.mxu2  ;;  %v2437_v7 = vpop.f32.mrf.mxu3  ;;  %v3557_v49 = vsel %vm3551_vm10, %v3546_v5, %v3548_v53 }
 0x24c   : > { %v4443_v19 = vld.sshfl [vmem:[#allocation1] sm:$0xff pattern:$0x75316420]  ;;  %v3578_v4 = vand.u32 %v3557_v49, %v9304_v50  ;;  %v4444_v6 = vld.sshfl [vmem:[#allocation1 + $0x8] sm:$0xff pattern:$0x75316420] }
 0x24d   : > { %v4457_v20 = vpack.c.bf16 %v4443_v19, %v4443_v19  ;;  %4623 = vst [vmem:[#allocation1] ss:$2 sm:$0xff] %v4613_v13 }
 0x24f   : > { %v2448_v42 = vpop.f32.mrf.mxu0  ;;  %v2461_v32 = vpop.f32.mrf.mxu1  ;;  %4471 = vrot.lane.b32.xlu1 %v4457_v20, %s12141_s30 }
 0x250   : > { %v10261_v35 = vadd.f32 %v2448_v42, %v10185_v55  ;;  %v10264_v36 = vadd.f32 %v2461_v32, %v10196_v14  ;;  %8273 = vmatmul.msk.bf16.vlgmr.msra.gmra.mxu2 %vm542_vm3, %v10252_v10  ;;  %8274 = vmatmul.msk.bf16.vlgmr.msra.gmra.mxu3 %vm542_vm3, %v10252_v10  ;;  %v3550_v55 = vpop.permute.xlu2 %3549  ;;  %v4449_v42 = vld.sshfl [vmem:[#allocation1 + $0x30] sm:$0xff pattern:$0x75316420] }
 0x251   : > { %3616 = vmatpush.bf16.msra.mxu2 %v3569_v15  ;;  %3629 = vmatpush.bf16.msra.mxu3 %v3572_v56  ;;  %v4445_v15 = vld.sshfl [vmem:[#allocation1 + $0x10] sm:$0xff pattern:$0x75316420]  ;;  %v4614_v56 = vld [vmem:[%s9224_s24 + $0xc] sm:$0x77] }
 0x252   : > { %8270 = vmatmul.msk.bf16.vlgmr.msra.gmra.mxu0 %vm542_vm3, %v10175_v47  ;;  %8272 = vmatmul.msk.bf16.vlgmr.msra.gmra.mxu1 %vm542_vm3, %v10252_v10  ;;  %v4446_v47 = vld.sshfl [vmem:[#allocation1 + $0x18] sm:$0xff pattern:$0x75316420]  ;;  %v4459_v18 = vpack.c.bf16 %v4445_v15, %v4445_v15 }
 0x253   : > { %v2474_v0 = vpop.f32.mrf.mxu2  ;;  %v2487_v14 = vpop.f32.mrf.mxu3  ;;  %3603 = vmatpush.bf16.msra.mxu1 %v3566_v21  ;;  %3590 = vmatpush.bf16.msra.mxu0 %v3563_v63  ;;  %v4460_v17 = vpack.c.bf16 %v4446_v47, %v4446_v47  ;;  %4625 = vst [vmem:[#allocation1 + $0x10] ss:$2 sm:$0xff] %v4614_v56  ;;  %v4463_v21 = vpack.c.bf16 %v4449_v42, %v4449_v42 }
 0x254   : > { %v10275_v1 = vadd.f32 %v2474_v0, %v10199_v28  ;;  %v10277_v61 = vadd.f32 %v2487_v14, %v2314_v33  ;;  %v3558_v28 = vsel %vm3551_vm10, %v3548_v53, %v3550_v55  ;;  %v4447_v33 = vld.sshfl [vmem:[#allocation1 + $0x20] sm:$0xff pattern:$0x75316420]  ;;  %v3741_v55 = vpop.permute.xlu0 %3740  ;;  %v4631_v13 = vld.sshfl [vmem:[#allocation1 + $0x8] sm:$0xff pattern:$0x75316420] }
 0x255   : > { %4477 = vrot.lane.b32.xlu0 %v4460_v17, %s12141_s30  ;;  %v3581_v58 = vand.u32 %v3558_v28, %v9304_v50  ;;  %v4461_v34 = vpack.c.bf16 %v4447_v33, %v4447_v33  ;;  %v4630_v63 = vld.sshfl [vmem:[#allocation1] sm:$0xff pattern:$0x75316420]  ;;  %vm6188_vm10 = vcmask 916480  }
 0x257   : > { %v2450_v54 = vpop.f32.mrf.mxu0  ;;  %v2463_v45 = vpop.f32.mrf.mxu1  ;;  %4479 = vrot.lane.b32.xlu1 %v4461_v34, %s12141_s30  ;;  %v10365_v34 = vld [vmem:[%s12152_s1 + $0x44] sm:$0x7] }
 0x258   : > { %v3733_v51 = vpop.permute.xlu2 %3732 }
 0x259   : > { %v3731_v31 = vpop.permute.xlu1 %3730 }
 0x25a   : > { %v3747_v26 = vsel %vm3746_vm11, %v3731_v31, %v3733_v51  ;;  %v4632_v19 = vld.sshfl [vmem:[#allocation1 + $0x10] sm:$0xff pattern:$0x75316420] }
 0x25b   : > { %v2476_v16 = vpop.f32.mrf.mxu2  ;;  %v2489_v62 = vpop.f32.mrf.mxu3  ;;  %v3758_v41 = vand.u32 %v3747_v26, %v9304_v50 }
 0x25c   : > { %v3743_v9 = vpop.permute.xlu0 %3742 }
 0x25d   : > { %4481 = vrot.lane.b32.xlu0 %v4462_v23, %s12141_s30 }
 0x25f   : > { %v2500_v37 = vpop.f32.mrf.mxu0  ;;  %v2617_v39 = vpop.f32.mrf.mxu1 }
 0x260   : > { %v10297_v44 = vadd.f32 %v2500_v37, %v10218_v22  ;;  %v10300_v27 = vadd.f32 %v2617_v39, %v10231_v29  ;;  %8277 = vmatmul.msk.bf16.vlgmr.msrb.gmra.mxu2 %vm542_vm3, %v10252_v10  ;;  %8278 = vmatmul.msk.bf16.vlgmr.msrb.gmra.mxu3 %vm542_vm3, %v10252_v10  ;;  %v3735_v25 = vpop.permute.xlu2 %3734  ;;  %v4633_v39 = vld.sshfl [vmem:[#allocation1 + $0x18] sm:$0xff pattern:$0x75316420] }
 0x261   : > { %3668 = vmatpush.bf16.msrb.mxu2 %v3581_v58  ;;  %3785 = vmatpush.bf16.msrb.mxu3 %v3758_v41  ;;  %v3748_v53 = vsel %vm3746_vm11, %v3733_v51, %v3735_v25  ;;  %v3749_v47 = vsel %vm3746_vm11, %v3735_v25, %v3737_v30  ;;  %v4646_v58 = vpack.c.bf16 %v4632_v19, %v4632_v19 }
 0x262   : > { %8275 = vmatmul.msk.bf16.vlgmr.msrb.gmra.mxu0 %vm542_vm3, %v10252_v10  ;;  %8276 = vmatmul.msk.bf16.vlgmr.msrb.gmra.mxu1 %vm542_vm3, %v10252_v10  ;;  %v4458_v10 = vpack.c.bf16 %v4444_v6, %v4444_v6  ;;  %v3761_v16 = vand.u32 %v3748_v53, %v9304_v50  ;;  %v3764_v62 = vand.u32 %v3749_v47, %v9304_v50  ;;  %v4801_v53 = vld [vmem:[%s9224_s24 + $0xc] sm:$0x77] }
 0x263   : > { %v2630_v22 = vpop.f32.mrf.mxu2  ;;  %v2643_v29 = vpop.f32.mrf.mxu3  ;;  %3642 = vmatpush.bf16.msrb.mxu0 %v3575_v8  ;;  %3655 = vmatpush.bf16.msrb.mxu1 %v3578_v4  ;;  %v4615_v8 = vld [vmem:[%s9224_s24 + $0x14] sm:$0x77]  ;;  %v4647_v23 = vpack.c.bf16 %v4633_v39, %v4633_v39  ;;  %v3752_v41 = vsel %vm3746_vm11, %v3741_v55, %v3743_v9  ;;  %4812 = vst [vmem:[#allocation1 + $0x10] ss:$2 sm:$0xff] %v4801_v53 }
 0x264   : > { %v10314_v7 = vadd.f32 %v2630_v22, %v10234_v60  ;;  %v10317_v40 = vadd.f32 %v2643_v29, %v10261_v35  ;;  %4473 = vrot.lane.b32.xlu2 %v4458_v10, %s12141_s30  ;;  %v4644_v60 = vpack.c.bf16 %v4630_v63, %v4630_v63  ;;  %4627 = vst [vmem:[#allocation1 + $0x20] ss:$2 sm:$0xff] %v4615_v8 }
 0x265   : > { %4483 = vrot.lane.b32.xlu0 %v4463_v21, %s12141_s30  ;;  %v3773_v10 = vand.u32 %v3752_v41, %v9304_v50 }
 0x266   : > { %v3739_v32 = vpop.permute.xlu1 %3738  ;;  %4658 = vrot.lane.b32.xlu1 %v4644_v60, %s12139_s15 }
 0x267   : > { %v2502_v57 = vpop.f32.mrf.mxu0  ;;  %v2619_v38 = vpop.f32.mrf.mxu1  ;;  %v3750_v35 = vsel %vm3746_vm11, %v3737_v30, %v3739_v32  ;;  %v3751_v0 = vsel %vm3746_vm11, %v3739_v32, %v3741_v55 }
 0x268   : > { %v3767_v54 = vand.u32 %v3750_v35, %v9304_v50  ;;  %v3770_v45 = vand.u32 %v3751_v0, %v9304_v50  ;;  %v3928_v17 = vpop.permute.xlu2 %3927  ;;  %v4800_v57 = vld [vmem:[%s9224_s24 + $0x4] sm:$0x77] }
 0x269   : > { %4810 = vst [vmem:[#allocation1] ss:$2 sm:$0xff] %v4800_v57 }
 0x26b   : > { %v2632_v14 = vpop.f32.mrf.mxu2  ;;  %v2645_v5 = vpop.f32.mrf.mxu3  ;;  %v4635_v56 = vld.sshfl [vmem:[#allocation1 + $0x28] sm:$0xff pattern:$0x75316420] }
 0x26c   : > { %4475 = vrot.lane.b32.xlu2 %v4459_v18, %s12141_s30  ;;  %v4649_v55 = vpack.c.bf16 %v4635_v56, %v4635_v56 }
 0x26e   : > { %4662 = vrot.lane.b32.xlu1 %v4646_v58, %s12139_s15  ;;  %4668 = vrot.lane.b32.xlu0 %v4649_v55, %s12139_s15 }
 0x26f   : > { %v2656_v20 = vpop.f32.mrf.mxu0  ;;  %v2669_v28 = vpop.f32.mrf.mxu1 }
 0x270   : > { %v2702_v51 = vadd.f32 %v2656_v20, %v10264_v36  ;;  %v10339_v49 = vadd.f32 %v2669_v28, %v10275_v1  ;;  %8282 = vmatmul.msk.bf16.vlgmr.msra.gmra.mxu2 %vm542_vm3, %v10331_v52  ;;  %8283 = vmatmul.msk.bf16.vlgmr.msra.gmra.mxu3 %vm542_vm3, %v10331_v52  ;;  %v3930_v33 = vpop.permute.xlu2 %3929  ;;  %v3926_v37 = vpop.permute.xlu1 %3925  ;;  %v4818_v5 = vld.sshfl [vmem:[#allocation1 + $0x8] sm:$0xff pattern:$0x75316420] }
 0x271   : > { %3824 = vmatpush.bf16.msra.mxu2 %v3767_v54  ;;  %3837 = vmatpush.bf16.msra.mxu3 %v3770_v45  ;;  %v3942_v12 = vsel %vm3941_vm12, %v3926_v37, %v3928_v17  ;;  %v4645_v45 = vpack.c.bf16 %v4631_v13, %v4631_v13  ;;  %v4819_v37 = vld.sshfl [vmem:[#allocation1 + $0x10] sm:$0xff pattern:$0x75316420] }
 0x272   : > { %8280 = vmatmul.msk.bf16.vlgmr.msra.gmra.mxu0 %vm542_vm3, %v10331_v52  ;;  %8281 = vmatmul.msk.bf16.vlgmr.msra.gmra.mxu1 %vm542_vm3, %v10331_v52  ;;  %v3953_v29 = vand.u32 %v3942_v12, %v9304_v50 }
 0x273   : > { %v2682_v36 = vpop.f32.mrf.mxu2  ;;  %v2695_v30 = vpop.f32.mrf.mxu3  ;;  %3798 = vmatpush.bf16.msra.mxu0 %v3761_v16  ;;  %3811 = vmatpush.bf16.msra.mxu1 %v3764_v62 }
 0x274   : > { %v10350_v1 = vadd.f32 %v2682_v36, %v10277_v61  ;;  %v10353_v31 = vadd.f32 %v2695_v30, %v10297_v44  ;;  %v3943_v61 = vsel %vm3941_vm12, %v3928_v17, %v3930_v33  ;;  %4660 = vrot.lane.b32.xlu2 %v4645_v45, %s12139_s15 }
 0x275   : > { %v3956_v22 = vand.u32 %v3943_v61, %v9304_v50 }
 0x276   : > { %4664 = vrot.lane.b32.xlu1 %v4647_v23, %s12139_s15 }
 0x277   : > { %v2658_v4 = vpop.f32.mrf.mxu0  ;;  %v2671_v26 = vpop.f32.mrf.mxu1 }
 0x278   : > { %v3934_v25 = vpop.permute.xlu0 %3933  ;;  %v3745_v15 = vpop.permute.xlu1 %3744 }
 0x279   : > { %v3753_v32 = vsel %vm3746_vm11, %v3743_v9, %v3745_v15  ;;  %v3932_v14 = vpop.permute.xlu2 %3931  ;;  %v4820_v9 = vld.sshfl [vmem:[#allocation1 + $0x18] sm:$0xff pattern:$0x75316420]  ;;  %vm6353_vm11 = vcmask 818176  }
 0x27a   : > { %v3776_v60 = vand.u32 %v3753_v32, %v9304_v50  ;;  %v3944_v62 = vsel %vm3941_vm12, %v3930_v33, %v3932_v14  ;;  %v3945_v18 = vsel %vm3941_vm12, %v3932_v14, %v3934_v25  ;;  %v4834_v23 = vpack.c.bf16 %v4820_v9, %v4820_v9  ;;  %v4802_v33 = vld [vmem:[%s9224_s24 + $0x14] sm:$0x77] }
 0x27b   : > { %v2684_v6 = vpop.f32.mrf.mxu2  ;;  %v2697_v44 = vpop.f32.mrf.mxu3  ;;  %v3959_v4 = vand.u32 %v3944_v62, %v9304_v50  ;;  %v3962_v26 = vand.u32 %v3945_v18, %v9304_v50 }
 0x27c   : > { %v4833_v6 = vpack.c.bf16 %v4819_v37, %v4819_v37 }
 0x27e   : > { %4849 = vrot.lane.b32.xlu1 %v4833_v6, %s12153_s16 }
 0x27f   : > { %v2812_v38 = vpop.f32.mrf.mxu0  ;;  %v2825_v42 = vpop.f32.mrf.mxu1 }
 0x280   : > { %v10373_v21 = vadd.f32 %v2812_v38, %v10300_v27  ;;  %v10376_v63 = vadd.f32 %v2825_v42, %v10314_v7  ;;  %8286 = vmatmul.msk.bf16.vlgmr.msrb.gmra.mxu2 %vm542_vm3, %v10331_v52  ;;  %8288 = vmatmul.msk.bf16.vlgmr.msrb.gmra.mxu3 %vm542_vm3, %v10365_v34  ;;  %v3938_v19 = vpop.permute.xlu0 %3937 }
 0x281   : > { %3980 = vmatpush.bf16.msrb.mxu2 %v3953_v29  ;;  %3993 = vmatpush.bf16.msrb.mxu3 %v3956_v22  ;;  %v4125_v30 = vpop.permute.xlu2 %4124  ;;  %v4616_v29 = vld [vmem:[%s9224_s24 + $0x1c] sm:$0x7] }
 0x282   : > { %8284 = vmatmul.msk.bf16.vlgmr.msrb.gmra.mxu0 %vm542_vm3, %v10331_v52  ;;  %8285 = vmatmul.msk.bf16.vlgmr.msrb.gmra.mxu1 %vm542_vm3, %v10331_v52  ;;  %v4832_v52 = vpack.c.bf16 %v4818_v5, %v4818_v5  ;;  %4629 = vst [vmem:[#allocation1 + $0x30] ss:$2 sm:$0xff] %v4616_v29 }
 0x283   : > { %v2838_v27 = vpop.f32.mrf.mxu2  ;;  %v2851_v7 = vpop.f32.mrf.mxu3  ;;  %3850 = vmatpush.bf16.msrb.mxu0 %v3773_v10  ;;  %3863 = vmatpush.bf16.msrb.mxu1 %v3776_v60 }
 0x284   : > { %v10388_v35 = vadd.f32 %v2838_v27, %v10317_v40  ;;  %v10390_v0 = vadd.f32 %v2851_v7, %v2702_v51  ;;  %4847 = vrot.lane.b32.xlu0 %v4832_v52, %s12153_s16  ;;  %v4634_v51 = vld.sshfl [vmem:[#allocation1 + $0x20] sm:$0xff pattern:$0x75316420] }
 0x285   : > { %4814 = vst [vmem:[#allocation1 + $0x20] ss:$2 sm:$0xff] %v4802_v33  ;;  %v4648_v57 = vpack.c.bf16 %v4634_v51, %v4634_v51  ;;  %v10440_v7 = vld [vmem:[%s12152_s1 + $0x48] sm:$0x7] }
 0x286   : > { %v3936_v17 = vpop.permute.xlu1 %3935 }
 0x287   : > { %v2814_v47 = vpop.f32.mrf.mxu0  ;;  %v2827_v54 = vpop.f32.mrf.mxu1  ;;  %v3946_v20 = vsel %vm3941_vm12, %v3934_v25, %v3936_v17  ;;  %v3947_v40 = vsel %vm3941_vm12, %v3936_v17, %v3938_v19  ;;  %4666 = vrot.lane.b32.xlu2 %v4648_v57, %s12139_s15 }
 0x288   : > { %v3965_v58 = vand.u32 %v3946_v20, %v9304_v50  ;;  %v3968_v36 = vand.u32 %v3947_v40, %v9304_v50  ;;  %v3940_v42 = vpop.permute.xlu0 %3939  ;;  %v4988_v20 = vld [vmem:[%s9224_s24 + $0xc] sm:$0x77] }
 0x289   : > { %v10427_v22 = vpop.permute.xlu2 %4126  ;;  %v3948_v60 = vsel %vm3941_vm12, %v3938_v19, %v3940_v42  ;;  %v4636_v53 = vld.sshfl [vmem:[#allocation1 + $0x30] sm:$0xff pattern:$0x75316420]  ;;  %4999 = vst [vmem:[#allocation1 + $0x10] ss:$2 sm:$0xff] %v4988_v20  ;;  %v4300_v20 = vpack.c.bf16 %v10243_v59, %v10243_v59  ;;  %vm6298_vm12 = vcmask 900096  }
 0x28a   : > { %v4139_v32 = vsel %vm4136_vm13, %v4125_v30, %v10427_v22  ;;  %v3971_v17 = vand.u32 %v3948_v60, %v9304_v50  ;;  %v4650_v19 = vpack.c.bf16 %v4636_v53, %v4636_v53 }
 0x28b   : > { %v2840_v28 = vpop.f32.mrf.mxu2  ;;  %v2853_v16 = vpop.f32.mrf.mxu3  ;;  %v4154_v5 = vand.u32 %v4139_v32, %v9304_v50 }
 0x28c   : > { %4851 = vrot.lane.b32.xlu0 %v4834_v23, %s12153_s16  ;;  %v4821_v56 = vld.sshfl [vmem:[#allocation1 + $0x20] sm:$0xff pattern:$0x75316420]  ;;  %v4822_v47 = vld.sshfl [vmem:[#allocation1 + $0x28] sm:$0xff pattern:$0x75316420] }
 0x28d   : > { %v4835_v38 = vpack.c.bf16 %v4821_v56, %v4821_v56  ;;  %v4836_v16 = vpack.c.bf16 %v4822_v47, %v4822_v47 }
 0x28e   : > { %v4123_v44 = vpop.permute.xlu1 %4122 }
 0x28f   : > { %v2864_v39 = vpop.f32.mrf.mxu0  ;;  %v2877_v8 = vpop.f32.mrf.mxu1  ;;  %v4138_v10 = vsel %vm4136_vm13, %v4123_v44, %v4125_v30  ;;  %4670 = vrot.lane.b32.xlu2 %v4650_v19, %s12139_s15  ;;  %4855 = vrot.lane.b32.xlu1 %v4836_v16, %s12153_s16  ;;  %v4299_v19 = vpack.c.bf16 %v10241_v48, %v10241_v48  ;;  %s9083_s15 = smov 114  }
 0x290   : > { %v10406_v61 = vadd.f32 %v2864_v39, %v10339_v49  ;;  %v10409_v12 = vadd.f32 %v2877_v8, %v10350_v1  ;;  %8291 = vmatmul.msk.bf16.vlgmr.msra.gmra.mxu2 %vm542_vm3, %v10365_v34  ;;  %8292 = vmatmul.msk.bf16.vlgmr.msra.gmra.mxu3 %vm542_vm3, %v10365_v34  ;;  %v4151_v14 = vand.u32 %v4138_v10, %v9304_v50  ;;  %v4131_v51 = vpop.permute.xlu0 %4130 }
 0x291   : > { %4032 = vmatpush.bf16.msra.mxu2 %v3965_v58  ;;  %4045 = vmatpush.bf16.msra.mxu3 %v3968_v36  ;;  %v4817_v58 = vld.sshfl [vmem:[#allocation1] sm:$0xff pattern:$0x75316420]  ;;  %v4314_v16 = vand.u32 %v4299_v19, %v9304_v50 }
 0x292   : > { %8289 = vmatmul.msk.bf16.vlgmr.msra.gmra.mxu0 %vm542_vm3, %v10365_v34  ;;  %8290 = vmatmul.msk.bf16.vlgmr.msra.gmra.mxu1 %vm542_vm3, %v10365_v34  ;;  %v4987_v36 = vld [vmem:[%s9224_s24 + $0x4] sm:$0x77]  ;;  %v4831_v39 = vpack.c.bf16 %v4817_v58, %v4817_v58 }
 0x293   : > { %v2890_v49 = vpop.f32.mrf.mxu2  ;;  %v3007_v1 = vpop.f32.mrf.mxu3  ;;  %4006 = vmatpush.bf16.msra.mxu0 %v3959_v4  ;;  %4019 = vmatpush.bf16.msra.mxu1 %v3962_v26  ;;  %4997 = vst [vmem:[#allocation1] ss:$2 sm:$0xff] %v4987_v36 }
 0x294   : > { %v10420_v13 = vadd.f32 %v2890_v49, %v10353_v31  ;;  %v10423_v41 = vadd.f32 %v3007_v1, %v10373_v21  ;;  %4853 = vrot.lane.b32.xlu0 %v4835_v38, %s12153_s16  ;;  %v4803_v1 = vld [vmem:[%s9224_s24 + $0x1c] sm:$0x7]  ;;  %v4989_v38 = vld [vmem:[%s9224_s24 + $0x14] sm:$0x77] }
 0x295   : > { %4816 = vst [vmem:[#allocation1 + $0x30] ss:$2 sm:$0xff] %v4803_v1 }
 0x296   : > { %v4121_v31 = vpop.permute.xlu1 %4120  ;;  %5001 = vst [vmem:[#allocation1 + $0x20] ss:$2 sm:$0xff] %v4989_v38 }
 0x297   : > { %v2866_v25 = vpop.f32.mrf.mxu0  ;;  %v2879_v15 = vpop.f32.mrf.mxu1  ;;  %v4137_v27 = vsel %vm4136_vm13, %v4121_v31, %v4123_v44  ;;  %4845 = vrot.lane.b32.xlu2 %v4831_v39, %s12153_s16 }
 0x298   : > { %v4148_v52 = vand.u32 %v4137_v27, %v9304_v50 }
 0x29a   : > { %v5005_v49 = vld.sshfl [vmem:[#allocation1 + $0x8] sm:$0xff pattern:$0x75316420] }
 0x29b   : > { %v2892_v21 = vpop.f32.mrf.mxu2  ;;  %v3009_v55 = vpop.f32.mrf.mxu3 }
 0x29c   : > { %v5004_v55 = vld.sshfl [vmem:[#allocation1] sm:$0xff pattern:$0x75316420]  ;;  %v4823_v27 = vld.sshfl [vmem:[#allocation1 + $0x30] sm:$0xff pattern:$0x75316420] }
 0x29d   : > { %v5018_v60 = vpack.c.bf16 %v5004_v55, %v5004_v55  ;;  %v4837_v53 = vpack.c.bf16 %v4823_v27, %v4823_v27  ;;  %v5009_v47 = vld.sshfl [vmem:[#allocation1 + $0x28] sm:$0xff pattern:$0x75316420]  ;;  %v5008_v39 = vld.sshfl [vmem:[#allocation1 + $0x20] sm:$0xff pattern:$0x75316420] }
 0x29e   : > { %v4133_v37 = vpop.permute.xlu1 %4132 }
 0x29f   : > { %v3020_v54 = vpop.f32.mrf.mxu0  ;;  %v3033_v45 = vpop.f32.mrf.mxu1  ;;  %v4142_v4 = vsel %vm4136_vm13, %v4131_v51, %v4133_v37  ;;  %5032 = vrot.lane.b32.xlu0 %v5018_v60, %s12154_s20  ;;  %4857 = vrot.lane.b32.xlu2 %v4837_v53, %s12153_s16 }
 0x2a0   : > { %v3090_v40 = vadd.f32 %v3020_v54, %v10376_v63  ;;  %v10449_v28 = vadd.f32 %v3033_v45, %v10388_v35  ;;  %8296 = vmatmul.msk.bf16.vlgmr.msrb.gmra.mxu2 %vm542_vm3, %v10440_v7  ;;  %8297 = vmatmul.msk.bf16.vlgmr.msrb.gmra.mxu3 %vm542_vm3, %v10440_v7  ;;  %v4163_v6 = vand.u32 %v4142_v4, %v9304_v50 }
 0x2a1   : > { %4188 = vmatpush.bf16.msrb.mxu2 %v4151_v14  ;;  %4201 = vmatpush.bf16.msrb.mxu3 %v4154_v5  ;;  %v5023_v54 = vpack.c.bf16 %v5009_v47, %v5009_v47 }
 0x2a2   : > { %8293 = vmatmul.msk.bf16.vlgmr.msrb.gmra.mxu0 %vm542_vm3, %v10365_v34  ;;  %8294 = vmatmul.msk.bf16.vlgmr.msrb.gmra.mxu1 %vm542_vm3, %v10365_v34  ;;  %v5006_v34 = vld.sshfl [vmem:[#allocation1 + $0x10] sm:$0xff pattern:$0x75316420] }
 0x2a3   : > { %v3046_v63 = vpop.f32.mrf.mxu2  ;;  %v3059_v35 = vpop.f32.mrf.mxu3  ;;  %4058 = vmatpush.bf16.msrb.mxu0 %v3971_v17  ;;  %4175 = vmatpush.bf16.msrb.mxu1 %v4148_v52  ;;  %v5020_v8 = vpack.c.bf16 %v5006_v34, %v5006_v34  ;;  %v4297_v17 = vpack.c.bf16 %v10239_v3, %v10239_v3  ;;  %v4298_v52 = vpack.c.bf16 %v10247_v24, %v10247_v24  ;;  %v5007_v3 = vld.sshfl [vmem:[#allocation1 + $0x18] sm:$0xff pattern:$0x75316420] }
 0x2a4   : > { %v10460_v62 = vadd.f32 %v3046_v63, %v10390_v0  ;;  %v10463_v18 = vadd.f32 %v3059_v35, %v10406_v61  ;;  %v4129_v0 = vpop.permute.xlu2 %4128  ;;  %v4317_v63 = vand.u32 %v4300_v20, %v9304_v50  ;;  %v4990_v35 = vld [vmem:[%s9224_s24 + $0x1c] sm:$0x7]  ;;  %s9089_s24 = smov 99  }
 0x2a5   : > { %v4140_v33 = vsel %vm4136_vm13, %v10427_v22, %v4129_v0  ;;  %v4141_v61 = vsel %vm4136_vm13, %v4129_v0, %v4131_v51  ;;  %5036 = vrot.lane.b32.xlu1 %v5020_v8, %s12154_s20  ;;  %v5019_v22 = vpack.c.bf16 %v5005_v49, %v5005_v49  ;;  %v4308_v58 = vand.u32 %v4297_v17, %v9304_v50 }
 0x2a6   : > { %v4157_v15 = vand.u32 %v4140_v33, %v9304_v50  ;;  %v4160_v56 = vand.u32 %v4141_v61, %v9304_v50  ;;  %v4311_v48 = vand.u32 %v4298_v52, %v9304_v50  ;;  %5003 = vst [vmem:[#allocation1 + $0x30] ss:$2 sm:$0xff] %v4990_v35  ;;  %v4301_v33 = vpack.c.bf16 %v10279_v2, %v10279_v2 }
 0x2a7   : > { %v3022_v30 = vpop.f32.mrf.mxu0  ;;  %v3035_v9 = vpop.f32.mrf.mxu1  ;;  %v4303_v61 = vpack.c.bf16 %v10289_v46, %v10289_v46 }
 0x2a8   : > { %v4135_v44 = vpop.permute.xlu0 %4134  ;;  %v5021_v30 = vpack.c.bf16 %v5007_v3, %v5007_v3  ;;  %v4320_v2 = vand.u32 %v4301_v33, %v9304_v50 }
 0x2a9   : > { %v4143_v57 = vsel %vm4136_vm13, %v4133_v37, %v4135_v44  ;;  %v4326_v1 = vand.u32 %v4303_v61, %v9304_v50  ;;  %vm6463_vm13 = vcmask 801792  }
 0x2aa   : > { %v4166_v10 = vand.u32 %v4143_v57, %v9304_v50  ;;  %5038 = vrot.lane.b32.xlu2 %v5021_v30, %s12154_s20 }
 0x2ab   : > { %v3048_v26 = vpop.f32.mrf.mxu2  ;;  %v3061_v23 = vpop.f32.mrf.mxu3 }
 0x2ac   : > { %v5022_v26 = vpack.c.bf16 %v5008_v39, %v5008_v39  ;;  %v10580_v39 = vld [vmem:[%s12152_s1 + $0x54] sm:$0x7] }
 0x2ad   : > { %5034 = vrot.lane.b32.xlu1 %v5019_v22, %s12154_s20  ;;  %v5010_v37 = vld.sshfl [vmem:[#allocation1 + $0x30] sm:$0xff pattern:$0x75316420] }
 0x2ae   : > { %v5024_v4 = vpack.c.bf16 %v5010_v37, %v5010_v37 }
 0x2af   : > { %v3072_v29 = vpop.f32.mrf.mxu0  ;;  %v3085_v25 = vpop.f32.mrf.mxu1 }
 0x2b0   : > { %v3094_v42 = vadd.f32 %v3072_v29, %v10409_v12  ;;  %v10482_v31 = vadd.f32 %v3085_v25, %v10420_v13  ;;  %8300 = vmatmul.msk.bf16.vlgmr.msra.gmra.mxu2 %vm542_vm3, %v10440_v7  ;;  %8301 = vmatmul.msk.bf16.vlgmr.msra.gmra.mxu3 %vm542_vm3, %v10440_v7 }
 0x2b1   : > { %4240 = vmatpush.bf16.msra.mxu2 %v4163_v6  ;;  %4253 = vmatpush.bf16.msra.mxu3 %v4166_v10 }
 0x2b2   : > { %8298 = vmatmul.msk.bf16.vlgmr.msra.gmra.mxu0 %vm542_vm3, %v10440_v7  ;;  %8299 = vmatmul.msk.bf16.vlgmr.msra.gmra.mxu1 %vm542_vm3, %v10440_v7 }
 0x2b3   : > { %v3202_v12 = vpop.f32.mrf.mxu2  ;;  %v3215_v32 = vpop.f32.mrf.mxu3  ;;  %4214 = vmatpush.bf16.msra.mxu0 %v4157_v15  ;;  %4227 = vmatpush.bf16.msra.mxu1 %v4160_v56 }
 0x2b4   : > { %v10494_v13 = vadd.f32 %v3202_v12, %v10423_v41  ;;  %v10496_v21 = vadd.f32 %v3215_v32, %v3090_v40  ;;  %v8303_v40 = vld [vmem:[%s12152_s1 + $0x4c] sm:$0x7]  ;;  %5044 = vrot.lane.b32.xlu0 %v5024_v4, %s12154_s20  ;;  %5040 = vrot.lane.b32.xlu2 %v5022_v26, %s12154_s20 }
 0x2b5   : > { %5042 = vrot.lane.b32.xlu1 %v5023_v54, %s12154_s20 }
 0x2b7   : > { %v3074_v14 = vpop.f32.mrf.mxu0  ;;  %v3087_v5 = vpop.f32.mrf.mxu1 }
 0x2bb   : > { %v3204_v41 = vpop.f32.mrf.mxu2  ;;  %v3217_v45 = vpop.f32.mrf.mxu3 }
 0x2be   : > { %v4474_v6 = vpop.permute.xlu2 %4473 }
 0x2bf   : > { %v3228_v51 = vpop.f32.mrf.mxu0  ;;  %v3241_v24 = vpop.f32.mrf.mxu1 }
 0x2c0   : > { %v3286_v59 = vadd.f32 %v3228_v51, %v10449_v28  ;;  %v10520_v36 = vadd.f32 %v3241_v24, %v10460_v62  ;;  %8305 = vmatmul.msk.bf16.vlgmr.msrb.gmra.mxu2 %vm542_vm3, %v8303_v40  ;;  %8306 = vmatmul.msk.bf16.vlgmr.msrb.gmra.mxu3 %vm542_vm3, %v8303_v40 }
 0x2c1   : > { %4361 = vmatpush.bf16.msrb.mxu2 %v4314_v16  ;;  %4374 = vmatpush.bf16.msrb.mxu3 %v4317_v63  ;;  %v4472_v44 = vpop.permute.xlu1 %4471 }
 0x2c2   : > { %8302 = vmatmul.msk.bf16.vlgmr.msrb.gmra.mxu0 %vm542_vm3, %v10440_v7  ;;  %8304 = vmatmul.msk.bf16.vlgmr.msrb.gmra.mxu1 %vm542_vm3, %v8303_v40  ;;  %v4485_v49 = vsel %vm535_vm2, %v4472_v44, %v4474_v6 }
 0x2c3   : > { %v3254_v9 = vpop.f32.mrf.mxu2  ;;  %v3267_v34 = vpop.f32.mrf.mxu3  ;;  %4335 = vmatpush.bf16.msrb.mxu0 %v4308_v58  ;;  %4348 = vmatpush.bf16.msrb.mxu1 %v4311_v48  ;;  %v4495_v25 = vand.u32 %v4485_v49, %v9304_v50 }
 0x2c4   : > { %v3288_v28 = vadd.f32 %v3254_v9, %v10463_v18  ;;  %v10528_v62 = vadd.f32 %v3267_v34, %v3094_v42  ;;  %v4302_v18 = vpack.c.bf16 %v10281_v11, %v10281_v11 }
 0x2c6   : > { %v4323_v11 = vand.u32 %v4302_v18, %v9304_v50 }
 0x2c7   : > { %v3230_v8 = vpop.f32.mrf.mxu0  ;;  %v3243_v0 = vpop.f32.mrf.mxu1 }
 0x2c8   : > { %v4478_v29 = vpop.permute.xlu0 %4477 }
 0x2c9   : > { %v4480_v10 = vpop.permute.xlu1 %4479 }
 0x2ca   : > { %v4488_v60 = vsel %vm535_vm2, %v4478_v29, %v4480_v10 }
 0x2cb   : > { %v3256_v7 = vpop.f32.mrf.mxu2  ;;  %v3269_v23 = vpop.f32.mrf.mxu3  ;;  %v4504_v54 = vand.u32 %v4488_v60, %v9304_v50 }
 0x2cf   : > { %v3280_v15 = vpop.f32.mrf.mxu0  ;;  %v3397_v56 = vpop.f32.mrf.mxu1 }
 0x2d0   : > { %v3290_v57 = vadd.f32 %v3280_v15, %v10482_v31  ;;  %v10546_v46 = vadd.f32 %v3397_v56, %v10494_v13  ;;  %8309 = vmatmul.msk.bf16.vlgmr.msra.gmra.mxu2 %vm542_vm3, %v8303_v40  ;;  %8310 = vmatmul.msk.bf16.vlgmr.msra.gmra.mxu3 %vm542_vm3, %v8303_v40  ;;  %v4476_v13 = vpop.permute.xlu2 %4475  ;;  %v4482_v55 = vpop.permute.xlu0 %4481 }
 0x2d1   : > { %4413 = vmatpush.bf16.msra.mxu2 %v4326_v1  ;;  %4522 = vmatpush.bf16.msra.mxu3 %v4495_v25  ;;  %v4489_v27 = vsel %vm535_vm2, %v4480_v10, %v4482_v55  ;;  %v4486_v53 = vsel %vm535_vm2, %v4474_v6, %v4476_v13  ;;  %v4487_v47 = vsel %vm535_vm2, %v4476_v13, %v4478_v29 }
 0x2d2   : > { %8307 = vmatmul.msk.bf16.vlgmr.msra.gmra.mxu0 %vm542_vm3, %v8303_v40  ;;  %8308 = vmatmul.msk.bf16.vlgmr.msra.gmra.mxu1 %vm542_vm3, %v8303_v40  ;;  %v4507_v41 = vand.u32 %v4489_v27, %v9304_v50  ;;  %v4498_v19 = vand.u32 %v4486_v53, %v9304_v50  ;;  %v4501_v20 = vand.u32 %v4487_v47, %v9304_v50 }
 0x2d3   : > { %v3410_v22 = vpop.f32.mrf.mxu2  ;;  %v3423_v38 = vpop.f32.mrf.mxu3  ;;  %4387 = vmatpush.bf16.msra.mxu0 %v4320_v2  ;;  %4400 = vmatpush.bf16.msra.mxu1 %v4323_v11 }
 0x2d4   : > { %v3480_v42 = vadd.f32 %v3410_v22, %v10496_v21  ;;  %v10553_v31 = vadd.f32 %v3423_v38, %v3286_v59  ;;  %v8311_v21 = vld [vmem:[%s12152_s1 + $0x50] sm:$0x7] }
 0x2d7   : > { %v3282_v12 = vpop.f32.mrf.mxu0  ;;  %v3399_v32 = vpop.f32.mrf.mxu1 }
 0x2d8   : > { %v4659_v45 = vpop.permute.xlu1 %4658  ;;  %v4661_v24 = vpop.permute.xlu2 %4660 }
 0x2d9   : > { %v4484_v59 = vpop.permute.xlu0 %4483  ;;  %v4672_v30 = vsel %vm836_vm4, %v4659_v45, %v4661_v24 }
 0x2da   : > { %v4490_v37 = vsel %vm535_vm2, %v4482_v55, %v4484_v59  ;;  %v4513_v7 = vand.u32 %v4484_v59, %v9304_v50 }
 0x2db   : > { %v3412_v14 = vpop.f32.mrf.mxu2  ;;  %v3425_v5 = vpop.f32.mrf.mxu3  ;;  %v4510_v26 = vand.u32 %v4490_v37, %v9304_v50 }
 0x2df   : > { %v3436_v17 = vpop.f32.mrf.mxu0  ;;  %v3449_v52 = vpop.f32.mrf.mxu1 }
 0x2e0   : > { %v3482_v40 = vadd.f32 %v3436_v17, %v10520_v36  ;;  %v10567_v16 = vadd.f32 %v3449_v52, %v3288_v28  ;;  %8314 = vmatmul.msk.bf16.vlgmr.msrb.gmra.mxu2 %vm542_vm3, %v8311_v21  ;;  %8315 = vmatmul.msk.bf16.vlgmr.msrb.gmra.mxu3 %vm542_vm3, %v8311_v21  ;;  %v4663_v36 = vpop.permute.xlu1 %4662 }
 0x2e1   : > { %4561 = vmatpush.bf16.msrb.mxu2 %v4504_v54  ;;  %4574 = vmatpush.bf16.msrb.mxu3 %v4507_v41  ;;  %v4673_v9 = vsel %vm836_vm4, %v4661_v24, %v4663_v36  ;;  %v4667_v49 = vpop.permute.xlu2 %4666  ;;  %v4669_v1 = vpop.permute.xlu0 %4668 }
 0x2e2   : > { %8312 = vmatmul.msk.bf16.vlgmr.msrb.gmra.mxu0 %vm542_vm3, %v8311_v21  ;;  %8313 = vmatmul.msk.bf16.vlgmr.msrb.gmra.mxu1 %vm542_vm3, %v8311_v21  ;;  %v4685_v8 = vand.u32 %v4673_v9, %v9304_v50  ;;  %v4676_v56 = vsel %vm836_vm4, %v4667_v49, %v4669_v1 }
 0x2e3   : > { %v3462_v63 = vpop.f32.mrf.mxu2  ;;  %v3475_v3 = vpop.f32.mrf.mxu3  ;;  %4535 = vmatpush.bf16.msrb.mxu0 %v4498_v19  ;;  %4548 = vmatpush.bf16.msrb.mxu1 %v4501_v20  ;;  %v4694_v22 = vand.u32 %v4676_v56, %v9304_v50 }
 0x2e4   : > { %v3484_v35 = vadd.f32 %v3462_v63, %v10528_v62  ;;  %v3485_v51 = vadd.f32 %v3475_v3, %v3290_v57  ;;  %v4682_v62 = vand.u32 %v4672_v30, %v9304_v50  ;;  %v10622_v63 = vld [vmem:[%s12152_s1 + $0x58] sm:$0x7] }
 0x2e7   : > { %v3438_v58 = vpop.f32.mrf.mxu0  ;;  %v3451_v48 = vpop.f32.mrf.mxu1 }
 0x2e8   : > { %v4665_v15 = vpop.permute.xlu1 %4664 }
 0x2e9   : > { %v4674_v57 = vsel %vm836_vm4, %v4663_v36, %v4665_v15 }
 0x2ea   : > { %v4688_v12 = vand.u32 %v4674_v57, %v9304_v50 }
 0x2eb   : > { %v3464_v34 = vpop.f32.mrf.mxu2  ;;  %v3477_v28 = vpop.f32.mrf.mxu3 }
 0x2ef   : > { %v3592_v0 = vpop.f32.mrf.mxu0  ;;  %v3605_v4 = vpop.f32.mrf.mxu1 }
 0x2f0   : > { %v3674_v23 = vadd.f32 %v3592_v0, %v10546_v46  ;;  %v10587_v33 = vadd.f32 %v3605_v4, %v3480_v42  ;;  %8318 = vmatmul.msk.bf16.vlgmr.msra.gmra.mxu2 %vm542_vm3, %v8311_v21  ;;  %8320 = vmatmul.msk.bf16.vlgmr.msra.gmra.mxu3 %vm542_vm3, %v10580_v39  ;;  %v4675_v46 = vsel %vm836_vm4, %v4665_v15, %v4667_v49  ;;  %v4671_v42 = vpop.permute.xlu2 %4670  ;;  %v4850_v41 = vpop.permute.xlu1 %4849 }
 0x2f1   : > { %4709 = vmatpush.bf16.msra.mxu2 %v4682_v62  ;;  %4722 = vmatpush.bf16.msra.mxu3 %v4685_v8  ;;  %v4691_v32 = vand.u32 %v4675_v46, %v9304_v50  ;;  %v4677_v13 = vsel %vm836_vm4, %v4669_v1, %v4671_v42  ;;  %v4700_v58 = vand.u32 %v4671_v42, %v9304_v50 }
 0x2f2   : > { %8316 = vmatmul.msk.bf16.vlgmr.msra.gmra.mxu0 %vm542_vm3, %v8311_v21  ;;  %8317 = vmatmul.msk.bf16.vlgmr.msra.gmra.mxu1 %vm542_vm3, %v8311_v21  ;;  %v4697_v27 = vand.u32 %v4677_v13, %v9304_v50 }
 0x2f3   : > { %v3618_v18 = vpop.f32.mrf.mxu2  ;;  %v3631_v61 = vpop.f32.mrf.mxu3  ;;  %4587 = vmatpush.bf16.msra.mxu0 %v4510_v26  ;;  %4600 = vmatpush.bf16.msra.mxu1 %v4513_v7 }
 0x2f4   : > { %v3676_v6 = vadd.f32 %v3618_v18, %v10553_v31  ;;  %v10595_v44 = vadd.f32 %v3631_v61, %v3482_v40 }
 0x2f6   : > { %v4848_v38 = vpop.permute.xlu0 %4847 }
 0x2f7   : > { %v3594_v29 = vpop.f32.mrf.mxu0  ;;  %v3607_v25 = vpop.f32.mrf.mxu1  ;;  %v4860_v52 = vsel %vm1024_vm5, %v4848_v38, %v4850_v41 }
 0x2f8   : > { %v4846_v17 = vpop.permute.xlu2 %4845  ;;  %v4872_v3 = vand.u32 %v4860_v52, %v9304_v50 }
 0x2fb   : > { %v3620_v2 = vpop.f32.mrf.mxu2  ;;  %v3633_v11 = vpop.f32.mrf.mxu3 }
 0x2fe   : > { %v4852_v45 = vpop.permute.xlu0 %4851 }
 0x2ff   : > { %v3644_v31 = vpop.f32.mrf.mxu0  ;;  %v3657_v10 = vpop.f32.mrf.mxu1  ;;  %v4861_v19 = vsel %vm1024_vm5, %v4850_v41, %v4852_v45 }
 0x300   : > { %v3678_v55 = vadd.f32 %v3644_v31, %v10567_v16  ;;  %v3679_v60 = vadd.f32 %v3657_v10, %v3484_v35  ;;  %8323 = vmatmul.msk.bf16.vlgmr.msrb.gmra.mxu2 %vm542_vm3, %v10580_v39  ;;  %8324 = vmatmul.msk.bf16.vlgmr.msrb.gmra.mxu3 %vm542_vm3, %v10580_v39  ;;  %v4859_v16 = vsel %vm1024_vm5, %v4846_v17, %v4848_v38  ;;  %v4858_v37 = vpop.permute.xlu2 %4857 }
 0x301   : > { %4761 = vmatpush.bf16.msrb.mxu2 %v4694_v22  ;;  %4774 = vmatpush.bf16.msrb.mxu3 %v4697_v27  ;;  %v4875_v35 = vand.u32 %v4861_v19, %v9304_v50  ;;  %v4869_v48 = vand.u32 %v4859_v16, %v9304_v50  ;;  %v4856_v62 = vpop.permute.xlu1 %4855  ;;  %v4887_v18 = vand.u32 %v4858_v37, %v9304_v50  ;;  %v8335_v27 = vld [vmem:[%s12152_s1 + $0x5c] sm:$0x7] }
 0x302   : > { %8321 = vmatmul.msk.bf16.vlgmr.msrb.gmra.mxu0 %vm542_vm3, %v10580_v39  ;;  %8322 = vmatmul.msk.bf16.vlgmr.msrb.gmra.mxu1 %vm542_vm3, %v10580_v39  ;;  %v4864_v26 = vsel %vm1024_vm5, %v4856_v62, %v4858_v37 }
 0x303   : > { %v3670_v14 = vpop.f32.mrf.mxu2  ;;  %v3787_v5 = vpop.f32.mrf.mxu3  ;;  %4735 = vmatpush.bf16.msrb.mxu0 %v4688_v12  ;;  %4748 = vmatpush.bf16.msrb.mxu1 %v4691_v32  ;;  %v4884_v61 = vand.u32 %v4864_v26, %v9304_v50  ;;  %v8343_v26 = vld [vmem:[%s12152_s1 + $0x60] sm:$0x7]  ;;  %s9085_s1 = smov 112  }
 0x304   : > { %v3680_v53 = vadd.f32 %v3670_v14, %v3485_v51  ;;  %v10614_v47 = vadd.f32 %v3787_v5, %v3674_v23 }
 0x306   : > { %v4854_v4 = vpop.permute.xlu0 %4853 }
 0x307   : > { %v3646_v21 = vpop.f32.mrf.mxu0  ;;  %v3659_v54 = vpop.f32.mrf.mxu1 }
 0x30b   : > { %v3672_v20 = vpop.f32.mrf.mxu2  ;;  %v3789_v40 = vpop.f32.mrf.mxu3 }
 0x30f   : > { %v3800_v51 = vpop.f32.mrf.mxu0  ;;  %v3813_v24 = vpop.f32.mrf.mxu1 }
 0x310   : > { %v10629_v59 = vadd.f32 %v3800_v51, %v10587_v33  ;;  %v10631_v36 = vadd.f32 %v3813_v24, %v3676_v6  ;;  %8328 = vmatmul.msk.bf16.vlgmr.msra.gmra.mxu2 %vm542_vm3, %v10622_v63  ;;  %8329 = vmatmul.msk.bf16.vlgmr.msra.gmra.mxu3 %vm542_vm3, %v10622_v63  ;;  %v4863_v33 = vsel %vm1024_vm5, %v4854_v4, %v4856_v62  ;;  %v5039_v6 = vpop.permute.xlu2 %5038 }
 0x311   : > { %4909 = vmatpush.bf16.msra.mxu2 %v4872_v3  ;;  %4922 = vmatpush.bf16.msra.mxu3 %v4875_v35  ;;  %v4881_v29 = vand.u32 %v4863_v33, %v9304_v50  ;;  %v5033_v12 = vpop.permute.xlu0 %5032 }
 0x312   : > { %8325 = vmatmul.msk.bf16.vlgmr.msra.gmra.mxu0 %vm542_vm3, %v10580_v39  ;;  %8326 = vmatmul.msk.bf16.vlgmr.msra.gmra.mxu1 %vm542_vm3, %v10580_v39  ;;  %v4862_v39 = vsel %vm1024_vm5, %v4852_v45, %v4854_v4 }
 0x313   : > { %v3826_v30 = vpop.f32.mrf.mxu2  ;;  %v3839_v9 = vpop.f32.mrf.mxu3  ;;  %4787 = vmatpush.bf16.msra.mxu0 %v4700_v58  ;;  %4896 = vmatpush.bf16.msra.mxu1 %v4869_v48  ;;  %v4878_v1 = vand.u32 %v4862_v39, %v9304_v50 }
 0x314   : > { %v10642_v34 = vadd.f32 %v3826_v30, %v10595_v44  ;;  %v10644_v28 = vadd.f32 %v3839_v9, %v3678_v55 }
 0x317   : > { %v3802_v8 = vpop.f32.mrf.mxu0  ;;  %v3815_v0 = vpop.f32.mrf.mxu1 }
 0x318   : > { %v5037_v56 = vpop.permute.xlu1 %5036  ;;  %v5041_v46 = vpop.permute.xlu2 %5040 }
 0x319   : > { %v5048_v42 = vsel %vm1212_vm6, %v5037_v56, %v5039_v6  ;;  %v5049_v31 = vsel %vm1212_vm6, %v5039_v6, %v5041_v46 }
 0x31a   : > { %v5062_v14 = vand.u32 %v5048_v42, %v9304_v50  ;;  %v5065_v5 = vand.u32 %v5049_v31, %v9304_v50 }
 0x31b   : > { %v3828_v7 = vpop.f32.mrf.mxu2  ;;  %v3841_v23 = vpop.f32.mrf.mxu3 }
 0x31f   : > { %v3852_v44 = vpop.f32.mrf.mxu0  ;;  %v3865_v49 = vpop.f32.mrf.mxu1 }
 0x320   : > { %v10653_v25 = vadd.f32 %v3852_v44, %v3679_v60  ;;  %v10655_v15 = vadd.f32 %v3865_v49, %v3680_v53  ;;  %8332 = vmatmul.msk.bf16.vlgmr.msrb.gmra.mxu2 %vm542_vm3, %v10622_v63  ;;  %8333 = vmatmul.msk.bf16.vlgmr.msrb.gmra.mxu3 %vm542_vm3, %v10622_v63  ;;  %v5035_v10 = vpop.permute.xlu1 %5034  ;;  %v9081_v44 = vmov 0  }
 0x321   : > { %4974 = vmatpush.bf16.msrb.mxu3 %v4887_v18  ;;  %4961 = vmatpush.bf16.msrb.mxu2 %v4884_v61  ;;  %v5047_v55 = vsel %vm1212_vm6, %v5035_v10, %v5037_v56  ;;  %v5046_v60 = vsel %vm1212_vm6, %v5033_v12, %v5035_v10 }
 0x322   : > { %8330 = vmatmul.msk.bf16.vlgmr.msrb.gmra.mxu0 %vm542_vm3, %v10622_v63  ;;  %8331 = vmatmul.msk.bf16.vlgmr.msrb.gmra.mxu1 %vm542_vm3, %v10622_v63  ;;  %v5059_v21 = vand.u32 %v5047_v55, %v9304_v50  ;;  %v5056_v54 = vand.u32 %v5046_v60, %v9304_v50 }
 0x323   : > { %v3982_v2 = vpop.f32.mrf.mxu2  ;;  %v10665_v11 = vpop.f32.mrf.mxu3  ;;  %4935 = vmatpush.bf16.msrb.mxu0 %v4878_v1  ;;  %4948 = vmatpush.bf16.msrb.mxu1 %v4881_v29 }
 0x324   : > { %v10668_v57 = vadd.f32 %v3982_v2, %v10614_v47  ;;  %8961 = vset.pattern.permute.xlu2 %v9081_v44  ;;  %8992 = vset.pattern.permute.xlu0 %v9081_v44 }
 0x326   : > { %v5045_v3 = vpop.permute.xlu0 %5044 }
 0x327   : > { %v3854_v22 = vpop.f32.mrf.mxu0  ;;  %v3867_v38 = vpop.f32.mrf.mxu1  ;;  %v5074_v51 = vand.u32 %v5045_v3, %v9304_v50 }
 0x328   : > { %v5043_v19 = vpop.permute.xlu1 %5042 }
 0x329   : > { %v5050_v16 = vsel %vm1212_vm6, %v5041_v46, %v5043_v19  ;;  %v5051_v35 = vsel %vm1212_vm6, %v5043_v19, %v5045_v3 }
 0x32a   : > { %v5068_v58 = vand.u32 %v5050_v16, %v9304_v50  ;;  %v5071_v48 = vand.u32 %v5051_v35, %v9304_v50 }
 0x32b   : > { %v3984_v32 = vpop.f32.mrf.mxu2  ;;  %v3997_v13 = vpop.f32.mrf.mxu3 }
 0x32f   : > { %v4008_v53 = vpop.f32.mrf.mxu0  ;;  %v10679_v47 = vpop.f32.mrf.mxu1 }
 0x330   : > { %8337 = vmatmul.msk.bf16.vlgmr.msra.gmra.mxu2 %vm542_vm3, %v8335_v27  ;;  %8338 = vmatmul.msk.bf16.vlgmr.msra.gmra.mxu3 %vm542_vm3, %v8335_v27  ;;  %v4066_v30 = vadd.f32 %v4008_v53, %v10631_v36  ;;  %v4067_v38 = vadd.f32 %v10679_v47, %v10642_v34 }
 0x331   : > { %5109 = vmatpush.bf16.msra.mxu2 %v5062_v14  ;;  %5122 = vmatpush.bf16.msra.mxu3 %v5065_v5 }
 0x332   : > { %8334 = vmatmul.msk.bf16.vlgmr.msra.gmra.mxu0 %vm542_vm3, %v10622_v63  ;;  %8336 = vmatmul.msk.bf16.vlgmr.msra.gmra.mxu1 %vm542_vm3, %v8335_v27 }
 0x333   : > { %v4034_v41 = vpop.f32.mrf.mxu2  ;;  %v10688_v45 = vpop.f32.mrf.mxu3  ;;  %5096 = vmatpush.bf16.msra.mxu1 %v5059_v21  ;;  %5083 = vmatpush.bf16.msra.mxu0 %v5056_v54 }
 0x334   : > { %v4068_v7 = vadd.f32 %v4034_v41, %v10644_v28  ;;  %v5174_v28 = vld [vmem:[%s12155_s2] sm:$0x3f]  ;;  %v4069_v34 = vadd.f32 %v10688_v45, %v10653_v25  ;;  %s9086_s2 = smov 100  }
 0x335   : > { %5177 = vperm.xlu2 %8961, %v5174_v28  }
 0x337   : > { %v4010_v17 = vpop.f32.mrf.mxu0  ;;  %v4023_v52 = vpop.f32.mrf.mxu1 }
 0x33b   : > { %v4036_v20 = vpop.f32.mrf.mxu2  ;;  %v4049_v40 = vpop.f32.mrf.mxu3 }
 0x33f   : > { %v4060_v63 = vpop.f32.mrf.mxu0  ;;  %v4177_v24 = vpop.f32.mrf.mxu1 }
 0x340   : > { %8341 = vmatmul.msk.bf16.vlgmr.msrb.gmra.mxu2 %vm542_vm3, %v8335_v27  ;;  %8342 = vmatmul.msk.bf16.vlgmr.msrb.gmra.mxu3 %vm542_vm3, %v8335_v27  ;;  %v4070_v33 = vadd.f32 %v4060_v63, %v10655_v15  ;;  %v4065_v15 = vadd.f32 %v10665_v11, %v10629_v59  ;;  %v4259_v5 = vadd.f32 %v4177_v24, %v10668_v57 }
 0x341   : > { %5161 = vmatpush.bf16.msrb.mxu2 %v5074_v51 }
 0x342   : > { %8339 = vmatmul.msk.bf16.vlgmr.msrb.gmra.mxu0 %vm542_vm3, %v8335_v27  ;;  %8340 = vmatmul.msk.bf16.vlgmr.msrb.gmra.mxu1 %vm542_vm3, %v8335_v27 }
 0x343   : > { %v4190_v9 = vpop.f32.mrf.mxu2  ;;  %v4203_v37 = vpop.f32.mrf.mxu3  ;;  %5135 = vmatpush.bf16.msrb.mxu0 %v5068_v58  ;;  %5148 = vmatpush.bf16.msrb.mxu1 %v5071_v48 }
 0x344   : > { %v4261_v62 = vadd.f32 %v4203_v37, %v4066_v30  ;;  %v4260_v2 = vadd.f32 %v4190_v9, %v4065_v15 }
 0x347   : > { %v4062_v8 = vpop.f32.mrf.mxu0  ;;  %v4179_v0 = vpop.f32.mrf.mxu1 }
 0x34b   : > { %v4192_v4 = vpop.f32.mrf.mxu2  ;;  %v4205_v50 = vpop.f32.mrf.mxu3 }
 0x34f   : > { %v4216_v36 = vpop.f32.mrf.mxu0  ;;  %v4229_v23 = vpop.f32.mrf.mxu1 }
 0x350   : > { %v4263_v39 = vadd.f32 %v4229_v23, %v4068_v7  ;;  %8346 = vmatmul.msk.bf16.vlgmr.msra.gmra.mxu2 %vm542_vm3, %v8343_v26  ;;  %8347 = vmatmul.msk.bf16.vlgmr.msra.gmra.mxu3 %vm542_vm3, %v8343_v26  ;;  %v4262_v31 = vadd.f32 %v4216_v36, %v4067_v38 }
 0x352   : > { %8344 = vmatmul.msk.bf16.vlgmr.msra.gmra.mxu0 %vm542_vm3, %v8343_v26  ;;  %8345 = vmatmul.msk.bf16.vlgmr.msra.gmra.mxu1 %vm542_vm3, %v8343_v26 }
 0x353   : > { %v4242_v18 = vpop.f32.mrf.mxu2  ;;  %v4255_v61 = vpop.f32.mrf.mxu3 }
 0x354   : > { %v4265_v6 = vadd.f32 %v4255_v61, %v4070_v33  ;;  %v4264_v60 = vadd.f32 %v4242_v18, %v4069_v34 }
 0x357   : > { %v4218_v49 = vpop.f32.mrf.mxu0  ;;  %v4231_v1 = vpop.f32.mrf.mxu1 }
 0x35b   : > { %v4244_v29 = vpop.f32.mrf.mxu2  ;;  %v4257_v56 = vpop.f32.mrf.mxu3 }
 0x35f   : > { %v4337_v46 = vpop.f32.mrf.mxu0  ;;  %v4350_v22 = vpop.f32.mrf.mxu1 }
 0x360   : > { %v10716_v42 = vadd.f32 %v4350_v22, %v4260_v2  ;;  %8350 = vmatmul.msk.bf16.vlgmr.msrb.gmra.mxu2 %vm542_vm3, %v8343_v26  ;;  %v4419_v47 = vadd.f32 %v4337_v46, %v4259_v5 }
 0x362   : > { %8348 = vmatmul.msk.bf16.vlgmr.msrb.gmra.mxu0 %vm542_vm3, %v8343_v26  ;;  %8349 = vmatmul.msk.bf16.vlgmr.msrb.gmra.mxu1 %vm542_vm3, %v8343_v26  ;;  %vm5200_vm3 = vcmask 1012736  }
 0x363   : > { %v4363_v10 = vpop.f32.mrf.mxu2  ;;  %v4376_v12 = vpop.f32.mrf.mxu3 }
 0x364   : > { %v10721_v32 = vadd.f32 %v4376_v12, %v4262_v31  ;;  %v4421_v40 = vadd.f32 %v4363_v10, %v4261_v62 }
 0x367   : > { %v4339_v59 = vpop.f32.mrf.mxu0  ;;  %v4352_v11 = vpop.f32.mrf.mxu1 }
 0x36b   : > { %v4365_v13 = vpop.f32.mrf.mxu2  ;;  %v4378_v55 = vpop.f32.mrf.mxu3 }
 0x36f   : > { %v4389_v27 = vpop.f32.mrf.mxu0  ;;  %v4402_v14 = vpop.f32.mrf.mxu1 }
 0x370   : > { %v10726_v53 = vadd.f32 %v4402_v14, %v4264_v60  ;;  %v4423_v25 = vadd.f32 %v4389_v27, %v4263_v39 }
 0x373   : > { %v4415_v21 = vpop.f32.mrf.mxu2  ;;  %v4524_v54 = vpop.f32.mrf.mxu3 }
 0x374   : > { %v4606_v41 = vadd.f32 %v4524_v54, %v4419_v47  ;;  %v4425_v30 = vadd.f32 %v4415_v21, %v4265_v6 }
 0x377   : > { %v4391_v17 = vpop.f32.mrf.mxu0  ;;  %v4404_v52 = vpop.f32.mrf.mxu1 }
 0x37b   : > { %v4417_v19 = vpop.f32.mrf.mxu2  ;;  %v4526_v20 = vpop.f32.mrf.mxu3 }
 0x37f   : > { %v4537_v16 = vpop.f32.mrf.mxu0  ;;  %v4550_v3 = vpop.f32.mrf.mxu1 }
 0x380   : > { %v4608_v35 = vadd.f32 %v4550_v3, %v4421_v40  ;;  %v4607_v11 = vadd.f32 %v4537_v16, %v10716_v42 }
 0x383   : > { %v4563_v45 = vpop.f32.mrf.mxu2  ;;  %v4576_v51 = vpop.f32.mrf.mxu3 }
 0x384   : > { %v10728_v63 = vadd.f32 %v4576_v51, %v4423_v25  ;;  %v4609_v27 = vadd.f32 %v4563_v45, %v10721_v32 }
 0x387   : > { %v4539_v57 = vpop.f32.mrf.mxu0  ;;  %v4552_v24 = vpop.f32.mrf.mxu1 }
 0x38b   : > { %v4565_v58 = vpop.f32.mrf.mxu2  ;;  %v4578_v48 = vpop.f32.mrf.mxu3 }
 0x38f   : > { %v10730_v9 = vpop.f32.mrf.mxu0  ;;  %v4602_v37 = vpop.f32.mrf.mxu1 }
 0x390   : > { %v10732_v8 = vadd.f32 %v4602_v37, %v4425_v30  ;;  %v5178_v47 = vpop.permute.xlu2 %5177 }
 0x393   : > { %v4711_v0 = vpop.f32.mrf.mxu2  ;;  %v4724_v62 = vpop.f32.mrf.mxu3 }
 0x394   : > { %v4793_v34 = vadd.f32 %v4711_v0, %v4606_v41  ;;  %v4794_v60 = vadd.f32 %v4724_v62, %v4607_v11  ;;  %v4611_v0 = vadd.f32 %v10730_v9, %v10726_v53 }
 0x397   : > { %v4591_v4 = vpop.f32.mrf.mxu0  ;;  %v4604_v50 = vpop.f32.mrf.mxu1 }
 0x39b   : > { %v4713_v26 = vpop.f32.mrf.mxu2  ;;  %v4726_v7 = vpop.f32.mrf.mxu3 }
 0x39f   : > { %v4737_v36 = vpop.f32.mrf.mxu0  ;;  %v4750_v23 = vpop.f32.mrf.mxu1 }
 0x3a0   : > { %v4795_v17 = vadd.f32 %v4737_v36, %v4608_v35  ;;  %v4796_v52 = vadd.f32 %v4750_v23, %v4609_v27  ;;  %v5323_v27 = vld [vmem:[%s12124_s5 + $0xf0] sm:$0xff] }
 0x3a1   : > { %5520 = vmatpush.msrb.mxu3 %v5323_v27  ;;  %v5299_v27 = vld [vmem:[%s12124_s5 + $0x30] sm:$0xff] }
 0x3a3   : > { %v4763_v39 = vpop.f32.mrf.mxu2  ;;  %v4776_v33 = vpop.f32.mrf.mxu3 }
 0x3a4   : > { %v4797_v50 = vadd.f32 %v4763_v39, %v10728_v63  ;;  %v4798_v26 = vadd.f32 %v4776_v33, %v4611_v0  ;;  %v5385_v0 = vld [vmem:[%s12124_s5 + $0x2e0] sm:$0xff] }
 0x3a7   : > { %v4739_v18 = vpop.f32.mrf.mxu0  ;;  %v4752_v61 = vpop.f32.mrf.mxu1 }
 0x3ab   : > { %v4765_v28 = vpop.f32.mrf.mxu2  ;;  %v4778_v44 = vpop.f32.mrf.mxu3 }
 0x3af   : > { %v4789_v6 = vpop.f32.mrf.mxu0  ;;  %v4898_v49 = vpop.f32.mrf.mxu1 }
 0x3b0   : > { %v4980_v14 = vadd.f32 %v4898_v49, %v4793_v34  ;;  %v4799_v53 = vadd.f32 %v4789_v6, %v10732_v8  ;;  %v5417_v34 = vld [vmem:[%s12124_s5 + $0x3e0] sm:$0xff] }
 0x3b3   : > { %v4911_v1 = vpop.f32.mrf.mxu2  ;;  %v4924_v29 = vpop.f32.mrf.mxu3 }
 0x3b4   : > { %v4981_v5 = vadd.f32 %v4911_v1, %v4794_v60  ;;  %v4982_v40 = vadd.f32 %v4924_v29, %v4795_v17  ;;  %v5415_v60 = vld [vmem:[%s12124_s5 + $0x3d0] sm:$0xff]  ;;  %v5317_v17 = vld [vmem:[%s12124_s5 + $0xc0] sm:$0xff] }
 0x3b7   : > { %v4791_v56 = vpop.f32.mrf.mxu0  ;;  %v4900_v15 = vpop.f32.mrf.mxu1 }
 0x3bb   : > { %v4913_v2 = vpop.f32.mrf.mxu2  ;;  %v4926_v46 = vpop.f32.mrf.mxu3 }
 0x3bf   : > { %v4937_v22 = vpop.f32.mrf.mxu0  ;;  %v4950_v38 = vpop.f32.mrf.mxu1 }
 0x3c0   : > { %v4983_v3 = vadd.f32 %v4937_v22, %v4796_v52  ;;  %v4984_v36 = vadd.f32 %v4950_v38, %v4797_v50  ;;  %v5355_v52 = vld [vmem:[%s12124_s5 + $0x1f0] sm:$0xff] }
 0x3c1   : > { %5540 = vmatpush.msra.mxu0 %v5355_v52  ;;  %v5297_v52 = vld [vmem:[%s12124_s5 + $0x20] sm:$0xff] }
 0x3c3   : > { %v4963_v31 = vpop.f32.mrf.mxu2  ;;  %v4976_v10 = vpop.f32.mrf.mxu3 }
 0x3c4   : > { %v4985_v23 = vadd.f32 %v4963_v31, %v4798_v26  ;;  %v4986_v63 = vadd.f32 %v4976_v10, %v4799_v53  ;;  %v5403_v26 = vld [vmem:[%s12124_s5 + $0x370] sm:$0xff] }
 0x3c7   : > { %v4939_v12 = vpop.f32.mrf.mxu0  ;;  %v4952_v59 = vpop.f32.mrf.mxu1 }
 0x3cb   : > { %v4965_v13 = vpop.f32.mrf.mxu2  ;;  %v4978_v55 = vpop.f32.mrf.mxu3 }
 0x3cc   : > { %v5419_v55 = vld [vmem:[%s12124_s5 + $0x3f0] sm:$0xff] }
 0x3cd   : > { %5580 = vmatpush.msra.mxu2 %v5419_v55  ;;  %v5375_v55 = vld [vmem:[%s12124_s5 + $0x290] sm:$0xff] }
 0x3cf   : > { %v5085_v21 = vpop.f32.mrf.mxu0  ;;  %v5098_v54 = vpop.f32.mrf.mxu1  ;;  %5581 = vmatpush.msra.mxu2 %v5417_v34 }
 0x3d0   : > { %v5167_v19 = vadd.f32 %v5085_v21, %v4980_v14  ;;  %v5168_v20 = vadd.f32 %v5098_v54, %v4981_v5  ;;  %v5413_v14 = vld [vmem:[%s12124_s5 + $0x3c0] sm:$0xff]  ;;  %v5411_v54 = vld [vmem:[%s12124_s5 + $0x3b0] sm:$0xff] }
 0x3d1   : > { %v5321_v5 = vld [vmem:[%s12124_s5 + $0xe0] sm:$0xff]  ;;  %5582 = vmatpush.msra.mxu2 %v5415_v60 }
 0x3d2   : > { %v5180_v25 = vadd.f32 %v5178_v47, %v5167_v19  ;;  %v5181_v51 = vadd.f32 %v5178_v47, %v5168_v20  ;;  %5521 = vmatpush.msrb.mxu3 %v5321_v5  ;;  %v5409_v19 = vld [vmem:[%s12124_s5 + $0x3a0] sm:$0xff]  ;;  %v5335_v5 = vld [vmem:[%s12124_s5 + $0x150] sm:$0xff] }
 0x3d3   : > { %v5111_v42 = vpop.f32.mrf.mxu2  ;;  %v5124_v16 = vpop.f32.mrf.mxu3  ;;  %5583 = vmatpush.msra.mxu2 %v5413_v14  ;;  %v5353_v20 = vld [vmem:[%s12124_s5 + $0x1e0] sm:$0xff] }
 0x3d4   : > { %v5187_v57 = vmax.f32 %v5180_v25, 0.0  ;;  %v5188_v41 = vmax.f32 %v5181_v51, 0.0  ;;  %v5169_v24 = vadd.f32 %v5111_v42, %v4982_v40  ;;  %v5170_v58 = vadd.f32 %v5124_v16, %v4983_v3  ;;  %v5315_v51 = vld [vmem:[%s12124_s5 + $0xb0] sm:$0xff]  ;;  %5541 = vmatpush.msra.mxu0 %v5353_v20  ;;  %v5393_v60 = vld [vmem:[%s12124_s5 + $0x320] sm:$0xff] }
 0x3d5   : > { %5584 = vmatpush.msra.mxu2 %v5411_v54  ;;  %v5351_v42 = vld [vmem:[%s12124_s5 + $0x1d0] sm:$0xff] }
 0x3d6   : > { %5194 = vst [vmem:[#allocation2] sm:$0x3f] %v5187_v57  ;;  %v5182_v32 = vadd.f32 %v5178_v47, %v5169_v24  ;;  %v5183_v45 = vadd.f32 %v5178_v47, %v5170_v58  ;;  %v5313_v24 = vld [vmem:[%s12124_s5 + $0xa0] sm:$0xff]  ;;  %5542 = vmatpush.msra.mxu0 %v5351_v42  ;;  %v5318_v42 = vld [vmem:[%s12124_s5 + $0xc8] sm:$0xff] }
 0x3d7   : > { %5195 = vst [vmem:[#allocation2 + $0x8] sm:$0x3f] %v5188_v41  ;;  %v5087_v48 = vpop.f32.mrf.mxu0  ;;  %v5100_v30 = vpop.f32.mrf.mxu1  ;;  %v5407_v41 = vld [vmem:[%s12124_s5 + $0x390] sm:$0xff]  ;;  %5585 = vmatpush.msra.mxu2 %v5409_v19  ;;  %v5349_v58 = vld [vmem:[%s12124_s5 + $0x1c0] sm:$0xff] }
 0x3d8   : > { %v5189_v35 = vmax.f32 %v5182_v32, 0.0  ;;  %v5190_v37 = vmax.f32 %v5183_v45, 0.0  ;;  %v5405_v32 = vld [vmem:[%s12124_s5 + $0x380] sm:$0xff]  ;;  %v5387_v45 = vld [vmem:[%s12124_s5 + $0x2f0] sm:$0xff]  ;;  %5543 = vmatpush.msra.mxu0 %v5349_v58  ;;  %v5308_v58 = vld [vmem:[%s12124_s5 + $0x78] sm:$0xff] }
 0x3d9   : > { %5586 = vmatpush.msra.mxu2 %v5407_v41  ;;  %5560 = vmatpush.msra.mxu1 %v5387_v45  ;;  %v5312_v41 = vld [vmem:[%s12124_s5 + $0x98] sm:$0xff] }
 0x3da   : > { %5196 = vst [vmem:[#allocation2 + $0x10] sm:$0x3f] %v5189_v35  ;;  %v5311_v35 = vld [vmem:[%s12124_s5 + $0x90] sm:$0xff]  ;;  %v5304_v45 = vld [vmem:[%s12124_s5 + $0x58] sm:$0xff] }
 0x3db   : > { %5197 = vst [vmem:[#allocation2 + $0x18] sm:$0x3f] %v5190_v37  ;;  %v5113_v62 = vpop.f32.mrf.mxu2  ;;  %v5126_v4 = vpop.f32.mrf.mxu3  ;;  %v5347_v37 = vld [vmem:[%s12124_s5 + $0x1b0] sm:$0xff]  ;;  %5587 = vmatpush.msra.mxu2 %v5405_v32  ;;  %5561 = vmatpush.msra.mxu1 %v5385_v0  ;;  %v5306_v32 = vld [vmem:[%s12124_s5 + $0x68] sm:$0xff] }
 0x3dc   : > { %5544 = vmatpush.msra.mxu0 %v5347_v37  ;;  %v5302_v37 = vld [vmem:[%s12124_s5 + $0x48] sm:$0xff]  ;;  %v5447_v0 = vld [vmem:[%s12124_s5 + $0x4d0] sm:$0xff] }
 0x3dd   : > { %v10739_v7 = vld [vmem:[#allocation2] sm:$0x3f]  ;;  %5588 = vmatpush.msra.mxu2 %v5403_v26  ;;  %v5445_v26 = vld [vmem:[%s12124_s5 + $0x4c0] sm:$0xff] }
 0x3de   : > { %v10741_v18 = vld [vmem:[#allocation2 + $0x8] sm:$0x3f] }
 0x3df   : > { %v5137_v61 = vpop.f32.mrf.mxu0  ;;  %v5150_v28 = vpop.f32.mrf.mxu1  ;;  %v8962_v44 = vpack.i.bf16 %v10741_v18, %v10739_v7 }
 0x3e0   : > { %v5171_v9 = vadd.f32 %v5137_v61, %v4984_v36  ;;  %v5172_v49 = vadd.f32 %v5150_v28, %v4985_v23  ;;  %v5383_v36 = vld [vmem:[%s12124_s5 + $0x2d0] sm:$0xff]  ;;  %v5309_v23 = vld [vmem:[%s12124_s5 + $0x80] sm:$0xff] }
 0x3e1   : > { %8963 = vrot.lane.b32.xlu0 %v8962_v44, %s12141_s30  ;;  %v10747_v1 = vld [vmem:[#allocation2 + $0x10] sm:$0x3f]  ;;  %5562 = vmatpush.msra.mxu1 %v5383_v36 }
 0x3e2   : > { %v5184_v39 = vadd.f32 %v5178_v47, %v5171_v9  ;;  %v5185_v33 = vadd.f32 %v5178_v47, %v5172_v49  ;;  %v10749_v29 = vld [vmem:[#allocation2 + $0x18] sm:$0x3f]  ;;  %v5345_v61 = vld [vmem:[%s12124_s5 + $0x1a0] sm:$0xff] }
 0x3e3   : > { %v5163_v56 = vpop.f32.mrf.mxu2  ;;  %v8967_v15 = vpack.i.bf16 %v10749_v29, %v10747_v1  ;;  %v5401_v9 = vld [vmem:[%s12124_s5 + $0x360] sm:$0xff]  ;;  %5545 = vmatpush.msra.mxu0 %v5345_v61  ;;  %v5298_v61 = vld [vmem:[%s12124_s5 + $0x28] sm:$0xff] }
 0x3e4   : > { %v5191_v2 = vmax.f32 %v5184_v39, 0.0  ;;  %v5192_v46 = vmax.f32 %v5185_v33, 0.0  ;;  %v5173_v22 = vadd.f32 %v5163_v56, %v4986_v63  ;;  %v5381_v49 = vld [vmem:[%s12124_s5 + $0x2c0] sm:$0xff]  ;;  %v5307_v56 = vld [vmem:[%s12124_s5 + $0x70] sm:$0xff]  ;;  %5589 = vmatpush.msra.mxu2 %v5401_v9 }
 0x3e5   : > { %8968 = vrot.lane.b32.xlu1 %v8967_v15, %s12141_s30  ;;  %v5343_v15 = vld [vmem:[%s12124_s5 + $0x190] sm:$0xff]  ;;  %5563 = vmatpush.msra.mxu1 %v5381_v49  ;;  %v5329_v36 = vld [vmem:[%s12124_s5 + $0x120] sm:$0xff]  ;;  %v5296_v49 = vld [vmem:[%s12124_s5 + $0x18] sm:$0xff] }
 0x3e6   : > { %5198 = vst [vmem:[#allocation2 + $0x20] sm:$0x3f] %v5191_v2  ;;  %v5186_v8 = vadd.f32 %v5178_v47, %v5173_v22  ;;  %v5319_v47 = vld [vmem:[%s12124_s5 + $0xd0] sm:$0xff]  ;;  %v5305_v2 = vld [vmem:[%s12124_s5 + $0x60] sm:$0xff]  ;;  %5546 = vmatpush.msra.mxu0 %v5343_v15 }
 0x3e7   : > { %5199 = vst [vmem:[#allocation2 + $0x28] sm:$0x3f] %v5192_v46  ;;  %v5139_v6 = vpop.f32.mrf.mxu0  ;;  %v5152_v38 = vpop.f32.mrf.mxu1  ;;  %5522 = vmatpush.msrb.mxu3 %v5319_v47  ;;  %v5341_v46 = vld [vmem:[%s12124_s5 + $0x180] sm:$0xff]  ;;  %v5379_v22 = vld [vmem:[%s12124_s5 + $0x2b0] sm:$0xff] }
 0x3e8   : > { %v5193_v31 = vmax.f32 %v5186_v8, 0.0  ;;  %v5397_v8 = vld [vmem:[%s12124_s5 + $0x340] sm:$0xff]  ;;  %v5303_v6 = vld [vmem:[%s12124_s5 + $0x50] sm:$0xff]  ;;  %5547 = vmatpush.msra.mxu0 %v5341_v46  ;;  %5564 = vmatpush.msra.mxu1 %v5379_v22 }
 0x3e9   : > { %5523 = vmatpush.msrb.mxu3 %v5317_v17  ;;  %v5339_v38 = vld [vmem:[%s12124_s5 + $0x170] sm:$0xff]  ;;  %v5325_v15 = vld [vmem:[%s12124_s5 + $0x100] sm:$0xff] }
 0x3ea   : > { %5201 = vst.msk [vmem:[#allocation2 + $0x30] sm:$0x3f] %vm5200_vm3, %v5193_v31  ;;  %v5377_v31 = vld [vmem:[%s12124_s5 + $0x2a0] sm:$0xff]  ;;  %5548 = vmatpush.msra.mxu0 %v5339_v38  ;;  %v5391_v17 = vld [vmem:[%s12124_s5 + $0x310] sm:$0xff]  ;;  %vm6408_vm3 = vcmask 809984  }
 0x3eb   : > { %v5165_v10 = vpop.f32.mrf.mxu2  ;;  %5524 = vmatpush.msrb.mxu3 %v5315_v51  ;;  %5565 = vmatpush.msra.mxu1 %v5377_v31  ;;  %v5320_v51 = vld [vmem:[%s12124_s5 + $0xd8] sm:$0xff]  ;;  %v5367_v9 = vld [vmem:[%s12124_s5 + $0x250] sm:$0xff]  ;;  %v5437_v22 = vld [vmem:[%s12124_s5 + $0x480] sm:$0xff] }
 0x3ec   : > { %v5395_v10 = vld [vmem:[%s12124_s5 + $0x330] sm:$0xff] }
 0x3ed   : > { %v10754_v12 = vld [vmem:[#allocation2 + $0x20] sm:$0x3f]  ;;  %5525 = vmatpush.msrb.mxu3 %v5313_v24  ;;  %5566 = vmatpush.msra.mxu1 %v5375_v55  ;;  %v5310_v24 = vld [vmem:[%s12124_s5 + $0x88] sm:$0xff]  ;;  %v5357_v55 = vld [vmem:[%s12124_s5 + $0x200] sm:$0xff] }
 0x3ee   : > { %v10756_v59 = vld [vmem:[#allocation2 + $0x28] sm:$0x3f]  ;;  %v5363_v46 = vld [vmem:[%s12124_s5 + $0x230] sm:$0xff] }
 0x3ef   : > { %v8972_v11 = vpack.i.bf16 %v10756_v59, %v10754_v12  ;;  %5526 = vmatpush.msrb.mxu3 %v5311_v35  ;;  %v5373_v35 = vld [vmem:[%s12124_s5 + $0x280] sm:$0xff]  ;;  %v5435_v38 = vld [vmem:[%s12124_s5 + $0x470] sm:$0xff] }
 0x3f0   : > { %5567 = vmatpush.msra.mxu1 %v5373_v35  ;;  %v5479_v31 = vld [vmem:[%s12124_s5 + $0x5d0] sm:$0xff] }
 0x3f1   : > { %8973 = vrot.lane.b32.xlu2 %v8972_v11, %s12141_s30  ;;  %v10761_v13 = vld [vmem:[#allocation2 + $0x30] sm:$0x3f]  ;;  %5527 = vmatpush.msrb.mxu3 %v5309_v23  ;;  %v5459_v35 = vld [vmem:[%s12124_s5 + $0x530] sm:$0xff] }
 0x3f2   : > { %5228 = vrot.lane.b32.xlu0 %v10761_v13, %s12141_s30  ;;  %v5337_v11 = vld [vmem:[%s12124_s5 + $0x160] sm:$0xff]  ;;  %s9087_s30 = smov 110  }
 0x3f3   : > { %5528 = vmatpush.msrb.mxu3 %v5307_v56  ;;  %5549 = vmatpush.msra.mxu0 %v5337_v11  ;;  %v5369_v23 = vld [vmem:[%s12124_s5 + $0x260] sm:$0xff] }
 0x3f4   : > { %v5441_v56 = vld [vmem:[%s12124_s5 + $0x4a0] sm:$0xff] }
 0x3f5   : > { %5529 = vmatpush.msrb.mxu3 %v5305_v2  ;;  %5550 = vmatpush.msra.mxu0 %v5335_v5  ;;  %v5483_v2 = vld [vmem:[%s12124_s5 + $0x5f0] sm:$0xff]  ;;  %v5477_v11 = vld [vmem:[%s12124_s5 + $0x5c0] sm:$0xff] }
 0x3f6   : > { %v5505_v5 = vld [vmem:[%s12124_s5 + $0x6a0] sm:$0xff] }
 0x3f7   : > { %5530 = vmatpush.msrb.mxu3 %v5303_v6  ;;  %v5361_v6 = vld [vmem:[%s12124_s5 + $0x220] sm:$0xff] }
 0x44b   : > { %v10786_v21 = vpop.permute.xlu2 %8973 }
 0x44c   : > { %v8976_v40 = vunpack.i.h.bf16 %v10786_v21  ;;  %v8975_v3 = vunpack.i.l.bf16 %v10786_v21 }
 0x44e   : > { %v5235_v48 = vsel %vm535_vm2, %v8975_v3, %v8976_v40 }
 0x44f   : > { %v10852_v28 = vmax.f32 %v10754_v12, %v5235_v48  ;;  %v5301_v12 = vld [vmem:[%s12124_s5 + $0x40] sm:$0xff] }
 0x450   : > { %5531 = vmatpush.msrb.mxu3 %v5301_v12  ;;  %v5449_v48 = vld [vmem:[%s12124_s5 + $0x4e0] sm:$0xff] }
 0x451   : > { %v5433_v12 = vld [vmem:[%s12124_s5 + $0x460] sm:$0xff] }
 0x452   : > { %5532 = vmatpush.msrb.mxu3 %v5299_v27  ;;  %v5475_v27 = vld [vmem:[%s12124_s5 + $0x5b0] sm:$0xff] }
 0x453   : > { %v8964_v25 = vpop.permute.xlu0 %8963 }
 0x454   : > { %v8966_v16 = vunpack.i.h.bf16 %v8964_v25  ;;  %v8965_v57 = vunpack.i.l.bf16 %v8964_v25  ;;  %5533 = vmatpush.msrb.mxu3 %v5297_v52  ;;  %v5451_v25 = vld [vmem:[%s12124_s5 + $0x4f0] sm:$0xff] }
 0x455   : > { %v5503_v52 = vld [vmem:[%s12124_s5 + $0x690] sm:$0xff] }
 0x456   : > { %v5231_v62 = vsel %vm535_vm2, %v8965_v57, %v8966_v16  ;;  %v5314_v57 = vld [vmem:[%s12124_s5 + $0xa8] sm:$0xff] }
 0x457   : > { %v8969_v30 = vpop.permute.xlu1 %8968  ;;  %v10863_v63 = vmax.f32 %v10739_v7, %v5231_v62  ;;  %v5331_v62 = vld [vmem:[%s12124_s5 + $0x130] sm:$0xff] }
 0x458   : > { %v8971_v4 = vunpack.i.h.bf16 %v8969_v30  ;;  %v8970_v50 = vunpack.i.l.bf16 %v8969_v30  ;;  %v5333_v30 = vld [vmem:[%s12124_s5 + $0x140] sm:$0xff] }
 0x459   : > { %5551 = vmatpush.msra.mxu0 %v5333_v30 }
 0x45a   : > { %v5232_v44 = vsel %vm535_vm2, %v8966_v16, %v8970_v50  ;;  %v5234_v53 = vsel %vm535_vm2, %v8971_v4, %v8975_v3  ;;  %v5233_v34 = vsel %vm535_vm2, %v8970_v50, %v8971_v4  ;;  %v5293_v3 = vld [vmem:[%s12124_s5] sm:$0xff]  ;;  %v5316_v16 = vld [vmem:[%s12124_s5 + $0xb8] sm:$0xff]  ;;  %v5371_v4 = vld [vmem:[%s12124_s5 + $0x270] sm:$0xff] }
 0x45b   : > { %v10866_v39 = vmax.f32 %v10741_v18, %v5232_v44  ;;  %v10869_v33 = vmax.f32 %v10749_v29, %v5234_v53  ;;  %v5399_v29 = vld [vmem:[%s12124_s5 + $0x350] sm:$0xff]  ;;  %v10942_v19 = vmax.f32 %v10747_v1, %v5233_v34  ;;  %v5324_v1 = vld [vmem:[%s12124_s5 + $0xf8] sm:$0xff]  ;;  %5552 = vmatpush.msra.mxu0 %v5331_v62  ;;  %5568 = vmatpush.msra.mxu1 %v5371_v4  ;;  %v5450_v4 = vld [vmem:[%s12124_s5 + $0x4e8] sm:$0xff] }
 0x45c   : > { %5590 = vmatpush.msra.mxu2 %v5399_v29  ;;  %v5300_v50 = vld [vmem:[%s12124_s5 + $0x38] sm:$0xff]  ;;  %v5443_v44 = vld [vmem:[%s12124_s5 + $0x4b0] sm:$0xff] }
 0x45d   : > { %v8982_v7 = vpack.i.bf16 %v10852_v28, %v10869_v33  ;;  %v8977_v18 = vpack.i.bf16 %v10866_v39, %v10863_v63  ;;  %v5327_v53 = vld [vmem:[%s12124_s5 + $0x110] sm:$0xff]  ;;  %5553 = vmatpush.msra.mxu0 %v5329_v36  ;;  %5569 = vmatpush.msra.mxu1 %v5369_v23  ;;  %v5452_v62 = vld [vmem:[%s12124_s5 + $0x4f8] sm:$0xff] }
 0x45e   : > { %5591 = vmatpush.msra.mxu2 %v5397_v8  ;;  %v5439_v29 = vld [vmem:[%s12124_s5 + $0x490] sm:$0xff]  ;;  %v5481_v8 = vld [vmem:[%s12124_s5 + $0x5e0] sm:$0xff]  ;;  %v5448_v23 = vld [vmem:[%s12124_s5 + $0x4d8] sm:$0xff] }
 0x45f   : > { %8983 = vrot.lane.b32.xlu2 %v8982_v7, %s12156_s17  ;;  %8978 = vrot.lane.b32.xlu1 %v8977_v18, %s12156_s17  ;;  %v5365_v7 = vld [vmem:[%s12124_s5 + $0x240] sm:$0xff]  ;;  %v5294_v18 = vld [vmem:[%s12124_s5 + $0x8] sm:$0xff] }
 0x460   : > { %5592 = vmatpush.msra.mxu2 %v5395_v10  ;;  %5554 = vmatpush.msra.mxu0 %v5327_v53  ;;  %v5359_v10 = vld [vmem:[%s12124_s5 + $0x210] sm:$0xff]  ;;  %v5446_v53 = vld [vmem:[%s12124_s5 + $0x4c8] sm:$0xff] }
 0x461   : > { %5570 = vmatpush.msra.mxu1 %v5367_v9  ;;  %v5431_v34 = vld [vmem:[%s12124_s5 + $0x450] sm:$0xff]  ;;  %v5444_v9 = vld [vmem:[%s12124_s5 + $0x4b8] sm:$0xff] }
 0x462   : > { %5593 = vmatpush.msra.mxu2 %v5393_v60  ;;  %5555 = vmatpush.msra.mxu0 %v5325_v15  ;;  %v5507_v60 = vld [vmem:[%s12124_s5 + $0x6b0] sm:$0x7]  ;;  %v5438_v15 = vld [vmem:[%s12124_s5 + $0x488] sm:$0xff] }
 0x463   : > { %5571 = vmatpush.msra.mxu1 %v5365_v7  ;;  %v5487_v36 = vld [vmem:[%s12124_s5 + $0x610] sm:$0xff]  ;;  %v5436_v7 = vld [vmem:[%s12124_s5 + $0x478] sm:$0xff] }
 0x464   : > { %v5229_v14 = vpop.permute.xlu0 %5228  ;;  %5594 = vmatpush.msra.mxu2 %v5391_v17  ;;  %5620 = vmatpush.msrb.mxu0 %v5483_v2  ;;  %v5427_v17 = vld [vmem:[%s12124_s5 + $0x430] sm:$0xff]  ;;  %v5432_v2 = vld [vmem:[%s12124_s5 + $0x458] sm:$0xff] }
 0x465   : > { %v5236_v47 = vsel %vm535_vm2, %v8976_v40, %v5229_v14  ;;  %v10933_v54 = vmax.f32 %v10761_v13, %v5229_v14  ;;  %v5389_v13 = vld [vmem:[%s12124_s5 + $0x300] sm:$0xff]  ;;  %v5322_v40 = vld [vmem:[%s12124_s5 + $0xe8] sm:$0xff]  ;;  %5572 = vmatpush.msra.mxu1 %v5363_v46 }
 0x466   : > { %v10945_v21 = vmax.f32 %v10756_v59, %v5236_v47  ;;  %v5295_v59 = vld [vmem:[%s12124_s5 + $0x10] sm:$0xff]  ;;  %5595 = vmatpush.msra.mxu2 %v5389_v13  ;;  %5621 = vmatpush.msrb.mxu0 %v5481_v8  ;;  %v5429_v14 = vld [vmem:[%s12124_s5 + $0x440] sm:$0xff]  ;;  %v5430_v8 = vld [vmem:[%s12124_s5 + $0x448] sm:$0xff] }
 0x467   : > { %5270 = vrot.lane.b32.xlu1 %v10933_v54, %s12156_s17  ;;  %5534 = vmatpush.msrb.mxu3 %v5295_v59  ;;  %v5473_v47 = vld [vmem:[%s12124_s5 + $0x5a0] sm:$0xff]  ;;  %v5471_v13 = vld [vmem:[%s12124_s5 + $0x590] sm:$0xff] }
 0x468   : > { %v8987_v20 = vpack.i.bf16 %v10945_v21, %v10942_v19  ;;  %5660 = vmatpush.msrb.mxu2 %v5324_v1  ;;  %5573 = vmatpush.msra.mxu1 %v5361_v6  ;;  %v5469_v1 = vld [vmem:[%s12124_s5 + $0x580] sm:$0xff] }
 0x469   : > { %5535 = vmatpush.msrb.mxu3 %v5293_v3  ;;  %5622 = vmatpush.msrb.mxu0 %v5479_v31  ;;  %v5501_v59 = vld [vmem:[%s12124_s5 + $0x680] sm:$0xff]  ;;  %v5467_v3 = vld [vmem:[%s12124_s5 + $0x570] sm:$0xff]  ;;  %v5356_v31 = vld [vmem:[%s12124_s5 + $0x1f8] sm:$0xff] }
 0x46a   : > { %8988 = vrot.lane.b32.xlu0 %v8987_v20, %s12156_s17  ;;  %5661 = vmatpush.msrb.mxu2 %v5322_v40  ;;  %v5425_v20 = vld [vmem:[%s12124_s5 + $0x420] sm:$0xff]  ;;  %v5423_v40 = vld [vmem:[%s12124_s5 + $0x410] sm:$0xff] }
 0x46b   : > { %5600 = vmatpush.msra.mxu3 %v5451_v25  ;;  %5574 = vmatpush.msra.mxu1 %v5359_v10  ;;  %v5499_v25 = vld [vmem:[%s12124_s5 + $0x670] sm:$0xff]  ;;  %v5428_v10 = vld [vmem:[%s12124_s5 + $0x438] sm:$0xff] }
 0x46c   : > { %5662 = vmatpush.msrb.mxu2 %v5320_v51  ;;  %5623 = vmatpush.msrb.mxu0 %v5477_v11  ;;  %v5421_v51 = vld [vmem:[%s12124_s5 + $0x400] sm:$0xff]  ;;  %v5426_v11 = vld [vmem:[%s12124_s5 + $0x428] sm:$0xff] }
 0x46d   : > { %5601 = vmatpush.msra.mxu3 %v5449_v48  ;;  %5575 = vmatpush.msra.mxu1 %v5357_v55  ;;  %v5493_v48 = vld [vmem:[%s12124_s5 + $0x640] sm:$0xff]  ;;  %v5424_v55 = vld [vmem:[%s12124_s5 + $0x418] sm:$0xff] }
 0x46e   : > { %5663 = vmatpush.msrb.mxu2 %v5318_v42  ;;  %5624 = vmatpush.msrb.mxu0 %v5475_v27  ;;  %v5465_v42 = vld [vmem:[%s12124_s5 + $0x560] sm:$0xff] }
 0x46f   : > { %5602 = vmatpush.msra.mxu3 %v5447_v0  ;;  %8351 = vmatpush.msk.msrb.mxu1 %vm5513_vm14, %v5507_v60  ;;  %v5422_v60 = vld [vmem:[%s12124_s5 + $0x408] sm:$0xff] }
 0x470   : > { %5664 = vmatpush.msrb.mxu2 %v5316_v16  ;;  %5625 = vmatpush.msrb.mxu0 %v5473_v47  ;;  %v5497_v16 = vld [vmem:[%s12124_s5 + $0x660] sm:$0xff]  ;;  %v5348_v47 = vld [vmem:[%s12124_s5 + $0x1b8] sm:$0xff] }
 0x471   : > { %5603 = vmatpush.msra.mxu3 %v5445_v26  ;;  %5645 = vmatpush.msrb.mxu1 %v5505_v5  ;;  %v5455_v26 = vld [vmem:[%s12124_s5 + $0x510] sm:$0xff] }
 0x472   : > { %5665 = vmatpush.msrb.mxu2 %v5314_v57  ;;  %5626 = vmatpush.msrb.mxu0 %v5471_v13  ;;  %v5463_v57 = vld [vmem:[%s12124_s5 + $0x550] sm:$0xff] }
 0x473   : > { %5604 = vmatpush.msra.mxu3 %v5443_v44  ;;  %5646 = vmatpush.msrb.mxu1 %v5503_v52  ;;  %v5485_v44 = vld [vmem:[%s12124_s5 + $0x600] sm:$0xff] }
 0x474   : > { %5666 = vmatpush.msrb.mxu2 %v5312_v41  ;;  %5627 = vmatpush.msrb.mxu0 %v5469_v1  ;;  %v5495_v41 = vld [vmem:[%s12124_s5 + $0x650] sm:$0xff] }
 0x475   : > { %5605 = vmatpush.msra.mxu3 %v5441_v56  ;;  %5647 = vmatpush.msrb.mxu1 %v5501_v59  ;;  %v5440_v56 = vld [vmem:[%s12124_s5 + $0x498] sm:$0xff] }
 0x476   : > { %5667 = vmatpush.msrb.mxu2 %v5310_v24  ;;  %5628 = vmatpush.msrb.mxu0 %v5467_v3  ;;  %v5344_v3 = vld [vmem:[%s12124_s5 + $0x198] sm:$0xff] }
 0x477   : > { %5606 = vmatpush.msra.mxu3 %v5439_v29  ;;  %5648 = vmatpush.msrb.mxu1 %v5499_v25  ;;  %v5388_v25 = vld [vmem:[%s12124_s5 + $0x2f8] sm:$0xff] }
 0x478   : > { %5668 = vmatpush.msrb.mxu2 %v5308_v58  ;;  %5629 = vmatpush.msrb.mxu0 %v5465_v42  ;;  %v5340_v42 = vld [vmem:[%s12124_s5 + $0x178] sm:$0xff] }
 0x479   : > { %5607 = vmatpush.msra.mxu3 %v5437_v22  ;;  %5649 = vmatpush.msrb.mxu1 %v5497_v16  ;;  %v5384_v16 = vld [vmem:[%s12124_s5 + $0x2d8] sm:$0xff] }
 0x47a   : > { %5669 = vmatpush.msrb.mxu2 %v5306_v32  ;;  %5630 = vmatpush.msrb.mxu0 %v5463_v57 }
 0x47b   : > { %5608 = vmatpush.msra.mxu3 %v5435_v38  ;;  %5650 = vmatpush.msrb.mxu1 %v5495_v41  ;;  %v5416_v41 = vld [vmem:[%s12124_s5 + $0x3d8] sm:$0xff] }
 0x47c   : > { %5670 = vmatpush.msrb.mxu2 %v5304_v45  ;;  %v5461_v45 = vld [vmem:[%s12124_s5 + $0x540] sm:$0xff] }
 0x47d   : > { %5609 = vmatpush.msra.mxu3 %v5433_v12  ;;  %5651 = vmatpush.msrb.mxu1 %v5493_v48  ;;  %v5354_v12 = vld [vmem:[%s12124_s5 + $0x1e8] sm:$0xff] }
 0x47e   : > { %5671 = vmatpush.msrb.mxu2 %v5302_v37  ;;  %v5491_v37 = vld [vmem:[%s12124_s5 + $0x630] sm:$0xff]  ;;  %5631 = vmatpush.msrb.mxu0 %v5461_v45  ;;  %v5414_v45 = vld [vmem:[%s12124_s5 + $0x3c8] sm:$0xff] }
 0x47f   : > { %5610 = vmatpush.msra.mxu3 %v5431_v34  ;;  %5652 = vmatpush.msrb.mxu1 %v5491_v37  ;;  %v5350_v34 = vld [vmem:[%s12124_s5 + $0x1c8] sm:$0xff]  ;;  %v5380_v37 = vld [vmem:[%s12124_s5 + $0x2b8] sm:$0xff] }
 0x480   : > { %5672 = vmatpush.msrb.mxu2 %v5300_v50  ;;  %5632 = vmatpush.msrb.mxu0 %v5459_v35  ;;  %v5457_v50 = vld [vmem:[%s12124_s5 + $0x520] sm:$0xff] }
 0x481   : > { %5611 = vmatpush.msra.mxu3 %v5429_v14 }
 0x482   : > { %5673 = vmatpush.msrb.mxu2 %v5298_v61  ;;  %5633 = vmatpush.msrb.mxu0 %v5457_v50  ;;  %v5453_v61 = vld [vmem:[%s12124_s5 + $0x500] sm:$0xff]  ;;  %v5332_v50 = vld [vmem:[%s12124_s5 + $0x138] sm:$0xff] }
 0x483   : > { %5612 = vmatpush.msra.mxu3 %v5427_v17 }
 0x484   : > { %5674 = vmatpush.msrb.mxu2 %v5296_v49  ;;  %5634 = vmatpush.msrb.mxu0 %v5455_v26  ;;  %v5442_v49 = vld [vmem:[%s12124_s5 + $0x4a8] sm:$0xff]  ;;  %v5408_v26 = vld [vmem:[%s12124_s5 + $0x398] sm:$0xff] }
 0x485   : > { %5613 = vmatpush.msra.mxu3 %v5425_v20  ;;  %v5346_v20 = vld [vmem:[%s12124_s5 + $0x1a8] sm:$0xff] }
 0x486   : > { %5675 = vmatpush.msrb.mxu2 %v5294_v18  ;;  %5635 = vmatpush.msrb.mxu0 %v5453_v61  ;;  %v5434_v18 = vld [vmem:[%s12124_s5 + $0x468] sm:$0xff] }
 0x487   : > { %5614 = vmatpush.msra.mxu3 %v5423_v40  ;;  %v5406_v61 = vld [vmem:[%s12124_s5 + $0x388] sm:$0xff] }
 0x489   : > { %5615 = vmatpush.msra.mxu3 %v5421_v51  ;;  %v5418_v51 = vld [vmem:[%s12124_s5 + $0x3e8] sm:$0xff] }
 0x4b9   : > { %v11154_v24 = vpop.permute.xlu2 %8983 }
 0x4ba   : > { %v8986_v58 = vunpack.i.h.bf16 %v11154_v24  ;;  %v8985_v32 = vunpack.i.l.bf16 %v11154_v24 }
 0x4bc   : > { %v5276_v30 = vsel %vm1406_vm7, %v8985_v32, %v8986_v58 }
 0x4bd   : > { %v11176_v0 = vmax.f32 %v10869_v33, %v5276_v30  ;;  %v5489_v33 = vld [vmem:[%s12124_s5 + $0x620] sm:$0xff]  ;;  %v5336_v30 = vld [vmem:[%s12124_s5 + $0x158] sm:$0xff] }
 0x4be   : > { %5653 = vmatpush.msrb.mxu1 %v5489_v33  ;;  %v5376_v33 = vld [vmem:[%s12124_s5 + $0x298] sm:$0xff] }
 0x4bf   : > { %5596 = vmatmul.f32.vlgmr.msra.gmra.mxu2 %v11176_v0 }
 0x4c0   : > { %5740 = vmatpush.msra.mxu2 %v5452_v62  ;;  %5654 = vmatpush.msrb.mxu1 %v5487_v36  ;;  %v5412_v62 = vld [vmem:[%s12124_s5 + $0x3b8] sm:$0xff]  ;;  %v5330_v36 = vld [vmem:[%s12124_s5 + $0x128] sm:$0xff] }
 0x4c2   : > { %5741 = vmatpush.msra.mxu2 %v5450_v4  ;;  %5655 = vmatpush.msrb.mxu1 %v5485_v44  ;;  %v5410_v4 = vld [vmem:[%s12124_s5 + $0x3a8] sm:$0xff]  ;;  %v5328_v44 = vld [vmem:[%s12124_s5 + $0x118] sm:$0xff] }
 0x4c4   : > { %5742 = vmatpush.msra.mxu2 %v5448_v23  ;;  %v5374_v23 = vld [vmem:[%s12124_s5 + $0x288] sm:$0xff] }
 0x4c6   : > { %5743 = vmatpush.msra.mxu2 %v5446_v53  ;;  %v5372_v53 = vld [vmem:[%s12124_s5 + $0x278] sm:$0xff] }
 0x4c8   : > { %5744 = vmatpush.msra.mxu2 %v5444_v9  ;;  %v5404_v9 = vld [vmem:[%s12124_s5 + $0x378] sm:$0xff] }
 0x4ca   : > { %5745 = vmatpush.msra.mxu2 %v5442_v49  ;;  %v5326_v49 = vld [vmem:[%s12124_s5 + $0x108] sm:$0xff] }
 0x4cc   : > { %5746 = vmatpush.msra.mxu2 %v5440_v56  ;;  %v5370_v56 = vld [vmem:[%s12124_s5 + $0x268] sm:$0xff] }
 0x4ce   : > { %5747 = vmatpush.msra.mxu2 %v5438_v15  ;;  %v5402_v15 = vld [vmem:[%s12124_s5 + $0x368] sm:$0xff] }
 0x4d0   : > { %5748 = vmatpush.msra.mxu2 %v5436_v7  ;;  %v5484_v7 = vld [vmem:[%s12124_s5 + $0x5f8] sm:$0xff] }
 0x4d1   : > { %v8979_v29 = vpop.permute.xlu1 %8978 }
 0x4d2   : > { %v8981_v46 = vunpack.i.h.bf16 %v8979_v29  ;;  %v8980_v22 = vunpack.i.l.bf16 %v8979_v29  ;;  %5749 = vmatpush.msra.mxu2 %v5434_v18  ;;  %v5368_v18 = vld [vmem:[%s12124_s5 + $0x258] sm:$0xff] }
 0x4d3   : > { %v5400_v29 = vld [vmem:[%s12124_s5 + $0x358] sm:$0xff] }
 0x4d4   : > { %v5273_v6 = vsel %vm1406_vm7, %v8980_v22, %v8981_v46  ;;  %5750 = vmatpush.msra.mxu2 %v5432_v2  ;;  %v5482_v2 = vld [vmem:[%s12124_s5 + $0x5e8] sm:$0xff] }
 0x4d5   : > { %v5286_v38 = vmax.f32 %v10863_v63, %v5273_v6  ;;  %v5352_v63 = vld [vmem:[%s12124_s5 + $0x1d8] sm:$0xff]  ;;  %v5398_v22 = vld [vmem:[%s12124_s5 + $0x348] sm:$0xff] }
 0x4d6   : > { %5751 = vmatpush.msra.mxu2 %v5430_v8  ;;  %v5480_v8 = vld [vmem:[%s12124_s5 + $0x5d8] sm:$0xff] }
 0x4d7   : > { %5536 = vmatmul.f32.vlgmr.msrb.gmra.mxu3 %v5286_v38  ;;  %5676 = vmatmul.f32.vlgmr.msrb.gmra.mxu2 %v5286_v38  ;;  %v5364_v6 = vld [vmem:[%s12124_s5 + $0x238] sm:$0xff] }
 0x4d8   : > { %5680 = vmatpush.msrb.mxu3 %v5356_v31  ;;  %5752 = vmatpush.msra.mxu2 %v5428_v10  ;;  %v5396_v38 = vld [vmem:[%s12124_s5 + $0x338] sm:$0xff]  ;;  %v5478_v31 = vld [vmem:[%s12124_s5 + $0x5c8] sm:$0xff] }
 0x4d9   : > { %v5271_v57 = vpop.permute.xlu1 %5270  ;;  %v5362_v10 = vld [vmem:[%s12124_s5 + $0x228] sm:$0xff] }
 0x4da   : > { %5681 = vmatpush.msrb.mxu3 %v5354_v12  ;;  %5753 = vmatpush.msra.mxu2 %v5426_v11  ;;  %v11319_v48 = vmax.f32 %v10933_v54, %v5271_v57  ;;  %v5334_v54 = vld [vmem:[%s12124_s5 + $0x148] sm:$0xff]  ;;  %v5476_v11 = vld [vmem:[%s12124_s5 + $0x5b8] sm:$0xff] }
 0x4db   : > { %v5394_v12 = vld [vmem:[%s12124_s5 + $0x328] sm:$0xff] }
 0x4dc   : > { %5682 = vmatpush.msrb.mxu3 %v5352_v63  ;;  %v8989_v27 = vpop.permute.xlu0 %8988  ;;  %5754 = vmatpush.msra.mxu2 %v5424_v55  ;;  %v5360_v63 = vld [vmem:[%s12124_s5 + $0x218] sm:$0xff] }
 0x4dd   : > { %v8991_v14 = vunpack.i.h.bf16 %v8989_v27  ;;  %v8990_v5 = vunpack.i.l.bf16 %v8989_v27  ;;  %v5392_v55 = vld [vmem:[%s12124_s5 + $0x318] sm:$0xff]  ;;  %v5390_v27 = vld [vmem:[%s12124_s5 + $0x308] sm:$0xff] }
 0x4de   : > { %5683 = vmatpush.msrb.mxu3 %v5350_v34  ;;  %5755 = vmatpush.msra.mxu2 %v5422_v60  ;;  %v5474_v34 = vld [vmem:[%s12124_s5 + $0x5a8] sm:$0xff] }
 0x4df   : > { %v5277_v17 = vsel %vm1406_vm7, %v8986_v58, %v8991_v14  ;;  %v5274_v52 = vsel %vm1406_vm7, %v8981_v46, %v8990_v5  ;;  %v5275_v13 = vsel %vm1406_vm7, %v8990_v5, %v8985_v32  ;;  %v5278_v24 = vsel %vm1406_vm7, %v8991_v14, %v5271_v57  ;;  %v5338_v58 = vld [vmem:[%s12124_s5 + $0x168] sm:$0xff]  ;;  %v5472_v14 = vld [vmem:[%s12124_s5 + $0x598] sm:$0xff] }
 0x4e0   : > { %v5290_v1 = vmax.f32 %v10852_v28, %v5277_v17  ;;  %v11274_v59 = vmax.f32 %v10866_v39, %v5274_v52  ;;  %v11277_v40 = vmax.f32 %v10942_v19, %v5275_v13  ;;  %5684 = vmatpush.msrb.mxu3 %v5348_v47  ;;  %v5420_v28 = vld [vmem:[%s12124_s5 + $0x3f8] sm:$0xff]  ;;  %v5342_v39 = vld [vmem:[%s12124_s5 + $0x188] sm:$0xff]  ;;  %v11325_v35 = vmax.f32 %v10945_v21, %v5278_v24 }
 0x4e1   : > { %v5386_v19 = vld [vmem:[%s12124_s5 + $0x2e8] sm:$0xff]  ;;  %v5508_v5 = vld [vmem:[%s12124_s5 + $0x6b8] sm:$0x7] }
 0x4e2   : > { %5685 = vmatpush.msrb.mxu3 %v5346_v20  ;;  %5556 = vmatmul.f32.vlgmr.msra.gmra.mxu0 %v11274_v59  ;;  %v5382_v32 = vld [vmem:[%s12124_s5 + $0x2c8] sm:$0xff]  ;;  %v5468_v52 = vld [vmem:[%s12124_s5 + $0x578] sm:$0xff] }
 0x4e3   : > { %5576 = vmatmul.f32.vlgmr.msra.gmra.mxu1 %v11277_v40  ;;  %5616 = vmatmul.f32.vlgmr.msra.gmra.mxu3 %v5290_v1  ;;  %v5378_v21 = vld [vmem:[%s12124_s5 + $0x2a8] sm:$0xff]  ;;  %v5504_v13 = vld [vmem:[%s12124_s5 + $0x698] sm:$0xff] }
 0x4e4   : > { %5686 = vmatpush.msrb.mxu3 %v5344_v3  ;;  %5700 = vmatpush.msra.mxu1 %v5388_v25  ;;  %v5366_v46 = vld [vmem:[%s12124_s5 + $0x248] sm:$0xff]  ;;  %v5460_v25 = vld [vmem:[%s12124_s5 + $0x538] sm:$0xff] }
 0x4e5   : > { %5720 = vmatpush.msra.mxu0 %v5420_v28  ;;  %5756 = vmatmul.f32.vlgmr.msra.gmra.mxu2 %v5290_v1  ;;  %v5358_v60 = vld [vmem:[%s12124_s5 + $0x208] sm:$0xff]  ;;  %v5464_v1 = vld [vmem:[%s12124_s5 + $0x558] sm:$0xff] }
 0x4e6   : > { %5687 = vmatpush.msrb.mxu3 %v5342_v39  ;;  %5701 = vmatpush.msra.mxu1 %v5386_v19  ;;  %v5470_v47 = vld [vmem:[%s12124_s5 + $0x588] sm:$0xff]  ;;  %v5496_v28 = vld [vmem:[%s12124_s5 + $0x658] sm:$0xff] }
 0x4e7   : > { %5721 = vmatpush.msra.mxu0 %v5418_v51  ;;  %v5506_v17 = vld [vmem:[%s12124_s5 + $0x6a8] sm:$0xff]  ;;  %v5456_v51 = vld [vmem:[%s12124_s5 + $0x518] sm:$0xff] }
 0x4e8   : > { %5688 = vmatpush.msrb.mxu3 %v5340_v42  ;;  %5702 = vmatpush.msra.mxu1 %v5384_v16  ;;  %v5502_v20 = vld [vmem:[%s12124_s5 + $0x688] sm:$0xff]  ;;  %v5492_v42 = vld [vmem:[%s12124_s5 + $0x638] sm:$0xff] }
 0x4e9   : > { %5722 = vmatpush.msra.mxu0 %v5416_v41  ;;  %v5498_v3 = vld [vmem:[%s12124_s5 + $0x668] sm:$0xff]  ;;  %v5488_v41 = vld [vmem:[%s12124_s5 + $0x618] sm:$0xff] }
 0x4ea   : > { %5689 = vmatpush.msrb.mxu3 %v5338_v58  ;;  %5703 = vmatpush.msra.mxu1 %v5382_v32  ;;  %v5458_v39 = vld [vmem:[%s12124_s5 + $0x528] sm:$0xff] }
 0x4eb   : > { %5723 = vmatpush.msra.mxu0 %v5414_v45  ;;  %8352 = vmatmul.msk.f32.vlgmr.msrb.gmra.mxu1 %vm5509_vm15, %v11319_v48  ;;  %v5494_v19 = vld [vmem:[%s12124_s5 + $0x648] sm:$0xff] }
 0x4ec   : > { %5636 = vmatmul.f32.vlgmr.msrb.gmra.mxu0 %v11325_v35  ;;  %5690 = vmatpush.msrb.mxu3 %v5336_v30  ;;  %v5454_v16 = vld [vmem:[%s12124_s5 + $0x508] sm:$0xff] }
 0x4ed   : > { %5704 = vmatpush.msra.mxu1 %v5380_v37  ;;  %5724 = vmatpush.msra.mxu0 %v5412_v62  ;;  %v5490_v57 = vld [vmem:[%s12124_s5 + $0x628] sm:$0xff] }
 0x4ee   : > { %5691 = vmatpush.msrb.mxu3 %v5334_v54  ;;  %v5486_v24 = vld [vmem:[%s12124_s5 + $0x608] sm:$0xff] }
 0x4ef   : > { %5705 = vmatpush.msra.mxu1 %v5378_v21  ;;  %5725 = vmatpush.msra.mxu0 %v5410_v4 }
 0x4f0   : > { %5692 = vmatpush.msrb.mxu3 %v5332_v50 }
 0x4f1   : > { %5706 = vmatpush.msra.mxu1 %v5376_v33  ;;  %5726 = vmatpush.msra.mxu0 %v5408_v26 }
 0x4f2   : > { %5693 = vmatpush.msrb.mxu3 %v5330_v36 }
 0x4f3   : > { %5707 = vmatpush.msra.mxu1 %v5374_v23  ;;  %5727 = vmatpush.msra.mxu0 %v5406_v61 }
 0x4f4   : > { %5694 = vmatpush.msrb.mxu3 %v5328_v44 }
 0x4f5   : > { %5708 = vmatpush.msra.mxu1 %v5372_v53  ;;  %5728 = vmatpush.msra.mxu0 %v5404_v9 }
 0x4f6   : > { %5695 = vmatpush.msrb.mxu3 %v5326_v49 }
 0x4f7   : > { %5709 = vmatpush.msra.mxu1 %v5370_v56  ;;  %5729 = vmatpush.msra.mxu0 %v5402_v15 }
 0x4f8   : > { %5696 = vmatmul.f32.vlgmr.msrb.gmra.mxu3 %v11274_v59  ;;  %v5500_v59 = vld [vmem:[%s12124_s5 + $0x678] sm:$0xff] }
 0x4f9   : > { %5760 = vmatpush.msra.mxu3 %v5484_v7  ;;  %5710 = vmatpush.msra.mxu1 %v5368_v18 }
 0x4fa   : > { %5730 = vmatpush.msra.mxu0 %v5400_v29 }
 0x4fb   : > { %5761 = vmatpush.msra.mxu3 %v5482_v2  ;;  %5711 = vmatpush.msra.mxu1 %v5366_v46 }
 0x4fc   : > { %5731 = vmatpush.msra.mxu0 %v5398_v22 }
 0x4fd   : > { %5762 = vmatpush.msra.mxu3 %v5480_v8  ;;  %5712 = vmatpush.msra.mxu1 %v5364_v6 }
 0x4fe   : > { %5732 = vmatpush.msra.mxu0 %v5396_v38  ;;  %v8813_v38 = vld [vmem:[%s12122_s3] sm:$0xff] }
 0x4ff   : > { %5763 = vmatpush.msra.mxu3 %v5478_v31  ;;  %5713 = vmatpush.msra.mxu1 %v5362_v10 }
 0x500   : > { %5733 = vmatpush.msra.mxu0 %v5394_v12 }
 0x501   : > { %5764 = vmatpush.msra.mxu3 %v5476_v11  ;;  %5714 = vmatpush.msra.mxu1 %v5360_v63  ;;  %v8814_v63 = vld [vmem:[%s12122_s3 + $0x8] sm:$0xff] }
 0x502   : > { %5734 = vmatpush.msra.mxu0 %v5392_v55 }
 0x503   : > { %5765 = vmatpush.msra.mxu3 %v5474_v34  ;;  %5715 = vmatpush.msra.mxu1 %v5358_v60 }
 0x504   : > { %5735 = vmatpush.msra.mxu0 %v5390_v27  ;;  %5716 = vmatmul.f32.vlgmr.msra.gmra.mxu1 %v11277_v40  ;;  %v5462_v40 = vld [vmem:[%s12124_s5 + $0x548] sm:$0xff] }
 0x505   : > { %5736 = vmatmul.f32.vlgmr.msra.gmra.mxu0 %v11176_v0  ;;  %5766 = vmatpush.msra.mxu3 %v5472_v14  ;;  %v5466_v0 = vld [vmem:[%s12124_s5 + $0x568] sm:$0xff] }
 0x506   : > { %8353 = vmatpush.msk.msrb.mxu1 %vm5513_vm14, %v5508_v5 }
 0x507   : > { %5767 = vmatpush.msra.mxu3 %v5470_v47  ;;  %v8815_v47 = vld [vmem:[%s12122_s3 + $0x10] sm:$0xff] }
 0x508   : > { %5785 = vmatpush.msrb.mxu1 %v5506_v17 }
 0x509   : > { %5768 = vmatpush.msra.mxu3 %v5468_v52 }
 0x50a   : > { %5786 = vmatpush.msrb.mxu1 %v5504_v13 }
 0x50b   : > { %5769 = vmatpush.msra.mxu3 %v5466_v0 }
 0x50c   : > { %5787 = vmatpush.msrb.mxu1 %v5502_v20 }
 0x50d   : > { %5770 = vmatpush.msra.mxu3 %v5464_v1 }
 0x50e   : > { %5788 = vmatpush.msrb.mxu1 %v5500_v59 }
 0x50f   : > { %5771 = vmatpush.msra.mxu3 %v5462_v40 }
 0x510   : > { %5789 = vmatpush.msrb.mxu1 %v5498_v3 }
 0x511   : > { %5772 = vmatpush.msra.mxu3 %v5460_v25  ;;  %v8817_v25 = vld [vmem:[%s12122_s3 + $0x20] sm:$0xff] }
 0x512   : > { %5790 = vmatpush.msrb.mxu1 %v5496_v28 }
 0x513   : > { %5773 = vmatpush.msra.mxu3 %v5458_v39 }
 0x514   : > { %5791 = vmatpush.msrb.mxu1 %v5494_v19 }
 0x515   : > { %5774 = vmatpush.msra.mxu3 %v5456_v51  ;;  %v8816_v51 = vld [vmem:[%s12122_s3 + $0x18] sm:$0xff] }
 0x516   : > { %5792 = vmatpush.msrb.mxu1 %v5492_v42 }
 0x517   : > { %5775 = vmatpush.msra.mxu3 %v5454_v16 }
 0x518   : > { %5793 = vmatpush.msrb.mxu1 %v5490_v57  ;;  %5776 = vmatmul.f32.vlgmr.msra.gmra.mxu3 %v11325_v35 }
 0x51a   : > { %5794 = vmatpush.msrb.mxu1 %v5488_v41 }
 0x51c   : > { %5795 = vmatpush.msrb.mxu1 %v5486_v24 }
 0x51d   : > { %8354 = vmatmul.msk.f32.vlgmr.msrb.gmra.mxu1 %vm5509_vm15, %v11319_v48  ;;  %vm6518_vm15 = vcmask 793600  }
 0x542   : > { %v5597_v62 = vpop.f32.mrf.mxu2 }
 0x55a   : > { %v5537_v58 = vpop.f32.mrf.mxu3  ;;  %v5677_v61 = vpop.f32.mrf.mxu2 }
 0x55f   : > { %v5557_v32 = vpop.f32.mrf.mxu0 }
 0x560   : > { %v5558_v45 = vadd.f32 %v5557_v32, %v5537_v58  ;;  %v5577_v30 = vpop.f32.mrf.mxu1  ;;  %v7165_v32 = vld [vmem:[%s12123_s4] sm:$0xff] }
 0x562   : > { %v5578_v37 = vadd.f32 %v5577_v30, %v5558_v45 }
 0x564   : > { %v5598_v54 = vadd.f32 %v5597_v62, %v5578_v37 }
 0x566   : > { %v5617_v21 = vpop.f32.mrf.mxu3 }
 0x567   : > { %v5618_v4 = vadd.f32 %v5617_v21, %v5598_v54 }
 0x568   : > { %v5657_v33 = vpop.f32.mrf.mxu1  ;;  %v5757_v15 = vpop.f32.mrf.mxu2 }
 0x569   : > { %v5637_v50 = vpop.f32.mrf.mxu0 }
 0x56a   : > { %v5638_v35 = vadd.f32 %v5637_v50, %v5618_v4  ;;  %v8819_v4 = vld [vmem:[%s12122_s3 + $0x30] sm:$0xff] }
 0x56c   : > { %v5658_v26 = vadd.f32 %v5657_v33, %v5638_v35 }
 0x56e   : > { %5800 = vst [vmem:[#allocation3] sm:$0x3f] %v5658_v26  ;;  %v8818_v26 = vld [vmem:[%s12122_s3 + $0x28] sm:$0xff] }
 0x575   : > { %v5803_v36 = vld [vmem:[#allocation3] sm:$0x3f] }
 0x576   : > { %v11508_v23 = vpack.c.bf16 %v5803_v36, %v5803_v36 }
 0x578   : > { %5912 = vrot.lane.b32.xlu1 %v11508_v23, %s12157_s22  ;;  %5819 = vrot.lane.b32.xlu0 %v11508_v23, %s12158_s0  ;;  %v5871_v34 = vsel %vm5513_vm14, %v11508_v23, 0 }
 0x57b   : > { %v5697_v48 = vpop.f32.mrf.mxu3 }
 0x57c   : > { %v5698_v53 = vadd.f32 %v5697_v48, %v5677_v61 }
 0x580   : > { %6020 = vrot.lane.b32.xlu0 %v11508_v23, %s12154_s20 }
 0x581   : > { %v5717_v44 = vpop.f32.mrf.mxu1 }
 0x582   : > { %v5718_v9 = vadd.f32 %v5717_v44, %v5698_v53  ;;  %v5737_v49 = vpop.f32.mrf.mxu0 }
 0x584   : > { %v5738_v56 = vadd.f32 %v5737_v49, %v5718_v9 }
 0x586   : > { %v5758_v7 = vadd.f32 %v5757_v15, %v5738_v56 }
 0x59a   : > { %v5797_v2 = vpop.f32.mrf.mxu1 }
 0x59b   : > { %v5777_v18 = vpop.f32.mrf.mxu3 }
 0x59c   : > { %v5778_v29 = vadd.f32 %v5777_v18, %v5758_v7  ;;  %v8821_v18 = vld [vmem:[%s12122_s3 + $0x40] sm:$0xff] }
 0x59e   : > { %v5798_v46 = vadd.f32 %v5797_v2, %v5778_v29 }
 0x5a0   : > { %5802 = vst.msk [vmem:[#allocation3 + $0x8] sm:$0x3f] %vm5801_vm8, %v5798_v46  ;;  %vm6627_vm8 = vcmask 703488  }
 0x5a7   : > { %v5804_v22 = vld [vmem:[#allocation3 + $0x8] sm:$0x3f] }
 0x5a8   : > { %v11516_v8 = vpack.c.bf16 %v5804_v22, %v5804_v22  ;;  %v8820_v22 = vld [vmem:[%s12122_s3 + $0x38] sm:$0xff] }
 0x5aa   : > { %5821 = vrot.lane.b32.xlu2 %v11516_v8, %s12158_s0  ;;  %6022 = vrot.lane.b32.xlu1 %v11516_v8, %s12154_s20  ;;  %v5874_v6 = vsel %vm5513_vm14, %v11516_v8, 0  ;;  %s9084_s20 = smov 111  }
 0x5ab   : > { %5968 = vrot.lane.b32.xlu0 %v11516_v8, %s12153_s16  ;;  %5897 = vmatpush.bf16.msra.mxu1 %v5874_v6 }
 0x5ae   : > { %8368 = vmatmul.msk.bf16.vlgmr.msra.gmra.mxu1 %vm5824_vm9, %v8813_v38 }
 0x5b2   : > { %5914 = vrot.lane.b32.xlu2 %v11516_v8, %s12157_s22  ;;  %6129 = vrot.lane.b32.xlu1 %v11508_v23, %s9082_s27  ;;  %s9092_s22 = smov 86  }
 0x5b3   : > { %6074 = vrot.lane.b32.xlu0 %v11508_v23, %s9083_s15 }
 0x5ba   : > { %5966 = vrot.lane.b32.xlu2 %v11508_v23, %s12153_s16  ;;  %6076 = vrot.lane.b32.xlu1 %v11516_v8, %s9083_s15  ;;  %s9088_s16 = smov 98  }
 0x5bb   : > { %6241 = vrot.lane.b32.xlu0 %v11516_v8, %s9084_s20 }
 0x5c2   : > { %6131 = vrot.lane.b32.xlu2 %v11516_v8, %s9082_s27  ;;  %6184 = vrot.lane.b32.xlu1 %v11508_v23, %s9085_s1 }
 0x5c3   : > { %6349 = vrot.lane.b32.xlu0 %v11508_v23, %s9086_s2 }
 0x5ca   : > { %6239 = vrot.lane.b32.xlu2 %v11508_v23, %s9084_s20  ;;  %6351 = vrot.lane.b32.xlu1 %v11516_v8, %s9086_s2  ;;  %s9094_s2 = smov 84   ;;  %s9099_s20 = smov 68  }
 0x5cb   : > { %6296 = vrot.lane.b32.xlu0 %v11516_v8, %s9087_s30 }
 0x5d2   : > { %6186 = vrot.lane.b32.xlu2 %v11516_v8, %s9085_s1  ;;  %6459 = vrot.lane.b32.xlu1 %v11508_v23, %s9088_s16  ;;  %s9093_s1 = smov 83  }
 0x5d3   : > { %6404 = vrot.lane.b32.xlu0 %v11508_v23, %s9089_s24 }
 0x5da   : > { %6294 = vrot.lane.b32.xlu2 %v11508_v23, %s9087_s30  ;;  %6406 = vrot.lane.b32.xlu1 %v11516_v8, %s9089_s24  ;;  %s9096_s30 = smov 82  }
 0x5db   : > { %6571 = vrot.lane.b32.xlu0 %v11516_v8, %s12156_s17 }
 0x5e2   : > { %6461 = vrot.lane.b32.xlu2 %v11516_v8, %s9088_s16  ;;  %6514 = vrot.lane.b32.xlu1 %v11508_v23, %s9090_s21  ;;  %s9097_s16 = smov 70  }
 0x5e3   : > { %6678 = vrot.lane.b32.xlu0 %v11508_v23, %s9091_s23 }
 0x5ea   : > { %6569 = vrot.lane.b32.xlu2 %v11508_v23, %s12156_s17  ;;  %6680 = vrot.lane.b32.xlu1 %v11516_v8, %s9091_s23  ;;  %s9095_s17 = smov 72   ;;  %v5820_v31 = vpop.permute.xlu0 %5819  ;;  %s9098_s23 = smov 71   ;;  %v5913_v60 = vpop.permute.xlu1 %5912 }
 0x5eb   : > { %6625 = vrot.lane.b32.xlu0 %v11516_v8, %s9092_s22 }
 0x5f2   : > { %6516 = vrot.lane.b32.xlu2 %v11516_v8, %s9090_s21  ;;  %6788 = vrot.lane.b32.xlu1 %v11508_v23, %s9093_s1  ;;  %v6021_v13 = vpop.permute.xlu0 %6020 }
 0x5f3   : > { %6733 = vrot.lane.b32.xlu0 %v11508_v23, %s9094_s2 }
 0x5fa   : > { %6623 = vrot.lane.b32.xlu2 %v11508_v23, %s9092_s22  ;;  %6735 = vrot.lane.b32.xlu1 %v11516_v8, %s9094_s2  ;;  %s8087_s2 = scalar_lea.hbm %s12132_s13, %s9192_s29  ;;  %s9017_s22 = scalar_lea.hbm %s12132_s13, 2 }
 0x5fb   : > { %6900 = vrot.lane.b32.xlu0 %v11516_v8, %s9095_s17 }
 0x602   : > { %6790 = vrot.lane.b32.xlu2 %v11516_v8, %s9093_s1  ;;  %6843 = vrot.lane.b32.xlu1 %v11508_v23, %s9096_s30  ;;  %s9100_s1 = smov 69  }
 0x603   : > { %7008 = vrot.lane.b32.xlu0 %v11508_v23, %s9097_s16 }
 0x604   : > { %v5822_v10 = vpop.permute.xlu2 %5821 }
 0x605   : > { %v5823_v12 = vsel %vm535_vm2, %v5820_v31, %v5822_v10  ;;  %v5832_v11 = vsel %vm5513_vm14, %v5822_v10, 0 }
 0x606   : > { %v5829_v55 = vsel %vm5513_vm14, %v5823_v12, 0  ;;  %5855 = vmatpush.bf16.msrb.mxu2 %v5832_v11 }
 0x607   : > { %5841 = vmatpush.bf16.msrb.mxu0 %v5829_v55 }
 0x609   : > { %8362 = vmatmul.msk.bf16.vlgmr.msrb.gmra.mxu2 %vm5824_vm9, %v8814_v63 }
 0x60a   : > { %6898 = vrot.lane.b32.xlu2 %v11508_v23, %s9095_s17  ;;  %7010 = vrot.lane.b32.xlu1 %v11516_v8, %s9097_s16  ;;  %s8091_s16 = sshll.u32 %s8087_s2, 4  ;;  %s8092_s16 = int_to_ptr.hbm [resolvable:$true] %s8091_s16 }
 0x60b   : > { %5883 = vmatpush.bf16.msra.mxu0 %v5871_v34  ;;  %6955 = vrot.lane.b32.xlu0 %v11516_v8, %s9098_s23  ;;  %s9011_s24 = sshra.s32 %s8092_s16, 4  ;;  %s9012_s24 = int_to_ptr.hbm [resolvable:$true] %s9011_s24 }
 0x60c   : > { %8361 = vmatmul.msk.bf16.vlgmr.msrb.gmra.mxu0 %vm5824_vm9, %v8814_v63  ;;  %v5915_v27 = vpop.permute.xlu2 %5914  ;;  %s9013_s29 = scalar_lea.hbm %s9012_s24, 1  ;;  %p9018_p0 = scmp.lt.s32.totalorder %s9012_s24, %s12132_s13 }
 0x60d   : > { %v5916_v14 = vsel %vm836_vm4, %v5913_v60, %v5915_v27  ;;  %v5924_v5 = vsel %vm5513_vm14, %v5915_v27, 0  ;;  %vm6133_vm4 = vcmask 924672   ;;  %v8823_v27 = vld [vmem:[%s12122_s3 + $0x50] sm:$0xff]  ;;  %p9014_p11 = scmp.ne.s32.totalorder %s9012_s24, %s9013_s29  ;;  %p9019_p1 = scmp.lt.s32.totalorder %s9017_s22, %s9013_s29 }
 0x60e   : > { %v5921_v17 = vsel %vm5513_vm14, %v5916_v14, 0  ;;  %5947 = vmatpush.bf16.msrb.mxu3 %v5924_v5  ;;  %v8822_v5 = vld [vmem:[%s12122_s3 + $0x48] sm:$0xff] }
 0x60f   : > { %5933 = vmatpush.bf16.msra.mxu2 %v5921_v17  ;;  %p9015_p12 = pnand %p9014_p11, %p9209_p5  ;;  %p9020_p2 = por %p9019_p1, %p9018_p0 }
 0x611   : > { %8376 = vmatmul.msk.bf16.vlgmr.msrb.gmra.mxu3 %vm5824_vm9, %v8815_v47  ;;  %p9016_p13 = pneg %p9015_p12 }
 0x612   : > { %6845 = vrot.lane.b32.xlu2 %v11516_v8, %s9096_s30  ;;  %7118 = vrot.lane.b32.xlu1 %v11508_v23, %s9099_s20 }
 0x613   : > { %7063 = vrot.lane.b32.xlu0 %v11508_v23, %s9100_s1  ;;  %p9021_p3 = pnand %p9020_p2, %p9016_p13 }
 0x614   : > { %v5967_v52 = vpop.permute.xlu2 %5966 }
 0x619   : > { %8375 = vmatmul.msk.bf16.vlgmr.msra.gmra.mxu2 %vm5824_vm9, %v8815_v47 }
 0x61a   : > { %6953 = vrot.lane.b32.xlu2 %v11508_v23, %s9098_s23  ;;  %7065 = vrot.lane.b32.xlu1 %v11516_v8, %s9100_s1 }
 0x61c   : > { %8367 = vmatmul.msk.bf16.vlgmr.msra.gmra.mxu0 %vm5824_vm9, %v8813_v38  ;;  %v6132_v0 = vpop.permute.xlu2 %6131  ;;  %v6023_v20 = vpop.permute.xlu1 %6022 }
 0x61d   : > { %v6142_v1 = vsel %vm5513_vm14, %v6132_v0, 0  ;;  %v6024_v59 = vsel %vm1212_vm6, %v6021_v13, %v6023_v20  ;;  %v6032_v40 = vsel %vm5513_vm14, %v6023_v20, 0  ;;  %v5969_v3 = vpop.permute.xlu0 %5968  ;;  %vm6243_vm6 = vcmask 908288  }
 0x61e   : > { %v6029_v28 = vsel %vm5513_vm14, %v6024_v59, 0  ;;  %v5970_v39 = vsel %vm1024_vm5, %v5967_v52, %v5969_v3  ;;  %v5978_v19 = vsel %vm5513_vm14, %v5969_v3, 0  ;;  %6055 = vmatpush.bf16.msra.mxu3 %v6032_v40  ;;  %vm6078_vm5 = vcmask 932864  }
 0x61f   : > { %v5975_v42 = vsel %vm5513_vm14, %v5970_v39, 0  ;;  %6001 = vmatpush.bf16.msrb.mxu1 %v5978_v19  ;;  %6041 = vmatpush.bf16.msrb.mxu2 %v6029_v28  ;;  %v8824_v28 = vld [vmem:[%s12122_s3 + $0x58] sm:$0xff] }
 0x620   : > { %5987 = vmatpush.bf16.msrb.mxu0 %v5975_v42 }
 0x621   : > { %8392 = vmatmul.msk.bf16.vlgmr.msra.gmra.mxu3 %vm5824_vm9, %v8817_v25 }
 0x622   : > { %6165 = vmatpush.bf16.msrb.mxu3 %v6142_v1  ;;  %8384 = vmatmul.msk.bf16.vlgmr.msrb.gmra.mxu1 %vm5824_vm9, %v8816_v51 }
 0x623   : > { %7120 = vrot.lane.b32.xlu2 %v11516_v8, %s9099_s20  ;;  %s431_s20 = sand.u32 1, %s9051_s26  }
 0x624   : > { %v6240_v16 = vpop.permute.xlu2 %6239  ;;  %v6130_v57 = vpop.permute.xlu1 %6129  ;;  %s432_s17 = scalar_lea.vmem [#allocation6], %s431_s20 }
 0x625   : > { %v6134_v41 = vsel %vm6133_vm4, %v6130_v57, %v6132_v0  ;;  %v6075_v24 = vpop.permute.xlu0 %6074  ;;  %vm6792_vm4 = vcmask 678912   ;;  %s8089_s30 = sshll.u32 %s432_s17, 4  ;;  %s8090_s30 = int_to_ptr.vmem [resolvable:$true] %s8089_s30 }
 0x626   : > { %v6139_v58 = vsel %vm5513_vm14, %v6134_v41, 0 }
 0x627   : > { %6151 = vmatpush.bf16.msra.mxu2 %v6139_v58 }
 0x629   : > { %8391 = vmatmul.msk.bf16.vlgmr.msrb.gmra.mxu2 %vm5824_vm9, %v8817_v25  ;;  %v8825_v25 = vld [vmem:[%s12122_s3 + $0x60] sm:$0xff] }
 0x62b   : > { %7169 = vperm.xlu2 %8961, %v7165_v32  }
 0x62c   : > { %8383 = vmatmul.msk.bf16.vlgmr.msrb.gmra.mxu0 %vm5824_vm9, %v8816_v51  ;;  %v6187_v45 = vpop.permute.xlu2 %6186  ;;  %v6077_v30 = vpop.permute.xlu1 %6076 }
 0x62d   : > { %v6197_v37 = vsel %vm5513_vm14, %v6187_v45, 0  ;;  %v6079_v62 = vsel %vm6078_vm5, %v6075_v24, %v6077_v30  ;;  %v6087_v54 = vsel %vm5513_vm14, %v6077_v30, 0  ;;  %v6242_v21 = vpop.permute.xlu0 %6241  ;;  %v8826_v30 = vld [vmem:[%s12122_s3 + $0x68] sm:$0xff] }
 0x62e   : > { %v6084_v50 = vsel %vm5513_vm14, %v6079_v62, 0  ;;  %v6244_v35 = vsel %vm6243_vm6, %v6240_v16, %v6242_v21  ;;  %v6252_v33 = vsel %vm5513_vm14, %v6242_v21, 0  ;;  %6110 = vmatpush.bf16.msra.mxu1 %v6087_v54  ;;  %vm6737_vm6 = vcmask 687104  }
 0x62f   : > { %v6249_v36 = vsel %vm5513_vm14, %v6244_v35, 0  ;;  %6275 = vmatpush.bf16.msra.mxu3 %v6252_v33  ;;  %6096 = vmatpush.bf16.msra.mxu0 %v6084_v50 }
 0x630   : > { %6261 = vmatpush.bf16.msrb.mxu2 %v6249_v36 }
 0x631   : > { %8408 = vmatmul.msk.bf16.vlgmr.msrb.gmra.mxu3 %vm5824_vm9, %v8819_v4 }
 0x632   : > { %6220 = vmatpush.bf16.msrb.mxu1 %v6197_v37 }
 0x633   : > { %8400 = vmatmul.msk.bf16.vlgmr.msra.gmra.mxu1 %vm5824_vm9, %v8818_v26 }
 0x634   : > { %v6295_v23 = vpop.permute.xlu2 %6294  ;;  %v6185_v48 = vpop.permute.xlu1 %6184 }
 0x635   : > { %v6189_v61 = vsel %vm6188_vm10, %v6185_v48, %v6187_v45  ;;  %v6350_v44 = vpop.permute.xlu0 %6349  ;;  %v8827_v45 = vld [vmem:[%s12122_s3 + $0x70] sm:$0xff]  ;;  %v8828_v48 = vld [vmem:[%s12122_s3 + $0x78] sm:$0xff]  ;;  %vm6902_vm10 = vcmask 588800  }
 0x636   : > { %v6194_v53 = vsel %vm5513_vm14, %v6189_v61, 0 }
 0x637   : > { %6206 = vmatpush.bf16.msrb.mxu0 %v6194_v53 }
 0x639   : > { %8407 = vmatmul.msk.bf16.vlgmr.msra.gmra.mxu2 %vm5824_vm9, %v8819_v4 }
 0x63c   : > { %8399 = vmatmul.msk.bf16.vlgmr.msra.gmra.mxu0 %vm5824_vm9, %v8818_v26  ;;  %v6462_v9 = vpop.permute.xlu2 %6461  ;;  %v6352_v49 = vpop.permute.xlu1 %6351 }
 0x63d   : > { %v6354_v56 = vsel %vm6353_vm11, %v6350_v44, %v6352_v49  ;;  %v6362_v15 = vsel %vm5513_vm14, %v6352_v49, 0  ;;  %v6297_v7 = vpop.permute.xlu0 %6296  ;;  %v6472_v6 = vsel %vm5513_vm14, %v6462_v9, 0  ;;  %vm6847_vm11 = vcmask 670720  }
 0x63e   : > { %v6359_v29 = vsel %vm5513_vm14, %v6354_v56, 0  ;;  %v6299_v2 = vsel %vm6298_vm12, %v6295_v23, %v6297_v7  ;;  %v6307_v46 = vsel %vm5513_vm14, %v6297_v7, 0  ;;  %6385 = vmatpush.bf16.msrb.mxu3 %v6362_v15  ;;  %v8829_v23 = vld [vmem:[%s12122_s3 + $0x80] sm:$0xff]  ;;  %vm7012_vm12 = vcmask 572416  }
 0x63f   : > { %v6304_v8 = vsel %vm5513_vm14, %v6299_v2, 0  ;;  %6330 = vmatpush.bf16.msra.mxu1 %v6307_v46  ;;  %6371 = vmatpush.bf16.msra.mxu2 %v6359_v29  ;;  %v5899_v29 = vpop.f32.mrf.mxu1 }
 0x640   : > { %6316 = vmatpush.bf16.msra.mxu0 %v6304_v8 }
 0x641   : > { %8424 = vmatmul.msk.bf16.vlgmr.msra.gmra.mxu3 %vm5824_vm9, %v8821_v18 }
 0x642   : > { %6495 = vmatpush.bf16.msra.mxu3 %v6472_v6  ;;  %v8831_v6 = vld [vmem:[%s12122_s3 + $0x90] sm:$0xff] }
 0x643   : > { %8416 = vmatmul.msk.bf16.vlgmr.msrb.gmra.mxu1 %vm5824_vm9, %v8820_v22 }
 0x644   : > { %v6460_v38 = vpop.permute.xlu1 %6459  ;;  %v6570_v31 = vpop.permute.xlu2 %6569 }
 0x645   : > { %v6405_v10 = vpop.permute.xlu0 %6404  ;;  %v6464_v12 = vsel %vm6463_vm13, %v6460_v38, %v6462_v9  ;;  %v8830_v38 = vld [vmem:[%s12122_s3 + $0x88] sm:$0xff]  ;;  %vm6957_vm13 = vcmask 580608  }
 0x646   : > { %v6469_v11 = vsel %vm5513_vm14, %v6464_v12, 0 }
 0x649   : > { %8423 = vmatmul.msk.bf16.vlgmr.msrb.gmra.mxu2 %vm5824_vm9, %v8821_v18 }
 0x64a   : > { %6481 = vmatpush.bf16.msrb.mxu2 %v6469_v11 }
 0x64c   : > { %8415 = vmatmul.msk.bf16.vlgmr.msrb.gmra.mxu0 %vm5824_vm9, %v8820_v22  ;;  %v6407_v63 = vpop.permute.xlu1 %6406  ;;  %v6517_v47 = vpop.permute.xlu2 %6516 }
 0x64d   : > { %v6409_v55 = vsel %vm6408_vm3, %v6405_v10, %v6407_v63  ;;  %v6417_v34 = vsel %vm5513_vm14, %v6407_v63, 0  ;;  %v6572_v60 = vpop.permute.xlu0 %6571  ;;  %v6527_v52 = vsel %vm5513_vm14, %v6517_v47, 0  ;;  %vm7122_vm3 = vcmask 556032  }
 0x64e   : > { %v6414_v14 = vsel %vm5513_vm14, %v6409_v55, 0  ;;  %6440 = vmatpush.bf16.msrb.mxu1 %v6417_v34  ;;  %v6581_v17 = vsel %vm5513_vm14, %v6572_v60, 0  ;;  %v6573_v20 = vsel %vm1406_vm7, %v6570_v31, %v6572_v60  ;;  %vm6682_vm7 = vcmask 695296  }
 0x64f   : > { %6426 = vmatpush.bf16.msrb.mxu0 %v6414_v14  ;;  %v6578_v59 = vsel %vm5513_vm14, %v6573_v20, 0 }
 0x651   : > { %8440 = vmatmul.msk.bf16.vlgmr.msrb.gmra.mxu3 %vm5824_vm9, %v8823_v27 }
 0x652   : > { %6604 = vmatpush.bf16.msrb.mxu3 %v6581_v17 }
 0x653   : > { %8432 = vmatmul.msk.bf16.vlgmr.msra.gmra.mxu1 %vm5824_vm9, %v8822_v5 }
 0x654   : > { %6550 = vmatpush.bf16.msra.mxu1 %v6527_v52  ;;  %v6515_v13 = vpop.permute.xlu1 %6514  ;;  %v6624_v19 = vpop.permute.xlu2 %6623 }
 0x655   : > { %v6679_v0 = vpop.permute.xlu0 %6678  ;;  %v6519_v1 = vsel %vm6518_vm15, %v6515_v13, %v6517_v47  ;;  %vm7067_vm15 = vcmask 564224  }
 0x656   : > { %v6524_v40 = vsel %vm5513_vm14, %v6519_v1, 0 }
 0x659   : > { %8439 = vmatmul.msk.bf16.vlgmr.msra.gmra.mxu2 %vm5824_vm9, %v8823_v27 }
 0x65a   : > { %6590 = vmatpush.bf16.msra.mxu2 %v6578_v59 }
 0x65c   : > { %8431 = vmatmul.msk.bf16.vlgmr.msra.gmra.mxu0 %vm5824_vm9, %v8822_v5  ;;  %v6681_v3 = vpop.permute.xlu1 %6680  ;;  %v6791_v58 = vpop.permute.xlu2 %6790 }
 0x65d   : > { %6536 = vmatpush.bf16.msra.mxu0 %v6524_v40  ;;  %v6626_v39 = vpop.permute.xlu0 %6625  ;;  %v6691_v51 = vsel %vm5513_vm14, %v6681_v3, 0  ;;  %v6683_v57 = vsel %vm6682_vm7, %v6679_v0, %v6681_v3  ;;  %v6801_v62 = vsel %vm5513_vm14, %v6791_v58, 0  ;;  %v11725_v5 = vpop.f32.mrf.mxu1  ;;  %v8833_v40 = vld [vmem:[%s12122_s3 + $0xa0] sm:$0xff]  ;;  %vm8052_vm7 = vcmask 73728  }
 0x65e   : > { %v6636_v42 = vsel %vm5513_vm14, %v6626_v39, 0  ;;  %v6628_v41 = vsel %vm6627_vm8, %v6624_v19, %v6626_v39  ;;  %v6688_v24 = vsel %vm5513_vm14, %v6683_v57, 0 }
 0x65f   : > { %v6633_v32 = vsel %vm5513_vm14, %v6628_v41, 0 }
 0x661   : > { %8456 = vmatmul.msk.bf16.vlgmr.msra.gmra.mxu3 %vm5824_vm9, %v8825_v25 }
 0x662   : > { %6714 = vmatpush.bf16.msra.mxu3 %v6691_v51 }
 0x663   : > { %8448 = vmatmul.msk.bf16.vlgmr.msrb.gmra.mxu1 %vm5824_vm9, %v8824_v28 }
 0x664   : > { %6659 = vmatpush.bf16.msrb.mxu1 %v6636_v42  ;;  %v6789_v16 = vpop.permute.xlu1 %6788  ;;  %v6899_v4 = vpop.permute.xlu2 %6898 }
 0x665   : > { %v6734_v54 = vpop.permute.xlu0 %6733  ;;  %v6793_v50 = vsel %vm6792_vm4, %v6789_v16, %v6791_v58 }
 0x666   : > { %v6798_v33 = vsel %vm5513_vm14, %v6793_v50, 0 }
 0x669   : > { %8455 = vmatmul.msk.bf16.vlgmr.msrb.gmra.mxu2 %vm5824_vm9, %v8825_v25  ;;  %v8832_v25 = vld [vmem:[%s12122_s3 + $0x98] sm:$0xff] }
 0x66a   : > { %6700 = vmatpush.bf16.msrb.mxu2 %v6688_v24 }
 0x66c   : > { %8447 = vmatmul.msk.bf16.vlgmr.msrb.gmra.mxu0 %vm5824_vm9, %v8824_v28  ;;  %v6736_v37 = vpop.permute.xlu1 %6735  ;;  %v6846_v61 = vpop.permute.xlu2 %6845 }
 0x66d   : > { %6645 = vmatpush.bf16.msrb.mxu0 %v6633_v32  ;;  %v6746_v21 = vsel %vm5513_vm14, %v6736_v37, 0  ;;  %v6738_v35 = vsel %vm6737_vm6, %v6734_v54, %v6736_v37  ;;  %v6901_v36 = vpop.permute.xlu0 %6900  ;;  %v6856_v9 = vsel %vm5513_vm14, %v6846_v61, 0 }
 0x66e   : > { %v6743_v26 = vsel %vm5513_vm14, %v6738_v35, 0  ;;  %v6911_v44 = vsel %vm5513_vm14, %v6901_v36, 0  ;;  %v6903_v56 = vsel %vm6902_vm10, %v6899_v4, %v6901_v36 }
 0x66f   : > { %v6908_v18 = vsel %vm5513_vm14, %v6903_v56, 0 }
 0x671   : > { %8472 = vmatmul.msk.bf16.vlgmr.msrb.gmra.mxu3 %vm5824_vm9, %v8827_v45 }
 0x672   : > { %6824 = vmatpush.bf16.msrb.mxu3 %v6801_v62 }
 0x673   : > { %8464 = vmatmul.msk.bf16.vlgmr.msra.gmra.mxu1 %vm5824_vm9, %v8826_v30 }
 0x674   : > { %6769 = vmatpush.bf16.msra.mxu1 %v6746_v21  ;;  %v6844_v53 = vpop.permute.xlu1 %6843  ;;  %v6954_v63 = vpop.permute.xlu2 %6953 }
 0x675   : > { %v7009_v49 = vpop.permute.xlu0 %7008  ;;  %v6848_v15 = vsel %vm6847_vm11, %v6844_v53, %v6846_v61 }
 0x676   : > { %v6853_v2 = vsel %vm5513_vm14, %v6848_v15, 0  ;;  %v7166_v15 = vld [vmem:[%s12123_s4 + $0x8] sm:$0xff] }
 0x677   : > { %7174 = vperm.xlu0 %8992, %v7166_v15  }
 0x679   : > { %8471 = vmatmul.msk.bf16.vlgmr.msra.gmra.mxu2 %vm5824_vm9, %v8827_v45 }
 0x67a   : > { %6810 = vmatpush.bf16.msra.mxu2 %v6798_v33  ;;  %v8835_v33 = vld [vmem:[%s12122_s3 + $0xb0] sm:$0xff] }
 0x67c   : > { %8463 = vmatmul.msk.bf16.vlgmr.msra.gmra.mxu0 %vm5824_vm9, %v8826_v30  ;;  %v7011_v46 = vpop.permute.xlu1 %7010 }
 0x67d   : > { %6755 = vmatpush.bf16.msra.mxu0 %v6743_v26  ;;  %v6956_v31 = vpop.permute.xlu0 %6955  ;;  %v7021_v12 = vsel %vm5513_vm14, %v7011_v46, 0  ;;  %v7013_v14 = vsel %vm7012_vm12, %v7009_v49, %v7011_v46  ;;  %v7121_v3 = vpop.permute.xlu2 %7120  ;;  %v8834_v26 = vld [vmem:[%s12122_s3 + $0xa8] sm:$0xff]  ;;  %v8836_v46 = vld [vmem:[%s12122_s3 + $0xb8] sm:$0xff] }
 0x67e   : > { %v6966_v11 = vsel %vm5513_vm14, %v6956_v31, 0  ;;  %v6958_v47 = vsel %vm6957_vm13, %v6954_v63, %v6956_v31  ;;  %v7018_v52 = vsel %vm5513_vm14, %v7013_v14, 0  ;;  %v7131_v42 = vsel %vm5513_vm14, %v7121_v3, 0 }
 0x67f   : > { %v6963_v13 = vsel %vm5513_vm14, %v6958_v47, 0 }
 0x681   : > { %8488 = vmatmul.msk.bf16.vlgmr.msra.gmra.mxu3 %vm5824_vm9, %v8829_v23 }
 0x682   : > { %6934 = vmatpush.bf16.msra.mxu3 %v6911_v44 }
 0x683   : > { %8480 = vmatmul.msk.bf16.vlgmr.msrb.gmra.mxu1 %vm5824_vm9, %v8828_v48 }
 0x684   : > { %6879 = vmatpush.bf16.msrb.mxu1 %v6856_v9  ;;  %v7119_v60 = vpop.permute.xlu1 %7118 }
 0x685   : > { %v7123_v58 = vsel %vm7122_vm3, %v7119_v60, %v7121_v3  ;;  %v7064_v32 = vpop.permute.xlu0 %7063 }
 0x686   : > { %v7128_v62 = vsel %vm5513_vm14, %v7123_v58, 0 }
 0x689   : > { %v5843_v7 = vpop.f32.mrf.mxu0  ;;  %8487 = vmatmul.msk.bf16.vlgmr.msrb.gmra.mxu2 %vm5824_vm9, %v8829_v23 }
 0x68a   : > { %6920 = vmatpush.bf16.msrb.mxu2 %v6908_v18 }
 0x68c   : > { %8479 = vmatmul.msk.bf16.vlgmr.msrb.gmra.mxu0 %vm5824_vm9, %v8828_v48  ;;  %v5857_v22 = vpop.f32.mrf.mxu2  ;;  %v7066_v28 = vpop.permute.xlu1 %7065 }
 0x68d   : > { %6865 = vmatpush.bf16.msrb.mxu0 %v6853_v2  ;;  %v5900_v8 = vadd.f32 %v5899_v29, %v5857_v22  ;;  %v7076_v16 = vsel %vm5513_vm14, %v7066_v28, 0  ;;  %v7068_v30 = vsel %vm7067_vm15, %v7064_v32, %v7066_v28  ;;  %v8837_v2 = vld [vmem:[%s12122_s3 + $0xc0] sm:$0xff] }
 0x68e   : > { %v7073_v21 = vsel %vm5513_vm14, %v7068_v30, 0  ;;  %vm7186_vm14 = vcmask 64512  }
 0x691   : > { %v11717_v10 = vpop.f32.mrf.mxu0  ;;  %8504 = vmatmul.msk.bf16.vlgmr.msrb.gmra.mxu3 %vm5824_vm9, %v8831_v6 }
 0x692   : > { %7044 = vmatpush.bf16.msrb.mxu3 %v7021_v12 }
 0x693   : > { %8496 = vmatmul.msk.bf16.vlgmr.msra.gmra.mxu1 %vm5824_vm9, %v8830_v38 }
 0x694   : > { %6989 = vmatpush.bf16.msra.mxu1 %v6966_v11  ;;  %v11723_v55 = vpop.f32.mrf.mxu2  ;;  %v5949_v34 = vpop.f32.mrf.mxu3 }
 0x695   : > { %v5955_v27 = vadd.f32 %v5949_v34, %v5900_v8 }
 0x699   : > { %v5885_v17 = vpop.f32.mrf.mxu0  ;;  %8503 = vmatmul.msk.bf16.vlgmr.msra.gmra.mxu2 %vm5824_vm9, %v8831_v6 }
 0x69a   : > { %7030 = vmatpush.bf16.msra.mxu2 %v7018_v52  ;;  %v5886_v0 = vadd.f32 %v5885_v17, %v5843_v7 }
 0x69c   : > { %8495 = vmatmul.msk.bf16.vlgmr.msra.gmra.mxu0 %vm5824_vm9, %v8830_v38  ;;  %v5935_v20 = vpop.f32.mrf.mxu2  ;;  %v11731_v1 = vpop.f32.mrf.mxu3 }
 0x69d   : > { %6975 = vmatpush.bf16.msra.mxu0 %v6963_v13  ;;  %v5954_v59 = vadd.f32 %v5935_v20, %v5886_v0  ;;  %v5902_v20 = vadd.f32 %v11725_v5, %v11723_v55 }
 0x69f   : > { %v6003_v39 = vpop.f32.mrf.mxu1  ;;  %v5957_v28 = vadd.f32 %v11731_v1, %v5902_v20 }
 0x6a0   : > { %v6009_v19 = vadd.f32 %v6003_v39, %v5955_v27 }
 0x6a1   : > { %v11739_v51 = vpop.f32.mrf.mxu0  ;;  %8520 = vmatmul.msk.bf16.vlgmr.msra.gmra.mxu3 %vm5824_vm9, %v8833_v40 }
 0x6a2   : > { %7154 = vmatpush.bf16.msra.mxu3 %v7131_v42  ;;  %v5888_v13 = vadd.f32 %v11739_v51, %v11717_v10 }
 0x6a3   : > { %8512 = vmatmul.msk.bf16.vlgmr.msrb.gmra.mxu1 %vm5824_vm9, %v8832_v25 }
 0x6a4   : > { %7099 = vmatpush.bf16.msrb.mxu1 %v7076_v16  ;;  %v5937_v57 = vpop.f32.mrf.mxu2  ;;  %v6057_v41 = vpop.f32.mrf.mxu3 }
 0x6a5   : > { %v6063_v24 = vadd.f32 %v6057_v41, %v6009_v19  ;;  %v5956_v0 = vadd.f32 %v5937_v57, %v5888_v13 }
 0x6a7   : > { %v11745_v45 = vpop.f32.mrf.mxu1 }
 0x6a8   : > { %v6011_v42 = vadd.f32 %v11745_v45, %v5957_v28 }
 0x6a9   : > { %v5989_v37 = vpop.f32.mrf.mxu0  ;;  %8519 = vmatmul.msk.bf16.vlgmr.msrb.gmra.mxu2 %vm5824_vm9, %v8833_v40 }
 0x6aa   : > { %v6008_v54 = vadd.f32 %v5989_v37, %v5954_v59  ;;  %7140 = vmatpush.bf16.msrb.mxu2 %v7128_v62 }
 0x6ac   : > { %8511 = vmatmul.msk.bf16.vlgmr.msrb.gmra.mxu0 %vm5824_vm9, %v8832_v25  ;;  %v6043_v4 = vpop.f32.mrf.mxu2  ;;  %v6059_v50 = vpop.f32.mrf.mxu3 }
 0x6ad   : > { %7085 = vmatpush.bf16.msrb.mxu0 %v7073_v21  ;;  %v6062_v35 = vadd.f32 %v6043_v4, %v6008_v54  ;;  %v6065_v58 = vadd.f32 %v6059_v50, %v6011_v42 }
 0x6b0   : > { %v6112_v36 = vpop.f32.mrf.mxu1 }
 0x6b1   : > { %v6118_v23 = vadd.f32 %v6112_v36, %v6063_v24  ;;  %v5991_v48 = vpop.f32.mrf.mxu0  ;;  %8536 = vmatmul.msk.bf16.vlgmr.msrb.gmra.mxu3 %vm5824_vm9, %v8835_v33 }
 0x6b2   : > { %v6010_v3 = vadd.f32 %v5991_v48, %v5956_v0 }
 0x6b3   : > { %8528 = vmatmul.msk.bf16.vlgmr.msra.gmra.mxu1 %vm5824_vm9, %v8834_v26 }
 0x6b4   : > { %v6045_v61 = vpop.f32.mrf.mxu2  ;;  %v6167_v44 = vpop.f32.mrf.mxu3 }
 0x6b5   : > { %v6173_v53 = vadd.f32 %v6167_v44, %v6118_v23  ;;  %v6064_v39 = vadd.f32 %v6045_v61, %v6010_v3 }
 0x6b8   : > { %v6114_v9 = vpop.f32.mrf.mxu1 }
 0x6b9   : > { %v6098_v49 = vpop.f32.mrf.mxu0  ;;  %8535 = vmatmul.msk.bf16.vlgmr.msra.gmra.mxu2 %vm5824_vm9, %v8835_v33  ;;  %v6120_v10 = vadd.f32 %v6114_v9, %v6065_v58 }
 0x6ba   : > { %v6117_v56 = vadd.f32 %v6098_v49, %v6062_v35 }
 0x6bc   : > { %8527 = vmatmul.msk.bf16.vlgmr.msra.gmra.mxu0 %vm5824_vm9, %v8834_v26  ;;  %v6153_v7 = vpop.f32.mrf.mxu2  ;;  %v6169_v18 = vpop.f32.mrf.mxu3 }
 0x6bd   : > { %v6172_v29 = vadd.f32 %v6153_v7, %v6117_v56  ;;  %v6175_v5 = vadd.f32 %v6169_v18, %v6120_v10 }
 0x6c0   : > { %v6222_v22 = vpop.f32.mrf.mxu1 }
 0x6c1   : > { %v6228_v8 = vadd.f32 %v6222_v22, %v6173_v53  ;;  %v6100_v6 = vpop.f32.mrf.mxu0  ;;  %8552 = vmatmul.msk.bf16.vlgmr.msra.gmra.mxu3 %vm5824_vm9, %v8837_v2 }
 0x6c2   : > { %v6119_v41 = vadd.f32 %v6100_v6, %v6064_v39 }
 0x6c3   : > { %8544 = vmatmul.msk.bf16.vlgmr.msrb.gmra.mxu1 %vm5824_vm9, %v8836_v46 }
 0x6c4   : > { %v6155_v38 = vpop.f32.mrf.mxu2  ;;  %v6277_v31 = vpop.f32.mrf.mxu3 }
 0x6c5   : > { %v6283_v12 = vadd.f32 %v6277_v31, %v6228_v8  ;;  %v6174_v32 = vadd.f32 %v6155_v38, %v6119_v41 }
 0x6c8   : > { %v6224_v11 = vpop.f32.mrf.mxu1 }
 0x6c9   : > { %v6208_v63 = vpop.f32.mrf.mxu0  ;;  %8551 = vmatmul.msk.bf16.vlgmr.msrb.gmra.mxu2 %vm5824_vm9, %v8837_v2  ;;  %v6230_v54 = vadd.f32 %v6224_v11, %v6175_v5 }
 0x6ca   : > { %v6227_v34 = vadd.f32 %v6208_v63, %v6172_v29 }
 0x6cc   : > { %8543 = vmatmul.msk.bf16.vlgmr.msrb.gmra.mxu0 %vm5824_vm9, %v8836_v46  ;;  %v6263_v60 = vpop.f32.mrf.mxu2  ;;  %v6279_v27 = vpop.f32.mrf.mxu3  ;;  %vm7319_vm9 = vcmask 1044480  }
 0x6cd   : > { %v6282_v14 = vadd.f32 %v6263_v60, %v6227_v34  ;;  %v6285_v35 = vadd.f32 %v6279_v27, %v6230_v54 }
 0x6d0   : > { %v6332_v47 = vpop.f32.mrf.mxu1 }
 0x6d1   : > { %v6338_v17 = vadd.f32 %v6332_v47, %v6283_v12  ;;  %v6210_v52 = vpop.f32.mrf.mxu0 }
 0x6d2   : > { %v6229_v30 = vadd.f32 %v6210_v52, %v6174_v32 }
 0x6d4   : > { %v6265_v59 = vpop.f32.mrf.mxu2  ;;  %v6387_v40 = vpop.f32.mrf.mxu3 }
 0x6d5   : > { %v6393_v25 = vadd.f32 %v6387_v40, %v6338_v17  ;;  %v6284_v37 = vadd.f32 %v6265_v59, %v6229_v30 }
 0x6d8   : > { %v6334_v19 = vpop.f32.mrf.mxu1 }
 0x6d9   : > { %v6318_v16 = vpop.f32.mrf.mxu0  ;;  %v6340_v33 = vadd.f32 %v6334_v19, %v6285_v35 }
 0x6da   : > { %v6337_v24 = vadd.f32 %v6318_v16, %v6282_v14 }
 0x6dc   : > { %v6373_v51 = vpop.f32.mrf.mxu2  ;;  %v6389_v57 = vpop.f32.mrf.mxu3 }
 0x6dd   : > { %v6392_v55 = vadd.f32 %v6373_v51, %v6337_v24  ;;  %v6395_v23 = vadd.f32 %v6389_v57, %v6340_v33 }
 0x6e0   : > { %v6442_v62 = vpop.f32.mrf.mxu1 }
 0x6e1   : > { %v6448_v21 = vadd.f32 %v6442_v62, %v6393_v25  ;;  %v6320_v1 = vpop.f32.mrf.mxu0 }
 0x6e2   : > { %v6339_v4 = vadd.f32 %v6320_v1, %v6284_v37 }
 0x6e4   : > { %v6375_v45 = vpop.f32.mrf.mxu2  ;;  %v6497_v26 = vpop.f32.mrf.mxu3 }
 0x6e5   : > { %v6503_v36 = vadd.f32 %v6497_v26, %v6448_v21  ;;  %v6394_v15 = vadd.f32 %v6375_v45, %v6339_v4 }
 0x6e8   : > { %v6444_v50 = vpop.f32.mrf.mxu1 }
 0x6e9   : > { %v6450_v48 = vadd.f32 %v6444_v50, %v6395_v23  ;;  %v6428_v61 = vpop.f32.mrf.mxu0 }
 0x6ea   : > { %v6447_v44 = vadd.f32 %v6428_v61, %v6392_v55 }
 0x6ec   : > { %v6483_v53 = vpop.f32.mrf.mxu2  ;;  %v6499_v9 = vpop.f32.mrf.mxu3 }
 0x6ed   : > { %v6502_v49 = vadd.f32 %v6483_v53, %v6447_v44  ;;  %v6505_v56 = vadd.f32 %v6499_v9, %v6450_v48 }
 0x6f0   : > { %v6552_v7 = vpop.f32.mrf.mxu1 }
 0x6f1   : > { %v6430_v18 = vpop.f32.mrf.mxu0  ;;  %v6558_v58 = vadd.f32 %v6552_v7, %v6503_v36 }
 0x6f2   : > { %v6449_v29 = vadd.f32 %v6430_v18, %v6394_v15 }
 0x6f4   : > { %v6485_v2 = vpop.f32.mrf.mxu2  ;;  %v6606_v46 = vpop.f32.mrf.mxu3 }
 0x6f5   : > { %v6504_v22 = vadd.f32 %v6485_v2, %v6449_v29  ;;  %v6612_v51 = vadd.f32 %v6606_v46, %v6558_v58 }
 0x6f8   : > { %v6554_v8 = vpop.f32.mrf.mxu1 }
 0x6f9   : > { %v6538_v6 = vpop.f32.mrf.mxu0  ;;  %v6560_v37 = vadd.f32 %v6554_v8, %v6505_v56 }
 0x6fa   : > { %v6557_v62 = vadd.f32 %v6538_v6, %v6502_v49 }
 0x6fc   : > { %v6592_v38 = vpop.f32.mrf.mxu2  ;;  %v6608_v31 = vpop.f32.mrf.mxu3 }
 0x6fd   : > { %v6611_v4 = vadd.f32 %v6592_v38, %v6557_v62  ;;  %v6614_v35 = vadd.f32 %v6608_v31, %v6560_v37 }
 0x700   : > { %v6661_v12 = vpop.f32.mrf.mxu1 }
 0x701   : > { %v6540_v11 = vpop.f32.mrf.mxu0  ;;  %v6667_v57 = vadd.f32 %v6661_v12, %v6612_v51 }
 0x702   : > { %v6559_v53 = vadd.f32 %v6540_v11, %v6504_v22  ;;  %v7170_v22 = vpop.permute.xlu2 %7169 }
 0x704   : > { %v6594_v63 = vpop.f32.mrf.mxu2  ;;  %v6716_v34 = vpop.f32.mrf.mxu3 }
 0x705   : > { %v6722_v5 = vadd.f32 %v6716_v34, %v6667_v57  ;;  %v6613_v18 = vadd.f32 %v6594_v63, %v6559_v53 }
 0x708   : > { %v6663_v60 = vpop.f32.mrf.mxu1 }
 0x709   : > { %v6647_v27 = vpop.f32.mrf.mxu0  ;;  %v6669_v45 = vadd.f32 %v6663_v60, %v6614_v35 }
 0x70a   : > { %v6666_v26 = vadd.f32 %v6647_v27, %v6611_v4 }
 0x70c   : > { %v6702_v14 = vpop.f32.mrf.mxu2  ;;  %v6718_v47 = vpop.f32.mrf.mxu3 }
 0x70d   : > { %v6721_v48 = vadd.f32 %v6702_v14, %v6666_v26  ;;  %v6724_v61 = vadd.f32 %v6718_v47, %v6669_v45 }
 0x710   : > { %v6771_v17 = vpop.f32.mrf.mxu1 }
 0x711   : > { %v6649_v52 = vpop.f32.mrf.mxu0  ;;  %v6777_v54 = vadd.f32 %v6771_v17, %v6722_v5 }
 0x712   : > { %v6668_v8 = vadd.f32 %v6649_v52, %v6613_v18  ;;  %v7249_v18 = vld [vmem:[%s12125_s6 + $0x50] sm:$0xff] }
 0x714   : > { %v6704_v13 = vpop.f32.mrf.mxu2  ;;  %v6826_v0 = vpop.f32.mrf.mxu3 }
 0x715   : > { %v6832_v33 = vadd.f32 %v6826_v0, %v6777_v54  ;;  %v6723_v60 = vadd.f32 %v6704_v13, %v6668_v8  ;;  %v7245_v8 = vld [vmem:[%s12125_s6 + $0x30] sm:$0xff] }
 0x718   : > { %v6773_v20 = vpop.f32.mrf.mxu1 }
 0x719   : > { %v6757_v59 = vpop.f32.mrf.mxu0  ;;  %v6779_v9 = vadd.f32 %v6773_v20, %v6724_v61 }
 0x71a   : > { %v6776_v15 = vadd.f32 %v6757_v59, %v6721_v48 }
 0x71c   : > { %v6812_v40 = vpop.f32.mrf.mxu2  ;;  %v6828_v3 = vpop.f32.mrf.mxu3 }
 0x71d   : > { %v6831_v29 = vadd.f32 %v6812_v40, %v6776_v15  ;;  %v6834_v2 = vadd.f32 %v6828_v3, %v6779_v9  ;;  %v7254_v9 = vld [vmem:[%s12125_s6 + $0x78] sm:$0x1]  ;;  %v7253_v15 = vld [vmem:[%s12125_s6 + $0x70] sm:$0xff] }
 0x71e   : > { %8553 = vmatpush.msk.msra.mxu0 %vm546_vm0, %v7254_v9  ;;  %vm7255_vm0 = vcmask 990208   ;;  %v8844_v9 = vld [vmem:[%s12126_s7 + $0x30] sm:$0xff] }
 0x720   : > { %v6881_v25 = vpop.f32.mrf.mxu1  ;;  %7266 = vmatpush.msra.mxu0 %v7253_v15  ;;  %v8846_v15 = vld [vmem:[%s12126_s7 + $0x40] sm:$0xff] }
 0x721   : > { %v6759_v28 = vpop.f32.mrf.mxu0  ;;  %v6887_v23 = vadd.f32 %v6881_v25, %v6832_v33 }
 0x722   : > { %v6778_v11 = vadd.f32 %v6759_v28, %v6723_v60  ;;  %v7239_v60 = vld [vmem:[%s12125_s6] sm:$0xff] }
 0x724   : > { %v6814_v39 = vpop.f32.mrf.mxu2  ;;  %v6936_v19 = vpop.f32.mrf.mxu3 }
 0x725   : > { %v6942_v44 = vadd.f32 %v6936_v19, %v6887_v23  ;;  %v6833_v40 = vadd.f32 %v6814_v39, %v6778_v11 }
 0x728   : > { %v6883_v42 = vpop.f32.mrf.mxu1 }
 0x729   : > { %v6867_v16 = vpop.f32.mrf.mxu0  ;;  %v6889_v6 = vadd.f32 %v6883_v42, %v6834_v2  ;;  %v7247_v2 = vld [vmem:[%s12125_s6 + $0x40] sm:$0xff] }
 0x72a   : > { %v6886_v38 = vadd.f32 %v6867_v16, %v6831_v29  ;;  %v7175_v16 = vpop.permute.xlu0 %7174  ;;  %v7248_v29 = vld [vmem:[%s12125_s6 + $0x48] sm:$0xff] }
 0x72c   : > { %v6922_v41 = vpop.f32.mrf.mxu2  ;;  %v6938_v24 = vpop.f32.mrf.mxu3 }
 0x72d   : > { %v6941_v27 = vadd.f32 %v6922_v41, %v6886_v38  ;;  %v6944_v14 = vadd.f32 %v6938_v24, %v6889_v6  ;;  %v7244_v6 = vld [vmem:[%s12125_s6 + $0x28] sm:$0xff]  ;;  %v7243_v38 = vld [vmem:[%s12125_s6 + $0x20] sm:$0xff] }
 0x730   : > { %v6991_v32 = vpop.f32.mrf.mxu1 }
 0x731   : > { %v6869_v10 = vpop.f32.mrf.mxu0  ;;  %v6997_v7 = vadd.f32 %v6991_v32, %v6942_v44 }
 0x732   : > { %v6888_v19 = vadd.f32 %v6869_v10, %v6833_v40  ;;  %v8566_v40 = vld [vmem:[%s12126_s7 + $0x18] sm:$0xf] }
 0x734   : > { %v6924_v30 = vpop.f32.mrf.mxu2  ;;  %v7046_v55 = vpop.f32.mrf.mxu3 }
 0x735   : > { %v7052_v46 = vadd.f32 %v7046_v55, %v6997_v7  ;;  %v6943_v58 = vadd.f32 %v6924_v30, %v6888_v19  ;;  %v7252_v7 = vld [vmem:[%s12125_s6 + $0x68] sm:$0xff] }
 0x736   : > { %7267 = vmatpush.msra.mxu0 %v7252_v7  ;;  %v8575_v19 = vld [vmem:[%s12126_s7 + $0x8] sm:$0xf]  ;;  %v8848_v7 = vld [vmem:[%s12126_s7 + $0x50] sm:$0xff] }
 0x738   : > { %v6993_v21 = vpop.f32.mrf.mxu1 }
 0x739   : > { %v6977_v1 = vpop.f32.mrf.mxu0  ;;  %v6999_v17 = vadd.f32 %v6993_v21, %v6944_v14 }
 0x73a   : > { %v6996_v0 = vadd.f32 %v6977_v1, %v6941_v27 }
 0x73c   : > { %v7032_v50 = vpop.f32.mrf.mxu2  ;;  %v7048_v36 = vpop.f32.mrf.mxu3 }
 0x73d   : > { %v7051_v3 = vadd.f32 %v7032_v50, %v6996_v0  ;;  %v7054_v52 = vadd.f32 %v7048_v36, %v6999_v17 }
 0x740   : > { %v7101_v56 = vpop.f32.mrf.mxu1 }
 0x741   : > { %v6979_v49 = vpop.f32.mrf.mxu0  ;;  %v7107_v31 = vadd.f32 %v7101_v56, %v7052_v46  ;;  %v7251_v56 = vld [vmem:[%s12125_s6 + $0x60] sm:$0xff]  ;;  %v7246_v46 = vld [vmem:[%s12125_s6 + $0x38] sm:$0xff] }
 0x742   : > { %v6998_v51 = vadd.f32 %v6979_v49, %v6943_v58  ;;  %v7250_v49 = vld [vmem:[%s12125_s6 + $0x58] sm:$0xff]  ;;  %7268 = vmatpush.msra.mxu0 %v7251_v56  ;;  %v8858_v56 = vld [vmem:[%s12126_s7 + $0xa0] sm:$0xff] }
 0x744   : > { %v7034_v12 = vpop.f32.mrf.mxu2  ;;  %v7156_v34 = vpop.f32.mrf.mxu3  ;;  %7269 = vmatpush.msra.mxu0 %v7250_v49 }
 0x745   : > { %v7162_v47 = vadd.f32 %v7156_v34, %v7107_v31  ;;  %v7053_v37 = vadd.f32 %v7034_v12, %v6998_v51  ;;  %v7242_v31 = vld [vmem:[%s12125_s6 + $0x18] sm:$0xff]  ;;  %v7241_v12 = vld [vmem:[%s12125_s6 + $0x10] sm:$0xff]  ;;  %v7240_v34 = vld [vmem:[%s12125_s6 + $0x8] sm:$0xff] }
 0x746   : > { %7270 = vmatpush.msra.mxu0 %v7249_v18  ;;  %v8653_v18 = vld [vmem:[%s12126_s7 + $0x78] sm:$0xf] }
 0x747   : > { %v7178_v20 = vadd.f32 %v7170_v22, %v7162_v47 }
 0x748   : > { %v7103_v63 = vpop.f32.mrf.mxu1  ;;  %7271 = vmatpush.msra.mxu0 %v7248_v29  ;;  %v8853_v29 = vld [vmem:[%s12126_s7 + $0x78] sm:$0x10] }
 0x749   : > { %v7087_v59 = vpop.f32.mrf.mxu0  ;;  %v7182_v25 = vmax.f32 %v7178_v20, 0.0  ;;  %v7109_v42 = vadd.f32 %v7103_v63, %v7054_v52 }
 0x74a   : > { %v7106_v13 = vadd.f32 %v7087_v59, %v7051_v3  ;;  %7272 = vmatpush.msra.mxu0 %v7247_v2  ;;  %v8841_v3 = vld [vmem:[%s12126_s7 + $0x18] sm:$0x10]  ;;  %v8666_v2 = vld [vmem:[%s12126_s7 + $0x88] sm:$0xf] }
 0x74b   : > { %7187 = vst.msk [vmem:[#allocation4 + $0x8] sm:$0xff] %vm7186_vm14, %v7182_v25  ;;  %v8567_v52 = vor.u32 %v8841_v3, %v8566_v40 }
 0x74c   : > { %v7142_v41 = vpop.f32.mrf.mxu2  ;;  %v7158_v24 = vpop.f32.mrf.mxu3  ;;  %7273 = vmatpush.msra.mxu0 %v7246_v46  ;;  %v8855_v46 = vld [vmem:[%s12126_s7 + $0x88] sm:$0x10] }
 0x74d   : > { %v7161_v28 = vadd.f32 %v7142_v41, %v7106_v13  ;;  %v7164_v32 = vadd.f32 %v7158_v24, %v7109_v42  ;;  %v8839_v42 = vld [vmem:[%s12126_s7 + $0x8] sm:$0x10]  ;;  %v8588_v41 = vld [vmem:[%s12126_s7 + $0x28] sm:$0xf] }
 0x74e   : > { %7274 = vmatpush.msra.mxu0 %v7245_v8  ;;  %v8843_v24 = vld [vmem:[%s12126_s7 + $0x28] sm:$0x10]  ;;  %v8679_v8 = vld [vmem:[%s12126_s7 + $0x98] sm:$0xf] }
 0x74f   : > { %v7177_v57 = vadd.f32 %v7170_v22, %v7161_v28  ;;  %v7180_v55 = vadd.f32 %v7175_v16, %v7164_v32  ;;  %v8589_v58 = vor.u32 %v8843_v24, %v8588_v41  ;;  %v8640_v28 = vld [vmem:[%s12126_s7 + $0x68] sm:$0xf]  ;;  %v8851_v32 = vld [vmem:[%s12126_s7 + $0x68] sm:$0x10]  ;;  %v8866_v41 = vld [vmem:[%s12126_s7 + $0xe0] sm:$0xff] }
 0x750   : > { %7275 = vmatpush.msra.mxu0 %v7244_v6  ;;  %v8857_v6 = vld [vmem:[%s12126_s7 + $0x98] sm:$0x10]  ;;  %v8705_v24 = vld [vmem:[%s12126_s7 + $0xb8] sm:$0xf] }
 0x751   : > { %v7089_v5 = vpop.f32.mrf.mxu0  ;;  %v11781_v39 = vmax.f32 %v7177_v57, 0.0  ;;  %v7184_v62 = vmax.f32 %v7180_v55, 0.0  ;;  %v8641_v57 = vor.u32 %v8851_v32, %v8640_v28  ;;  %v8863_v28 = vld [vmem:[%s12126_s7 + $0xc8] sm:$0x10]  ;;  %v8731_v32 = vld [vmem:[%s12126_s7 + $0xd8] sm:$0xf] }
 0x752   : > { %v7202_v54 = vld [vmem:[#allocation4 + $0x8] sm:$0xff]  ;;  %v7108_v10 = vadd.f32 %v7089_v5, %v7053_v37  ;;  %7276 = vmatpush.msra.mxu0 %v7243_v38  ;;  %v8840_v37 = vld [vmem:[%s12126_s7 + $0x10] sm:$0xff]  ;;  %v8744_v38 = vld [vmem:[%s12126_s7 + $0xe8] sm:$0xf] }
 0x753   : > { %7206 = vrot.lane.b32.xlu2 %v7202_v54, %s12158_s0  ;;  %7194 = vrot.lane.b32.xlu1 %v11781_v39, %s12158_s0  ;;  %7189 = vst.msk [vmem:[#allocation4 + $0x18] sm:$0xff] %vm7186_vm14, %v7184_v62  ;;  %v8842_v62 = vld [vmem:[%s12126_s7 + $0x20] sm:$0xff] }
 0x754   : > { %v7144_v30 = vpop.f32.mrf.mxu2  ;;  %7277 = vmatpush.msra.mxu0 %v7242_v31  ;;  %v8867_v31 = vld [vmem:[%s12126_s7 + $0xe8] sm:$0x10] }
 0x755   : > { %v7163_v21 = vadd.f32 %v7144_v30, %v7108_v10  ;;  %v8601_v10 = vld [vmem:[%s12126_s7 + $0x38] sm:$0xf]  ;;  %v8845_v30 = vld [vmem:[%s12126_s7 + $0x38] sm:$0x10] }
 0x756   : > { %7278 = vmatpush.msra.mxu0 %v7241_v12  ;;  %v8654_v12 = vor.u32 %v8853_v29, %v8653_v18  ;;  %v8868_v29 = vld [vmem:[%s12126_s7 + $0xf0] sm:$0xff] }
 0x757   : > { %v7179_v1 = vadd.f32 %v7175_v16, %v7163_v21  ;;  %v8576_v16 = vor.u32 %v8839_v42, %v8575_v19  ;;  %v8614_v21 = vld [vmem:[%s12126_s7 + $0x48] sm:$0xf]  ;;  %v8852_v19 = vld [vmem:[%s12126_s7 + $0x70] sm:$0xff]  ;;  %v8854_v42 = vld [vmem:[%s12126_s7 + $0x80] sm:$0xff] }
 0x758   : > { %7279 = vmatpush.msra.mxu0 %v7240_v34  ;;  %v8667_v34 = vor.u32 %v8855_v46, %v8666_v2 }
 0x759   : > { %v7183_v4 = vmax.f32 %v7179_v1, 0.0  ;;  %v8602_v1 = vor.u32 %v8845_v30, %v8601_v10 }
 0x75a   : > { %v7203_v35 = vld [vmem:[#allocation4 + $0x18] sm:$0xff]  ;;  %7280 = vmatpush.msra.mxu0 %v7239_v60  ;;  %v8680_v60 = vor.u32 %v8857_v6, %v8679_v8 }
 0x75b   : > { %7196 = vrot.lane.b32.xlu1 %v7183_v4, %s12158_s0  ;;  %7208 = vrot.lane.b32.xlu2 %v7203_v35, %s12158_s0  ;;  %s8079_s0 = scalar_lea.sflag [#allocation7], %s431_s20 }
 0x7ad   : > { %v7207_v33 = vpop.permute.xlu2 %7206 }
 0x7ae   : > { %v7217_v45 = vmax.f32 %v7202_v54, %v7207_v33  ;;  %v8850_v54 = vld [vmem:[%s12126_s7 + $0x60] sm:$0xff] }
 0x7b0   : > { %7226 = vrot.lane.b32.xlu1 %v7217_v45, %s9083_s15 }
 0x7b5   : > { %v7209_v36 = vpop.permute.xlu2 %7208 }
 0x7b6   : > { %v7219_v44 = vmax.f32 %v7203_v35, %v7209_v36  ;;  %v8627_v35 = vld [vmem:[%s12126_s7 + $0x58] sm:$0xf] }
 0x7c5   : > { %v7195_v26 = vpop.permute.xlu1 %7194 }
 0x7c6   : > { %v7210_v23 = vsel %vm535_vm2, %v7195_v26, %v7207_v33  ;;  %v7200_v27 = vmax.f32 %v11781_v39, %v7195_v26  ;;  %v8849_v33 = vld [vmem:[%s12126_s7 + $0x58] sm:$0x10] }
 0x7c7   : > { %v7216_v50 = vmax.f32 %v11781_v39, %v7210_v23  ;;  %v8838_v39 = vld [vmem:[%s12126_s7] sm:$0xff]  ;;  %v8628_v26 = vor.u32 %v8849_v33, %v8627_v35  ;;  %v8692_v23 = vld [vmem:[%s12126_s7 + $0xa8] sm:$0xf] }
 0x7c9   : > { %7224 = vrot.lane.b32.xlu0 %v7216_v50, %s9083_s15  ;;  %v8859_v50 = vld [vmem:[%s12126_s7 + $0xa8] sm:$0x10] }
 0x7cd   : > { %v7197_v48 = vpop.permute.xlu1 %7196 }
 0x7ce   : > { %v7211_v61 = vsel %vm535_vm2, %v7197_v48, %v7209_v36  ;;  %v7201_v17 = vmax.f32 %v7183_v4, %v7197_v48  ;;  %vm7318_vm2 = vcmask 1043456   ;;  %v8693_v48 = vor.u32 %v8859_v50, %v8692_v23  ;;  %v8864_v23 = vld [vmem:[%s12126_s7 + $0xd0] sm:$0xff]  ;;  %v8757_v50 = vld [vmem:[%s12126_s7 + $0xf8] sm:$0xf] }
 0x7cf   : > { %v7218_v53 = vmax.f32 %v7183_v4, %v7211_v61  ;;  %v7320_v25 = vsel %vm7318_vm2, 4294967295, %v9066_v43  ;;  %v8847_v4 = vld [vmem:[%s12126_s7 + $0x48] sm:$0x10] }
 0x7d0   : > { %v11862_v13 = vsel %vm7319_vm9, %v7320_v25, 0  ;;  %v8615_v45 = vor.u32 %v8847_v4, %v8614_v21 }
 0x7d1   : > { %7230 = vrot.lane.b32.xlu0 %v7219_v44, %s9083_s15  ;;  %7228 = vrot.lane.b32.xlu2 %v7218_v53, %s9083_s15  ;;  %v7323_v43 = vand.u32 %v8567_v52, %v11862_v13  ;;  %v7353_v51 = vand.u32 %v8576_v16, %v11862_v13  ;;  %v7390_v55 = vand.u32 %v8589_v58, %v11862_v13  ;;  %v8856_v16 = vld [vmem:[%s12126_s7 + $0x90] sm:$0xff]  ;;  %v8718_v58 = vld [vmem:[%s12126_s7 + $0xc8] sm:$0xf] }
 0x7d2   : > { %v7542_v5 = vand.u32 %v8641_v57, %v11862_v13  ;;  %v7428_v36 = vand.u32 %v8602_v1, %v11862_v13  ;;  %v7466_v61 = vand.u32 %v8615_v45, %v11862_v13  ;;  %v7504_v44 = vand.u32 %v8628_v26, %v11862_v13  ;;  %v8860_v45 = vld [vmem:[%s12126_s7 + $0xb0] sm:$0xff]  ;;  %v8862_v26 = vld [vmem:[%s12126_s7 + $0xc0] sm:$0xff] }
 0x7d3   : > { %7331 = vmatpush.bf16.msra.mxu1 %v7323_v43  ;;  %7361 = vmatpush.bf16.msra.mxu2 %v7353_v51  ;;  %v7694_v53 = vand.u32 %v8693_v48, %v11862_v13  ;;  %v7618_v40 = vand.u32 %v8667_v34, %v11862_v13  ;;  %v7656_v52 = vand.u32 %v8680_v60, %v11862_v13  ;;  %v8861_v43 = vld [vmem:[%s12126_s7 + $0xb8] sm:$0x10] }
 0x7d4   : > { %7398 = vmatpush.bf16.msrb.mxu3 %v7390_v55  ;;  %7550 = vmatpush.bf16.msrb.mxu0 %v7542_v5  ;;  %v8865_v51 = vld [vmem:[%s12126_s7 + $0xd8] sm:$0x10]  ;;  %v8706_v57 = vor.u32 %v8861_v43, %v8705_v24  ;;  %v8719_v55 = vor.u32 %v8863_v28, %v8718_v58 }
 0x7d5   : > { %v8873_v58 = vld [vmem:[%s12128_s9 + $0x18] sm:$0xff] }
 0x7d6   : > { %v7732_v21 = vand.u32 %v8706_v57, %v11862_v13  ;;  %v7770_v1 = vand.u32 %v8719_v55, %v11862_v13  ;;  %v8872_v57 = vld [vmem:[%s12128_s9 + $0x10] sm:$0xff] }
 0x7d7   : > { %7332 = vmatpush.bf16.msra.mxu1 %v8840_v37  ;;  %7362 = vmatpush.bf16.msra.mxu2 %v8838_v39  ;;  %v8732_v39 = vor.u32 %v8865_v51, %v8731_v32 }
 0x7d8   : > { %7399 = vmatpush.bf16.msrb.mxu3 %v8842_v62  ;;  %7551 = vmatpush.bf16.msrb.mxu0 %v8850_v54 }
 0x7d9   : > { %v7808_v33 = vand.u32 %v8732_v39, %v11862_v13 }
 0x7db   : > { %7436 = vmatpush.bf16.msrb.mxu1 %v7428_v36  ;;  %7474 = vmatpush.bf16.msrb.mxu2 %v7466_v61  ;;  %v8869_v36 = vld [vmem:[%s12126_s7 + $0xf8] sm:$0x10] }
 0x7dc   : > { %7512 = vmatpush.bf16.msra.mxu3 %v7504_v44  ;;  %v8758_v48 = vor.u32 %v8869_v36, %v8757_v50 }
 0x7df   : > { %7437 = vmatpush.bf16.msrb.mxu1 %v8844_v9  ;;  %7475 = vmatpush.bf16.msrb.mxu2 %v8846_v15 }
 0x7e0   : > { %7513 = vmatpush.bf16.msra.mxu3 %v8848_v7 }
 0x822   : > { %v7227_v14 = vpop.permute.xlu1 %7226 }
 0x82b   : > { %v7229_v0 = vpop.permute.xlu2 %7228 }
 0x83b   : > { %v7225_v47 = vpop.permute.xlu0 %7224 }
 0x83c   : > { %v7233_v22 = vsel %vm6078_vm5, %v7225_v47, %v7227_v14 }
 0x83d   : > { %v7237_v11 = vmax.f32 %v7200_v27, %v7233_v22  ;;  %v8745_v27 = vor.u32 %v8867_v31, %v8744_v38 }
 0x83f   : > { %8554 = vmatmul.msk.f32.vlgmr.msra.gmra.mxu0 %vm7255_vm0, %v7237_v11  ;;  %v7846_v25 = vand.u32 %v8745_v27, %v11862_v13 }
 0x840   : > { %7702 = vmatpush.bf16.msra.mxu0 %v7694_v53 }
 0x843   : > { %v7231_v20 = vpop.permute.xlu0 %7230 }
 0x844   : > { %v7234_v63 = vsel %vm6078_vm5, %v7229_v0, %v7231_v20  ;;  %7703 = vmatpush.bf16.msra.mxu0 %v8858_v56  ;;  %vm7288_vm5 = vcmask 203776   ;;  %v7884_v56 = vand.u32 %v8758_v48, %v11862_v13 }
 0x845   : > { %v7238_v59 = vmax.f32 %v7201_v17, %v7234_v63  ;;  %v7580_v17 = vand.u32 %v8654_v12, %v11862_v13 }
 0x847   : > { %8555 = vmatmul.msk.f32.gmra.mxu0 %vm7255_vm0, %v7238_v59 }
 0x8bc   : > { %v7282_v49 = vpop.f32.mrf.mxu0 }
 0x8bd   : > { %7289 = vst.msk [vmem:[#allocation5] sm:$0xff] %vm7288_vm5, %v7282_v49 }
 0x8c4   : > { %v7285_v14 = vpop.f32.mrf.mxu0  ;;  %v7297_v47 = vld [vmem:[#allocation5 + $0x1] sm:$0x1]  ;;  %v7291_v22 = vld [vmem:[#allocation5] sm:$0x1]  ;;  %v7368_v11 = vld [vmem:[#allocation5 + $0x2] sm:$0x1] }
 0x8c5   : > { %7290 = vst.msk [vmem:[#allocation5 + $0x8] sm:$0xff] %vm7288_vm5, %v7285_v14  ;;  %v7298_v0 = vpack.c.bf16 %v7297_v47, %v7297_v47  ;;  %v7292_v20 = vpack.c.bf16 %v7291_v22, %v7291_v22  ;;  %v7369_v63 = vpack.c.bf16 %v7368_v11, %v7368_v11  ;;  %v7520_v59 = vld [vmem:[#allocation5 + $0x6] sm:$0x1]  ;;  %v7406_v5 = vld [vmem:[#allocation5 + $0x3] sm:$0x1] }
 0x8c6   : > { %v7521_v3 = vpack.c.bf16 %v7520_v59, %v7520_v59  ;;  %v7444_v37 = vld [vmem:[#allocation5 + $0x4] sm:$0x1]  ;;  %v7482_v62 = vld [vmem:[#allocation5 + $0x5] sm:$0x1]  ;;  %v7407_v10 = vpack.c.bf16 %v7406_v5, %v7406_v5  ;;  %v7558_v61 = vld [vmem:[#allocation5 + $0x7] sm:$0x1] }
 0x8c7   : > { %8568 = vmatmul.msk.bf16.vlgmr.msra.gmra.mxu1 %vm7288_vm5, %v7298_v0  ;;  %8577 = vmatmul.msk.bf16.vlgmr.msra.gmra.mxu2 %vm7288_vm5, %v7292_v20  ;;  %v7445_v30 = vpack.c.bf16 %v7444_v37, %v7444_v37  ;;  %v7483_v4 = vpack.c.bf16 %v7482_v62, %v7482_v62  ;;  %v7559_v15 = vpack.c.bf16 %v7558_v61, %v7558_v61  ;;  %v7918_v14 = vld [vmem:[%s12128_s9 + $0x38] sm:$0xf]  ;;  %v8876_v59 = vld [vmem:[%s12128_s9 + $0x30] sm:$0xff]  ;;  %v8871_v62 = vld [vmem:[%s12128_s9 + $0x8] sm:$0xff] }
 0x8c8   : > { %8590 = vmatmul.msk.bf16.vlgmr.msrb.gmra.mxu3 %vm7288_vm5, %v7369_v63  ;;  %8642 = vmatmul.msk.bf16.vlgmr.msrb.gmra.mxu0 %vm7288_vm5, %v7521_v3  ;;  %v7949_v22 = vunpack.c.l.b16 %v7918_v14 }
 0x8c9   : > { %7588 = vmatpush.bf16.msra.mxu1 %v7580_v17  ;;  %7626 = vmatpush.bf16.msra.mxu2 %v7618_v40 }
 0x8ca   : > { %7664 = vmatpush.bf16.msrb.mxu3 %v7656_v52  ;;  %7854 = vmatpush.bf16.msrb.mxu0 %v7846_v25  ;;  %v7957_v0 = vpack.c.b16 %v7949_v22, %v7949_v22  ;;  %v8875_v25 = vld [vmem:[%s12128_s9 + $0x28] sm:$0xff] }
 0x8cb   : > { %v8878_v22 = vld [vmem:[%s12130_s11 + $0x8] sm:$0xff] }
 0x8cc   : > { %v7672_v54 = vld [vmem:[#allocation5 + $0xa] sm:$0x1]  ;;  %v7596_v44 = vld [vmem:[#allocation5 + $0x8] sm:$0x1]  ;;  %v7634_v53 = vld [vmem:[#allocation5 + $0x9] sm:$0x1] }
 0x8cd   : > { %7589 = vmatpush.bf16.msra.mxu1 %v8852_v19  ;;  %7627 = vmatpush.bf16.msra.mxu2 %v8854_v42  ;;  %v7673_v35 = vpack.c.bf16 %v7672_v54, %v7672_v54  ;;  %v7824_v9 = vld [vmem:[#allocation5 + $0xe] sm:$0x1]  ;;  %v7597_v7 = vpack.c.bf16 %v7596_v44, %v7596_v44  ;;  %v7635_v49 = vpack.c.bf16 %v7634_v53, %v7634_v53  ;;  %v7710_v2 = vld [vmem:[#allocation5 + $0xb] sm:$0x1]  ;;  %v7748_v46 = vld [vmem:[#allocation5 + $0xc] sm:$0x1] }
 0x8ce   : > { %7665 = vmatpush.bf16.msrb.mxu3 %v8856_v16  ;;  %7855 = vmatpush.bf16.msrb.mxu0 %v8866_v41  ;;  %v7825_v18 = vpack.c.bf16 %v7824_v9, %v7824_v9  ;;  %v7786_v8 = vld [vmem:[#allocation5 + $0xd] sm:$0x1]  ;;  %v7711_v13 = vpack.c.bf16 %v7710_v2, %v7710_v2  ;;  %v7749_v6 = vpack.c.bf16 %v7748_v46, %v7748_v46  ;;  %v7862_v31 = vld [vmem:[#allocation5 + $0xf] sm:$0x1]  ;;  %v7970_v20 = vsel %vm7318_vm2, %v7957_v0, 0  ;;  %v8879_v2 = vld [vmem:[%s12130_s11 + $0x10] sm:$0xff] }
 0x8cf   : > { %v7787_v38 = vpack.c.bf16 %v7786_v8, %v7786_v8  ;;  %v7863_v12 = vpack.c.bf16 %v7862_v31, %v7862_v31  ;;  %v8874_v42 = vld [vmem:[%s12128_s9 + $0x20] sm:$0xff] }
 0x8d0   : > { %v8881_v53 = vld [vmem:[%s12130_s11 + $0x20] sm:$0xff] }
 0x8d7   : > { %8603 = vmatmul.msk.bf16.vlgmr.msrb.gmra.mxu1 %vm7288_vm5, %v7407_v10  ;;  %8616 = vmatmul.msk.bf16.vlgmr.msrb.gmra.mxu2 %vm7288_vm5, %v7445_v30  ;;  %v8870_v30 = vld [vmem:[%s12128_s9] sm:$0xff] }
 0x8d8   : > { %8629 = vmatmul.msk.bf16.vlgmr.msra.gmra.mxu3 %vm7288_vm5, %v7483_v4  ;;  %8694 = vmatmul.msk.bf16.vlgmr.msra.gmra.mxu0 %vm7288_vm5, %v7673_v35 }
 0x8d9   : > { %7740 = vmatpush.bf16.msrb.mxu1 %v7732_v21  ;;  %7778 = vmatpush.bf16.msrb.mxu2 %v7770_v1 }
 0x8da   : > { %7816 = vmatpush.bf16.msra.mxu3 %v7808_v33 }
 0x8dd   : > { %7741 = vmatpush.bf16.msrb.mxu1 %v8860_v45  ;;  %7779 = vmatpush.bf16.msrb.mxu2 %v8862_v26  ;;  %v7997_v45 = vld [vmem:[%s12130_s11 + $0x28] sm:$0x3] }
 0x8de   : > { %7817 = vmatpush.bf16.msra.mxu3 %v8864_v23  ;;  %v8020_v26 = vunpack.c.l.b16 %v7997_v45 }
 0x8e0   : > { %v8026_v50 = vpack.c.b16 %v8020_v26, %v8020_v26 }
 0x8e2   : > { %v8037_v48 = vsel %vm547_vm1, %v8026_v50, 0  ;;  %vm7965_vm1 = vcmask 982016  }
 0x8e7   : > { %8655 = vmatmul.msk.bf16.vlgmr.msra.gmra.mxu1 %vm7288_vm5, %v7559_v15  ;;  %8668 = vmatmul.msk.bf16.vlgmr.msra.gmra.mxu2 %vm7288_vm5, %v7597_v7  ;;  %v8880_v7 = vld [vmem:[%s12130_s11 + $0x18] sm:$0xff] }
 0x8e8   : > { %8681 = vmatmul.msk.bf16.vlgmr.msrb.gmra.mxu3 %vm7288_vm5, %v7635_v49  ;;  %8746 = vmatmul.msk.bf16.vlgmr.msrb.gmra.mxu0 %vm7288_vm5, %v7825_v18 }
 0x8e9   : > { %7892 = vmatpush.bf16.msra.mxu1 %v7884_v56  ;;  %7972 = vmatpush.bf16.msra.mxu2 %v7970_v20 }
 0x8ea   : > { %8041 = vmatpush.bf16.msrb.mxu3 %v8037_v48 }
 0x8ed   : > { %7893 = vmatpush.bf16.msra.mxu1 %v8868_v29  ;;  %7973 = vmatpush.bf16.msra.mxu2 %v8876_v59 }
 0x8ee   : > { %8042 = vmatpush.bf16.msrb.mxu3 %v8881_v53 }
 0x8f1   : > { %7974 = vmatpush.bf16.msra.mxu2 %v8875_v25 }
 0x8f2   : > { %8043 = vmatpush.bf16.msrb.mxu3 %v8880_v7 }
 0x8f5   : > { %7975 = vmatpush.bf16.msra.mxu2 %v8874_v42 }
 0x8f6   : > { %8044 = vmatpush.bf16.msrb.mxu3 %v8879_v2 }
 0x8f7   : > { %8707 = vmatmul.msk.bf16.vlgmr.msrb.gmra.mxu1 %vm7288_vm5, %v7711_v13  ;;  %8720 = vmatmul.msk.bf16.vlgmr.msrb.gmra.mxu2 %vm7288_vm5, %v7749_v6 }
 0x8f8   : > { %8733 = vmatmul.msk.bf16.vlgmr.msra.gmra.mxu3 %vm7288_vm5, %v7787_v38 }
 0x8f9   : > { %7976 = vmatpush.bf16.msra.mxu2 %v8873_v58 }
 0x8fa   : > { %8045 = vmatpush.bf16.msrb.mxu3 %v8878_v22 }
 0x8fd   : > { %7977 = vmatpush.bf16.msra.mxu2 %v8872_v57 }
 0x901   : > { %7978 = vmatpush.bf16.msra.mxu2 %v8871_v62 }
 0x905   : > { %7979 = vmatpush.bf16.msra.mxu2 %v8870_v30 }
 0x907   : > { %8759 = vmatmul.msk.bf16.vlgmr.msra.gmra.mxu1 %vm7288_vm5, %v7863_v12  ;;  %v7900_v12 = vld [vmem:[%s12127_s8] sm:$0x1] }
 0x944   : > { %v7334_v34 = vpop.f32.mrf.mxu1 }
 0x945   : > { %v7553_v60 = vpop.f32.mrf.mxu0 }
 0x94a   : > { %v7364_v27 = vpop.f32.mrf.mxu2 }
 0x94b   : > { %v7401_v47 = vpop.f32.mrf.mxu3  ;;  %v7365_v16 = vadd.f32 %v7364_v27, %v7334_v34 }
 0x94c   : > { %v7336_v11 = vpop.f32.mrf.mxu1 }
 0x94d   : > { %v7555_v17 = vpop.f32.mrf.mxu0  ;;  %v7405_v28 = vadd.f32 %v7401_v47, %v7365_v16  ;;  %v8877_v11 = vld [vmem:[%s12130_s11] sm:$0xff] }
 0x94e   : > { %8046 = vmatpush.bf16.msrb.mxu3 %v8877_v11  ;;  %v7919_v17 = vld [vmem:[%s12129_s10] sm:$0x1] }
 0x952   : > { %v7366_v63 = vpop.f32.mrf.mxu2 }
 0x953   : > { %v7403_v40 = vpop.f32.mrf.mxu3 }
 0x954   : > { %v7439_v3 = vpop.f32.mrf.mxu1 }
 0x955   : > { %v7705_v52 = vpop.f32.mrf.mxu0  ;;  %v7443_v32 = vadd.f32 %v7439_v3, %v7405_v28  ;;  %v7998_v3 = vld [vmem:[%s12131_s12] sm:$0x1] }
 0x95a   : > { %v7477_v19 = vpop.f32.mrf.mxu2 }
 0x95b   : > { %v7515_v41 = vpop.f32.mrf.mxu3  ;;  %v7481_v55 = vadd.f32 %v7477_v19, %v7443_v32 }
 0x95c   : > { %v7441_v24 = vpop.f32.mrf.mxu1 }
 0x95d   : > { %v7707_v43 = vpop.f32.mrf.mxu0  ;;  %v7519_v54 = vadd.f32 %v7515_v41, %v7481_v55 }
 0x95f   : > { %v7557_v21 = vadd.f32 %v7553_v60, %v7519_v54 }
 0x962   : > { %v7479_v51 = vpop.f32.mrf.mxu2 }
 0x963   : > { %v7517_v5 = vpop.f32.mrf.mxu3 }
 0x964   : > { %v7591_v37 = vpop.f32.mrf.mxu1 }
 0x965   : > { %v7857_v39 = vpop.f32.mrf.mxu0  ;;  %v7595_v35 = vadd.f32 %v7591_v37, %v7557_v21 }
 0x96a   : > { %v7629_v10 = vpop.f32.mrf.mxu2 }
 0x96b   : > { %v7667_v1 = vpop.f32.mrf.mxu3  ;;  %v7633_v23 = vadd.f32 %v7629_v10, %v7595_v35 }
 0x96c   : > { %v7593_v4 = vpop.f32.mrf.mxu1 }
 0x96d   : > { %v7859_v33 = vpop.f32.mrf.mxu0  ;;  %v7671_v61 = vadd.f32 %v7667_v1, %v7633_v23 }
 0x96f   : > { %v7709_v15 = vadd.f32 %v7705_v52, %v7671_v61 }
 0x972   : > { %v7631_v36 = vpop.f32.mrf.mxu2 }
 0x973   : > { %v7669_v44 = vpop.f32.mrf.mxu3 }
 0x974   : > { %v7743_v9 = vpop.f32.mrf.mxu1 }
 0x975   : > { %v7747_v56 = vadd.f32 %v7743_v9, %v7709_v15 }
 0x97a   : > { %v7781_v49 = vpop.f32.mrf.mxu2 }
 0x97b   : > { %v7785_v18 = vadd.f32 %v7781_v49, %v7747_v56  ;;  %v7819_v29 = vpop.f32.mrf.mxu3 }
 0x97c   : > { %v7745_v46 = vpop.f32.mrf.mxu1 }
 0x97d   : > { %v7823_v8 = vadd.f32 %v7819_v29, %v7785_v18 }
 0x97f   : > { %v7861_v38 = vadd.f32 %v7857_v39, %v7823_v8 }
 0x982   : > { %v7783_v13 = vpop.f32.mrf.mxu2 }
 0x983   : > { %v7821_v6 = vpop.f32.mrf.mxu3 }
 0x984   : > { %v7895_v31 = vpop.f32.mrf.mxu1 }
 0x985   : > { %v7899_v34 = vadd.f32 %v7895_v31, %v7861_v38 }
 0x987   : > { %v7901_v60 = vadd.f32 %v7900_v12, %v7899_v34 }
 0x989   : > { %v7902_v27 = vmax.f32 %v7901_v60, 0.0 }
 0x98b   : > { %v7903_v14 = vpack.c.bf16 %v7902_v27, %v7902_v27 }
 0x98c   : > { %v7897_v47 = vpop.f32.mrf.mxu1 }
 0x98d   : > { %8788 = vmatmul.msk.bf16.vlgmr.msra.gmra.mxu2 %vm7965_vm1, %v7903_v14 }
 0xa10   : > { %v7981_v0 = vpop.f32.mrf.mxu2 }
 0xa11   : > { %v7982_v20 = vadd.f32 %v7981_v0, %v7919_v17 }
 0xa13   : > { %v7985_v63 = vmax.f32 %v7982_v20, 0.0 }
 0xa15   : > { %v7986_v59 = vpack.c.bf16 %v7985_v63, %v7985_v63 }
 0xa17   : > { %8809 = vmatmul.msk.bf16.vlgmr.msrb.gmra.mxu3 %vm6737_vm6, %v7986_v59 }
 0xa18   : > { %v7983_v40 = vpop.f32.mrf.mxu2 }
 0xa9a   : > { %v8048_v52 = vpop.f32.mrf.mxu3 }
 0xa9b   : > { %v8049_v25 = vadd.f32 %v8048_v52, %v7998_v3 }
 0xa9d   : > { %v8053_v19 = vsel %vm8052_vm7, %v8049_v25, -inf }
 0xa9e   : > { %8054 = vmax.xlane.f32.xlu1 %v8053_v19 }
 0xaa2   : > { %v8050_v42 = vpop.f32.mrf.mxu3 }
 0xb11   : > { %v8055_v16 = vpop.xlane.xlu1 %8054 }
 0xb12   : > { %v8056_v41 = vsub.f32 %v8049_v25, %v8055_v16 }
 0xb14   : > { %v8057_v24 = vmul.f32 1.442695, %v8056_v41 }
 0xb16   : > { %8993 = vpow2.f32 %v8057_v24 }
 0xb1c   : > { %v8994_v43 = vpop.eup %8993 }
 0xb1d   : > { %v8059_v58 = vsel %vm8052_vm7, %v8994_v43, 0.0 }
 0xb1e   : > { %8060 = vadd.xlane.f32.xlu2 %v8059_v58 }
 0xb91   : > { %v8061_v28 = vpop.xlane.xlu2 %8060 }
 0xb92   : > { %8995 = vrcp.f32 %v8061_v28  ;;  %v8073_v55 = vand.u32 2147483648, %v8061_v28  ;;  %v8071_v37 = vand.u32 2147483647, %v8061_v28  ;;  %vm8067_vm4 = vweird.f32 %v8061_v28 }
 0xb94   : > { %v8074_v62 = vor.u32 1.1754944e-38, %v8073_v55  ;;  %vm8072_vm10 = vcmp.eq.f32.partialorder %v8071_v37, 8.507059e+37 }
 0xb98   : > { %v8996_v32 = vpop.eup %8995 }
 0xb99   : > { %v8063_v51 = vmul.f32 %v8996_v32, %v8061_v28  ;;  %vm8068_vm8 = vweird.f32 %v8996_v32 }
 0xb9a   : > { %vm8069_vm6 = vmor %vm8067_vm4, %vm8068_vm8 }
 0xb9b   : > { %v8064_v57 = vsub.f32 1.0, %v8063_v51 }
 0xb9d   : > { %v8065_v5 = vmul.f32 %v8996_v32, %v8064_v57 }
 0xb9f   : > { %v8066_v39 = vadd.f32 %v8996_v32, %v8065_v5 }
 0xba1   : > { %v8070_v54 = vsel %vm8069_vm6, %v8996_v32, %v8066_v39 }
 0xba2   : > { %v8075_v10 = vsel %vm8072_vm10, %v8074_v62, %v8070_v54 }
 0xba3   : > { %v8076_v30 = vmul.f32 %v8994_v43, %v8075_v10 }
 0xba5   : > { %8077 = vst.msk [vmem:[%s432_s17] sm:$0x1] %vm8052_vm7, %v8076_v30 }
 0xba6   : > { %9024 = shalt.err (!%p9021_p3)
}
 0xba7   : > { %8882 = dma.vmem_to_hbm [thread:$0]  (%p9209_p5), %s8090_s30, 16, %s8092_s16, %s8079_s0  }
 0xba8 PF: > { %p8888_p4 = scmp.ge.s32.totalorder %s9059_s28, 2  ;;  %s8103_s20 = sand.u32 1, %s9047_s25  }
 0xba9   : > { %s8104_s15 = scalar_lea.sflag [#allocation7], %s8103_s20 }
 0xbaa   : > { %p8885_p7 = pnand %p8888_p4, %p9213_p6 }
 0xbac   : > { %p8886_p8 = pneg %p8885_p7 }
 0xbae   : > { %9042 = dma.done.wait (%p8886_p8), %s8104_s15, 16  }
 0xbaf   : > { %9044 = vsyncadd (%p8886_p8), %s8104_s15, 4294967280  ;;  %s12159_s2 = sld [smem:[#allocation9_spill]]  ;;  %p23_p9 = scmp.ge.s32.totalorder %s9196_s14, 4  }
 0xbb0   : > { %s12160_s27 = sld [smem:[#allocation10_spill]]  ;;  %s12161_s25 = smov %s9051_s26 }
 0xbb1   : > { %s12163_s28 = smov %s9196_s14  ;;  %25 = sbr.rel (!%p23_p9) target bundleno = 7 (0x7), region = 245 }
 0xbb5   : > { %s12162_s26 = smov %s12159_s2 }
 0xbb6   :  { %8109 = vsyncpa [#allocation7], 1 }
 0xbb7   :  { %8111 = vsyncpa [#allocation7 + $0x1], 1 }

</bundles_post_ra>
